<compile_context>
chip_gen: v6e
topology: v6e:2x2x1
jax: 0.10.0
libtpu: 0.0.40
codegen_flags: <defaults>
</compile_context>

<pallas_src>
import math

import jax
import jax.numpy as jnp
from jax.experimental import pallas as pl
from jax.experimental.pallas import tpu as pltpu

NCLASS = 6


def make_param_specs(nclass: int = NCLASS):
    """Ordered (name, shape, fan_in, dtype).

    Conv1d weights are stored in their native PyTorch (C_out, C_in) orientation
    (kernel_size=1 squeezed) in bf16; biases are (C_out, 1) f32 so bias-add /
    ReLU / means stay in f32.
    """
    c_nocs = nclass * 3
    W, F = jnp.bfloat16, jnp.float32
    return [
        # pts_mlp1: Conv1d(3,32) ReLU Conv1d(32,64) ReLU
        ("w1", (32, 3), 3, W), ("b1", (32, 1), 3, F),
        ("w2", (64, 32), 32, W), ("b2", (64, 1), 32, F),
        # deform_mlp1: Conv1d(320,384) ReLU Conv1d(384,256) ReLU
        # first-layer weight split along the channel concat:
        #   pts_feat(64) | pts_local(128) | rgb_local(128)
        ("w3_pts", (384, 64), 320, W), ("w3_pl", (384, 128), 320, W),
        ("w3_rgb", (384, 128), 320, W), ("b3", (384, 1), 320, F),
        ("w4", (256, 384), 384, W), ("b4", (256, 1), 384, F),
        # glo_enhance2(256)  (SE-style gate, see TODO above)
        ("ge1_w", (256, 256), 256, W), ("ge1_b", (256, 1), 256, F),
        ("ge2_w", (256, 256), 256, W), ("ge2_b", (256, 1), 256, F),
        # deform_mlp2: Conv1d(512,384) ReLU Conv1d(384,256) ReLU Conv1d(256,128) ReLU
        # first-layer split along the concat: local(256) | global-mean(256)
        ("w5a", (384, 256), 512, W), ("w5b", (384, 256), 512, W), ("b5", (384, 1), 512, F),
        ("w6", (256, 384), 384, W), ("b6", (256, 1), 384, F),
        ("w7", (128, 256), 256, W), ("b7", (128, 1), 256, F),
        # pred_nocs: Conv1d(128,256) ReLU Conv1d(256,128) ReLU Conv1d(128, nclass*3)
        ("w8", (256, 128), 128, W), ("b8", (256, 1), 128, F),
        ("w9", (128, 256), 256, W), ("b9", (128, 1), 256, F),
        ("w10", (c_nocs, 128), 128, W), ("b10", (c_nocs, 1), 128, F),
        # outer glo_enhance2(128)
        ("go1_w", (128, 128), 128, W), ("go1_b", (128, 1), 128, F),
        ("go2_w", (128, 128), 128, W), ("go2_b", (128, 1), 128, F),
    ]


def init_params(key):
    """Deterministic synthetic init (PyTorch-ish uniform(-1/sqrt(fan_in), +))."""
    specs = make_param_specs()
    keys = jax.random.split(key, len(specs))
    params = {}
    for (name, shape, fan_in, dtype), k in zip(specs, keys):
        bound = 1.0 / math.sqrt(float(fan_in))
        params[name] = jax.random.uniform(
            k, shape, jnp.float32, -bound, bound).astype(dtype)
    return params


def _implicit_transform_kernel(pts_ref, pts_local_ref, rgb_local_ref, *rest):
    # rest = 31 parameter refs (make_param_specs order) + 2 output refs
    (w1, b1, w2, b2,
     w3_pts, w3_pl, w3_rgb, b3, w4, b4,
     ge1_w, ge1_b, ge2_w, ge2_b,
     w5a, w5b, b5, w6, b6, w7, b7,
     w8, b8, w9, b9, w10, b10,
     go1_w, go1_b, go2_w, go2_b) = rest[:-2]
    out_local_ref, out_nocs_ref = rest[-2:]

    bf16 = jnp.bfloat16

    def mm(w_ref, x):
        # bf16 x bf16 -> f32 accumulate on the MXU.
        return jnp.dot(w_ref[...], x.astype(bf16),
                       preferred_element_type=jnp.float32)

    def mmb(w_ref, x, b_ref):
        return mm(w_ref, x) + b_ref[...]

    pts = pts_ref[0]              # (3, N)   f32
    pts_loc = pts_local_ref[0]    # (128, N)
    rgb_loc = rgb_local_ref[0]    # (128, N)

    # ---- pts_mlp1 ----
    h = jax.nn.relu(mmb(w1, pts, b1))       # (32, N)
    h = jax.nn.relu(mmb(w2, h, b2))         # (64, N)

    # ---- deform_mlp1 (channel-concat fused via split first-layer weight) ----
    f = mm(w3_pts, h) + mm(w3_pl, pts_loc) + mm(w3_rgb, rgb_loc)
    f = jax.nn.relu(f + b3[...])            # (384, N)
    f = jax.nn.relu(mmb(w4, f, b4))         # (256, N)

    # ---- glo_enhance2(256): global mean -> MLP -> sigmoid channel gate ----
    g = jnp.mean(f, axis=1, keepdims=True)  # (256, 1) f32
    g = jax.nn.relu(mmb(ge1_w, g, ge1_b))
    g = jax.nn.sigmoid(mmb(ge2_w, g, ge2_b))
    f = f * g                               # (256, N)

    # ---- global mean + concat fused via split weight, then deform_mlp2 ----
    gm = jnp.mean(f, axis=1, keepdims=True)        # (256, 1)
    f2 = mm(w5a, f) + mm(w5b, gm)                  # (384, N) + (384, 1) bcast
    f2 = jax.nn.relu(f2 + b5[...])                 # (384, N)
    f2 = jax.nn.relu(mmb(w6, f2, b6))              # (256, N)
    f2 = jax.nn.relu(mmb(w7, f2, b7))              # (128, N)

    # ---- pred_nocs (from f2 BEFORE the outer glo_enhance2, as in PyTorch) ----
    n1 = jax.nn.relu(mmb(w8, f2, b8))              # (256, N)
    n1 = jax.nn.relu(mmb(w9, n1, b9))              # (128, N)
    nocs = mmb(w10, n1, b10)                       # (nclass*3, N) lane-dense

    # ---- outer glo_enhance2(128) ----
    g2 = jnp.mean(f2, axis=1, keepdims=True)
    g2 = jax.nn.relu(mmb(go1_w, g2, go1_b))
    g2 = jax.nn.sigmoid(mmb(go2_w, g2, go2_b))

    out_local_ref[0] = (f2 * g2).astype(out_local_ref.dtype)   # (128, N)
    out_nocs_ref[0] = nocs.astype(out_nocs_ref.dtype)          # (nclass*3, N)


def _build_forward(B, N, c_loc, c_rgb, c_nocs, param_shapes):
    in_specs = [
        pl.BlockSpec((1, 3, N), lambda b: (b, 0, 0)),       # pts (3 sublanes, lane-dense N)
        pl.BlockSpec((1, c_loc, N), lambda b: (b, 0, 0)),   # pts_local
        pl.BlockSpec((1, c_rgb, N), lambda b: (b, 0, 0)),   # rgb_local
    ] + [pl.BlockSpec(s, lambda b: (0, 0)) for s in param_shapes]

    out_specs = [
        pl.BlockSpec((1, 128, N), lambda b: (b, 0, 0)),
        pl.BlockSpec((1, c_nocs, N), lambda b: (b, 0, 0)),
    ]
    out_shapes = (
        jax.ShapeDtypeStruct((B, 128, N), jnp.float32),
        jax.ShapeDtypeStruct((B, c_nocs, N), jnp.float32),
    )
    return pl.pallas_call(
        _implicit_transform_kernel,
        out_shape=out_shapes,
        grid_spec=pltpu.PrefetchScalarGridSpec(
            num_scalar_prefetch=0,
            grid=(B,),
            in_specs=in_specs,
            out_specs=out_specs,
        ),
        compiler_params=pltpu.CompilerParams(
            dimension_semantics=("parallel",),    # B axis -> both TCs on v7x
            vmem_limit_bytes=32 * 1024 * 1024,    # safe on v5e/v6e/v7x
        ),
    )


def implicit_transformation(rgb_local, pts_local, pts, center, index, params,
                            nclass: int = NCLASS):
    """Matches ImplicitTransformation.forward(rgb_local, pts_local, pts, center, index).

    rgb_local: (B, 128, N), pts_local: (B, 128, N)  [PyTorch NCL]
    pts: (B, N, 3), center: unused (as in PyTorch), index: (K,) int32 into B*nclass.
    Returns (pts_w, pts_local_w) with PyTorch shapes ((K, N, 3), (B, 128, N)).
    For best store/DMA efficiency N should be a multiple of 128.
    """
    del center  # not used by the reference forward
    B, c_loc, N = pts_local.shape
    _, c_rgb, _ = rgb_local.shape
    c_nocs = nclass * 3

    # Only pts needs a (tiny) layout change: (B, N, 3) -> (B, 3, N).
    pts_cn = jnp.transpose(pts, (0, 2, 1)).astype(jnp.float32)

    specs = make_param_specs(nclass)
    param_list = [params[name].astype(dtype) for name, _, _, dtype in specs]
    param_shapes = [p.shape for p in param_list]

    fwd = _build_forward(B, N, c_loc, c_rgb, c_nocs, param_shapes)
    out_local, out_nocs = fwd(pts_cn, pts_local, rgb_local, *param_list)

    # Reproduce PyTorch: pts_w.view(-1, 3, N) -> index_select(0, index) -> permute(0,2,1)
    nocs_flat = out_nocs.reshape(B * nclass, 3, N)       # channel k = class*3 + coord
    pts_w = jnp.transpose(jnp.take(nocs_flat, index, axis=0), (0, 2, 1))  # (K, N, 3)

    # out_local is already (B, 128, N) — no wrapper transpose needed.
    return pts_w, out_local


if __name__ == "__main__":
    B, N = 2, 256
    key = jax.random.PRNGKey(0)
    k1, k2, k3, k4, k5 = jax.random.split(key, 5)

    rgb_local = jax.random.normal(k1, (B, 128, N), jnp.float32)   # (B, C_rgb=128, N)
    pts_local = jax.random.normal(k2, (B, 128, N), jnp.float32)   # (B, C_pts=128, N)
    pts = jax.random.normal(k3, (B, N, 3), jnp.float32)           # (B, N, 3)
    center = jax.random.normal(k4, (B, 3), jnp.float32)           # unused by forward
    index = jnp.array([0 * NCLASS + 2, 1 * NCLASS + 4], dtype=jnp.int32)

    params = init_params(k5)

    pts_w, pts_local_w = implicit_transformation(
        rgb_local, pts_local, pts, center, index, params)
    jax.block_until_ready((pts_w, pts_local_w))

    assert pts_w.shape == (index.shape[0], N, 3), pts_w.shape
    assert pts_local_w.shape == (B, 128, N), pts_local_w.shape
    assert bool(jnp.all(jnp.isfinite(pts_w))) and bool(jnp.all(jnp.isfinite(pts_local_w)))
    print("KERNEL_OK")
</pallas_src>

<mosaic_0001>
module attributes {stable_mosaic.version = 11 : i64} {
  func.func @_implicit_transform_kernel(%arg0: i32, %arg1: memref<1x3x256xf32, #tpu.memory_space<vmem>>, %arg2: memref<1x128x256xf32, #tpu.memory_space<vmem>>, %arg3: memref<1x128x256xf32, #tpu.memory_space<vmem>>, %arg4: memref<32x3xbf16, #tpu.memory_space<vmem>>, %arg5: memref<32x1xf32, #tpu.memory_space<vmem>>, %arg6: memref<64x32xbf16, #tpu.memory_space<vmem>>, %arg7: memref<64x1xf32, #tpu.memory_space<vmem>>, %arg8: memref<384x64xbf16, #tpu.memory_space<vmem>>, %arg9: memref<384x128xbf16, #tpu.memory_space<vmem>>, %arg10: memref<384x128xbf16, #tpu.memory_space<vmem>>, %arg11: memref<384x1xf32, #tpu.memory_space<vmem>>, %arg12: memref<256x384xbf16, #tpu.memory_space<vmem>>, %arg13: memref<256x1xf32, #tpu.memory_space<vmem>>, %arg14: memref<256x256xbf16, #tpu.memory_space<vmem>>, %arg15: memref<256x1xf32, #tpu.memory_space<vmem>>, %arg16: memref<256x256xbf16, #tpu.memory_space<vmem>>, %arg17: memref<256x1xf32, #tpu.memory_space<vmem>>, %arg18: memref<384x256xbf16, #tpu.memory_space<vmem>>, %arg19: memref<384x256xbf16, #tpu.memory_space<vmem>>, %arg20: memref<384x1xf32, #tpu.memory_space<vmem>>, %arg21: memref<256x384xbf16, #tpu.memory_space<vmem>>, %arg22: memref<256x1xf32, #tpu.memory_space<vmem>>, %arg23: memref<128x256xbf16, #tpu.memory_space<vmem>>, %arg24: memref<128x1xf32, #tpu.memory_space<vmem>>, %arg25: memref<256x128xbf16, #tpu.memory_space<vmem>>, %arg26: memref<256x1xf32, #tpu.memory_space<vmem>>, %arg27: memref<128x256xbf16, #tpu.memory_space<vmem>>, %arg28: memref<128x1xf32, #tpu.memory_space<vmem>>, %arg29: memref<18x128xbf16, #tpu.memory_space<vmem>>, %arg30: memref<18x1xf32, #tpu.memory_space<vmem>>, %arg31: memref<128x128xbf16, #tpu.memory_space<vmem>>, %arg32: memref<128x1xf32, #tpu.memory_space<vmem>>, %arg33: memref<128x128xbf16, #tpu.memory_space<vmem>>, %arg34: memref<128x1xf32, #tpu.memory_space<vmem>>, %arg35: memref<1x128x256xf32, #tpu.memory_space<vmem>>, %arg36: memref<1x18x256xf32, #tpu.memory_space<vmem>>) attributes {dimension_semantics = [#tpu.dimension_semantics<parallel>], iteration_bounds = array<i64: 2>, scalar_prefetch = 0 : i64, scratch_operands = 0 : i64, tpu.core_type = #tpu.core_type<tc>, window_params = [{transform_indices = @transform_0, window_bounds = array<i64: 1, 3, 256>}, {transform_indices = @transform_1, window_bounds = array<i64: 1, 128, 256>}, {transform_indices = @transform_2, window_bounds = array<i64: 1, 128, 256>}, {pipeline_mode = #tpu.pipeline_mode<synchronous>, transform_indices = @transform_3, window_bounds = array<i64: 32, 3>}, {pipeline_mode = #tpu.pipeline_mode<synchronous>, transform_indices = @transform_4, window_bounds = array<i64: 32, 1>}, {pipeline_mode = #tpu.pipeline_mode<synchronous>, transform_indices = @transform_5, window_bounds = array<i64: 64, 32>}, {pipeline_mode = #tpu.pipeline_mode<synchronous>, transform_indices = @transform_6, window_bounds = array<i64: 64, 1>}, {pipeline_mode = #tpu.pipeline_mode<synchronous>, transform_indices = @transform_7, window_bounds = array<i64: 384, 64>}, {pipeline_mode = #tpu.pipeline_mode<synchronous>, transform_indices = @transform_8, window_bounds = array<i64: 384, 128>}, {pipeline_mode = #tpu.pipeline_mode<synchronous>, transform_indices = @transform_9, window_bounds = array<i64: 384, 128>}, {pipeline_mode = #tpu.pipeline_mode<synchronous>, transform_indices = @transform_10, window_bounds = array<i64: 384, 1>}, {pipeline_mode = #tpu.pipeline_mode<synchronous>, transform_indices = @transform_11, window_bounds = array<i64: 256, 384>}, {pipeline_mode = #tpu.pipeline_mode<synchronous>, transform_indices = @transform_12, window_bounds = array<i64: 256, 1>}, {pipeline_mode = #tpu.pipeline_mode<synchronous>, transform_indices = @transform_13, window_bounds = array<i64: 256, 256>}, {pipeline_mode = #tpu.pipeline_mode<synchronous>, transform_indices = @transform_14, window_bounds = array<i64: 256, 1>}, {pipeline_mode = #tpu.pipeline_mode<synchronous>, transform_indices = @transform_15, window_bounds = array<i64: 256, 256>}, {pipeline_mode = #tpu.pipeline_mode<synchronous>, transform_indices = @transform_16, window_bounds = array<i64: 256, 1>}, {pipeline_mode = #tpu.pipeline_mode<synchronous>, transform_indices = @transform_17, window_bounds = array<i64: 384, 256>}, {pipeline_mode = #tpu.pipeline_mode<synchronous>, transform_indices = @transform_18, window_bounds = array<i64: 384, 256>}, {pipeline_mode = #tpu.pipeline_mode<synchronous>, transform_indices = @transform_19, window_bounds = array<i64: 384, 1>}, {pipeline_mode = #tpu.pipeline_mode<synchronous>, transform_indices = @transform_20, window_bounds = array<i64: 256, 384>}, {pipeline_mode = #tpu.pipeline_mode<synchronous>, transform_indices = @transform_21, window_bounds = array<i64: 256, 1>}, {pipeline_mode = #tpu.pipeline_mode<synchronous>, transform_indices = @transform_22, window_bounds = array<i64: 128, 256>}, {pipeline_mode = #tpu.pipeline_mode<synchronous>, transform_indices = @transform_23, window_bounds = array<i64: 128, 1>}, {pipeline_mode = #tpu.pipeline_mode<synchronous>, transform_indices = @transform_24, window_bounds = array<i64: 256, 128>}, {pipeline_mode = #tpu.pipeline_mode<synchronous>, transform_indices = @transform_25, window_bounds = array<i64: 256, 1>}, {pipeline_mode = #tpu.pipeline_mode<synchronous>, transform_indices = @transform_26, window_bounds = array<i64: 128, 256>}, {pipeline_mode = #tpu.pipeline_mode<synchronous>, transform_indices = @transform_27, window_bounds = array<i64: 128, 1>}, {pipeline_mode = #tpu.pipeline_mode<synchronous>, transform_indices = @transform_28, window_bounds = array<i64: 18, 128>}, {pipeline_mode = #tpu.pipeline_mode<synchronous>, transform_indices = @transform_29, window_bounds = array<i64: 18, 1>}, {pipeline_mode = #tpu.pipeline_mode<synchronous>, transform_indices = @transform_30, window_bounds = array<i64: 128, 128>}, {pipeline_mode = #tpu.pipeline_mode<synchronous>, transform_indices = @transform_31, window_bounds = array<i64: 128, 1>}, {pipeline_mode = #tpu.pipeline_mode<synchronous>, transform_indices = @transform_32, window_bounds = array<i64: 128, 128>}, {pipeline_mode = #tpu.pipeline_mode<synchronous>, transform_indices = @transform_33, window_bounds = array<i64: 128, 1>}, {transform_indices = @transform_34, window_bounds = array<i64: 1, 128, 256>}, {transform_indices = @transform_35, window_bounds = array<i64: 1, 18, 256>}]} {
    %c0 = arith.constant 0 : index
    %c0_0 = arith.constant 0 : index
    %c0_1 = arith.constant 0 : index
    %0 = vector.load %arg1[%c0, %c0_0, %c0_1] : memref<1x3x256xf32, #tpu.memory_space<vmem>>, vector<1x3x256xf32>
    %1 = vector.shape_cast %0 : vector<1x3x256xf32> to vector<3x256xf32>
    %c0_2 = arith.constant 0 : index
    %c0_3 = arith.constant 0 : index
    %c0_4 = arith.constant 0 : index
    %2 = vector.load %arg2[%c0_2, %c0_3, %c0_4] : memref<1x128x256xf32, #tpu.memory_space<vmem>>, vector<1x128x256xf32>
    %3 = vector.shape_cast %2 : vector<1x128x256xf32> to vector<128x256xf32>
    %c0_5 = arith.constant 0 : index
    %c0_6 = arith.constant 0 : index
    %c0_7 = arith.constant 0 : index
    %4 = vector.load %arg3[%c0_5, %c0_6, %c0_7] : memref<1x128x256xf32, #tpu.memory_space<vmem>>, vector<1x128x256xf32>
    %5 = vector.shape_cast %4 : vector<1x128x256xf32> to vector<128x256xf32>
    %c0_8 = arith.constant 0 : index
    %c0_9 = arith.constant 0 : index
    %6 = vector.load %arg4[%c0_8, %c0_9] : memref<32x3xbf16, #tpu.memory_space<vmem>>, vector<32x3xbf16>
    %7 = arith.truncf %1 : vector<3x256xf32> to vector<3x256xbf16>
    %cst = arith.constant dense<0.000000e+00> : vector<32x256xf32>
    %8 = tpu.matmul %6, %7, %cst {dimension_numbers = #tpu.dot_dimension_numbers<[1], [0], [0], [1], [0, 0, 1, 1], [], []>} : vector<32x3xbf16>, vector<3x256xbf16>, vector<32x256xf32> -> vector<32x256xf32>
    %c0_10 = arith.constant 0 : index
    %c0_11 = arith.constant 0 : index
    %9 = vector.load %arg5[%c0_10, %c0_11] : memref<32x1xf32, #tpu.memory_space<vmem>>, vector<32x1xf32>
    %10 = vector.broadcast %9 : vector<32x1xf32> to vector<32x256xf32>
    %11 = arith.addf %8, %10 : vector<32x256xf32>
    %cst_12 = arith.constant 0.000000e+00 : f32
    %12 = vector.broadcast %cst_12 : f32 to vector<32x256xf32>
    %13 = arith.maximumf %11, %12 : vector<32x256xf32>
    %c0_13 = arith.constant 0 : index
    %c0_14 = arith.constant 0 : index
    %14 = vector.load %arg6[%c0_13, %c0_14] : memref<64x32xbf16, #tpu.memory_space<vmem>>, vector<64x32xbf16>
    %15 = arith.truncf %13 : vector<32x256xf32> to vector<32x256xbf16>
    %cst_15 = arith.constant dense<0.000000e+00> : vector<64x256xf32>
    %16 = tpu.matmul %14, %15, %cst_15 {dimension_numbers = #tpu.dot_dimension_numbers<[1], [0], [0], [1], [0, 0, 1, 1], [], []>} : vector<64x32xbf16>, vector<32x256xbf16>, vector<64x256xf32> -> vector<64x256xf32>
    %c0_16 = arith.constant 0 : index
    %c0_17 = arith.constant 0 : index
    %17 = vector.load %arg7[%c0_16, %c0_17] : memref<64x1xf32, #tpu.memory_space<vmem>>, vector<64x1xf32>
    %18 = vector.broadcast %17 : vector<64x1xf32> to vector<64x256xf32>
    %19 = arith.addf %16, %18 : vector<64x256xf32>
    %cst_18 = arith.constant 0.000000e+00 : f32
    %20 = vector.broadcast %cst_18 : f32 to vector<64x256xf32>
    %21 = arith.maximumf %19, %20 : vector<64x256xf32>
    %c0_19 = arith.constant 0 : index
    %c0_20 = arith.constant 0 : index
    %22 = vector.load %arg8[%c0_19, %c0_20] : memref<384x64xbf16, #tpu.memory_space<vmem>>, vector<384x64xbf16>
    %23 = arith.truncf %21 : vector<64x256xf32> to vector<64x256xbf16>
    %cst_21 = arith.constant dense<0.000000e+00> : vector<384x256xf32>
    %24 = tpu.matmul %22, %23, %cst_21 {dimension_numbers = #tpu.dot_dimension_numbers<[1], [0], [0], [1], [0, 0, 1, 1], [], []>} : vector<384x64xbf16>, vector<64x256xbf16>, vector<384x256xf32> -> vector<384x256xf32>
    %c0_22 = arith.constant 0 : index
    %c0_23 = arith.constant 0 : index
    %25 = vector.load %arg9[%c0_22, %c0_23] : memref<384x128xbf16, #tpu.memory_space<vmem>>, vector<384x128xbf16>
    %26 = arith.truncf %3 : vector<128x256xf32> to vector<128x256xbf16>
    %cst_24 = arith.constant dense<0.000000e+00> : vector<384x256xf32>
    %27 = tpu.matmul %25, %26, %cst_24 {dimension_numbers = #tpu.dot_dimension_numbers<[1], [0], [0], [1], [0, 0, 1, 1], [], []>} : vector<384x128xbf16>, vector<128x256xbf16>, vector<384x256xf32> -> vector<384x256xf32>
    %28 = arith.addf %24, %27 : vector<384x256xf32>
    %c0_25 = arith.constant 0 : index
    %c0_26 = arith.constant 0 : index
    %29 = vector.load %arg10[%c0_25, %c0_26] : memref<384x128xbf16, #tpu.memory_space<vmem>>, vector<384x128xbf16>
    %30 = arith.truncf %5 : vector<128x256xf32> to vector<128x256xbf16>
    %cst_27 = arith.constant dense<0.000000e+00> : vector<384x256xf32>
    %31 = tpu.matmul %29, %30, %cst_27 {dimension_numbers = #tpu.dot_dimension_numbers<[1], [0], [0], [1], [0, 0, 1, 1], [], []>} : vector<384x128xbf16>, vector<128x256xbf16>, vector<384x256xf32> -> vector<384x256xf32>
    %32 = arith.addf %28, %31 : vector<384x256xf32>
    %c0_28 = arith.constant 0 : index
    %c0_29 = arith.constant 0 : index
    %33 = vector.load %arg11[%c0_28, %c0_29] : memref<384x1xf32, #tpu.memory_space<vmem>>, vector<384x1xf32>
    %34 = vector.broadcast %33 : vector<384x1xf32> to vector<384x256xf32>
    %35 = arith.addf %32, %34 : vector<384x256xf32>
    %cst_30 = arith.constant 0.000000e+00 : f32
    %36 = vector.broadcast %cst_30 : f32 to vector<384x256xf32>
    %37 = arith.maximumf %35, %36 : vector<384x256xf32>
    %c0_31 = arith.constant 0 : index
    %c0_32 = arith.constant 0 : index
    %38 = vector.load %arg12[%c0_31, %c0_32] : memref<256x384xbf16, #tpu.memory_space<vmem>>, vector<256x384xbf16>
    %39 = arith.truncf %37 : vector<384x256xf32> to vector<384x256xbf16>
    %cst_33 = arith.constant dense<0.000000e+00> : vector<256x256xf32>
    %40 = tpu.matmul %38, %39, %cst_33 {dimension_numbers = #tpu.dot_dimension_numbers<[1], [0], [0], [1], [0, 0, 1, 1], [], []>} : vector<256x384xbf16>, vector<384x256xbf16>, vector<256x256xf32> -> vector<256x256xf32>
    %c0_34 = arith.constant 0 : index
    %c0_35 = arith.constant 0 : index
    %41 = vector.load %arg13[%c0_34, %c0_35] : memref<256x1xf32, #tpu.memory_space<vmem>>, vector<256x1xf32>
    %42 = vector.broadcast %41 : vector<256x1xf32> to vector<256x256xf32>
    %43 = arith.addf %40, %42 : vector<256x256xf32>
    %cst_36 = arith.constant 0.000000e+00 : f32
    %44 = vector.broadcast %cst_36 : f32 to vector<256x256xf32>
    %45 = arith.maximumf %43, %44 : vector<256x256xf32>
    %cst_37 = arith.constant dense<0.000000e+00> : vector<256xf32>
    %46 = vector.multi_reduction <add>, %45, %cst_37 [1] : vector<256x256xf32> to vector<256xf32>
    %47 = vector.shape_cast %46 : vector<256xf32> to vector<256x1xf32>
    %cst_38 = arith.constant 2.560000e+02 : f32
    %48 = vector.broadcast %cst_38 : f32 to vector<256x1xf32>
    %49 = arith.divf %47, %48 : vector<256x1xf32>
    %c0_39 = arith.constant 0 : index
    %c0_40 = arith.constant 0 : index
    %50 = vector.load %arg14[%c0_39, %c0_40] : memref<256x256xbf16, #tpu.memory_space<vmem>>, vector<256x256xbf16>
    %51 = arith.truncf %49 : vector<256x1xf32> to vector<256x1xbf16>
    %cst_41 = arith.constant dense<0.000000e+00> : vector<256x1xf32>
    %52 = tpu.matmul %50, %51, %cst_41 {dimension_numbers = #tpu.dot_dimension_numbers<[1], [0], [0], [1], [0, 0, 1, 1], [], []>} : vector<256x256xbf16>, vector<256x1xbf16>, vector<256x1xf32> -> vector<256x1xf32>
    %c0_42 = arith.constant 0 : index
    %c0_43 = arith.constant 0 : index
    %53 = vector.load %arg15[%c0_42, %c0_43] : memref<256x1xf32, #tpu.memory_space<vmem>>, vector<256x1xf32>
    %54 = arith.addf %52, %53 : vector<256x1xf32>
    %cst_44 = arith.constant 0.000000e+00 : f32
    %55 = vector.broadcast %cst_44 : f32 to vector<256x1xf32>
    %56 = arith.maximumf %54, %55 : vector<256x1xf32>
    %c0_45 = arith.constant 0 : index
    %c0_46 = arith.constant 0 : index
    %57 = vector.load %arg16[%c0_45, %c0_46] : memref<256x256xbf16, #tpu.memory_space<vmem>>, vector<256x256xbf16>
    %58 = arith.truncf %56 : vector<256x1xf32> to vector<256x1xbf16>
    %cst_47 = arith.constant dense<0.000000e+00> : vector<256x1xf32>
    %59 = tpu.matmul %57, %58, %cst_47 {dimension_numbers = #tpu.dot_dimension_numbers<[1], [0], [0], [1], [0, 0, 1, 1], [], []>} : vector<256x256xbf16>, vector<256x1xbf16>, vector<256x1xf32> -> vector<256x1xf32>
    %c0_48 = arith.constant 0 : index
    %c0_49 = arith.constant 0 : index
    %60 = vector.load %arg17[%c0_48, %c0_49] : memref<256x1xf32, #tpu.memory_space<vmem>>, vector<256x1xf32>
    %61 = arith.addf %59, %60 : vector<256x1xf32>
    %62 = arith.negf %61 : vector<256x1xf32>
    %63 = math.exp %62 : vector<256x1xf32>
    %cst_50 = arith.constant 1.000000e+00 : f32
    %64 = vector.broadcast %cst_50 : f32 to vector<256x1xf32>
    %65 = arith.addf %64, %63 : vector<256x1xf32>
    %66 = arith.divf %64, %65 : vector<256x1xf32>
    %67 = vector.broadcast %66 : vector<256x1xf32> to vector<256x256xf32>
    %68 = arith.mulf %45, %67 : vector<256x256xf32>
    %cst_51 = arith.constant dense<0.000000e+00> : vector<256xf32>
    %69 = vector.multi_reduction <add>, %68, %cst_51 [1] : vector<256x256xf32> to vector<256xf32>
    %70 = vector.shape_cast %69 : vector<256xf32> to vector<256x1xf32>
    %cst_52 = arith.constant 2.560000e+02 : f32
    %71 = vector.broadcast %cst_52 : f32 to vector<256x1xf32>
    %72 = arith.divf %70, %71 : vector<256x1xf32>
    %c0_53 = arith.constant 0 : index
    %c0_54 = arith.constant 0 : index
    %73 = vector.load %arg18[%c0_53, %c0_54] : memref<384x256xbf16, #tpu.memory_space<vmem>>, vector<384x256xbf16>
    %74 = arith.truncf %68 : vector<256x256xf32> to vector<256x256xbf16>
    %cst_55 = arith.constant dense<0.000000e+00> : vector<384x256xf32>
    %75 = tpu.matmul %73, %74, %cst_55 {dimension_numbers = #tpu.dot_dimension_numbers<[1], [0], [0], [1], [0, 0, 1, 1], [], []>} : vector<384x256xbf16>, vector<256x256xbf16>, vector<384x256xf32> -> vector<384x256xf32>
    %c0_56 = arith.constant 0 : index
    %c0_57 = arith.constant 0 : index
    %76 = vector.load %arg19[%c0_56, %c0_57] : memref<384x256xbf16, #tpu.memory_space<vmem>>, vector<384x256xbf16>
    %77 = arith.truncf %72 : vector<256x1xf32> to vector<256x1xbf16>
    %cst_58 = arith.constant dense<0.000000e+00> : vector<384x1xf32>
    %78 = tpu.matmul %76, %77, %cst_58 {dimension_numbers = #tpu.dot_dimension_numbers<[1], [0], [0], [1], [0, 0, 1, 1], [], []>} : vector<384x256xbf16>, vector<256x1xbf16>, vector<384x1xf32> -> vector<384x1xf32>
    %79 = vector.broadcast %78 : vector<384x1xf32> to vector<384x256xf32>
    %80 = arith.addf %75, %79 : vector<384x256xf32>
    %c0_59 = arith.constant 0 : index
    %c0_60 = arith.constant 0 : index
    %81 = vector.load %arg20[%c0_59, %c0_60] : memref<384x1xf32, #tpu.memory_space<vmem>>, vector<384x1xf32>
    %82 = vector.broadcast %81 : vector<384x1xf32> to vector<384x256xf32>
    %83 = arith.addf %80, %82 : vector<384x256xf32>
    %cst_61 = arith.constant 0.000000e+00 : f32
    %84 = vector.broadcast %cst_61 : f32 to vector<384x256xf32>
    %85 = arith.maximumf %83, %84 : vector<384x256xf32>
    %c0_62 = arith.constant 0 : index
    %c0_63 = arith.constant 0 : index
    %86 = vector.load %arg21[%c0_62, %c0_63] : memref<256x384xbf16, #tpu.memory_space<vmem>>, vector<256x384xbf16>
    %87 = arith.truncf %85 : vector<384x256xf32> to vector<384x256xbf16>
    %cst_64 = arith.constant dense<0.000000e+00> : vector<256x256xf32>
    %88 = tpu.matmul %86, %87, %cst_64 {dimension_numbers = #tpu.dot_dimension_numbers<[1], [0], [0], [1], [0, 0, 1, 1], [], []>} : vector<256x384xbf16>, vector<384x256xbf16>, vector<256x256xf32> -> vector<256x256xf32>
    %c0_65 = arith.constant 0 : index
    %c0_66 = arith.constant 0 : index
    %89 = vector.load %arg22[%c0_65, %c0_66] : memref<256x1xf32, #tpu.memory_space<vmem>>, vector<256x1xf32>
    %90 = vector.broadcast %89 : vector<256x1xf32> to vector<256x256xf32>
    %91 = arith.addf %88, %90 : vector<256x256xf32>
    %cst_67 = arith.constant 0.000000e+00 : f32
    %92 = vector.broadcast %cst_67 : f32 to vector<256x256xf32>
    %93 = arith.maximumf %91, %92 : vector<256x256xf32>
    %c0_68 = arith.constant 0 : index
    %c0_69 = arith.constant 0 : index
    %94 = vector.load %arg23[%c0_68, %c0_69] : memref<128x256xbf16, #tpu.memory_space<vmem>>, vector<128x256xbf16>
    %95 = arith.truncf %93 : vector<256x256xf32> to vector<256x256xbf16>
    %cst_70 = arith.constant dense<0.000000e+00> : vector<128x256xf32>
    %96 = tpu.matmul %94, %95, %cst_70 {dimension_numbers = #tpu.dot_dimension_numbers<[1], [0], [0], [1], [0, 0, 1, 1], [], []>} : vector<128x256xbf16>, vector<256x256xbf16>, vector<128x256xf32> -> vector<128x256xf32>
    %c0_71 = arith.constant 0 : index
    %c0_72 = arith.constant 0 : index
    %97 = vector.load %arg24[%c0_71, %c0_72] : memref<128x1xf32, #tpu.memory_space<vmem>>, vector<128x1xf32>
    %98 = vector.broadcast %97 : vector<128x1xf32> to vector<128x256xf32>
    %99 = arith.addf %96, %98 : vector<128x256xf32>
    %cst_73 = arith.constant 0.000000e+00 : f32
    %100 = vector.broadcast %cst_73 : f32 to vector<128x256xf32>
    %101 = arith.maximumf %99, %100 : vector<128x256xf32>
    %c0_74 = arith.constant 0 : index
    %c0_75 = arith.constant 0 : index
    %102 = vector.load %arg25[%c0_74, %c0_75] : memref<256x128xbf16, #tpu.memory_space<vmem>>, vector<256x128xbf16>
    %103 = arith.truncf %101 : vector<128x256xf32> to vector<128x256xbf16>
    %cst_76 = arith.constant dense<0.000000e+00> : vector<256x256xf32>
    %104 = tpu.matmul %102, %103, %cst_76 {dimension_numbers = #tpu.dot_dimension_numbers<[1], [0], [0], [1], [0, 0, 1, 1], [], []>} : vector<256x128xbf16>, vector<128x256xbf16>, vector<256x256xf32> -> vector<256x256xf32>
    %c0_77 = arith.constant 0 : index
    %c0_78 = arith.constant 0 : index
    %105 = vector.load %arg26[%c0_77, %c0_78] : memref<256x1xf32, #tpu.memory_space<vmem>>, vector<256x1xf32>
    %106 = vector.broadcast %105 : vector<256x1xf32> to vector<256x256xf32>
    %107 = arith.addf %104, %106 : vector<256x256xf32>
    %cst_79 = arith.constant 0.000000e+00 : f32
    %108 = vector.broadcast %cst_79 : f32 to vector<256x256xf32>
    %109 = arith.maximumf %107, %108 : vector<256x256xf32>
    %c0_80 = arith.constant 0 : index
    %c0_81 = arith.constant 0 : index
    %110 = vector.load %arg27[%c0_80, %c0_81] : memref<128x256xbf16, #tpu.memory_space<vmem>>, vector<128x256xbf16>
    %111 = arith.truncf %109 : vector<256x256xf32> to vector<256x256xbf16>
    %cst_82 = arith.constant dense<0.000000e+00> : vector<128x256xf32>
    %112 = tpu.matmul %110, %111, %cst_82 {dimension_numbers = #tpu.dot_dimension_numbers<[1], [0], [0], [1], [0, 0, 1, 1], [], []>} : vector<128x256xbf16>, vector<256x256xbf16>, vector<128x256xf32> -> vector<128x256xf32>
    %c0_83 = arith.constant 0 : index
    %c0_84 = arith.constant 0 : index
    %113 = vector.load %arg28[%c0_83, %c0_84] : memref<128x1xf32, #tpu.memory_space<vmem>>, vector<128x1xf32>
    %114 = vector.broadcast %113 : vector<128x1xf32> to vector<128x256xf32>
    %115 = arith.addf %112, %114 : vector<128x256xf32>
    %cst_85 = arith.constant 0.000000e+00 : f32
    %116 = vector.broadcast %cst_85 : f32 to vector<128x256xf32>
    %117 = arith.maximumf %115, %116 : vector<128x256xf32>
    %c0_86 = arith.constant 0 : index
    %c0_87 = arith.constant 0 : index
    %118 = vector.load %arg29[%c0_86, %c0_87] : memref<18x128xbf16, #tpu.memory_space<vmem>>, vector<18x128xbf16>
    %119 = arith.truncf %117 : vector<128x256xf32> to vector<128x256xbf16>
    %cst_88 = arith.constant dense<0.000000e+00> : vector<18x256xf32>
    %120 = tpu.matmul %118, %119, %cst_88 {dimension_numbers = #tpu.dot_dimension_numbers<[1], [0], [0], [1], [0, 0, 1, 1], [], []>} : vector<18x128xbf16>, vector<128x256xbf16>, vector<18x256xf32> -> vector<18x256xf32>
    %c0_89 = arith.constant 0 : index
    %c0_90 = arith.constant 0 : index
    %121 = vector.load %arg30[%c0_89, %c0_90] : memref<18x1xf32, #tpu.memory_space<vmem>>, vector<18x1xf32>
    %122 = vector.broadcast %121 : vector<18x1xf32> to vector<18x256xf32>
    %123 = arith.addf %120, %122 : vector<18x256xf32>
    %cst_91 = arith.constant dense<0.000000e+00> : vector<128xf32>
    %124 = vector.multi_reduction <add>, %101, %cst_91 [1] : vector<128x256xf32> to vector<128xf32>
    %125 = vector.shape_cast %124 : vector<128xf32> to vector<128x1xf32>
    %cst_92 = arith.constant 2.560000e+02 : f32
    %126 = vector.broadcast %cst_92 : f32 to vector<128x1xf32>
    %127 = arith.divf %125, %126 : vector<128x1xf32>
    %c0_93 = arith.constant 0 : index
    %c0_94 = arith.constant 0 : index
    %128 = vector.load %arg31[%c0_93, %c0_94] : memref<128x128xbf16, #tpu.memory_space<vmem>>, vector<128x128xbf16>
    %129 = arith.truncf %127 : vector<128x1xf32> to vector<128x1xbf16>
    %cst_95 = arith.constant dense<0.000000e+00> : vector<128x1xf32>
    %130 = tpu.matmul %128, %129, %cst_95 {dimension_numbers = #tpu.dot_dimension_numbers<[1], [0], [0], [1], [0, 0, 1, 1], [], []>} : vector<128x128xbf16>, vector<128x1xbf16>, vector<128x1xf32> -> vector<128x1xf32>
    %c0_96 = arith.constant 0 : index
    %c0_97 = arith.constant 0 : index
    %131 = vector.load %arg32[%c0_96, %c0_97] : memref<128x1xf32, #tpu.memory_space<vmem>>, vector<128x1xf32>
    %132 = arith.addf %130, %131 : vector<128x1xf32>
    %cst_98 = arith.constant 0.000000e+00 : f32
    %133 = vector.broadcast %cst_98 : f32 to vector<128x1xf32>
    %134 = arith.maximumf %132, %133 : vector<128x1xf32>
    %c0_99 = arith.constant 0 : index
    %c0_100 = arith.constant 0 : index
    %135 = vector.load %arg33[%c0_99, %c0_100] : memref<128x128xbf16, #tpu.memory_space<vmem>>, vector<128x128xbf16>
    %136 = arith.truncf %134 : vector<128x1xf32> to vector<128x1xbf16>
    %cst_101 = arith.constant dense<0.000000e+00> : vector<128x1xf32>
    %137 = tpu.matmul %135, %136, %cst_101 {dimension_numbers = #tpu.dot_dimension_numbers<[1], [0], [0], [1], [0, 0, 1, 1], [], []>} : vector<128x128xbf16>, vector<128x1xbf16>, vector<128x1xf32> -> vector<128x1xf32>
    %c0_102 = arith.constant 0 : index
    %c0_103 = arith.constant 0 : index
    %138 = vector.load %arg34[%c0_102, %c0_103] : memref<128x1xf32, #tpu.memory_space<vmem>>, vector<128x1xf32>
    %139 = arith.addf %137, %138 : vector<128x1xf32>
    %140 = arith.negf %139 : vector<128x1xf32>
    %141 = math.exp %140 : vector<128x1xf32>
    %cst_104 = arith.constant 1.000000e+00 : f32
    %142 = vector.broadcast %cst_104 : f32 to vector<128x1xf32>
    %143 = arith.addf %142, %141 : vector<128x1xf32>
    %144 = arith.divf %142, %143 : vector<128x1xf32>
    %145 = vector.broadcast %144 : vector<128x1xf32> to vector<128x256xf32>
    %146 = arith.mulf %101, %145 : vector<128x256xf32>
    %c0_105 = arith.constant 0 : index
    %c0_106 = arith.constant 0 : index
    %c0_107 = arith.constant 0 : index
    %147 = vector.load %arg35[%c0_105, %c0_106, %c0_107] : memref<1x128x256xf32, #tpu.memory_space<vmem>>, vector<1x128x256xf32>
    %148 = vector.shape_cast %147 : vector<1x128x256xf32> to vector<128x256xf32>
    %149 = vector.shape_cast %146 : vector<128x256xf32> to vector<1x128x256xf32>
    tpu.vector_store %arg35[%c0_105, %c0_106, %c0_107], %149 {strides = array<i32>} : memref<1x128x256xf32, #tpu.memory_space<vmem>>, vector<1x128x256xf32>,
    %c0_108 = arith.constant 0 : index
    %c0_109 = arith.constant 0 : index
    %c0_110 = arith.constant 0 : index
    %150 = vector.load %arg36[%c0_108, %c0_109, %c0_110] : memref<1x18x256xf32, #tpu.memory_space<vmem>>, vector<1x18x256xf32>
    %151 = vector.shape_cast %150 : vector<1x18x256xf32> to vector<18x256xf32>
    %152 = vector.shape_cast %123 : vector<18x256xf32> to vector<1x18x256xf32>
    tpu.vector_store %arg36[%c0_108, %c0_109, %c0_110], %152 {strides = array<i32>} : memref<1x18x256xf32, #tpu.memory_space<vmem>>, vector<1x18x256xf32>,
    return
  }
  func.func @transform_0(%arg0: i32) -> (i32, i32, i32) {
    %c0_i32 = arith.constant 0 : i32
    %c0_i32_0 = arith.constant 0 : i32
    %c0_i32_1 = arith.constant 0 : i32
    return %arg0, %c0_i32, %c0_i32_0 : i32, i32, i32
  }
  func.func @transform_1(%arg0: i32) -> (i32, i32, i32) {
    %c0_i32 = arith.constant 0 : i32
    %c0_i32_0 = arith.constant 0 : i32
    %c0_i32_1 = arith.constant 0 : i32
    return %arg0, %c0_i32, %c0_i32_0 : i32, i32, i32
  }
  func.func @transform_2(%arg0: i32) -> (i32, i32, i32) {
    %c0_i32 = arith.constant 0 : i32
    %c0_i32_0 = arith.constant 0 : i32
    %c0_i32_1 = arith.constant 0 : i32
    return %arg0, %c0_i32, %c0_i32_0 : i32, i32, i32
  }
  func.func @transform_3(%arg0: i32) -> (i32, i32) {
    %c0_i32 = arith.constant 0 : i32
    %c0_i32_0 = arith.constant 0 : i32
    %c0_i32_1 = arith.constant 0 : i32
    return %c0_i32, %c0_i32_0 : i32, i32
  }
  func.func @transform_4(%arg0: i32) -> (i32, i32) {
    %c0_i32 = arith.constant 0 : i32
    %c0_i32_0 = arith.constant 0 : i32
    %c0_i32_1 = arith.constant 0 : i32
    return %c0_i32, %c0_i32_0 : i32, i32
  }
  func.func @transform_5(%arg0: i32) -> (i32, i32) {
    %c0_i32 = arith.constant 0 : i32
    %c0_i32_0 = arith.constant 0 : i32
    %c0_i32_1 = arith.constant 0 : i32
    return %c0_i32, %c0_i32_0 : i32, i32
  }
  func.func @transform_6(%arg0: i32) -> (i32, i32) {
    %c0_i32 = arith.constant 0 : i32
    %c0_i32_0 = arith.constant 0 : i32
    %c0_i32_1 = arith.constant 0 : i32
    return %c0_i32, %c0_i32_0 : i32, i32
  }
  func.func @transform_7(%arg0: i32) -> (i32, i32) {
    %c0_i32 = arith.constant 0 : i32
    %c0_i32_0 = arith.constant 0 : i32
    %c0_i32_1 = arith.constant 0 : i32
    return %c0_i32, %c0_i32_0 : i32, i32
  }
  func.func @transform_8(%arg0: i32) -> (i32, i32) {
    %c0_i32 = arith.constant 0 : i32
    %c0_i32_0 = arith.constant 0 : i32
    %c0_i32_1 = arith.constant 0 : i32
    return %c0_i32, %c0_i32_0 : i32, i32
  }
  func.func @transform_9(%arg0: i32) -> (i32, i32) {
    %c0_i32 = arith.constant 0 : i32
    %c0_i32_0 = arith.constant 0 : i32
    %c0_i32_1 = arith.constant 0 : i32
    return %c0_i32, %c0_i32_0 : i32, i32
  }
  func.func @transform_10(%arg0: i32) -> (i32, i32) {
    %c0_i32 = arith.constant 0 : i32
    %c0_i32_0 = arith.constant 0 : i32
    %c0_i32_1 = arith.constant 0 : i32
    return %c0_i32, %c0_i32_0 : i32, i32
  }
  func.func @transform_11(%arg0: i32) -> (i32, i32) {
    %c0_i32 = arith.constant 0 : i32
    %c0_i32_0 = arith.constant 0 : i32
    %c0_i32_1 = arith.constant 0 : i32
    return %c0_i32, %c0_i32_0 : i32, i32
  }
  func.func @transform_12(%arg0: i32) -> (i32, i32) {
    %c0_i32 = arith.constant 0 : i32
    %c0_i32_0 = arith.constant 0 : i32
    %c0_i32_1 = arith.constant 0 : i32
    return %c0_i32, %c0_i32_0 : i32, i32
  }
  func.func @transform_13(%arg0: i32) -> (i32, i32) {
    %c0_i32 = arith.constant 0 : i32
    %c0_i32_0 = arith.constant 0 : i32
    %c0_i32_1 = arith.constant 0 : i32
    return %c0_i32, %c0_i32_0 : i32, i32
  }
  func.func @transform_14(%arg0: i32) -> (i32, i32) {
    %c0_i32 = arith.constant 0 : i32
    %c0_i32_0 = arith.constant 0 : i32
    %c0_i32_1 = arith.constant 0 : i32
    return %c0_i32, %c0_i32_0 : i32, i32
  }
  func.func @transform_15(%arg0: i32) -> (i32, i32) {
    %c0_i32 = arith.constant 0 : i32
    %c0_i32_0 = arith.constant 0 : i32
    %c0_i32_1 = arith.constant 0 : i32
    return %c0_i32, %c0_i32_0 : i32, i32
  }
  func.func @transform_16(%arg0: i32) -> (i32, i32) {
    %c0_i32 = arith.constant 0 : i32
    %c0_i32_0 = arith.constant 0 : i32
    %c0_i32_1 = arith.constant 0 : i32
    return %c0_i32, %c0_i32_0 : i32, i32
  }
  func.func @transform_17(%arg0: i32) -> (i32, i32) {
    %c0_i32 = arith.constant 0 : i32
    %c0_i32_0 = arith.constant 0 : i32
    %c0_i32_1 = arith.constant 0 : i32
    return %c0_i32, %c0_i32_0 : i32, i32
  }
  func.func @transform_18(%arg0: i32) -> (i32, i32) {
    %c0_i32 = arith.constant 0 : i32
    %c0_i32_0 = arith.constant 0 : i32
    %c0_i32_1 = arith.constant 0 : i32
    return %c0_i32, %c0_i32_0 : i32, i32
  }
  func.func @transform_19(%arg0: i32) -> (i32, i32) {
    %c0_i32 = arith.constant 0 : i32
    %c0_i32_0 = arith.constant 0 : i32
    %c0_i32_1 = arith.constant 0 : i32
    return %c0_i32, %c0_i32_0 : i32, i32
  }
  func.func @transform_20(%arg0: i32) -> (i32, i32) {
    %c0_i32 = arith.constant 0 : i32
    %c0_i32_0 = arith.constant 0 : i32
    %c0_i32_1 = arith.constant 0 : i32
    return %c0_i32, %c0_i32_0 : i32, i32
  }
  func.func @transform_21(%arg0: i32) -> (i32, i32) {
    %c0_i32 = arith.constant 0 : i32
    %c0_i32_0 = arith.constant 0 : i32
    %c0_i32_1 = arith.constant 0 : i32
    return %c0_i32, %c0_i32_0 : i32, i32
  }
  func.func @transform_22(%arg0: i32) -> (i32, i32) {
    %c0_i32 = arith.constant 0 : i32
    %c0_i32_0 = arith.constant 0 : i32
    %c0_i32_1 = arith.constant 0 : i32
    return %c0_i32, %c0_i32_0 : i32, i32
  }
  func.func @transform_23(%arg0: i32) -> (i32, i32) {
    %c0_i32 = arith.constant 0 : i32
    %c0_i32_0 = arith.constant 0 : i32
    %c0_i32_1 = arith.constant 0 : i32
    return %c0_i32, %c0_i32_0 : i32, i32
  }
  func.func @transform_24(%arg0: i32) -> (i32, i32) {
    %c0_i32 = arith.constant 0 : i32
    %c0_i32_0 = arith.constant 0 : i32
    %c0_i32_1 = arith.constant 0 : i32
    return %c0_i32, %c0_i32_0 : i32, i32
  }
  func.func @transform_25(%arg0: i32) -> (i32, i32) {
    %c0_i32 = arith.constant 0 : i32
    %c0_i32_0 = arith.constant 0 : i32
    %c0_i32_1 = arith.constant 0 : i32
    return %c0_i32, %c0_i32_0 : i32, i32
  }
  func.func @transform_26(%arg0: i32) -> (i32, i32) {
    %c0_i32 = arith.constant 0 : i32
    %c0_i32_0 = arith.constant 0 : i32
    %c0_i32_1 = arith.constant 0 : i32
    return %c0_i32, %c0_i32_0 : i32, i32
  }
  func.func @transform_27(%arg0: i32) -> (i32, i32) {
    %c0_i32 = arith.constant 0 : i32
    %c0_i32_0 = arith.constant 0 : i32
    %c0_i32_1 = arith.constant 0 : i32
    return %c0_i32, %c0_i32_0 : i32, i32
  }
  func.func @transform_28(%arg0: i32) -> (i32, i32) {
    %c0_i32 = arith.constant 0 : i32
    %c0_i32_0 = arith.constant 0 : i32
    %c0_i32_1 = arith.constant 0 : i32
    return %c0_i32, %c0_i32_0 : i32, i32
  }
  func.func @transform_29(%arg0: i32) -> (i32, i32) {
    %c0_i32 = arith.constant 0 : i32
    %c0_i32_0 = arith.constant 0 : i32
    %c0_i32_1 = arith.constant 0 : i32
    return %c0_i32, %c0_i32_0 : i32, i32
  }
  func.func @transform_30(%arg0: i32) -> (i32, i32) {
    %c0_i32 = arith.constant 0 : i32
    %c0_i32_0 = arith.constant 0 : i32
    %c0_i32_1 = arith.constant 0 : i32
    return %c0_i32, %c0_i32_0 : i32, i32
  }
  func.func @transform_31(%arg0: i32) -> (i32, i32) {
    %c0_i32 = arith.constant 0 : i32
    %c0_i32_0 = arith.constant 0 : i32
    %c0_i32_1 = arith.constant 0 : i32
    return %c0_i32, %c0_i32_0 : i32, i32
  }
  func.func @transform_32(%arg0: i32) -> (i32, i32) {
    %c0_i32 = arith.constant 0 : i32
    %c0_i32_0 = arith.constant 0 : i32
    %c0_i32_1 = arith.constant 0 : i32
    return %c0_i32, %c0_i32_0 : i32, i32
  }
  func.func @transform_33(%arg0: i32) -> (i32, i32) {
    %c0_i32 = arith.constant 0 : i32
    %c0_i32_0 = arith.constant 0 : i32
    %c0_i32_1 = arith.constant 0 : i32
    return %c0_i32, %c0_i32_0 : i32, i32
  }
  func.func @transform_34(%arg0: i32) -> (i32, i32, i32) {
    %c0_i32 = arith.constant 0 : i32
    %c0_i32_0 = arith.constant 0 : i32
    %c0_i32_1 = arith.constant 0 : i32
    return %arg0, %c0_i32, %c0_i32_0 : i32, i32, i32
  }
  func.func @transform_35(%arg0: i32) -> (i32, i32, i32) {
    %c0_i32 = arith.constant 0 : i32
    %c0_i32_0 = arith.constant 0 : i32
    %c0_i32_1 = arith.constant 0 : i32
    return %arg0, %c0_i32, %c0_i32_0 : i32, i32, i32
  }
}

</mosaic_0001>

<bundles_post_ra>
// kernel: tpu_custom_call.1
= control target key start
LH: loop header
LB: loop body
LE: loop exit
PB: predicated region body
PF: predicated region fallthrough
CT: control target
= control target key end

     0   :  { %s13370_s6 = smov 1   ;;  %s13371_s10 = smov 2   ;;  %s17902_s0 = inlined_call_operand.smem [shape: u32[36], index: -1, kind: input, shape index: {}] }
   0x1   :  { %s13429_s5 = sld [smem:[%s17902_s0]]   ;;  %s13372_s14 = smov 3  }
   0x2   :  { %s13434_s9 = sld [smem:[%s17902_s0 + %s13370_s6]]   ;;  %s13373_s18 = smov 4  }
   0x3   :  { %s13439_s13 = sld [smem:[%s17902_s0 + %s13371_s10]]   ;;  %s13374_s22 = smov 5  }
   0x4   :  { %s13444_s17 = sld [smem:[%s17902_s0 + %s13372_s14]]   ;;  %s13375_s26 = smov 6  }
   0x5   :  { %s13449_s21 = sld [smem:[%s17902_s0 + %s13373_s18]]   ;;  %s13376_s30 = smov 7  }
   0x6   :  { %s13454_s25 = sld [smem:[%s17902_s0 + %s13374_s22]]   ;;  %s13377_s4 = smov 8  }
   0x7   :  { %18197 = sst [smem:[#allocation20_spill]] %s13429_s5  ;;  %s13378_s10 = smov 9  }
   0x8   :  { %s13459_s29 = sld [smem:[%s17902_s0 + %s13375_s26]]   ;;  %s13379_s15 = smov 10  }
   0x9   :  { %18198 = sst [smem:[#allocation21_spill]] %s13439_s13  ;;  %s13380_s20 = smov 11  }
   0xa   :  { %s13464_s3 = sld [smem:[%s17902_s0 + %s13376_s30]]   ;;  %s13381_s26 = smov 12  }
   0xb   :  { %s13469_s8 = sld [smem:[%s17902_s0 + %s13377_s4]]   ;;  %s13382_s1 = smov 13  }
   0xc   :  { %s13474_s14 = sld [smem:[%s17902_s0 + %s13378_s10]]   ;;  %s13383_s7 = smov 14  }
   0xd   :  { %s13479_s19 = sld [smem:[%s17902_s0 + %s13379_s15]]   ;;  %s13384_s15 = smov 15  }
   0xe   :  { %s13484_s24 = sld [smem:[%s17902_s0 + %s13380_s20]]   ;;  %s13385_s22 = smov 16  }
   0xf   :  { %s13489_s30 = sld [smem:[%s17902_s0 + %s13381_s26]]   ;;  %s13386_s28 = smov 17  }
  0x10   :  { %18199 = sst [smem:[#allocation22_spill]] %s13464_s3 }
  0x11   :  { %s13494_s6 = sld [smem:[%s17902_s0 + %s13382_s1]]  }
  0x12   :  { %18200 = sst [smem:[#allocation23_spill]] %s13474_s14 }
  0x13   :  { %s13499_s12 = sld [smem:[%s17902_s0 + %s13383_s7]]   ;;  %s13387_s7 = smov 18  }
  0x14   :  { %18201 = sst [smem:[#allocation24_spill]] %s13484_s24 }
  0x15   :  { %s13504_s20 = sld [smem:[%s17902_s0 + %s13384_s15]]   ;;  %s13388_s15 = smov 19  }
  0x16   :  { %s13509_s27 = sld [smem:[%s17902_s0 + %s13385_s22]]   ;;  %s13389_s22 = smov 20  }
  0x17   :  { %18202 = sst [smem:[#allocation25_spill]] %s13494_s6 }
  0x18   :  { %s13514_s4 = sld [smem:[%s17902_s0 + %s13386_s28]]   ;;  %s13390_s28 = smov 21  }
  0x19   :  { %18203 = sst [smem:[#allocation26_spill]] %s13499_s12 }
  0x1a   :  { %s13519_s12 = sld [smem:[%s17902_s0 + %s13387_s7]]   ;;  %s13391_s7 = smov 22  }
  0x1b   :  { %18204 = sst [smem:[#allocation27_spill]] %s13504_s20 }
  0x1c   :  { %18205 = sst [smem:[#allocation28_spill]] %s13509_s27 }
  0x1d   :  { %s13524_s20 = sld [smem:[%s17902_s0 + %s13388_s15]]   ;;  %s13392_s15 = smov 23  }
  0x1e   :  { %18206 = sst [smem:[#allocation29_spill]] %s13514_s4 }
  0x1f   :  { %s13529_s27 = sld [smem:[%s17902_s0 + %s13389_s22]]   ;;  %s13393_s22 = smov 24  }
  0x20   :  { %18207 = sst [smem:[#allocation30_spill]] %s13519_s12 }
  0x21   :  { %s13534_s4 = sld [smem:[%s17902_s0 + %s13390_s28]]   ;;  %s13394_s28 = smov 25  }
  0x22   :  { %s13539_s12 = sld [smem:[%s17902_s0 + %s13391_s7]]   ;;  %s13395_s7 = smov 26  }
  0x23   :  { %18208 = sst [smem:[#allocation31_spill]] %s13524_s20 }
  0x24   :  { %s13544_s20 = sld [smem:[%s17902_s0 + %s13392_s15]]   ;;  %s13396_s15 = smov 27  }
  0x25   :  { %18209 = sst [smem:[#allocation32_spill]] %s13529_s27 }
  0x26   :  { %s13549_s27 = sld [smem:[%s17902_s0 + %s13393_s22]]   ;;  %s13397_s22 = smov 28  }
  0x27   :  { %18210 = sst [smem:[#allocation33_spill]] %s13534_s4 }
  0x28   :  { %s13554_s4 = sld [smem:[%s17902_s0 + %s13394_s28]]   ;;  %s13398_s28 = smov 29  }
  0x29   :  { %s13559_s6 = sld [smem:[%s17902_s0 + %s13395_s7]]   ;;  %s13399_s7 = smov 30  }
  0x2a   :  { %18211 = sst [smem:[#allocation34_spill]] %s13544_s20 }
  0x2b   :  { %s13564_s20 = sld [smem:[%s17902_s0 + %s13396_s15]]   ;;  %s13400_s15 = smov 31  }
  0x2c   :  { %18212 = sst [smem:[#allocation35_spill]] %s13549_s27 }
  0x2d   :  { %s13569_s24 = sld [smem:[%s17902_s0 + %s13397_s22]]   ;;  %s13401_s22 = smov 32  }
  0x2e   :  { %18213 = sst [smem:[#allocation36_spill]] %s13554_s4 }
  0x2f   :  { %18214 = sst [smem:[#allocation37_spill]] %s13559_s6 }
  0x30   :  { %s13574_s4 = sld [smem:[%s17902_s0 + %s13398_s28]]   ;;  %s13402_s28 = smov 33  }
  0x31   :  { %18215 = sst [smem:[#allocation38_spill]] %s13564_s20 }
  0x32   :  { %s13579_s3 = sld [smem:[%s17902_s0 + %s13399_s7]]   ;;  %s13403_s7 = smov 34  }
  0x33   :  { %18216 = sst [smem:[#allocation39_spill]] %s13569_s24 }
  0x34   :  { %s13584_s20 = sld [smem:[%s17902_s0 + %s13400_s15]]   ;;  %s13404_s15 = smov 35  }
  0x35   :  { %s13589_s24 = sld [smem:[%s17902_s0 + %s13401_s22]]  }
  0x36   :  { %18217 = sst [smem:[#allocation40_spill]] %s13574_s4 }
  0x37   :  { %s13594_s4 = sld [smem:[%s17902_s0 + %s13402_s28]]  }
  0x38   :  { %18218 = sst [smem:[#allocation41_spill]] %s13579_s3 }
  0x39   :  { %s13599_s13 = sld [smem:[%s17902_s0 + %s13403_s7]]  }
  0x3a   :  { %18219 = sst [smem:[#allocation42_spill]] %s13584_s20 }
  0x3b   :  { %s13604_s20 = sld [smem:[%s17902_s0 + %s13404_s15]]  }
  0x3d   :  { %18220 = sst [smem:[#allocation43_spill]] %s13594_s4 }
  0x3e   :  { %77 = vsyncpa [#allocation3], 0 }
  0x3f   :  { %78 = vsyncpa [#allocation6], 0 }
  0x40   :  { %79 = vsyncpa [#allocation9], 0 }
  0x41   :  { %80 = vsyncpa [#allocation12], 0 }
  0x42   :  { %81 = vsyncpa [#allocation4], 0 }
  0x43   :  { %83 = vsyncpa [#allocation4 + $0x1], 0  ;;  %s13606_s22 = smov 0   ;;  %s13608_s23 = smov 0  }
  0x44   :  { %s13610_s26 = smov 0   ;;  %s13612_s28 = smov 0  }
  0x45 LB: > { %s18221_s4 = sld [smem:[#allocation43_spill]]  ;;  %s13627_s0 = sadd.s32 4294967295, %s13368_s28   ;;  %s13356_s22 = sphi %s13606_s22, %s19162_s22   ;;  %s13368_s28 = sphi %s13612_s28, %s19159_s28   ;;  %s13364_s26 = sphi %s13610_s26, %s19161_s26   ;;  %s13360_s23 = sphi %s13608_s23, %s19163_s23  }
  0x46   : > { %18222 = sst [smem:[#allocation44_spill]] %s13356_s22  ;;  %s11384_s1 = sadd.s32 4294967294, %s13368_s28  }
  0x47   : > { %18223 = sst [smem:[#allocation45_spill]] %s13364_s26  ;;  %s13631_s2 = sadd.s32 1, %s13368_s28  }
  0x48   : > { %18224 = sst [smem:[#allocation46_spill]] %s13368_s28  ;;  %s825_s7 = sadd.s32 1, %s13364_s26 }
  0x49   : > { %18225 = sst [smem:[#allocation47_spill]] %s13631_s2  ;;  %s822_s10 = ssub.s32 %s13368_s28, %s13631_s2 }
  0x4a   : > { %p835_p0 = scmp.ne.s32.totalorder %s13364_s26, %s13360_s23  ;;  %p823_p1 = scmp.eq.s32.totalorder %s822_s10, 0 }
  0x4b   : > { %p836_p2 = scmp.eq.s32.totalorder %s13627_s0, 1  ;;  %p841_p3 = scmp.ne.s32.totalorder %s13360_s23, %s13356_s22 }
  0x4c   : > { %p842_p4 = scmp.eq.s32.totalorder %s11384_s1, 1  ;;  %p11385_p7 = scmp.ge.s32.totalorder %s13368_s28, 1 }
  0x4d   : > { %s13642_s11 = scalar_select %p823_p1, %s13364_s26, %s825_s7  }
  0x4e   : > { %p13644_p5 = por %p836_p2, %p835_p0  ;;  %p13648_p6 = por %p842_p4, %p841_p3 }
  0x4f   : > { %18226 = sst [smem:[#allocation48_spill]] %s13642_s11  ;;  %p875_p8 = scmp.lt.s32.totalorder %s13368_s28, 3 }
  0x50   : > { %s18227_s15 = scalar_select %p13644_p5, 1, 0 }
  0x51   : > { %s18228_s16 = scalar_select %p13648_p6, 1, 0 }
  0x52   : > { %p17926_p9 = scmp.eq.s32.totalorder %s13627_s0, 0  ;;  %p13655_p10 = pnand %p11385_p7, %p875_p8 }
  0x53   : > { %18229 = sst [smem:[#allocation49_spill]] %s18228_s16  ;;  %s13405_s1 = smov [#allocation5]  }
  0x54   : > { %s18230_s18 = scalar_select %p13655_p10, 1, 0 }
  0x55   : > { %p12264_p11 = pneg %p13655_p10  ;;  %s915_s7 = sshll.u32 %s13405_s1, 4  ;;  %s916_s7 = int_to_ptr.vmem [resolvable:$true] %s915_s7 }
  0x56   : > { %s13406_s11 = smov [#allocation8]   ;;  %s13407_s2 = smov [#allocation11]  }
  0x57   : > { %p13663_p12 = pnand %p17926_p9, %p12264_p11  ;;  %s980_s26 = sshll.u32 %s13406_s11, 4  ;;  %s981_s26 = int_to_ptr.vmem [resolvable:$true] %s980_s26 }
  0x58   : > { %s1018_s16 = sshll.u32 %s13407_s2, 4  ;;  %s13121_s28 = scalar_lea.vmem %s916_s7, 3072  ;;  %s1019_s16 = int_to_ptr.vmem [resolvable:$true] %s1018_s16 }
  0x59   : > { %p13669_p13 = pneg %p13663_p12  ;;  %p13122_p0 = scmp.ne.s32.totalorder %s916_s7, %s13121_s28 }
  0x5a   : > { %p13129_p3 = scmp.lt.s32.totalorder %s916_s7, %s916_s7  ;;  %p13130_p4 = scmp.lt.s32.totalorder %s13121_s28, %s13121_s28 }
  0x5b   : > { %p13124_p1 = pnand %p13122_p0, %p13669_p13 }
  0x5c   : > { %p13131_p7 = por %p13130_p4, %p13129_p3 }
  0x5d   : > { %p13125_p2 = pneg %p13124_p1 }
  0x5f   : > { %p13132_p8 = pnand %p13131_p7, %p13125_p2 }
  0x61   : > { %13135 = shalt.err (!%p13132_p8)
}
  0x62   : > { %s17928_s11 = smov 64   ;;  %s18233_s14 = sld [smem:[#allocation23_spill]] }
  0x63   : > { %s17929_s2 = smov 4   ;;  %s13147_s1 = scalar_lea.vmem %s981_s26, 2048 }
  0x64   : > { %p13148_p11 = scmp.ne.s32.totalorder %s981_s26, %s13147_s1  ;;  %p13155_p9 = scmp.lt.s32.totalorder %s981_s26, %s981_s26 }
  0x65   : > { %p13156_p6 = scmp.lt.s32.totalorder %s13147_s1, %s13147_s1 }
  0x66   : > { %p13150_p0 = pnand %p13148_p11, %p13669_p13 }
  0x67   : > { %p13157_p3 = por %p13156_p6, %p13155_p9 }
  0x68   : > { %12270 = dma.hbm_to_vmem [thread:$0]  (!%p13663_p12), %s18233_s14, 3072, %s916_s7, [#allocation6], %s17928_s11, %s17928_s11, %s17929_s2  }
  0x69   : > { %p13151_p1 = pneg %p13150_p0 }
  0x6b   : > { %p13158_p2 = pnand %p13157_p3, %p13151_p1 }
  0x6d   : > { %13161 = shalt.err (!%p13158_p2)
}
  0x6e   : > { %s18234_s27 = sld [smem:[#allocation35_spill]]  ;;  %s13173_s28 = scalar_lea.vmem %s1019_s16, 1024 }
  0x6f   : > { %p13174_p4 = scmp.ne.s32.totalorder %s1019_s16, %s13173_s28  ;;  %p13181_p11 = scmp.lt.s32.totalorder %s1019_s16, %s1019_s16 }
  0x70   : > { %p13182_p0 = scmp.lt.s32.totalorder %s13173_s28, %s13173_s28 }
  0x71   : > { %p13176_p7 = pnand %p13174_p4, %p13669_p13 }
  0x72   : > { %p13183_p5 = por %p13182_p0, %p13181_p11 }
  0x73   : > { %p13177_p8 = pneg %p13176_p7 }
  0x74   : > { %12276 = dma.hbm_to_vmem [thread:$0]  (!%p13663_p12), %s18234_s27, 2048, %s981_s26, [#allocation9], %s17928_s11, %s17928_s11, %s17929_s2  }
  0x75   : > { %p13184_p6 = pnand %p13183_p5, %p13177_p8 }
  0x77   : > { %13187 = shalt.err (!%p13184_p6)
}
  0x78   : > { %s18235_s3 = sld [smem:[#allocation41_spill]]  ;;  %s13410_s26 = smov [#allocation2]  }
  0x79   : > { %s902_s7 = sshll.u32 %s13410_s26, 4  ;;  %s13411_s1 = smov [#allocation7]   ;;  %s903_s7 = int_to_ptr.vmem [resolvable:$true] %s902_s7 }
  0x7a   : > { %s964_s14 = sshll.u32 %s13411_s1, 4  ;;  %s13199_s27 = scalar_lea.vmem %s903_s7, 3072  ;;  %s965_s14 = int_to_ptr.vmem [resolvable:$true] %s964_s14 }
  0x7b   : > { %p13200_p9 = scmp.ne.s32.totalorder %s903_s7, %s13199_s27  ;;  %p13207_p5 = scmp.lt.s32.totalorder %s903_s7, %s903_s7 }
  0x7c   : > { %p13208_p2 = scmp.lt.s32.totalorder %s13199_s27, %s13199_s27 }
  0x7d   : > { %p13202_p1 = pnand %p13200_p9, %p13669_p13 }
  0x7e   : > { %12282 = dma.hbm_to_vmem [thread:$0]  (!%p13663_p12), %s18235_s3, 1024, %s1019_s16, [#allocation12], %s17928_s11, %s17928_s11, %s17929_s2  }
  0x7f   : > { %p13203_p3 = pneg %p13202_p1  ;;  %p13209_p4 = por %p13208_p2, %p13207_p5 }
  0x81   : > { %p13210_p7 = pnand %p13209_p4, %p13203_p3 }
  0x83   : > { %13213 = shalt.err (!%p13210_p7)
}
  0x84   : > { %12267 = dma.hbm_to_vmem [thread:$0]  (!%p13663_p12), %s13469_s8, 3072, %s903_s7, [#allocation3], %s17928_s11, %s17928_s11, %s17929_s2  }
  0x85   : > { %s13225_s16 = scalar_lea.vmem %s965_s14, 2048  ;;  %p13233_p6 = scmp.lt.s32.totalorder %s965_s14, %s965_s14 }
  0x86   : > { %p13226_p8 = scmp.ne.s32.totalorder %s965_s14, %s13225_s16  ;;  %p13234_p9 = scmp.lt.s32.totalorder %s13225_s16, %s13225_s16 }
  0x88   : > { %p13228_p11 = pnand %p13226_p8, %p13669_p13  ;;  %p13235_p1 = por %p13234_p9, %p13233_p6 }
  0x8a   : > { %p13229_p0 = pneg %p13228_p11 }
  0x8c   : > { %p13236_p5 = pnand %p13235_p1, %p13229_p0 }
  0x8e   : > { %13239 = shalt.err (!%p13236_p5)
}
  0x8f   : > { %s13412_s27 = smov 128   ;;  %s13413_s28 = smov 8  }
  0x90   : > { %12273 = dma.hbm_to_vmem [thread:$0]  (!%p13663_p12), %s13539_s12, 2048, %s965_s14, [#allocation6], %s13412_s27, %s13412_s27, %s13413_s28  }
  0x91   : > { %s13414_s26 = smov [#allocation10]   ;;  %s13415_s1 = smov [#allocation13]  }
  0x92   : > { %s996_s7 = sshll.u32 %s13414_s26, 4  ;;  %s1034_s11 = sshll.u32 %s13415_s1, 4  ;;  %s997_s7 = int_to_ptr.vmem [resolvable:$true] %s996_s7  ;;  %s1035_s11 = int_to_ptr.vmem [resolvable:$true] %s1034_s11 }
  0x93   : > { %s13251_s2 = scalar_lea.vmem %s997_s7, 2048  ;;  %p13259_p7 = scmp.lt.s32.totalorder %s997_s7, %s997_s7 }
  0x94   : > { %p13252_p3 = scmp.ne.s32.totalorder %s997_s7, %s13251_s2  ;;  %p13260_p8 = scmp.lt.s32.totalorder %s13251_s2, %s13251_s2 }
  0x96   : > { %p13254_p2 = pnand %p13252_p3, %p13669_p13  ;;  %p13261_p11 = por %p13260_p8, %p13259_p7 }
  0x98   : > { %p13255_p4 = pneg %p13254_p2 }
  0x9a   : > { %p13262_p0 = pnand %p13261_p11, %p13255_p4 }
  0x9c   : > { %13265 = shalt.err (!%p13262_p0)
}
  0x9d   : > { %s18236_s6 = sld [smem:[#allocation37_spill]]  ;;  %s13277_s14 = scalar_lea.vmem %s1035_s11, 1024 }
  0x9e   : > { %p13278_p6 = scmp.ne.s32.totalorder %s1035_s11, %s13277_s14  ;;  %p13285_p5 = scmp.lt.s32.totalorder %s1035_s11, %s1035_s11 }
  0x9f   : > { %p13286_p10 = scmp.lt.s32.totalorder %s13277_s14, %s13277_s14 }
  0xa0   : > { %p13280_p9 = pnand %p13278_p6, %p13669_p13 }
  0xa1   : > { %p13287_p3 = por %p13286_p10, %p13285_p5 }
  0xa2   : > { %p13281_p1 = pneg %p13280_p9 }
  0xa3   : > { %12279 = dma.hbm_to_vmem [thread:$0]  (!%p13663_p12), %s18236_s6, 2048, %s997_s7, [#allocation9], %s13412_s27, %s13412_s27, %s13413_s28  }
  0xa4   : > { %p13288_p2 = pnand %p13287_p3, %p13281_p1 }
  0xa6   : > { %13291 = shalt.err (!%p13288_p2)
}
  0xa7   : > { %s18237_s2 = smov 4   ;;  %s18238_s16 = smov 64  }
  0xa8   : > { %12285 = dma.hbm_to_vmem [thread:$0]  (!%p13663_p12), %s13589_s24, 1024, %s1035_s11, [#allocation12], %s18238_s16, %s18238_s16, %s18237_s2  }
  0xa9   : > { %p18239_p4 = scmp.ne.s32.totalorder %s18230_s18, 0 }
  0xab   : > { %1077 = sbr.rel (%p18239_p4) target bundleno = 5218 (0x1462), region = 156 }
  0xb0   : > { %p18240_p7 = scmp.eq.s32.totalorder %s13627_s0, 0 }
  0xb2   : > { %13335 = dma.done.wait (%p18240_p7), [#allocation3], 3072   ;;  %p18241_p13 = pmov %p18240_p7 }
  0xb3   : > { %p18242_p10 = pmov %p18240_p7 }
  0xb4   : > { %13337 = vsyncadd (%p18241_p13), [#allocation3], 4294964224 }
  0xb5   : > { %13339 = dma.done.wait (%p18242_p10), [#allocation6], 5120   ;;  %p18243_p8 = pmov %p18240_p7 }
  0xb6   : > { %p18244_p11 = pmov %p18240_p7 }
  0xb7   : > { %13341 = vsyncadd (%p18243_p8), [#allocation6], 4294962176 }
  0xb8   : > { %13343 = dma.done.wait (%p18244_p11), [#allocation9], 4096   ;;  %p18245_p12 = pmov %p18240_p7 }
  0xb9   : > { %p18246_p0 = pmov %p18240_p7 }
  0xba   : > { %13345 = vsyncadd (%p18245_p12), [#allocation9], 4294963200 }
  0xbb   : > { %13347 = dma.done.wait (%p18246_p0), [#allocation12], 2048   ;;  %p18247_p6 = pmov %p18246_p0 }
  0xbc   : > { %s18248_s5 = sld [smem:[#allocation20_spill]]  ;;  %p1204_p9 = scmp.lt.s32.totalorder %s13627_s0, 1  ;;  %v17931_v0 = vmov 0   ;;  %vm1340_vm0 = vcmask 1040384   ;;  %vm1341_vm1 = vcmask 1041408   ;;  %v13417_v1 = vmov 65535  }
  0xbd   : > { %13349 = vsyncadd (%p18247_p6), [#allocation12], 4294965248  ;;  %12388 = vset.pattern.permute.xlu1 %v17931_v0  ;;  %12387 = vset.pattern.permute.xlu0 %v17931_v0  ;;  %v1342_v2 = vsel %vm1340_vm0, 4294967295, %v13417_v1  ;;  %v1301_v3 = vld [vmem:[%s13449_s21 + $0x10] sm:$0xff]  ;;  %v1299_v4 = vld [vmem:[%s13449_s21] sm:$0xff]  ;;  %vm1333_vm2 = vcmask 23552  }
  0xbe   : > { %s13745_s22 = scalar_select %p1204_p9, %s13627_s0, 1  ;;  %1382 = vmatprep.mubr.bf16.mxu0 %v17931_v0  ;;  %1536 = vmatprep.mubr.bf16.mxu1 %v17931_v0  ;;  %v1302_v5 = vld [vmem:[%s13449_s21 + $0x18] sm:$0xff]  ;;  %v1300_v7 = vld [vmem:[%s13449_s21 + $0x8] sm:$0xff]  ;;  %v1343_v9 = vsel %vm1341_vm1, %v1342_v2, 0  ;;  %v1429_v14 = vld [vmem:[%s13459_s29 + $0x30] sm:$0xff]  ;;  %vm1491_vm3 = vcmask 261120  }
  0xbf   : > { %1315 = vperm.xlu0 %12387, %v1301_v3   ;;  %1305 = vperm.xlu1 %12388, %v1299_v4   ;;  %v1430_v15 = vld [vmem:[%s13459_s29 + $0x38] sm:$0xff]  ;;  %v12390_v16 = vld [vmem:[%s13444_s17] sm:$0xff]   ;;  %v1428_v18 = vld [vmem:[%s13459_s29 + $0x28] sm:$0xff]  ;;  %s18249_s28 = sld [smem:[#allocation21_spill]]  ;;  %vm2250_vm4 = vcmask 523264   ;;  %p19154_p5 = scmp.ne.s32.totalorder %s18227_s15, 0 }
  0xc0   : > { %s11893_s18 = sshll.u32 %s13745_s22, 3  ;;  %v1427_v17 = vld [vmem:[%s13459_s29 + $0x20] sm:$0xff]  ;;  %v1425_v19 = vld [vmem:[%s13459_s29 + $0x10] sm:$0xff]  ;;  %v1426_v20 = vld [vmem:[%s13459_s29 + $0x18] sm:$0xff]  ;;  %s11894_s11 = sshll.u32 %s13745_s22, 8 }
  0xc1   : > { %v12391_v21 = vld [vmem:[%s13444_s17 + $0x8] sm:$0xff]   ;;  %v1423_v22 = vld [vmem:[%s13459_s29] sm:$0xff]  ;;  %v3187_v24 = vld [vmem:[%s13479_s19 + $0x70] sm:$0xff]  ;;  %s13819_s27 = scalar_lea.vmem %s13434_s9, %s11894_s11  ;;  %s18285_s7 = sld [smem:[#allocation22_spill]] }
  0xc2   : > { %s1208_s10 = scalar_lea.vmem %s18248_s5, %s11893_s18  ;;  %v1424_v23 = vld [vmem:[%s13459_s29 + $0x8] sm:$0xff]  ;;  %v3188_v25 = vld [vmem:[%s13479_s19 + $0x78] sm:$0xff]  ;;  %v3185_v26 = vld [vmem:[%s13479_s19 + $0x60] sm:$0xff]  ;;  %s18377_s1 = sld [smem:[#allocation24_spill]] }
  0xc3   : > { %v1225_v6 = vld [vmem:[%s1208_s10] sm:$0x77]  ;;  %1320 = vperm.xlu0 %12387, %v1302_v5   ;;  %1310 = vperm.xlu1 %12388, %v1300_v7   ;;  %v3186_v27 = vld [vmem:[%s13479_s19 + $0x68] sm:$0xff]  ;;  %v3183_v28 = vld [vmem:[%s13479_s19 + $0x50] sm:$0xff]  ;;  %s18732_s14 = sld [smem:[#allocation25_spill]] }
  0xc4   : > { %v1295_v8 = vcombine.high %v1225_v6, %v1225_v6  ;;  %v1297_v10 = vpack.c.bf16 %v1225_v6, %v1225_v6  ;;  %v3184_v29 = vld [vmem:[%s13479_s19 + $0x58] sm:$0xff]  ;;  %v3181_v30 = vld [vmem:[%s13479_s19 + $0x40] sm:$0xff]  ;;  %v3182_v31 = vld [vmem:[%s13479_s19 + $0x48] sm:$0xff]  ;;  %s18736_s2 = sld [smem:[#allocation26_spill]] }
  0xc5   : > { %v3179_v32 = vld [vmem:[%s13479_s19 + $0x30] sm:$0xff]  ;;  %v3180_v33 = vld [vmem:[%s13479_s19 + $0x38] sm:$0xff]  ;;  %v3177_v34 = vld [vmem:[%s13479_s19 + $0x20] sm:$0xff]  ;;  %s13920_s26 = scalar_lea.vmem %s18249_s28, %s11894_s11  ;;  %s18737_s16 = sld [smem:[#allocation27_spill]] }
  0xc6   : > { %v1298_v11 = vpack.c.bf16 %v1295_v8, %v1295_v8  ;;  %v1345_v12 = vand.u32 %v1343_v9, %v1297_v10  ;;  %v3178_v35 = vld [vmem:[%s13479_s19 + $0x28] sm:$0xff]  ;;  %v3175_v36 = vld [vmem:[%s13479_s19 + $0x10] sm:$0xff]  ;;  %v3176_v37 = vld [vmem:[%s13479_s19 + $0x18] sm:$0xff]  ;;  %s18738_s18 = sld [smem:[#allocation28_spill]] }
  0xc7   : > { %1463 = vperm.xlu0 %12387, %v1429_v14   ;;  %1468 = vperm.xlu1 %12388, %v1430_v15   ;;  %v3173_v38 = vld [vmem:[%s13479_s19] sm:$0xff]  ;;  %v3174_v39 = vld [vmem:[%s13479_s19 + $0x8] sm:$0xff]  ;;  %v3203_v40 = vld [vmem:[%s13479_s19 + $0xf0] sm:$0xff]  ;;  %s18855_s10 = sld [smem:[#allocation31_spill]] }
  0xc8   : > { %v1348_v13 = vand.u32 %v1343_v9, %v1298_v11  ;;  %v3204_v41 = vld [vmem:[%s13479_s19 + $0xf8] sm:$0xff]  ;;  %v3201_v42 = vld [vmem:[%s13479_s19 + $0xe0] sm:$0xff]  ;;  %v3202_v43 = vld [vmem:[%s13479_s19 + $0xe8] sm:$0xff]  ;;  %s18856_s11 = sld [smem:[#allocation30_spill]] }
  0xc9   : > { %v3199_v44 = vld [vmem:[%s13479_s19 + $0xd0] sm:$0xff]  ;;  %v3200_v45 = vld [vmem:[%s13479_s19 + $0xd8] sm:$0xff]  ;;  %v3197_v46 = vld [vmem:[%s13479_s19 + $0xc0] sm:$0xff]  ;;  %s18946_s28 = sld [smem:[#allocation33_spill]] }
  0xca   : > { %1364 = vmatprep.subr.bf16.mxu0 %v1348_v13  ;;  %v3198_v47 = vld [vmem:[%s13479_s19 + $0xc8] sm:$0xff]  ;;  %v3195_v48 = vld [vmem:[%s13479_s19 + $0xb0] sm:$0xff]  ;;  %v3196_v49 = vld [vmem:[%s13479_s19 + $0xb8] sm:$0xff] }
  0xcb   : > { %1365 = vmatpush1.bf16.msra.mxu0 %v1345_v12  ;;  %1453 = vperm.xlu0 %12387, %v1427_v17   ;;  %v3193_v50 = vld [vmem:[%s13479_s19 + $0xa0] sm:$0xff]  ;;  %v3194_v51 = vld [vmem:[%s13479_s19 + $0xa8] sm:$0xff]  ;;  %v3191_v52 = vld [vmem:[%s13479_s19 + $0x90] sm:$0xff] }
  0xcc   : > { %1458 = vperm.xlu1 %12388, %v1428_v18   ;;  %v3192_v53 = vld [vmem:[%s13479_s19 + $0x98] sm:$0xff]  ;;  %v3189_v54 = vld [vmem:[%s13479_s19 + $0x80] sm:$0xff]  ;;  %v3190_v55 = vld [vmem:[%s13479_s19 + $0x88] sm:$0xff] }
  0xcd   : > { %v3219_v56 = vld [vmem:[%s13479_s19 + $0x170] sm:$0xff]  ;;  %v3220_v57 = vld [vmem:[%s13479_s19 + $0x178] sm:$0xff]  ;;  %v3217_v58 = vld [vmem:[%s13479_s19 + $0x160] sm:$0xff] }
  0xce   : > { %11412 = vmatmul.mubr.msk.bf16.vlgmr.msra.gmra.mxu0 %vm1333_vm2, %v12390_v16  ;;  %v3218_v59 = vld [vmem:[%s13479_s19 + $0x168] sm:$0xff]  ;;  %v3215_v60 = vld [vmem:[%s13479_s19 + $0x150] sm:$0xff]  ;;  %v3216_v61 = vld [vmem:[%s13479_s19 + $0x158] sm:$0xff] }
  0xcf   : > { %1392 = vmatprep.mubr.bf16.mxu0 %v17931_v0  ;;  %1443 = vperm.xlu0 %12387, %v1425_v19   ;;  %v3213_v62 = vld [vmem:[%s13479_s19 + $0x140] sm:$0xff]  ;;  %v3214_v63 = vld [vmem:[%s13479_s19 + $0x148] sm:$0xff]  ;;  %v3211_v1 = vld [vmem:[%s13479_s19 + $0x130] sm:$0xff] }
  0xd0   : > { %1448 = vperm.xlu1 %12388, %v1426_v20   ;;  %v3212_v2 = vld [vmem:[%s13479_s19 + $0x138] sm:$0xff]  ;;  %v3209_v3 = vld [vmem:[%s13479_s19 + $0x120] sm:$0xff]  ;;  %v3210_v4 = vld [vmem:[%s13479_s19 + $0x128] sm:$0xff] }
  0xd1   : > { %v3207_v5 = vld [vmem:[%s13479_s19 + $0x110] sm:$0xff]  ;;  %v3208_v6 = vld [vmem:[%s13479_s19 + $0x118] sm:$0xff]  ;;  %v3205_v7 = vld [vmem:[%s13479_s19 + $0x100] sm:$0xff] }
  0xd2   : > { %v3206_v8 = vld [vmem:[%s13479_s19 + $0x108] sm:$0xff]  ;;  %v3795_v9 = vld [vmem:[%s13489_s30 + $0xf0] sm:$0xff]  ;;  %v3796_v10 = vld [vmem:[%s13489_s30 + $0xf8] sm:$0xff] }
  0xd3   : > { %1433 = vperm.xlu0 %12387, %v1423_v22   ;;  %v1255_v11 = vld [vmem:[%s13819_s27 + $0xe8] sm:$0xff]  ;;  %v1257_v12 = vld [vmem:[%s13819_s27 + $0xf8] sm:$0xff]  ;;  %v3779_v13 = vld [vmem:[%s13489_s30 + $0x70] sm:$0xff] }
  0xd4   : > { %1438 = vperm.xlu1 %12388, %v1424_v23   ;;  %v1712_v14 = vpack.c.bf16 %v1257_v12, %v1255_v11  ;;  %v1254_v15 = vld [vmem:[%s13819_s27 + $0xe0] sm:$0xff]  ;;  %v1256_v16 = vld [vmem:[%s13819_s27 + $0xf0] sm:$0xff]  ;;  %v3780_v17 = vld [vmem:[%s13489_s30 + $0x78] sm:$0xff] }
  0xd5   : > { %v1711_v18 = vpack.c.bf16 %v1256_v16, %v1254_v15  ;;  %v1251_v19 = vld [vmem:[%s13819_s27 + $0xc8] sm:$0xff]  ;;  %v1253_v20 = vld [vmem:[%s13819_s27 + $0xd8] sm:$0xff]  ;;  %v1250_v23 = vld [vmem:[%s13819_s27 + $0xc0] sm:$0xff] }
  0xd6   : > { %11413 = vmatmul.mubr.msk.bf16.gmra.mxu0 %vm1333_vm2, %v12391_v21  ;;  %1857 = vmatprep.subr.bf16.mxu0 %v1712_v14  ;;  %v3793_v21 = vld [vmem:[%s13489_s30 + $0xe0] sm:$0xff]  ;;  %v1710_v22 = vpack.c.bf16 %v1253_v20, %v1251_v19  ;;  %v3771_v12 = vld [vmem:[%s13489_s30 + $0x30] sm:$0xff]  ;;  %v3772_v14 = vld [vmem:[%s13489_s30 + $0x38] sm:$0xff] }
  0xd7   : > { %1889 = vmatprep.mubr.bf16.mxu0 %v17931_v0  ;;  %3293 = vperm.xlu0 %12387, %v3187_v24   ;;  %v1252_v24 = vld [vmem:[%s13819_s27 + $0xd0] sm:$0xff]  ;;  %v3785_v15 = vld [vmem:[%s13489_s30 + $0xa0] sm:$0xff]  ;;  %v3786_v16 = vld [vmem:[%s13489_s30 + $0xa8] sm:$0xff] }
  0xd8   : > { %3298 = vperm.xlu1 %12388, %v3188_v25   ;;  %1858 = vmatpush1.bf16.msra.mxu0 %v1711_v18  ;;  %v1709_v25 = vpack.c.bf16 %v1252_v24, %v1250_v23  ;;  %v12397_v18 = vld [vmem:[#allocation2 + $0x8] sm:$0xff]   ;;  %v3783_v20 = vld [vmem:[%s13489_s30 + $0x90] sm:$0xff]  ;;  %v3768_v24 = vld [vmem:[%s13489_s30 + $0x18] sm:$0xff] }
  0xd9   : > { %1859 = vmatprep.subr.bf16.mxu0 %v1710_v22  ;;  %v3770_v19 = vld [vmem:[%s13489_s30 + $0x28] sm:$0xff]  ;;  %v3767_v22 = vld [vmem:[%s13489_s30 + $0x10] sm:$0xff] }
  0xda   : > { %v12398_v23 = vld [vmem:[#allocation2 + $0x10] sm:$0xff]  }
  0xdb   : > { %3283 = vperm.xlu0 %12387, %v3185_v26   ;;  %v3794_v26 = vld [vmem:[%s13489_s30 + $0xe8] sm:$0xff] }
  0xdc   : > { %3288 = vperm.xlu1 %12388, %v3186_v27   ;;  %1860 = vmatpush1.bf16.msra.mxu0 %v1709_v25  ;;  %v1247_v27 = vld [vmem:[%s13819_s27 + $0xa8] sm:$0xff]  ;;  %v3781_v25 = vld [vmem:[%s13489_s30 + $0x80] sm:$0xff] }
  0xdf   : > { %3273 = vperm.xlu0 %12387, %v3183_v28   ;;  %v1249_v28 = vld [vmem:[%s13819_s27 + $0xb8] sm:$0xff] }
  0xe0   : > { %3278 = vperm.xlu1 %12388, %v3184_v29   ;;  %v3777_v29 = vld [vmem:[%s13489_s30 + $0x60] sm:$0xff] }
  0xe3   : > { %3263 = vperm.xlu0 %12387, %v3181_v30   ;;  %v1708_v30 = vpack.c.bf16 %v1249_v28, %v1247_v27  ;;  %v12399_v27 = vld [vmem:[#allocation2 + $0x18] sm:$0xff]   ;;  %v3765_v28 = vld [vmem:[%s13489_s30] sm:$0xff] }
  0xe4   : > { %3268 = vperm.xlu1 %12388, %v3182_v31   ;;  %v1246_v31 = vld [vmem:[%s13819_s27 + $0xa0] sm:$0xff] }
  0xe5   : > { %1861 = vmatprep.subr.bf16.mxu0 %v1708_v30  ;;  %v12400_v30 = vld [vmem:[#allocation2 + $0x20] sm:$0xff]  }
  0xe7   : > { %3253 = vperm.xlu0 %12387, %v3179_v32   ;;  %v1248_v32 = vld [vmem:[%s13819_s27 + $0xb0] sm:$0xff] }
  0xe8   : > { %3258 = vperm.xlu1 %12388, %v3180_v33   ;;  %v3778_v33 = vld [vmem:[%s13489_s30 + $0x68] sm:$0xff] }
  0xeb   : > { %3243 = vperm.xlu0 %12387, %v3177_v34   ;;  %v1707_v34 = vpack.c.bf16 %v1248_v32, %v1246_v31  ;;  %v12401_v31 = vld [vmem:[#allocation2 + $0x28] sm:$0xff]   ;;  %v12402_v32 = vld [vmem:[#allocation2 + $0x30] sm:$0xff]  }
  0xec   : > { %3248 = vperm.xlu1 %12388, %v3178_v35   ;;  %v1243_v35 = vld [vmem:[%s13819_s27 + $0x88] sm:$0xff] }
  0xed   : > { %1862 = vmatpush1.bf16.msra.mxu0 %v1707_v34  ;;  %v12403_v34 = vld [vmem:[#allocation2 + $0x38] sm:$0xff]  }
  0xef   : > { %3233 = vperm.xlu0 %12387, %v3175_v36   ;;  %v1245_v36 = vld [vmem:[%s13819_s27 + $0x98] sm:$0xff] }
  0xf0   : > { %3238 = vperm.xlu1 %12388, %v3176_v37   ;;  %v3791_v37 = vld [vmem:[%s13489_s30 + $0xd0] sm:$0xff] }
  0xf3   : > { %3223 = vperm.xlu0 %12387, %v3173_v38   ;;  %v1706_v38 = vpack.c.bf16 %v1245_v36, %v1243_v35 }
  0xf4   : > { %3228 = vperm.xlu1 %12388, %v3174_v39   ;;  %v1242_v39 = vld [vmem:[%s13819_s27 + $0x80] sm:$0xff] }
  0xf5   : > { %1863 = vmatprep.subr.bf16.mxu0 %v1706_v38 }
  0xf7   : > { %3373 = vperm.xlu0 %12387, %v3203_v40   ;;  %v1244_v40 = vld [vmem:[%s13819_s27 + $0x90] sm:$0xff] }
  0xf8   : > { %3378 = vperm.xlu1 %12388, %v3204_v41   ;;  %v3792_v41 = vld [vmem:[%s13489_s30 + $0xd8] sm:$0xff] }
  0xfb   : > { %3363 = vperm.xlu0 %12387, %v3201_v42   ;;  %v1705_v42 = vpack.c.bf16 %v1244_v40, %v1242_v39 }
  0xfc   : > { %3368 = vperm.xlu1 %12388, %v3202_v43   ;;  %v1239_v43 = vld [vmem:[%s13819_s27 + $0x68] sm:$0xff] }
  0xfd   : > { %1864 = vmatpush1.bf16.msra.mxu0 %v1705_v42 }
  0xff   : > { %3353 = vperm.xlu0 %12387, %v3199_v44   ;;  %v1241_v44 = vld [vmem:[%s13819_s27 + $0x78] sm:$0xff] }
 0x100   : > { %3358 = vperm.xlu1 %12388, %v3200_v45   ;;  %v3775_v45 = vld [vmem:[%s13489_s30 + $0x50] sm:$0xff] }
 0x103   : > { %3343 = vperm.xlu0 %12387, %v3197_v46   ;;  %v1704_v46 = vpack.c.bf16 %v1241_v44, %v1239_v43 }
 0x104   : > { %3348 = vperm.xlu1 %12388, %v3198_v47   ;;  %v1238_v47 = vld [vmem:[%s13819_s27 + $0x60] sm:$0xff] }
 0x105   : > { %1865 = vmatprep.subr.bf16.mxu0 %v1704_v46 }
 0x107   : > { %3333 = vperm.xlu0 %12387, %v3195_v48   ;;  %v1240_v48 = vld [vmem:[%s13819_s27 + $0x70] sm:$0xff] }
 0x108   : > { %3338 = vperm.xlu1 %12388, %v3196_v49   ;;  %v3776_v49 = vld [vmem:[%s13489_s30 + $0x58] sm:$0xff] }
 0x10b   : > { %3323 = vperm.xlu0 %12387, %v3193_v50   ;;  %v1703_v50 = vpack.c.bf16 %v1240_v48, %v1238_v47 }
 0x10c   : > { %3328 = vperm.xlu1 %12388, %v3194_v51   ;;  %v1235_v51 = vld [vmem:[%s13819_s27 + $0x48] sm:$0xff] }
 0x10d   : > { %1866 = vmatpush1.bf16.msra.mxu0 %v1703_v50 }
 0x10f   : > { %3313 = vperm.xlu0 %12387, %v3191_v52   ;;  %v1237_v52 = vld [vmem:[%s13819_s27 + $0x58] sm:$0xff] }
 0x110   : > { %3318 = vperm.xlu1 %12388, %v3192_v53   ;;  %v3789_v53 = vld [vmem:[%s13489_s30 + $0xc0] sm:$0xff] }
 0x113   : > { %3303 = vperm.xlu0 %12387, %v3189_v54   ;;  %v1702_v54 = vpack.c.bf16 %v1237_v52, %v1235_v51 }
 0x114   : > { %3308 = vperm.xlu1 %12388, %v3190_v55   ;;  %v1234_v55 = vld [vmem:[%s13819_s27 + $0x40] sm:$0xff] }
 0x115   : > { %1867 = vmatprep.subr.bf16.mxu0 %v1702_v54 }
 0x117   : > { %3453 = vperm.xlu0 %12387, %v3219_v56   ;;  %v1236_v56 = vld [vmem:[%s13819_s27 + $0x50] sm:$0xff] }
 0x118   : > { %3458 = vperm.xlu1 %12388, %v3220_v57   ;;  %v3790_v57 = vld [vmem:[%s13489_s30 + $0xc8] sm:$0xff] }
 0x11b   : > { %3443 = vperm.xlu0 %12387, %v3217_v58   ;;  %v1701_v58 = vpack.c.bf16 %v1236_v56, %v1234_v55 }
 0x11c   : > { %3448 = vperm.xlu1 %12388, %v3218_v59   ;;  %v1231_v59 = vld [vmem:[%s13819_s27 + $0x28] sm:$0xff] }
 0x11d   : > { %1868 = vmatpush1.bf16.msra.mxu0 %v1701_v58 }
 0x11f   : > { %3433 = vperm.xlu0 %12387, %v3215_v60   ;;  %v1233_v60 = vld [vmem:[%s13819_s27 + $0x38] sm:$0xff] }
 0x120   : > { %3438 = vperm.xlu1 %12388, %v3216_v61   ;;  %v3773_v61 = vld [vmem:[%s13489_s30 + $0x40] sm:$0xff] }
 0x123   : > { %3423 = vperm.xlu0 %12387, %v3213_v62   ;;  %v1700_v62 = vpack.c.bf16 %v1233_v60, %v1231_v59 }
 0x124   : > { %3428 = vperm.xlu1 %12388, %v3214_v63   ;;  %v1230_v63 = vld [vmem:[%s13819_s27 + $0x20] sm:$0xff] }
 0x125   : > { %1869 = vmatprep.subr.bf16.mxu0 %v1700_v62 }
 0x127   : > { %3413 = vperm.xlu0 %12387, %v3211_v1   ;;  %v1232_v1 = vld [vmem:[%s13819_s27 + $0x30] sm:$0xff] }
 0x128   : > { %3418 = vperm.xlu1 %12388, %v3212_v2   ;;  %v3774_v2 = vld [vmem:[%s13489_s30 + $0x48] sm:$0xff] }
 0x12b   : > { %3403 = vperm.xlu0 %12387, %v3209_v3   ;;  %v1699_v3 = vpack.c.bf16 %v1232_v1, %v1230_v63 }
 0x12c   : > { %3408 = vperm.xlu1 %12388, %v3210_v4   ;;  %v1227_v4 = vld [vmem:[%s13819_s27 + $0x8] sm:$0xff] }
 0x12d   : > { %1870 = vmatpush1.bf16.msra.mxu0 %v1699_v3 }
 0x12f   : > { %3393 = vperm.xlu0 %12387, %v3207_v5   ;;  %v1229_v5 = vld [vmem:[%s13819_s27 + $0x18] sm:$0xff] }
 0x130   : > { %3398 = vperm.xlu1 %12388, %v3208_v6   ;;  %v3787_v6 = vld [vmem:[%s13489_s30 + $0xb0] sm:$0xff] }
 0x133   : > { %3383 = vperm.xlu0 %12387, %v3205_v7   ;;  %v1698_v7 = vpack.c.bf16 %v1229_v5, %v1227_v4  ;;  %v12392_v4 = vld [vmem:[%s13454_s25] sm:$0xff]  }
 0x134   : > { %3388 = vperm.xlu1 %12388, %v3206_v8   ;;  %v1226_v8 = vld [vmem:[%s13819_s27] sm:$0xff] }
 0x135   : > { %1871 = vmatprep.subr.bf16.mxu0 %v1698_v7  ;;  %v12393_v7 = vld [vmem:[%s13454_s25 + $0x8] sm:$0xff]  }
 0x137   : > { %3949 = vperm.xlu0 %12387, %v3795_v9   ;;  %v1228_v9 = vld [vmem:[%s13819_s27 + $0x10] sm:$0xff]  ;;  %s18858_s27 = sld [smem:[#allocation29_spill]] }
 0x138   : > { %3954 = vperm.xlu1 %12388, %v3796_v10   ;;  %v3788_v10 = vld [vmem:[%s13489_s30 + $0xb8] sm:$0xff]  ;;  %v1697_v11 = vpack.c.bf16 %v1228_v9, %v1226_v8  ;;  %v12394_v9 = vld [vmem:[%s13454_s25 + $0x10] sm:$0xff]  }
 0x139   : > { %v12407_v8 = vld [vmem:[#allocation2 + $0x58] sm:$0xff]  }
 0x13a   : > { %1872 = vmatpush1.bf16.msra.mxu0 %v1697_v11  ;;  %v1306_v36 = vpop.permute.xlu1 %1305  ;;  %v1316_v38 = vpop.permute.xlu0 %1315  ;;  %v12395_v11 = vld [vmem:[%s13454_s25 + $0x18] sm:$0xff]  }
 0x13b   : > { %3869 = vperm.xlu0 %12387, %v3779_v13   ;;  %v12396_v13 = vld [vmem:[#allocation2] sm:$0xff]  }
 0x13c   : > { %3874 = vperm.xlu1 %12388, %v3780_v17   ;;  %v3769_v17 = vld [vmem:[%s13489_s30 + $0x20] sm:$0xff] }
 0x13d   : > { %1890 = vmatmul.mubr.bf16.vlgmr.msra.gmra.mxu0 %v12396_v13  ;;  %v12410_v13 = vld [vmem:[#allocation2 + $0x70] sm:$0xff]  }
 0x13e   : > { %1899 = vmatprep.mubr.bf16.mxu0 %v17931_v0  ;;  %v1311_v42 = vpop.permute.xlu1 %1310 }
 0x13f   : > { %3939 = vperm.xlu0 %12387, %v3793_v21   ;;  %v3784_v21 = vld [vmem:[%s13489_s30 + $0x98] sm:$0xff] }
 0x140   : > { %3944 = vperm.xlu1 %12388, %v3794_v26   ;;  %v3782_v26 = vld [vmem:[%s13489_s30 + $0x88] sm:$0xff] }
 0x143   : > { %3859 = vperm.xlu0 %12387, %v3777_v29   ;;  %v3766_v29 = vld [vmem:[%s13489_s30 + $0x8] sm:$0xff] }
 0x144   : > { %3864 = vperm.xlu1 %12388, %v3778_v33  }
 0x145   : > { %1900 = vmatmul.mubr.bf16.gmra.mxu0 %v12397_v18  ;;  %v12415_v18 = vld [vmem:[#allocation2 + $0x98] sm:$0xff]  }
 0x146   : > { %1909 = vmatprep.mubr.bf16.mxu0 %v17931_v0 }
 0x147   : > { %3929 = vperm.xlu0 %12387, %v3791_v37  }
 0x148   : > { %3934 = vperm.xlu1 %12388, %v3792_v41   ;;  %v12404_v41 = vld [vmem:[#allocation2 + $0x40] sm:$0xff]  }
 0x14b   : > { %3849 = vperm.xlu0 %12387, %v3775_v45  }
 0x14c   : > { %3854 = vperm.xlu1 %12388, %v3776_v49   ;;  %v1321_v49 = vpop.permute.xlu0 %1320 }
 0x14d   : > { %1910 = vmatmul.mubr.bf16.gmra.mxu0 %v12398_v23  ;;  %v1286_v23 = vld [vmem:[%s13920_s26 + $0xe0] sm:$0xff] }
 0x14e   : > { %1919 = vmatprep.mubr.bf16.mxu0 %v17931_v0 }
 0x14f   : > { %3919 = vperm.xlu0 %12387, %v3789_v53  }
 0x150   : > { %3924 = vperm.xlu1 %12388, %v3790_v57  }
 0x153   : > { %3839 = vperm.xlu0 %12387, %v3773_v61   ;;  %v12405_v61 = vld [vmem:[#allocation2 + $0x48] sm:$0xff]  }
 0x154   : > { %3844 = vperm.xlu1 %12388, %v3774_v2  }
 0x155   : > { %1920 = vmatmul.mubr.bf16.gmra.mxu0 %v12399_v27  ;;  %v1285_v27 = vld [vmem:[%s13920_s26 + $0xd8] sm:$0xff] }
 0x156   : > { %1929 = vmatprep.mubr.bf16.mxu0 %v17931_v0 }
 0x157   : > { %3909 = vperm.xlu0 %12387, %v3787_v6   ;;  %v12406_v6 = vld [vmem:[#allocation2 + $0x50] sm:$0xff]  }
 0x158   : > { %3914 = vperm.xlu1 %12388, %v3788_v10   ;;  %v12408_v10 = vld [vmem:[#allocation2 + $0x60] sm:$0xff]  }
 0x15b   : > { %3829 = vperm.xlu0 %12387, %v3771_v12   ;;  %v12409_v12 = vld [vmem:[#allocation2 + $0x68] sm:$0xff]  }
 0x15c   : > { %3834 = vperm.xlu1 %12388, %v3772_v14   ;;  %v12411_v14 = vld [vmem:[#allocation2 + $0x78] sm:$0xff]  }
 0x15d   : > { %1930 = vmatmul.mubr.bf16.gmra.mxu0 %v12400_v30  ;;  %v1284_v30 = vld [vmem:[%s13920_s26 + $0xd0] sm:$0xff] }
 0x15e   : > { %1939 = vmatprep.mubr.bf16.mxu0 %v17931_v0 }
 0x15f   : > { %3899 = vperm.xlu0 %12387, %v3785_v15   ;;  %v12412_v15 = vld [vmem:[#allocation2 + $0x80] sm:$0xff]  }
 0x160   : > { %3904 = vperm.xlu1 %12388, %v3786_v16   ;;  %v12413_v16 = vld [vmem:[#allocation2 + $0x88] sm:$0xff]  }
 0x163   : > { %3819 = vperm.xlu0 %12387, %v3769_v17   ;;  %v12414_v17 = vld [vmem:[#allocation2 + $0x90] sm:$0xff]  }
 0x164   : > { %3824 = vperm.xlu1 %12388, %v3770_v19   ;;  %v1287_v19 = vld [vmem:[%s13920_s26 + $0xe8] sm:$0xff] }
 0x165   : > { %1940 = vmatmul.mubr.bf16.gmra.mxu0 %v12401_v31 }
 0x166   : > { %1949 = vmatprep.mubr.bf16.mxu0 %v17931_v0 }
 0x167   : > { %3889 = vperm.xlu0 %12387, %v3783_v20   ;;  %v1289_v20 = vld [vmem:[%s13920_s26 + $0xf8] sm:$0xff] }
 0x168   : > { %3894 = vperm.xlu1 %12388, %v3784_v21   ;;  %v12416_v21 = vld [vmem:[#allocation2 + $0xa0] sm:$0xff]  }
 0x16b   : > { %3809 = vperm.xlu0 %12387, %v3767_v22   ;;  %v2659_v22 = vpack.c.bf16 %v1289_v20, %v1287_v19 }
 0x16c   : > { %3814 = vperm.xlu1 %12388, %v3768_v24   ;;  %v1288_v24 = vld [vmem:[%s13920_s26 + $0xf0] sm:$0xff] }
 0x16d   : > { %1950 = vmatmul.mubr.bf16.gmra.mxu0 %v12402_v32  ;;  %2804 = vmatprep.subr.bf16.mxu0 %v2659_v22  ;;  %v1279_v32 = vld [vmem:[%s13920_s26 + $0xa8] sm:$0xff]  ;;  %v12426_v22 = vld [vmem:[#allocation5 + $0x18] sm:$0xff]  }
 0x16e   : > { %1959 = vmatprep.mubr.bf16.mxu0 %v17931_v0 }
 0x16f   : > { %3879 = vperm.xlu0 %12387, %v3781_v25   ;;  %v2658_v25 = vpack.c.bf16 %v1288_v24, %v1286_v23 }
 0x170   : > { %3884 = vperm.xlu1 %12388, %v3782_v26   ;;  %v1283_v26 = vld [vmem:[%s13920_s26 + $0xc8] sm:$0xff] }
 0x171   : > { %2805 = vmatpush1.bf16.msra.mxu0 %v2658_v25 }
 0x173   : > { %3799 = vperm.xlu0 %12387, %v3765_v28   ;;  %v2657_v28 = vpack.c.bf16 %v1285_v27, %v1283_v26  ;;  %v12428_v27 = vld [vmem:[#allocation5 + $0x20] sm:$0xff]  }
 0x174   : > { %3804 = vperm.xlu1 %12388, %v3766_v29   ;;  %v1282_v29 = vld [vmem:[%s13920_s26 + $0xc0] sm:$0xff] }
 0x175   : > { %1960 = vmatmul.mubr.bf16.gmra.mxu0 %v12403_v34  ;;  %v2656_v31 = vpack.c.bf16 %v1284_v30, %v1282_v29  ;;  %2806 = vmatprep.subr.bf16.mxu0 %v2657_v28  ;;  %v12417_v34 = vld [vmem:[#allocation2 + $0xa8] sm:$0xff]  }
 0x176   : > { %1969 = vmatprep.mubr.bf16.mxu0 %v17931_v0 }
 0x177   : > { %2807 = vmatpush1.bf16.msra.mxu0 %v2656_v31 }
 0x17d   : > { %1970 = vmatmul.mubr.bf16.gmra.mxu0 %v12404_v41 }
 0x17e   : > { %1979 = vmatprep.mubr.bf16.mxu0 %v17931_v0 }
 0x185   : > { %1980 = vmatmul.mubr.bf16.gmra.mxu0 %v12405_v61 }
 0x186   : > { %1989 = vmatprep.mubr.bf16.mxu0 %v17931_v0 }
 0x18d   : > { %1990 = vmatmul.mubr.bf16.gmra.mxu0 %v12406_v6  ;;  %v1260_v6 = vld [vmem:[%s13920_s26 + $0x10] sm:$0xff] }
 0x18e   : > { %v1384_v33 = vpop.f32.mrf.mxu0  ;;  %1999 = vmatprep.mubr.bf16.mxu0 %v17931_v0 }
 0x18f   : > { %v1385_v43 = vadd.f32 %v1384_v33, %v1306_v36  ;;  %v1281_v33 = vld [vmem:[%s13920_s26 + $0xb8] sm:$0xff] }
 0x190   : > { %v1386_v35 = vpop.f32.mrf.mxu0 }
 0x191   : > { %v1387_v44 = vadd.f32 %v1386_v35, %v1306_v36  ;;  %v1403_v51 = vmax.f32 %v1385_v43, 0.0  ;;  %v2655_v35 = vpack.c.bf16 %v1281_v33, %v1279_v32  ;;  %v1278_v36 = vld [vmem:[%s13920_s26 + $0xa0] sm:$0xff]  ;;  %v1276_v43 = vld [vmem:[%s13920_s26 + $0x90] sm:$0xff]  ;;  %v12430_v32 = vld [vmem:[#allocation5 + $0x28] sm:$0xff]  }
 0x192   : > { %v1388_v37 = vpop.f32.mrf.mxu0 }
 0x193   : > { %v1389_v45 = vadd.f32 %v1388_v37, %v1311_v42  ;;  %v1404_v54 = vmax.f32 %v1387_v44, 0.0  ;;  %v1280_v37 = vld [vmem:[%s13920_s26 + $0xb0] sm:$0xff]  ;;  %2808 = vmatprep.subr.bf16.mxu0 %v2655_v35 }
 0x194   : > { %v1390_v39 = vpop.f32.mrf.mxu0 }
 0x195   : > { %v1391_v46 = vadd.f32 %v1390_v39, %v1311_v42  ;;  %v1405_v55 = vmax.f32 %v1389_v45, 0.0  ;;  %2000 = vmatmul.mubr.bf16.gmra.mxu0 %v12407_v8  ;;  %v1275_v39 = vld [vmem:[%s13920_s26 + $0x88] sm:$0xff]  ;;  %v1274_v42 = vld [vmem:[%s13920_s26 + $0x80] sm:$0xff] }
 0x196   : > { %v1394_v40 = vpop.f32.mrf.mxu0  ;;  %2009 = vmatprep.mubr.bf16.mxu0 %v17931_v0  ;;  %v2652_v44 = vpack.c.bf16 %v1276_v43, %v1274_v42  ;;  %v1271_v45 = vld [vmem:[%s13920_s26 + $0x68] sm:$0xff]  ;;  %v12420_v8 = vld [vmem:[#allocation5] sm:$0xff]   ;;  %v12434_v42 = vld [vmem:[#allocation5 + $0x38] sm:$0xff]  }
 0x197   : > { %v1395_v48 = vadd.f32 %v1394_v40, %v1316_v38  ;;  %v1406_v56 = vmax.f32 %v1391_v46, 0.0  ;;  %v1419_v5 = vpack.c.bf16 %v1405_v55, %v1403_v51  ;;  %v1277_v40 = vld [vmem:[%s13920_s26 + $0x98] sm:$0xff]  ;;  %v1266_v55 = vld [vmem:[%s13920_s26 + $0x40] sm:$0xff] }
 0x198   : > { %v1396_v47 = vpop.f32.mrf.mxu0  ;;  %v2653_v41 = vpack.c.bf16 %v1277_v40, %v1275_v39  ;;  %v1273_v46 = vld [vmem:[%s13920_s26 + $0x78] sm:$0xff] }
 0x199   : > { %v1397_v52 = vadd.f32 %v1396_v47, %v1316_v38  ;;  %v1407_v58 = vmax.f32 %v1395_v48, 0.0  ;;  %v1420_v3 = vpack.c.bf16 %v1406_v56, %v1404_v54  ;;  %v2654_v38 = vpack.c.bf16 %v1280_v37, %v1278_v36  ;;  %v12418_v47 = vld [vmem:[#allocation2 + $0xb0] sm:$0xff]  }
 0x19a   : > { %v1398_v50 = vpop.f32.mrf.mxu0  ;;  %v2651_v48 = vpack.c.bf16 %v1273_v46, %v1271_v45  ;;  %v1268_v56 = vld [vmem:[%s13920_s26 + $0x50] sm:$0xff] }
 0x19b   : > { %v1399_v53 = vadd.f32 %v1398_v50, %v1321_v49  ;;  %v1408_v62 = vmax.f32 %v1397_v52, 0.0  ;;  %2809 = vmatpush1.bf16.msra.mxu0 %v2654_v38  ;;  %v1272_v50 = vld [vmem:[%s13920_s26 + $0x70] sm:$0xff]  ;;  %v1267_v52 = vld [vmem:[%s13920_s26 + $0x48] sm:$0xff] }
 0x19c   : > { %v1400_v57 = vpop.f32.mrf.mxu0  ;;  %2810 = vmatprep.subr.bf16.mxu0 %v2653_v41  ;;  %v12432_v37 = vld [vmem:[#allocation5 + $0x30] sm:$0xff]  }
 0x19d   : > { %v1409_v59 = vmax.f32 %v1399_v53, 0.0  ;;  %v1401_v60 = vadd.f32 %v1400_v57, %v1321_v49  ;;  %2010 = vmatmul.mubr.bf16.gmra.mxu0 %v12408_v10  ;;  %v1270_v49 = vld [vmem:[%s13920_s26 + $0x60] sm:$0xff]  ;;  %v1269_v53 = vld [vmem:[%s13920_s26 + $0x58] sm:$0xff]  ;;  %v2648_v57 = vpack.c.bf16 %v1268_v56, %v1266_v55 }
 0x19e   : > { %2019 = vmatprep.mubr.bf16.mxu0 %v17931_v0  ;;  %v2650_v51 = vpack.c.bf16 %v1272_v50, %v1270_v49  ;;  %v2649_v54 = vpack.c.bf16 %v1269_v53, %v1267_v52  ;;  %v12438_v52 = vld [vmem:[#allocation5 + $0x48] sm:$0xff]  }
 0x19f   : > { %v1410_v63 = vmax.f32 %v1401_v60, 0.0  ;;  %v1421_v2 = vpack.c.bf16 %v1409_v59, %v1407_v58  ;;  %2811 = vmatpush1.bf16.msra.mxu0 %v2652_v44  ;;  %v1263_v58 = vld [vmem:[%s13920_s26 + $0x28] sm:$0xff]  ;;  %v1265_v59 = vld [vmem:[%s13920_s26 + $0x38] sm:$0xff] }
 0x1a0   : > { %2812 = vmatprep.subr.bf16.mxu0 %v2651_v48  ;;  %v12419_v60 = vld [vmem:[#allocation2 + $0xb8] sm:$0xff]   ;;  %v2647_v61 = vpack.c.bf16 %v1265_v59, %v1263_v58 }
 0x1a1   : > { %v1422_v1 = vpack.c.bf16 %v1410_v63, %v1408_v62  ;;  %v1262_v62 = vld [vmem:[%s13920_s26 + $0x20] sm:$0xff]  ;;  %v1264_v63 = vld [vmem:[%s13920_s26 + $0x30] sm:$0xff] }
 0x1a3   : > { %1516 = vmatprep.subr.bf16.mxu1 %v1422_v1  ;;  %2813 = vmatpush1.bf16.msra.mxu0 %v2650_v51  ;;  %v2646_v1 = vpack.c.bf16 %v1264_v63, %v1262_v62 }
 0x1a4   : > { %1517 = vmatpush1.bf16.msra.mxu1 %v1421_v2  ;;  %2814 = vmatprep.subr.bf16.mxu0 %v2649_v54  ;;  %v1259_v2 = vld [vmem:[%s13920_s26 + $0x8] sm:$0xff] }
 0x1a5   : > { %1518 = vmatprep.subr.bf16.mxu1 %v1420_v3  ;;  %2020 = vmatmul.mubr.bf16.gmra.mxu0 %v12409_v12  ;;  %v1261_v3 = vld [vmem:[%s13920_s26 + $0x18] sm:$0xff]  ;;  %v12422_v12 = vld [vmem:[#allocation5 + $0x8] sm:$0xff]  }
 0x1a6   : > { %2029 = vmatprep.mubr.bf16.mxu0 %v17931_v0 }
 0x1a7   : > { %2815 = vmatpush1.bf16.msra.mxu0 %v2648_v57  ;;  %v12440_v57 = vld [vmem:[#allocation5 + $0x50] sm:$0xff]  }
 0x1a8   : > { %1519 = vmatpush1.bf16.msra.mxu1 %v1419_v5  ;;  %2816 = vmatprep.subr.bf16.mxu0 %v2647_v61  ;;  %v1258_v5 = vld [vmem:[%s13920_s26] sm:$0xff]  ;;  %s18948_s26 = sld [smem:[#allocation32_spill]] }
 0x1ab   : > { %11418 = vmatmul.mubr.msk.bf16.vlgmr.msra.gmra.mxu1 %vm1491_vm3, %v12392_v4  ;;  %2817 = vmatpush1.bf16.msra.mxu0 %v2646_v1  ;;  %v2645_v4 = vpack.c.bf16 %v1261_v3, %v1259_v2  ;;  %v12442_v2 = vld [vmem:[#allocation5 + $0x58] sm:$0xff]  }
 0x1ac   : > { %1546 = vmatprep.mubr.bf16.mxu1 %v17931_v0 }
 0x1ad   : > { %2030 = vmatmul.mubr.bf16.gmra.mxu0 %v12410_v13  ;;  %2818 = vmatprep.subr.bf16.mxu0 %v2645_v4 }
 0x1ae   : > { %2039 = vmatprep.mubr.bf16.mxu0 %v17931_v0 }
 0x1b3   : > { %11419 = vmatmul.mubr.msk.bf16.gmra.mxu1 %vm1491_vm3, %v12393_v7  ;;  %v2644_v7 = vpack.c.bf16 %v1260_v6, %v1258_v5 }
 0x1b4   : > { %1556 = vmatprep.mubr.bf16.mxu1 %v17931_v0 }
 0x1b5   : > { %2040 = vmatmul.mubr.bf16.gmra.mxu0 %v12411_v14 }
 0x1b6   : > { %2049 = vmatprep.mubr.bf16.mxu0 %v17931_v0  ;;  %2819 = vmatpush1.bf16.msra.mxu0 %v2644_v7 }
 0x1bb   : > { %11420 = vmatmul.mubr.msk.bf16.gmra.mxu1 %vm1491_vm3, %v12394_v9 }
 0x1bc   : > { %1566 = vmatprep.mubr.bf16.mxu1 %v17931_v0 }
 0x1bd   : > { %2050 = vmatmul.mubr.bf16.gmra.mxu0 %v12412_v15 }
 0x1be   : > { %2059 = vmatprep.mubr.bf16.mxu0 %v17931_v0 }
 0x1c3   : > { %11421 = vmatmul.mubr.msk.bf16.gmra.mxu1 %vm1491_vm3, %v12395_v11 }
 0x1c4   : > { %2355 = vmatprep.mubr.bf16.mxu1 %v17931_v0 }
 0x1c5   : > { %2060 = vmatmul.mubr.bf16.gmra.mxu0 %v12413_v16 }
 0x1c6   : > { %2069 = vmatprep.mubr.bf16.mxu0 %v17931_v0 }
 0x1cd   : > { %2070 = vmatmul.mubr.bf16.gmra.mxu0 %v12414_v17  ;;  %v12424_v17 = vld [vmem:[#allocation5 + $0x10] sm:$0xff]  }
 0x1ce   : > { %2079 = vmatprep.mubr.bf16.mxu0 %v17931_v0 }
 0x1d5   : > { %2080 = vmatmul.mubr.bf16.gmra.mxu0 %v12415_v18 }
 0x1d6   : > { %2089 = vmatprep.mubr.bf16.mxu0 %v17931_v0 }
 0x1dd   : > { %2090 = vmatmul.mubr.bf16.gmra.mxu0 %v12416_v21 }
 0x1de   : > { %2099 = vmatprep.mubr.bf16.mxu0 %v17931_v0 }
 0x1e5   : > { %2100 = vmatmul.mubr.bf16.gmra.mxu0 %v12417_v34 }
 0x1e6   : > { %2109 = vmatprep.mubr.bf16.mxu0 %v17931_v0 }
 0x1ed   : > { %2110 = vmatmul.mubr.bf16.gmra.mxu0 %v12418_v47  ;;  %v12436_v47 = vld [vmem:[#allocation5 + $0x40] sm:$0xff]  }
 0x1ee   : > { %2119 = vmatprep.mubr.bf16.mxu0 %v17931_v0 }
 0x1f5   : > { %2120 = vmatmul.mubr.bf16.gmra.mxu0 %v12419_v60 }
 0x1f6   : > { %2836 = vmatprep.mubr.bf16.mxu0 %v17931_v0 }
 0x1fd   : > { %v13958_v9 = vpop.f32.mrf.mxu0  ;;  %2837 = vmatmul.mubr.bf16.vlgmr.msra.gmra.mxu0 %v12420_v8 }
 0x1fe   : > { %2846 = vmatprep.mubr.bf16.mxu0 %v17931_v0 }
 0x1ff   : > { %v13961_v10 = vpop.f32.mrf.mxu0 }
 0x200   : > { %18250 = vst [vmem:[#allocation50_spill] sm:$0xff] %v13961_v10 }
 0x201   : > { %v13963_v11 = vpop.f32.mrf.mxu0 }
 0x203   : > { %v13965_v13 = vpop.f32.mrf.mxu0 }
 0x205   : > { %v13967_v14 = vpop.f32.mrf.mxu0  ;;  %2847 = vmatmul.mubr.bf16.gmra.mxu0 %v12422_v12 }
 0x206   : > { %2856 = vmatprep.mubr.bf16.mxu0 %v17931_v0 }
 0x207   : > { %v13970_v15 = vpop.f32.mrf.mxu0 }
 0x209   : > { %v13972_v16 = vpop.f32.mrf.mxu0 }
 0x20b   : > { %v13974_v18 = vpop.f32.mrf.mxu0 }
 0x20d   : > { %v13976_v19 = vpop.f32.mrf.mxu0  ;;  %2857 = vmatmul.mubr.bf16.gmra.mxu0 %v12424_v17 }
 0x20e   : > { %2866 = vmatprep.mubr.bf16.mxu0 %v17931_v0 }
 0x20f   : > { %v13979_v20 = vpop.f32.mrf.mxu0 }
 0x211   : > { %v13981_v21 = vpop.f32.mrf.mxu0 }
 0x213   : > { %v13983_v23 = vpop.f32.mrf.mxu0 }
 0x215   : > { %v13985_v24 = vpop.f32.mrf.mxu0  ;;  %2867 = vmatmul.mubr.bf16.gmra.mxu0 %v12426_v22  ;;  %v12444_v22 = vld [vmem:[#allocation5 + $0x60] sm:$0xff]  }
 0x216   : > { %2876 = vmatprep.mubr.bf16.mxu0 %v17931_v0 }
 0x217   : > { %v13988_v25 = vpop.f32.mrf.mxu0 }
 0x219   : > { %v13990_v26 = vpop.f32.mrf.mxu0 }
 0x21b   : > { %v13992_v28 = vpop.f32.mrf.mxu0 }
 0x21d   : > { %v13994_v29 = vpop.f32.mrf.mxu0  ;;  %2877 = vmatmul.mubr.bf16.gmra.mxu0 %v12428_v27 }
 0x21e   : > { %2886 = vmatprep.mubr.bf16.mxu0 %v17931_v0 }
 0x21f   : > { %v13997_v30 = vpop.f32.mrf.mxu0 }
 0x221   : > { %v13999_v31 = vpop.f32.mrf.mxu0 }
 0x223   : > { %v14001_v33 = vpop.f32.mrf.mxu0 }
 0x225   : > { %v14003_v34 = vpop.f32.mrf.mxu0  ;;  %2887 = vmatmul.mubr.bf16.gmra.mxu0 %v12430_v32 }
 0x226   : > { %18251 = vst [vmem:[#allocation51_spill] sm:$0xff] %v14003_v34  ;;  %2896 = vmatprep.mubr.bf16.mxu0 %v17931_v0 }
 0x227   : > { %v14006_v35 = vpop.f32.mrf.mxu0 }
 0x228   : > { %18252 = vst [vmem:[#allocation52_spill] sm:$0xff] %v14006_v35 }
 0x229   : > { %v14008_v36 = vpop.f32.mrf.mxu0 }
 0x22a   : > { %18253 = vst [vmem:[#allocation53_spill] sm:$0xff] %v14008_v36 }
 0x22b   : > { %v14010_v38 = vpop.f32.mrf.mxu0 }
 0x22d   : > { %v14012_v39 = vpop.f32.mrf.mxu0  ;;  %2897 = vmatmul.mubr.bf16.gmra.mxu0 %v12432_v37 }
 0x22e   : > { %2906 = vmatprep.mubr.bf16.mxu0 %v17931_v0 }
 0x22f   : > { %v14015_v40 = vpop.f32.mrf.mxu0 }
 0x231   : > { %v14017_v41 = vpop.f32.mrf.mxu0 }
 0x233   : > { %v14019_v43 = vpop.f32.mrf.mxu0 }
 0x235   : > { %v14021_v44 = vpop.f32.mrf.mxu0  ;;  %2907 = vmatmul.mubr.bf16.gmra.mxu0 %v12434_v42 }
 0x236   : > { %2916 = vmatprep.mubr.bf16.mxu0 %v17931_v0 }
 0x237   : > { %v14024_v45 = vpop.f32.mrf.mxu0 }
 0x239   : > { %v14026_v46 = vpop.f32.mrf.mxu0 }
 0x23b   : > { %v14028_v48 = vpop.f32.mrf.mxu0 }
 0x23c   : > { %18254 = vst [vmem:[#allocation54_spill] sm:$0xff] %v14028_v48 }
 0x23d   : > { %v14030_v49 = vpop.f32.mrf.mxu0  ;;  %2917 = vmatmul.mubr.bf16.gmra.mxu0 %v12436_v47  ;;  %v1469_v47 = vpop.permute.xlu1 %1468 }
 0x23e   : > { %18255 = vst [vmem:[#allocation55_spill] sm:$0xff] %v14030_v49  ;;  %2926 = vmatprep.mubr.bf16.mxu0 %v17931_v0 }
 0x23f   : > { %v14033_v50 = vpop.f32.mrf.mxu0 }
 0x240   : > { %18256 = vst [vmem:[#allocation56_spill] sm:$0xff] %v14033_v50 }
 0x241   : > { %v14035_v51 = vpop.f32.mrf.mxu0 }
 0x242   : > { %18257 = vst [vmem:[#allocation57_spill] sm:$0xff] %v14035_v51 }
 0x243   : > { %v14037_v53 = vpop.f32.mrf.mxu0 }
 0x244   : > { %18258 = vst [vmem:[#allocation58_spill] sm:$0xff] %v14037_v53  ;;  %v1459_v53 = vpop.permute.xlu1 %1458 }
 0x245   : > { %v14039_v54 = vpop.f32.mrf.mxu0  ;;  %2927 = vmatmul.mubr.bf16.gmra.mxu0 %v12438_v52 }
 0x246   : > { %18259 = vst [vmem:[#allocation59_spill] sm:$0xff] %v14039_v54  ;;  %2936 = vmatprep.mubr.bf16.mxu0 %v17931_v0 }
 0x247   : > { %v14042_v55 = vpop.f32.mrf.mxu0 }
 0x248   : > { %18260 = vst [vmem:[#allocation60_spill] sm:$0xff] %v14042_v55 }
 0x249   : > { %v14044_v56 = vpop.f32.mrf.mxu0 }
 0x24a   : > { %18261 = vst [vmem:[#allocation61_spill] sm:$0xff] %v14044_v56  ;;  %v1449_v56 = vpop.permute.xlu1 %1448 }
 0x24b   : > { %v14046_v58 = vpop.f32.mrf.mxu0 }
 0x24c   : > { %18262 = vst [vmem:[#allocation62_spill] sm:$0xff] %v14046_v58 }
 0x24d   : > { %v14050_v60 = vpop.f32.mrf.mxu0  ;;  %2937 = vmatmul.mubr.bf16.gmra.mxu0 %v12440_v57 }
 0x24e   : > { %18263 = vst [vmem:[#allocation63_spill] sm:$0xff] %v14050_v60  ;;  %2946 = vmatprep.mubr.bf16.mxu0 %v17931_v0  ;;  %v12448_v60 = vld [vmem:[#allocation5 + $0x70] sm:$0xff]  }
 0x24f   : > { %v14055_v62 = vpop.f32.mrf.mxu0 }
 0x250   : > { %18264 = vst [vmem:[#allocation64_spill] sm:$0xff] %v14055_v62  ;;  %v12446_v62 = vld [vmem:[#allocation5 + $0x68] sm:$0xff]  }
 0x251   : > { %v14059_v1 = vpop.f32.mrf.mxu0 }
 0x252   : > { %18265 = vst [vmem:[#allocation65_spill] sm:$0xff] %v14059_v1 }
 0x253   : > { %v14063_v4 = vpop.f32.mrf.mxu0 }
 0x254   : > { %18266 = vst [vmem:[#allocation66_spill] sm:$0xff] %v14063_v4 }
 0x255   : > { %v14067_v6 = vpop.f32.mrf.mxu0  ;;  %2947 = vmatmul.mubr.bf16.gmra.mxu0 %v12442_v2  ;;  %v1464_v2 = vpop.permute.xlu0 %1463 }
 0x256   : > { %18267 = vst [vmem:[#allocation67_spill] sm:$0xff] %v14067_v6  ;;  %2956 = vmatprep.mubr.bf16.mxu0 %v17931_v0 }
 0x257   : > { %v14070_v8 = vpop.f32.mrf.mxu0 }
 0x258   : > { %18268 = vst [vmem:[#allocation68_spill] sm:$0xff] %v14070_v8 }
 0x259   : > { %v14072_v17 = vpop.f32.mrf.mxu0 }
 0x25a   : > { %18269 = vst [vmem:[#allocation69_spill] sm:$0xff] %v14072_v17 }
 0x25b   : > { %v14074_v32 = vpop.f32.mrf.mxu0 }
 0x25c   : > { %18270 = vst [vmem:[#allocation70_spill] sm:$0xff] %v14074_v32 }
 0x25d   : > { %v14076_v42 = vpop.f32.mrf.mxu0  ;;  %2957 = vmatmul.mubr.bf16.gmra.mxu0 %v12444_v22  ;;  %v1454_v22 = vpop.permute.xlu0 %1453 }
 0x25e   : > { %18271 = vst [vmem:[#allocation71_spill] sm:$0xff] %v14076_v42  ;;  %2966 = vmatprep.mubr.bf16.mxu0 %v17931_v0 }
 0x25f   : > { %v14079_v57 = vpop.f32.mrf.mxu0 }
 0x260   : > { %18272 = vst [vmem:[#allocation72_spill] sm:$0xff] %v14079_v57 }
 0x261   : > { %v14081_v6 = vpop.f32.mrf.mxu0 }
 0x262   : > { %18273 = vst [vmem:[#allocation73_spill] sm:$0xff] %v14081_v6 }
 0x263   : > { %v14083_v55 = vpop.f32.mrf.mxu0 }
 0x264   : > { %18274 = vst [vmem:[#allocation74_spill] sm:$0xff] %v14083_v55 }
 0x265   : > { %v14085_v8 = vpop.f32.mrf.mxu0  ;;  %2967 = vmatmul.mubr.bf16.gmra.mxu0 %v12446_v62  ;;  %v1444_v62 = vpop.permute.xlu0 %1443 }
 0x266   : > { %18275 = vst [vmem:[#allocation75_spill] sm:$0xff] %v14085_v8  ;;  %2976 = vmatprep.mubr.bf16.mxu0 %v17931_v0 }
 0x267   : > { %v14088_v4 = vpop.f32.mrf.mxu0 }
 0x268   : > { %18276 = vst [vmem:[#allocation76_spill] sm:$0xff] %v14088_v4 }
 0x269   : > { %v14090_v6 = vpop.f32.mrf.mxu0 }
 0x26a   : > { %18277 = vst [vmem:[#allocation77_spill] sm:$0xff] %v14090_v6  ;;  %v18280_v6 = vmov 0  }
 0x26b   : > { %v14048_v59 = vpop.f32.mrf.mxu1  ;;  %v14092_v8 = vpop.f32.mrf.mxu0 }
 0x26c   : > { %18278 = vst [vmem:[#allocation78_spill] sm:$0xff] %v14092_v8 }
 0x26d   : > { %v14052_v61 = vpop.f32.mrf.mxu1  ;;  %2977 = vmatmul.mubr.bf16.gmra.mxu0 %v12448_v60  ;;  %v12450_v60 = vld [vmem:[#allocation5 + $0x78] sm:$0xff]  }
 0x26e   : > { %2986 = vmatprep.mubr.bf16.mxu0 %v18280_v6 }
 0x26f   : > { %v14057_v63 = vpop.f32.mrf.mxu1 }
 0x271   : > { %v14061_v3 = vpop.f32.mrf.mxu1 }
 0x273   : > { %v14065_v5 = vpop.f32.mrf.mxu1 }
 0x275   : > { %v1550_v7 = vpop.f32.mrf.mxu1  ;;  %2987 = vmatmul.mubr.bf16.gmra.mxu0 %v12450_v60 }
 0x276   : > { %2996 = vmatprep.mubr.bf16.mxu0 %v18280_v6 }
 0x277   : > { %v1552_v12 = vpop.f32.mrf.mxu1 }
 0x278   : > { %v1553_v8 = vadd.f32 %v1552_v12, %v1449_v56 }
 0x279   : > { %v1554_v27 = vpop.f32.mrf.mxu1 }
 0x27a   : > { %v1555_v0 = vadd.f32 %v1554_v27, %v1449_v56  ;;  %v1549_v27 = vadd.f32 %v14065_v5, %v1444_v62 }
 0x27b   : > { %v1558_v37 = vpop.f32.mrf.mxu1 }
 0x27c   : > { %v1581_v5 = vmax.f32 %v1549_v27, 0.0 }
 0x27d   : > { %v1560_v52 = vpop.f32.mrf.mxu1 }
 0x27e   : > { %v1561_v51 = vadd.f32 %v1560_v52, %v1454_v22 }
 0x27f   : > { %v1562_v50 = vpop.f32.mrf.mxu1 }
 0x280   : > { %v1563_v36 = vadd.f32 %v1562_v50, %v1459_v53 }
 0x281   : > { %v1564_v17 = vpop.f32.mrf.mxu1 }
 0x282   : > { %v1565_v58 = vadd.f32 %v1564_v17, %v1459_v53  ;;  %v14094_v17 = vpop.f32.mrf.mxu0  ;;  %v1587_v50 = vmax.f32 %v1563_v36, 0.0  ;;  %v1583_v36 = vmax.f32 %v1553_v8, 0.0 }
 0x283   : > { %v1568_v32 = vpop.f32.mrf.mxu1  ;;  %18279 = vst [vmem:[#allocation79_spill] sm:$0xff] %v14094_v17  ;;  %v12451_v17 = vld [vmem:[%s18285_s7 + $0x78] sm:$0xff]  }
 0x284   : > { %v1569_v55 = vadd.f32 %v1568_v32, %v1464_v2  ;;  %v1588_v34 = vmax.f32 %v1565_v58, 0.0  ;;  %v1551_v32 = vadd.f32 %v1550_v7, %v1444_v62  ;;  %v1584_v58 = vmax.f32 %v1555_v0, 0.0 }
 0x285   : > { %v1570_v42 = vpop.f32.mrf.mxu1 }
 0x286   : > { %v1571_v1 = vadd.f32 %v1570_v42, %v1464_v2  ;;  %v1559_v42 = vadd.f32 %v1558_v37, %v1454_v22  ;;  %v1586_v2 = vmax.f32 %v1561_v51, 0.0  ;;  %v1582_v51 = vmax.f32 %v1551_v32, 0.0  ;;  %v12421_v32 = vld [vmem:[%s18285_s7] sm:$0xff]  }
 0x287   : > { %v1572_v57 = vpop.f32.mrf.mxu1 }
 0x288   : > { %v1573_v10 = vadd.f32 %v1572_v57, %v1469_v47  ;;  %v1590_v4 = vmax.f32 %v1571_v1, 0.0  ;;  %v1589_v57 = vmax.f32 %v1569_v55, 0.0  ;;  %v1434_v55 = vpop.permute.xlu0 %1433  ;;  %v1585_v7 = vmax.f32 %v1559_v42, 0.0 }
 0x289   : > { %v1574_v54 = vpop.f32.mrf.mxu1  ;;  %v1539_v12 = vadd.f32 %v14048_v59, %v1434_v55 }
 0x28a   : > { %v1575_v49 = vadd.f32 %v1574_v54, %v1469_v47  ;;  %v1591_v35 = vmax.f32 %v1573_v10, 0.0  ;;  %v14097_v54 = vpop.f32.mrf.mxu0  ;;  %v1439_v47 = vpop.permute.xlu1 %1438  ;;  %v1645_v0 = vpack.c.bf16 %v1587_v50, %v1585_v7  ;;  %v12453_v50 = vld [vmem:[#allocation5 + $0x80] sm:$0xff]   ;;  %v12425_v7 = vld [vmem:[%s18285_s7 + $0x10] sm:$0xff]  }
 0x28b   : > { %18281 = vst [vmem:[#allocation80_spill] sm:$0xff] %v14097_v54  ;;  %v1545_v53 = vadd.f32 %v14061_v3, %v1439_v47  ;;  %v1577_v42 = vmax.f32 %v1539_v12, 0.0  ;;  %2997 = vmatmul.mubr.bf16.gmra.mxu0 %v12453_v50  ;;  %v12452_v54 = vld [vmem:[%s18285_s7 + $0x80] sm:$0xff]  }
 0x28c   : > { %v1592_v48 = vmax.f32 %v1575_v49, 0.0  ;;  %v1647_v10 = vpack.c.bf16 %v1591_v35, %v1589_v57  ;;  %v1646_v49 = vpack.c.bf16 %v1588_v34, %v1586_v2  ;;  %v14100_v1 = vpop.f32.mrf.mxu0  ;;  %v1543_v35 = vadd.f32 %v14057_v63, %v1439_v47  ;;  %3006 = vmatprep.mubr.bf16.mxu0 %v18280_v6 }
 0x28d   : > { %18282 = vst [vmem:[#allocation81_spill] sm:$0xff] %v14100_v1  ;;  %v1580_v3 = vmax.f32 %v1545_v53, 0.0  ;;  %v1644_v34 = vpack.c.bf16 %v1584_v58, %v1582_v51  ;;  %v1643_v63 = vpack.c.bf16 %v1583_v36, %v1581_v5  ;;  %v12423_v53 = vld [vmem:[%s18285_s7 + $0x8] sm:$0xff]   ;;  %v12457_v36 = vld [vmem:[#allocation5 + $0x90] sm:$0xff]  }
 0x28e   : > { %v1648_v52 = vpack.c.bf16 %v1592_v48, %v1590_v4  ;;  %v1541_v48 = vadd.f32 %v14052_v61, %v1434_v55  ;;  %v14104_v56 = vpop.f32.mrf.mxu0  ;;  %v1579_v22 = vmax.f32 %v1543_v35, 0.0  ;;  %v12455_v55 = vld [vmem:[#allocation5 + $0x88] sm:$0xff]  }
 0x28f   : > { %18283 = vst [vmem:[#allocation82_spill] sm:$0xff] %v14104_v56 }
 0x290   : > { %2331 = vmatprep.subr.bf16.mxu1 %v1648_v52  ;;  %v14107_v4 = vpop.f32.mrf.mxu0  ;;  %v1578_v61 = vmax.f32 %v1541_v48, 0.0  ;;  %v1641_v59 = vpack.c.bf16 %v1579_v22, %v1577_v42 }
 0x291   : > { %2332 = vmatpush1.bf16.msra.mxu1 %v1647_v10  ;;  %18284 = vst [vmem:[#allocation83_spill] sm:$0xff] %v14107_v4  ;;  %v12454_v4 = vld [vmem:[%s18285_s7 + $0x88] sm:$0xff]  }
 0x292   : > { %2333 = vmatprep.subr.bf16.mxu1 %v1646_v49  ;;  %v14111_v37 = vpop.f32.mrf.mxu0  ;;  %v1642_v8 = vpack.c.bf16 %v1580_v3, %v1578_v61  ;;  %v12427_v3 = vld [vmem:[%s18285_s7 + $0x18] sm:$0xff]  }
 0x293   : > { %18286 = vst [vmem:[#allocation84_spill] sm:$0xff] %v14111_v37  ;;  %3007 = vmatmul.mubr.bf16.gmra.mxu0 %v12455_v55  ;;  %v12459_v61 = vld [vmem:[#allocation5 + $0x98] sm:$0xff]  }
 0x294   : > { %v14113_v62 = vpop.f32.mrf.mxu0  ;;  %3016 = vmatprep.mubr.bf16.mxu0 %v18280_v6 }
 0x295   : > { %2334 = vmatpush1.bf16.msra.mxu1 %v1645_v0  ;;  %18287 = vst [vmem:[#allocation85_spill] sm:$0xff] %v14113_v62 }
 0x296   : > { %2335 = vmatprep.subr.bf16.mxu1 %v1644_v34  ;;  %v14115_v57 = vpop.f32.mrf.mxu0 }
 0x297   : > { %18288 = vst [vmem:[#allocation86_spill] sm:$0xff] %v14115_v57 }
 0x298   : > { %v14118_v2 = vpop.f32.mrf.mxu0 }
 0x299   : > { %2336 = vmatpush1.bf16.msra.mxu1 %v1643_v63  ;;  %18289 = vst [vmem:[#allocation87_spill] sm:$0xff] %v14118_v2  ;;  %v12429_v63 = vld [vmem:[%s18285_s7 + $0x20] sm:$0xff]  }
 0x29a   : > { %2337 = vmatprep.subr.bf16.mxu1 %v1642_v8  ;;  %v14120_v52 = vpop.f32.mrf.mxu0 }
 0x29b   : > { %18290 = vst [vmem:[#allocation88_spill] sm:$0xff] %v14120_v52  ;;  %3017 = vmatmul.mubr.bf16.gmra.mxu0 %v12457_v36 }
 0x29c   : > { %v14123_v47 = vpop.f32.mrf.mxu0  ;;  %3026 = vmatprep.mubr.bf16.mxu0 %v18280_v6 }
 0x29d   : > { %2338 = vmatpush1.bf16.msra.mxu1 %v1641_v59  ;;  %18291 = vst [vmem:[#allocation89_spill] sm:$0xff] %v14123_v47 }
 0x29e   : > { %v14126_v10 = vpop.f32.mrf.mxu0 }
 0x29f   : > { %18292 = vst [vmem:[#allocation90_spill] sm:$0xff] %v14126_v10  ;;  %v12465_v10 = vld [vmem:[#allocation5 + $0xb0] sm:$0xff]  }
 0x2a0   : > { %11470 = vmatmul.mubr.msk.bf16.vlgmr.msra.gmra.mxu1 %vm2250_vm4, %v12421_v32  ;;  %v14130_v58 = vpop.f32.mrf.mxu0  ;;  %v12461_v32 = vld [vmem:[#allocation5 + $0xa0] sm:$0xff]  }
 0x2a1   : > { %2365 = vmatprep.mubr.bf16.mxu1 %v18280_v6  ;;  %18293 = vst [vmem:[#allocation91_spill] sm:$0xff] %v14130_v58  ;;  %v12449_v58 = vld [vmem:[%s18285_s7 + $0x70] sm:$0xff]  }
 0x2a2   : > { %v14132_v49 = vpop.f32.mrf.mxu0 }
 0x2a3   : > { %18294 = vst [vmem:[#allocation92_spill] sm:$0xff] %v14132_v49  ;;  %3027 = vmatmul.mubr.bf16.gmra.mxu0 %v12459_v61 }
 0x2a4   : > { %v14135_v60 = vpop.f32.mrf.mxu0  ;;  %3036 = vmatprep.mubr.bf16.mxu0 %v18280_v6 }
 0x2a5   : > { %18295 = vst [vmem:[#allocation93_spill] sm:$0xff] %v14135_v60 }
 0x2a6   : > { %v14138_v27 = vpop.f32.mrf.mxu0 }
 0x2a7   : > { %18296 = vst [vmem:[#allocation94_spill] sm:$0xff] %v14138_v27  ;;  %v12445_v27 = vld [vmem:[%s18285_s7 + $0x60] sm:$0xff]  }
 0x2a8   : > { %11471 = vmatmul.mubr.msk.bf16.gmra.mxu1 %vm2250_vm4, %v12423_v53  ;;  %v14142_v48 = vpop.f32.mrf.mxu0  ;;  %v12431_v53 = vld [vmem:[%s18285_s7 + $0x28] sm:$0xff]  }
 0x2a9   : > { %2375 = vmatprep.mubr.bf16.mxu1 %v18280_v6  ;;  %18297 = vst [vmem:[#allocation95_spill] sm:$0xff] %v14142_v48 }
 0x2aa   : > { %v14144_v51 = vpop.f32.mrf.mxu0 }
 0x2ab   : > { %18298 = vst [vmem:[#allocation96_spill] sm:$0xff] %v14144_v51  ;;  %3037 = vmatmul.mubr.bf16.gmra.mxu0 %v12461_v32 }
 0x2ac   : > { %v14147_v35 = vpop.f32.mrf.mxu0  ;;  %3046 = vmatprep.mubr.bf16.mxu0 %v18280_v6 }
 0x2ad   : > { %18299 = vst [vmem:[#allocation97_spill] sm:$0xff] %v14147_v35 }
 0x2ae   : > { %v14150_v0 = vpop.f32.mrf.mxu0 }
 0x2af   : > { %18300 = vst [vmem:[#allocation98_spill] sm:$0xff] %v14150_v0 }
 0x2b0   : > { %11472 = vmatmul.mubr.msk.bf16.gmra.mxu1 %vm2250_vm4, %v12425_v7  ;;  %v14154_v34 = vpop.f32.mrf.mxu0 }
 0x2b1   : > { %2385 = vmatprep.mubr.bf16.mxu1 %v18280_v6  ;;  %18301 = vst [vmem:[#allocation99_spill] sm:$0xff] %v14154_v34 }
 0x2b2   : > { %v14156_v12 = vpop.f32.mrf.mxu0 }
 0x2b3   : > { %18302 = vst [vmem:[#allocation100_spill] sm:$0xff] %v14156_v12  ;;  %v12443_v12 = vld [vmem:[%s18285_s7 + $0x58] sm:$0xff]  }
 0x2b4   : > { %v14159_v5 = vpop.f32.mrf.mxu0 }
 0x2b5   : > { %18303 = vst [vmem:[#allocation101_spill] sm:$0xff] %v14159_v5  ;;  %v12467_v5 = vld [vmem:[#allocation5 + $0xb8] sm:$0xff]  }
 0x2b6   : > { %v14162_v22 = vpop.f32.mrf.mxu0 }
 0x2b7   : > { %18304 = vst [vmem:[#allocation102_spill] sm:$0xff] %v14162_v22  ;;  %v12441_v22 = vld [vmem:[%s18285_s7 + $0x50] sm:$0xff]  }
 0x2b8   : > { %11473 = vmatmul.mubr.msk.bf16.gmra.mxu1 %vm2250_vm4, %v12427_v3  ;;  %v14166_v8 = vpop.f32.mrf.mxu0  ;;  %v12463_v3 = vld [vmem:[#allocation5 + $0xa8] sm:$0xff]  }
 0x2b9   : > { %2395 = vmatprep.mubr.bf16.mxu1 %v18280_v6  ;;  %18305 = vst [vmem:[#allocation103_spill] sm:$0xff] %v14166_v8  ;;  %3047 = vmatmul.mubr.bf16.gmra.mxu0 %v12463_v3  ;;  %v12435_v3 = vld [vmem:[%s18285_s7 + $0x38] sm:$0xff]  }
 0x2ba   : > { %v14168_v42 = vpop.f32.mrf.mxu0  ;;  %3056 = vmatprep.mubr.bf16.mxu0 %v18280_v6 }
 0x2bb   : > { %18306 = vst [vmem:[#allocation104_spill] sm:$0xff] %v14168_v42  ;;  %v12439_v42 = vld [vmem:[%s18285_s7 + $0x48] sm:$0xff]  }
 0x2bc   : > { %v14171_v59 = vpop.f32.mrf.mxu0 }
 0x2bd   : > { %18307 = vst [vmem:[#allocation105_spill] sm:$0xff] %v14171_v59 }
 0x2be   : > { %v14174_v50 = vpop.f32.mrf.mxu0 }
 0x2bf   : > { %18308 = vst [vmem:[#allocation106_spill] sm:$0xff] %v14174_v50 }
 0x2c0   : > { %11474 = vmatmul.mubr.msk.bf16.gmra.mxu1 %vm2250_vm4, %v12429_v63  ;;  %v14178_v55 = vpop.f32.mrf.mxu0  ;;  %v12433_v63 = vld [vmem:[%s18285_s7 + $0x30] sm:$0xff]  }
 0x2c1   : > { %2405 = vmatprep.mubr.bf16.mxu1 %v18280_v6  ;;  %18309 = vst [vmem:[#allocation107_spill] sm:$0xff] %v14178_v55  ;;  %3057 = vmatmul.mubr.bf16.gmra.mxu0 %v12465_v10  ;;  %v12437_v10 = vld [vmem:[%s18285_s7 + $0x40] sm:$0xff]  }
 0x2c2   : > { %v14180_v7 = vpop.f32.mrf.mxu0  ;;  %3066 = vmatprep.mubr.bf16.mxu0 %v18280_v6 }
 0x2c3   : > { %18310 = vst [vmem:[#allocation108_spill] sm:$0xff] %v14180_v7 }
 0x2c4   : > { %v14183_v36 = vpop.f32.mrf.mxu0 }
 0x2c5   : > { %18311 = vst [vmem:[#allocation109_spill] sm:$0xff] %v14183_v36 }
 0x2c6   : > { %v14186_v61 = vpop.f32.mrf.mxu0 }
 0x2c7   : > { %18312 = vst [vmem:[#allocation110_spill] sm:$0xff] %v14186_v61 }
 0x2c8   : > { %11475 = vmatmul.mubr.msk.bf16.gmra.mxu1 %vm2250_vm4, %v12431_v53  ;;  %v14190_v32 = vpop.f32.mrf.mxu0 }
 0x2c9   : > { %2415 = vmatprep.mubr.bf16.mxu1 %v18280_v6  ;;  %18313 = vst [vmem:[#allocation111_spill] sm:$0xff] %v14190_v32  ;;  %3067 = vmatmul.mubr.bf16.gmra.mxu0 %v12467_v5 }
 0x2ca   : > { %v14192_v52 = vpop.f32.mrf.mxu0 }
 0x2cb   : > { %18314 = vst [vmem:[#allocation112_spill] sm:$0xff] %v14192_v52 }
 0x2cc   : > { %v14195_v53 = vpop.f32.mrf.mxu0 }
 0x2cd   : > { %18315 = vst [vmem:[#allocation113_spill] sm:$0xff] %v14195_v53 }
 0x2ce   : > { %v14198_v49 = vpop.f32.mrf.mxu0 }
 0x2cf   : > { %18316 = vst [vmem:[#allocation114_spill] sm:$0xff] %v14198_v49  ;;  %v12447_v49 = vld [vmem:[%s18285_s7 + $0x68] sm:$0xff]  }
 0x2d0   : > { %11476 = vmatmul.mubr.msk.bf16.gmra.mxu1 %vm2250_vm4, %v12433_v63  ;;  %v14202_v51 = vpop.f32.mrf.mxu0 }
 0x2d1   : > { %2425 = vmatprep.mubr.bf16.mxu1 %v18280_v6  ;;  %18317 = vst [vmem:[#allocation115_spill] sm:$0xff] %v14202_v51 }
 0x2d2   : > { %v14204_v34 = vpop.f32.mrf.mxu0 }
 0x2d3   : > { %18318 = vst [vmem:[#allocation116_spill] sm:$0xff] %v14204_v34 }
 0x2d4   : > { %v14207_v63 = vpop.f32.mrf.mxu0 }
 0x2d5   : > { %18319 = vst [vmem:[#allocation117_spill] sm:$0xff] %v14207_v63 }
 0x2d6   : > { %v14210_v8 = vpop.f32.mrf.mxu0 }
 0x2d7   : > { %18320 = vst [vmem:[#allocation118_spill] sm:$0xff] %v14210_v8 }
 0x2d8   : > { %11477 = vmatmul.mubr.msk.bf16.gmra.mxu1 %vm2250_vm4, %v12435_v3  ;;  %v14213_v59 = vpop.f32.mrf.mxu0 }
 0x2d9   : > { %2435 = vmatprep.mubr.bf16.mxu1 %v18280_v6 }
 0x2da   : > { %v14215_v55 = vpop.f32.mrf.mxu0 }
 0x2db   : > { %18321 = vst [vmem:[#allocation119_spill] sm:$0xff] %v14215_v55  ;;  %v12456_v55 = vld [vmem:[%s18285_s7 + $0x90] sm:$0xff]  }
 0x2dc   : > { %v14218_v50 = vpop.f32.mrf.mxu0 }
 0x2de   : > { %v14221_v3 = vpop.f32.mrf.mxu0 }
 0x2df   : > { %18322 = vst [vmem:[#allocation120_spill] sm:$0xff] %v14221_v3 }
 0x2e0   : > { %11478 = vmatmul.mubr.msk.bf16.gmra.mxu1 %vm2250_vm4, %v12437_v10  ;;  %v14224_v36 = vpop.f32.mrf.mxu0 }
 0x2e1   : > { %2445 = vmatprep.mubr.bf16.mxu1 %v18280_v6 }
 0x2e2   : > { %v14226_v7 = vpop.f32.mrf.mxu0 }
 0x2e3   : > { %18323 = vst [vmem:[#allocation121_spill] sm:$0xff] %v14226_v7  ;;  %v12458_v7 = vld [vmem:[%s18285_s7 + $0x98] sm:$0xff]  }
 0x2e4   : > { %v14229_v5 = vpop.f32.mrf.mxu0 }
 0x2e6   : > { %v14232_v10 = vpop.f32.mrf.mxu0 }
 0x2e8   : > { %11479 = vmatmul.mubr.msk.bf16.gmra.mxu1 %vm2250_vm4, %v12439_v42  ;;  %v14235_v8 = vpop.f32.mrf.mxu0 }
 0x2e9   : > { %2455 = vmatprep.mubr.bf16.mxu1 %v18280_v6 }
 0x2ea   : > { %v14237_v32 = vpop.f32.mrf.mxu0 }
 0x2eb   : > { %18324 = vst [vmem:[#allocation122_spill] sm:$0xff] %v14237_v32 }
 0x2ec   : > { %v14240_v61 = vpop.f32.mrf.mxu0 }
 0x2ee   : > { %v14243_v42 = vpop.f32.mrf.mxu0 }
 0x2f0   : > { %11480 = vmatmul.mubr.msk.bf16.gmra.mxu1 %vm2250_vm4, %v12441_v22  ;;  %v14246_v63 = vpop.f32.mrf.mxu0 }
 0x2f1   : > { %2465 = vmatprep.mubr.bf16.mxu1 %v18280_v6  ;;  %18325 = vst [vmem:[#allocation123_spill] sm:$0xff] %v14246_v63  ;;  %v12460_v63 = vld [vmem:[%s18285_s7 + $0xa0] sm:$0xff]  }
 0x2f2   : > { %v14248_v53 = vpop.f32.mrf.mxu0 }
 0x2f4   : > { %v14251_v0 = vpop.f32.mrf.mxu0 }
 0x2f5   : > { %18326 = vst [vmem:[#allocation124_spill] sm:$0xff] %v14251_v0 }
 0x2f6   : > { %v14254_v22 = vpop.f32.mrf.mxu0 }
 0x2f8   : > { %11481 = vmatmul.mubr.msk.bf16.gmra.mxu1 %vm2250_vm4, %v12443_v12  ;;  %v14257_v52 = vpop.f32.mrf.mxu0 }
 0x2f9   : > { %2475 = vmatprep.mubr.bf16.mxu1 %v18280_v6 }
 0x2fa   : > { %v14259_v34 = vpop.f32.mrf.mxu0 }
 0x2fc   : > { %v14262_v51 = vpop.f32.mrf.mxu0 }
 0x2fd   : > { %18327 = vst [vmem:[#allocation125_spill] sm:$0xff] %v14262_v51 }
 0x2fe   : > { %v14265_v12 = vpop.f32.mrf.mxu0 }
 0x2ff   : > { %18328 = vst [vmem:[#allocation126_spill] sm:$0xff] %v14265_v12 }
 0x300   : > { %11482 = vmatmul.mubr.msk.bf16.gmra.mxu1 %vm2250_vm4, %v12445_v27  ;;  %v14268_v35 = vpop.f32.mrf.mxu0 }
 0x301   : > { %2485 = vmatprep.mubr.bf16.mxu1 %v18280_v6  ;;  %18329 = vst [vmem:[#allocation127_spill] sm:$0xff] %v14268_v35 }
 0x302   : > { %v14270_v48 = vpop.f32.mrf.mxu0 }
 0x303   : > { %18330 = vst [vmem:[#allocation128_spill] sm:$0xff] %v14270_v48 }
 0x304   : > { %v14273_v60 = vpop.f32.mrf.mxu0 }
 0x305   : > { %18331 = vst [vmem:[#allocation129_spill] sm:$0xff] %v14273_v60 }
 0x306   : > { %v14276_v27 = vpop.f32.mrf.mxu0 }
 0x307   : > { %18332 = vst [vmem:[#allocation130_spill] sm:$0xff] %v14276_v27 }
 0x308   : > { %11483 = vmatmul.mubr.msk.bf16.gmra.mxu1 %vm2250_vm4, %v12447_v49  ;;  %v14279_v47 = vpop.f32.mrf.mxu0 }
 0x309   : > { %2495 = vmatprep.mubr.bf16.mxu1 %v18280_v6  ;;  %18333 = vst [vmem:[#allocation131_spill] sm:$0xff] %v14279_v47 }
 0x30a   : > { %v14281_v2 = vpop.f32.mrf.mxu0 }
 0x30c   : > { %v14284_v57 = vpop.f32.mrf.mxu0 }
 0x30e   : > { %v14287_v49 = vpop.f32.mrf.mxu0 }
 0x310   : > { %11484 = vmatmul.mubr.msk.bf16.gmra.mxu1 %vm2250_vm4, %v12449_v58  ;;  %v14290_v62 = vpop.f32.mrf.mxu0 }
 0x311   : > { %2505 = vmatprep.mubr.bf16.mxu1 %v18280_v6 }
 0x312   : > { %v14293_v1 = vpop.f32.mrf.mxu0 }
 0x314   : > { %v14297_v37 = vpop.f32.mrf.mxu0 }
 0x316   : > { %v14300_v58 = vpop.f32.mrf.mxu0 }
 0x317   : > { %18334 = vst [vmem:[#allocation132_spill] sm:$0xff] %v14300_v58 }
 0x318   : > { %11485 = vmatmul.mubr.msk.bf16.gmra.mxu1 %vm2250_vm4, %v12451_v17  ;;  %v14304_v56 = vpop.f32.mrf.mxu0 }
 0x319   : > { %2515 = vmatprep.mubr.bf16.mxu1 %v18280_v6  ;;  %18335 = vst [vmem:[#allocation133_spill] sm:$0xff] %v14304_v56 }
 0x31a   : > { %v14307_v17 = vpop.f32.mrf.mxu0 }
 0x31b   : > { %18336 = vst [vmem:[#allocation134_spill] sm:$0xff] %v14307_v17  ;;  %v14324_v17 = vpop.permute.xlu0 %3293 }
 0x31c   : > { %v14311_v3 = vpop.f32.mrf.mxu0  ;;  %18341 = vst [vmem:[#allocation139_spill] sm:$0xff] %v14324_v17 }
 0x31d   : > { %18337 = vst [vmem:[#allocation135_spill] sm:$0xff] %v14311_v3 }
 0x31f   : > { %v14334_v3 = vpop.permute.xlu0 %3283 }
 0x320   : > { %11486 = vmatmul.mubr.msk.bf16.gmra.mxu1 %vm2250_vm4, %v12452_v54  ;;  %v14314_v54 = vpop.f32.mrf.mxu0  ;;  %18345 = vst [vmem:[#allocation143_spill] sm:$0xff] %v14334_v3 }
 0x321   : > { %2525 = vmatprep.mubr.bf16.mxu1 %v18280_v6  ;;  %18338 = vst [vmem:[#allocation136_spill] sm:$0xff] %v14314_v54 }
 0x322   : > { %v14318_v32 = vpop.f32.mrf.mxu0 }
 0x323   : > { %18339 = vst [vmem:[#allocation137_spill] sm:$0xff] %v14318_v32  ;;  %v14342_v35 = vpop.permute.xlu0 %3273 }
 0x324   : > { %18348 = vst [vmem:[#allocation146_spill] sm:$0xff] %v14342_v35 }
 0x327   : > { %v14353_v3 = vpop.permute.xlu0 %3263 }
 0x328   : > { %11487 = vmatmul.mubr.msk.bf16.gmra.mxu1 %vm2250_vm4, %v12454_v4  ;;  %v14321_v4 = vpop.f32.mrf.mxu0  ;;  %18352 = vst [vmem:[#allocation150_spill] sm:$0xff] %v14353_v3 }
 0x329   : > { %2535 = vmatprep.mubr.bf16.mxu1 %v18280_v6  ;;  %18340 = vst [vmem:[#allocation138_spill] sm:$0xff] %v14321_v4  ;;  %v12462_v4 = vld [vmem:[%s18285_s7 + $0xa8] sm:$0xff]  }
 0x32a   : > { %v14327_v0 = vpop.f32.mrf.mxu0 }
 0x32b   : > { %18342 = vst [vmem:[#allocation140_spill] sm:$0xff] %v14327_v0 }
 0x32c   : > { %v14332_v54 = vpop.f32.mrf.mxu0 }
 0x32d   : > { %18344 = vst [vmem:[#allocation142_spill] sm:$0xff] %v14332_v54 }
 0x32e   : > { %v14340_v32 = vpop.f32.mrf.mxu0 }
 0x32f   : > { %18347 = vst [vmem:[#allocation145_spill] sm:$0xff] %v14340_v32 }
 0x330   : > { %11488 = vmatmul.mubr.msk.bf16.gmra.mxu1 %vm2250_vm4, %v12456_v55  ;;  %v14329_v55 = vpop.permute.xlu1 %3298  ;;  %v14345_v0 = vpop.f32.mrf.mxu0 }
 0x331   : > { %2545 = vmatprep.mubr.bf16.mxu1 %v18280_v6  ;;  %18343 = vst [vmem:[#allocation141_spill] sm:$0xff] %v14329_v55  ;;  %18349 = vst [vmem:[#allocation147_spill] sm:$0xff] %v14345_v0  ;;  %v12466_v0 = vld [vmem:[%s18285_s7 + $0xb8] sm:$0xff]  }
 0x332   : > { %v14351_v54 = vpop.f32.mrf.mxu0 }
 0x333   : > { %18351 = vst [vmem:[#allocation149_spill] sm:$0xff] %v14351_v54 }
 0x334   : > { %v14358_v32 = vpop.f32.mrf.mxu0 }
 0x335   : > { %18354 = vst [vmem:[#allocation152_spill] sm:$0xff] %v14358_v32 }
 0x336   : > { %v14364_v35 = vpop.f32.mrf.mxu0 }
 0x337   : > { %18356 = vst [vmem:[#allocation154_spill] sm:$0xff] %v14364_v35 }
 0x338   : > { %11489 = vmatmul.mubr.msk.bf16.gmra.mxu1 %vm2250_vm4, %v12458_v7  ;;  %v14337_v7 = vpop.permute.xlu1 %3288  ;;  %v14369_v54 = vpop.f32.mrf.mxu0 }
 0x339   : > { %2555 = vmatprep.mubr.bf16.mxu1 %v18280_v6  ;;  %18346 = vst [vmem:[#allocation144_spill] sm:$0xff] %v14337_v7  ;;  %18358 = vst [vmem:[#allocation156_spill] sm:$0xff] %v14369_v54 }
 0x33c   : > { %v14347_v60 = vpop.permute.xlu1 %3278 }
 0x33d   : > { %18350 = vst [vmem:[#allocation148_spill] sm:$0xff] %v14347_v60 }
 0x340   : > { %11490 = vmatmul.mubr.msk.bf16.gmra.mxu1 %vm2250_vm4, %v12460_v63  ;;  %v12464_v63 = vld [vmem:[%s18285_s7 + $0xb0] sm:$0xff]   ;;  %v14355_v48 = vpop.permute.xlu1 %3268 }
 0x341   : > { %2565 = vmatprep.mubr.bf16.mxu1 %v18280_v6  ;;  %18353 = vst [vmem:[#allocation151_spill] sm:$0xff] %v14355_v48 }
 0x344   : > { %v14366_v60 = vpop.permute.xlu1 %3258 }
 0x345   : > { %18357 = vst [vmem:[#allocation155_spill] sm:$0xff] %v14366_v60 }
 0x348   : > { %11491 = vmatmul.mubr.msk.bf16.gmra.mxu1 %vm2250_vm4, %v12462_v4  ;;  %v14361_v4 = vpop.permute.xlu0 %3253  ;;  %v14373_v48 = vpop.permute.xlu1 %3248 }
 0x349   : > { %2575 = vmatprep.mubr.bf16.mxu1 %v18280_v6  ;;  %18355 = vst [vmem:[#allocation153_spill] sm:$0xff] %v14361_v4  ;;  %18360 = vst [vmem:[#allocation158_spill] sm:$0xff] %v14373_v48 }
 0x34c   : > { %v14371_v3 = vpop.permute.xlu0 %3243  ;;  %v14381_v4 = vpop.permute.xlu1 %3238 }
 0x34d   : > { %18359 = vst [vmem:[#allocation157_spill] sm:$0xff] %v14371_v3  ;;  %18364 = vst [vmem:[#allocation162_spill] sm:$0xff] %v14381_v4 }
 0x350   : > { %11492 = vmatmul.mubr.msk.bf16.gmra.mxu1 %vm2250_vm4, %v12464_v63  ;;  %v14375_v63 = vpop.f32.mrf.mxu0  ;;  %v14377_v32 = vpop.permute.xlu0 %3233 }
 0x351   : > { %2585 = vmatprep.mubr.bf16.mxu1 %v18280_v6  ;;  %18361 = vst [vmem:[#allocation159_spill] sm:$0xff] %v14375_v63  ;;  %18362 = vst [vmem:[#allocation160_spill] sm:$0xff] %v14377_v32  ;;  %v14394_v7 = vpop.permute.xlu1 %3228 }
 0x352   : > { %v14379_v12 = vpop.f32.mrf.mxu0  ;;  %18368 = vst [vmem:[#allocation166_spill] sm:$0xff] %v14394_v7 }
 0x353   : > { %18363 = vst [vmem:[#allocation161_spill] sm:$0xff] %v14379_v12 }
 0x354   : > { %v14387_v56 = vpop.f32.mrf.mxu0  ;;  %v14390_v17 = vpop.permute.xlu0 %3223 }
 0x355   : > { %18366 = vst [vmem:[#allocation164_spill] sm:$0xff] %v14387_v56  ;;  %18367 = vst [vmem:[#allocation165_spill] sm:$0xff] %v14390_v17 }
 0x358   : > { %11493 = vmatmul.mubr.msk.bf16.gmra.mxu1 %vm2250_vm4, %v12466_v0 }
 0x360   : > { %v2357_v6 = vpop.f32.mrf.mxu1 }
 0x361   : > { %v2358_v35 = vadd.f32 %v2357_v6, %v13958_v9  ;;  %v14398_v6 = vpop.f32.mrf.mxu0 }
 0x362   : > { %v14384_v60 = vpop.f32.mrf.mxu1  ;;  %18369 = vst [vmem:[#allocation167_spill] sm:$0xff] %v14398_v6 }
 0x363   : > { %18365 = vst [vmem:[#allocation163_spill] sm:$0xff] %v14384_v60  ;;  %v3077_v0 = vadd.f32 %v14213_v59, %v2358_v35  ;;  %v14405_v58 = vpop.f32.mrf.mxu0 }
 0x364   : > { %v2361_v54 = vpop.f32.mrf.mxu1  ;;  %18370 = vst [vmem:[#allocation168_spill] sm:$0xff] %v14405_v58 }
 0x365   : > { %v2362_v47 = vadd.f32 %v2361_v54, %v13963_v11  ;;  %v3461_v12 = vadd.f32 %v14390_v17, %v3077_v0 }
 0x366   : > { %v14392_v63 = vpop.f32.mrf.mxu1 }
 0x367   : > { %v3079_v27 = vadd.f32 %v14218_v50, %v2362_v47  ;;  %v3557_v11 = vmax.f32 %v3461_v12, 0.0 }
 0x368   : > { %v2367_v9 = vpop.f32.mrf.mxu1 }
 0x369   : > { %v3463_v35 = vadd.f32 %v14394_v7, %v3079_v27  ;;  %v2368_v59 = vadd.f32 %v2367_v9, %v13967_v14  ;;  %v14412_v14 = vpop.f32.mrf.mxu0 }
 0x36a   : > { %v14402_v56 = vpop.f32.mrf.mxu1  ;;  %18372 = vst [vmem:[#allocation170_spill] sm:$0xff] %v14412_v14 }
 0x36b   : > { %v3559_v54 = vmax.f32 %v3463_v35, 0.0  ;;  %v3081_v60 = vadd.f32 %v14224_v36, %v2368_v59 }
 0x36c   : > { %v2371_v51 = vpop.f32.mrf.mxu1 }
 0x36d   : > { %v14407_v55 = vpack.c.bf16 %v3559_v54, %v3557_v11  ;;  %v2372_v47 = vadd.f32 %v2371_v51, %v13972_v16  ;;  %v3465_v0 = vadd.f32 %v14377_v32, %v3081_v60  ;;  %v14419_v16 = vpop.f32.mrf.mxu0 }
 0x36e   : > { %v2373_v50 = vpop.f32.mrf.mxu1  ;;  %18373 = vst [vmem:[#allocation171_spill] sm:$0xff] %v14419_v16 }
 0x36f   : > { %18371 = vst [vmem:[#allocation169_spill] sm:$0xff] %v14407_v55  ;;  %v3083_v27 = vadd.f32 %v14229_v5, %v2372_v47  ;;  %v3561_v35 = vmax.f32 %v3465_v0, 0.0 }
 0x370   : > { %v2377_v6 = vpop.f32.mrf.mxu1 }
 0x371   : > { %v3467_v12 = vadd.f32 %v14381_v4, %v3083_v27  ;;  %v2378_v9 = vadd.f32 %v2377_v6, %v13976_v19  ;;  %v14426_v19 = vpop.f32.mrf.mxu0 }
 0x372   : > { %v14416_v36 = vpop.f32.mrf.mxu1  ;;  %18375 = vst [vmem:[#allocation173_spill] sm:$0xff] %v14426_v19 }
 0x373   : > { %v3563_v59 = vmax.f32 %v3467_v12, 0.0  ;;  %v3085_v11 = vadd.f32 %v14235_v8, %v2378_v9  ;;  %v14429_v12 = vpop.permute.xlu0 %3373 }
 0x374   : > { %v2381_v54 = vpop.f32.mrf.mxu1  ;;  %18376 = vst [vmem:[#allocation174_spill] sm:$0xff] %v14429_v12 }
 0x375   : > { %v14421_v51 = vpack.c.bf16 %v3563_v59, %v3561_v35  ;;  %v2382_v60 = vadd.f32 %v2381_v54, %v13981_v21  ;;  %v3469_v47 = vadd.f32 %v14371_v3, %v3085_v11  ;;  %v14431_v59 = vpop.f32.mrf.mxu0  ;;  %v14433_v21 = vpop.permute.xlu1 %3378 }
 0x376   : > { %v2383_v5 = vpop.f32.mrf.mxu1  ;;  %18378 = vst [vmem:[#allocation175_spill] sm:$0xff] %v14431_v59  ;;  %18379 = vst [vmem:[#allocation176_spill] sm:$0xff] %v14433_v21  ;;  %v12470_v59 = vld [vmem:[%s18377_s1 + $0x4] ss:$12 sps:$4 sm:$0xff]  }
 0x377   : > { %18374 = vst [vmem:[#allocation172_spill] sm:$0xff] %v14421_v51  ;;  %v3087_v27 = vadd.f32 %v14240_v61, %v2382_v60  ;;  %v3565_v8 = vmax.f32 %v3469_v47, 0.0  ;;  %v14437_v60 = vpop.f32.mrf.mxu0  ;;  %v14439_v16 = vpop.permute.xlu0 %3363  ;;  %4245 = vmatprep.mubr.bf16.mxu1 %v12470_v59  ;;  %v2374_v59 = vadd.f32 %v2373_v50, %v13974_v18  ;;  %v14481_v18 = vadd.f32 %v14402_v56, %v13970_v15 }
 0x378   : > { %v2387_v14 = vpop.f32.mrf.mxu1  ;;  %18381 = vst [vmem:[#allocation178_spill] sm:$0xff] %v14437_v60  ;;  %18382 = vst [vmem:[#allocation179_spill] sm:$0xff] %v14439_v16 }
 0x379   : > { %v3471_v6 = vadd.f32 %v14373_v48, %v3087_v27  ;;  %v14441_v19 = vpop.permute.xlu1 %3368  ;;  %v14443_v47 = vpop.f32.mrf.mxu0  ;;  %v14498_v15 = vadd.f32 %v2387_v14, %v13985_v24 }
 0x37a   : > { %v2389_v0 = vpop.f32.mrf.mxu1  ;;  %18383 = vst [vmem:[#allocation180_spill] sm:$0xff] %v14441_v19  ;;  %18384 = vst [vmem:[#allocation181_spill] sm:$0xff] %v14443_v47 }
 0x37b   : > { %v3567_v9 = vmax.f32 %v3471_v6, 0.0  ;;  %v14445_v58 = vpop.permute.xlu0 %3353  ;;  %v14448_v21 = vpop.f32.mrf.mxu0 }
 0x37c   : > { %v2391_v35 = vpop.f32.mrf.mxu1  ;;  %18385 = vst [vmem:[#allocation182_spill] sm:$0xff] %v14445_v58  ;;  %18386 = vst [vmem:[#allocation183_spill] sm:$0xff] %v14448_v21 }
 0x37d   : > { %v14435_v54 = vpack.c.bf16 %v3567_v9, %v3565_v8  ;;  %v14450_v8 = vpop.permute.xlu1 %3358  ;;  %v14452_v51 = vpop.f32.mrf.mxu0 }
 0x37e   : > { %v2393_v11 = vpop.f32.mrf.mxu1  ;;  %18387 = vst [vmem:[#allocation184_spill] sm:$0xff] %v14450_v8  ;;  %18388 = vst [vmem:[#allocation185_spill] sm:$0xff] %v14452_v51  ;;  %v2384_v51 = vadd.f32 %v2383_v5, %v13983_v23 }
 0x37f   : > { %18380 = vst [vmem:[#allocation177_spill] sm:$0xff] %v14435_v54  ;;  %v14454_v16 = vpop.permute.xlu0 %3343  ;;  %v14458_v17 = vpop.f32.mrf.mxu0 }
 0x380   : > { %v2397_v61 = vpop.f32.mrf.mxu1  ;;  %18389 = vst [vmem:[#allocation186_spill] sm:$0xff] %v14454_v16  ;;  %18391 = vst [vmem:[#allocation188_spill] sm:$0xff] %v14458_v17  ;;  %v2390_v16 = vadd.f32 %v2389_v0, %v13988_v25  ;;  %v14485_v25 = vadd.f32 %v14232_v10, %v2374_v59 }
 0x381   : > { %v14456_v54 = vpop.permute.xlu1 %3348  ;;  %v14462_v21 = vpop.f32.mrf.mxu0  ;;  %v2398_v3 = vadd.f32 %v2397_v61, %v13994_v29  ;;  %v14492_v29 = vadd.f32 %v14243_v42, %v2384_v51 }
 0x382   : > { %v2399_v27 = vpop.f32.mrf.mxu1  ;;  %18390 = vst [vmem:[#allocation187_spill] sm:$0xff] %v14456_v54  ;;  %18393 = vst [vmem:[#allocation190_spill] sm:$0xff] %v14462_v21  ;;  %v2394_v54 = vadd.f32 %v2393_v11, %v13992_v28  ;;  %v14477_v21 = vadd.f32 %v14392_v63, %v13965_v13  ;;  %v14489_v28 = vadd.f32 %v14416_v36, %v13979_v20 }
 0x383   : > { %v14460_v7 = vpop.permute.xlu0 %3333  ;;  %v14471_v48 = vpop.f32.mrf.mxu0  ;;  %v2400_v23 = vadd.f32 %v2399_v27, %v13997_v30  ;;  %v14501_v30 = vadd.f32 %v14248_v53, %v2390_v16  ;;  %v14506_v20 = vadd.f32 %v2391_v35, %v13990_v26  ;;  %v18402_v27 = vld [vmem:[#allocation130_spill] sm:$0xff] }
 0x384   : > { %v2401_v12 = vpop.f32.mrf.mxu1  ;;  %18392 = vst [vmem:[#allocation189_spill] sm:$0xff] %v14460_v7  ;;  %v14509_v42 = vadd.f32 %v14254_v22, %v2394_v54  ;;  %v18400_v54 = vld [vmem:[#allocation55_spill] sm:$0xff] }
 0x385   : > { %v14464_v8 = vpop.permute.xlu1 %3338  ;;  %v14515_v14 = vpop.f32.mrf.mxu0  ;;  %v14518_v53 = vadd.f32 %v14259_v34, %v2400_v23 }
 0x386   : > { %v2403_v6 = vpop.f32.mrf.mxu1 }
 0x387   : > { %v14473_v7 = vpop.permute.xlu0 %3323  ;;  %v2404_v22 = vadd.f32 %v2403_v6, %v14001_v33  ;;  %v18396_v33 = vld [vmem:[#allocation52_spill] sm:$0xff] }
 0x388   : > { %v2407_v55 = vpop.f32.mrf.mxu1 }
 0x389   : > { %v14495_v63 = vpop.permute.xlu1 %3328 }
 0x38a   : > { %v2409_v9 = vpop.f32.mrf.mxu1 }
 0x38b   : > { %v2410_v51 = vadd.f32 %v2409_v9, %v18396_v33  ;;  %v18412_v33 = vld [vmem:[#allocation57_spill] sm:$0xff] }
 0x38c   : > { %v2411_v60 = vpop.f32.mrf.mxu1 }
 0x38d   : > { %v14539_v0 = vpop.permute.xlu1 %3318 }
 0x38e   : > { %v2413_v19 = vpop.f32.mrf.mxu1 }
 0x390   : > { %v2417_v47 = vpop.f32.mrf.mxu1 }
 0x391   : > { %v2418_v34 = vadd.f32 %v2417_v47, %v14012_v39 }
 0x392   : > { %v2419_v58 = vpop.f32.mrf.mxu1 }
 0x394   : > { %v2421_v32 = vpop.f32.mrf.mxu1 }
 0x396   : > { %v2423_v4 = vpop.f32.mrf.mxu1 }
 0x397   : > { %v2424_v50 = vadd.f32 %v2423_v4, %v14019_v43  ;;  %v14512_v43 = vadd.f32 %v14257_v52, %v2398_v3  ;;  %v2420_v4 = vadd.f32 %v2419_v58, %v14015_v40  ;;  %v14527_v58 = vpop.permute.xlu0 %3313 }
 0x398   : > { %v2427_v17 = vpop.f32.mrf.mxu1 }
 0x399   : > { %v2428_v56 = vadd.f32 %v2427_v17, %v14021_v44  ;;  %v2402_v44 = vadd.f32 %v2401_v12, %v13999_v31  ;;  %v2414_v17 = vadd.f32 %v2413_v19, %v14010_v38  ;;  %v3104_v52 = vadd.f32 %v14287_v49, %v2424_v50  ;;  %v18397_v38 = vld [vmem:[#allocation53_spill] sm:$0xff]  ;;  %v14537_v19 = vpop.f32.mrf.mxu0  ;;  %v18405_v50 = vld [vmem:[#allocation131_spill] sm:$0xff] }
 0x39a   : > { %v2429_v13 = vpop.f32.mrf.mxu1  ;;  %v2412_v5 = vadd.f32 %v2411_v60, %v18397_v38  ;;  %v3102_v49 = vadd.f32 %v14281_v2, %v2420_v4  ;;  %v18403_v60 = vld [vmem:[#allocation144_spill] sm:$0xff]  ;;  %v18404_v2 = vld [vmem:[#allocation139_spill] sm:$0xff] }
 0x39b   : > { %v2430_v10 = vadd.f32 %v2429_v13, %v14024_v45  ;;  %v2422_v45 = vadd.f32 %v2421_v32, %v14017_v41  ;;  %v3105_v36 = vadd.f32 %v14290_v62, %v2428_v56  ;;  %v18394_v41 = vld [vmem:[#allocation54_spill] sm:$0xff]  ;;  %v18398_v62 = vld [vmem:[#allocation141_spill] sm:$0xff]  ;;  %v3100_v47 = vadd.f32 %v18402_v27, %v2414_v17  ;;  %v14551_v23 = vpop.f32.mrf.mxu0 }
 0x39c   : > { %v2431_v24 = vpop.f32.mrf.mxu1  ;;  %v3488_v6 = vadd.f32 %v18403_v60, %v3104_v52  ;;  %v18409_v17 = vld [vmem:[#allocation129_spill] sm:$0xff] }
 0x39d   : > { %v2432_v26 = vadd.f32 %v2431_v24, %v14026_v46  ;;  %v3106_v40 = vadd.f32 %v14293_v1, %v2430_v10  ;;  %v18395_v46 = vld [vmem:[#allocation51_spill] sm:$0xff]  ;;  %v3103_v39 = vadd.f32 %v14284_v57, %v2422_v45  ;;  %v3101_v57 = vadd.f32 %v18405_v50, %v2418_v34  ;;  %v18406_v10 = vld [vmem:[#allocation133_spill] sm:$0xff]  ;;  %v18407_v24 = vld [vmem:[#allocation126_spill] sm:$0xff] }
 0x39e   : > { %v2433_v3 = vpop.f32.mrf.mxu1  ;;  %v2408_v16 = vadd.f32 %v2407_v55, %v18395_v46  ;;  %v18401_v55 = vld [vmem:[#allocation125_spill] sm:$0xff]  ;;  %v3489_v13 = vadd.f32 %v18404_v2, %v3105_v36  ;;  %v18408_v45 = vld [vmem:[#allocation128_spill] sm:$0xff]  ;;  %v3099_v52 = vadd.f32 %v18409_v17, %v2412_v5  ;;  %v14569_v5 = vpop.f32.mrf.mxu0 }
 0x39f   : > { %v3107_v31 = vadd.f32 %v14297_v37, %v2432_v26  ;;  %v2434_v32 = vadd.f32 %v2433_v3, %v18394_v41  ;;  %v18399_v37 = vld [vmem:[#allocation132_spill] sm:$0xff]  ;;  %v3095_v61 = vadd.f32 %v18401_v55, %v2402_v44  ;;  %v3490_v9 = vadd.f32 %v18404_v2, %v3106_v40  ;;  %v18410_v3 = vld [vmem:[#allocation143_spill] sm:$0xff]  ;;  %v14561_v41 = vpop.permute.xlu0 %3303  ;;  %18414 = vst [vmem:[#allocation54_spill] sm:$0xff] %v14569_v5 }
 0x3a0   : > { %v2437_v1 = vpop.f32.mrf.mxu1  ;;  %v3096_v44 = vadd.f32 %v18407_v24, %v2404_v22  ;;  %v3098_v26 = vadd.f32 %v18408_v45, %v2410_v51  ;;  %v3486_v40 = vadd.f32 %v18410_v3, %v3102_v49  ;;  %v3487_v34 = vadd.f32 %v18403_v60, %v3103_v39  ;;  %v14574_v39 = vpop.permute.xlu1 %3308 }
 0x3a1   : > { %v3491_v12 = vadd.f32 %v18398_v62, %v3107_v31  ;;  %v3108_v35 = vadd.f32 %v18399_v37, %v2434_v32  ;;  %v2438_v11 = vadd.f32 %v2437_v1, %v18400_v54  ;;  %v18411_v32 = vld [vmem:[#allocation127_spill] sm:$0xff]  ;;  %v18413_v1 = vld [vmem:[#allocation148_spill] sm:$0xff]  ;;  %v3586_v37 = vmax.f32 %v3490_v9, 0.0 }
 0x3a2   : > { %v14549_v59 = vpop.f32.mrf.mxu1  ;;  %v3097_v46 = vadd.f32 %v18411_v32, %v2408_v16  ;;  %v3485_v49 = vadd.f32 %v18410_v3, %v3101_v57  ;;  %v3585_v54 = vmax.f32 %v3489_v13, 0.0  ;;  %v18415_v16 = vld [vmem:[#allocation135_spill] sm:$0xff]  ;;  %v3582_v60 = vmax.f32 %v3486_v40, 0.0  ;;  %v14584_v3 = vpop.f32.mrf.mxu0  ;;  %v18419_v32 = vld [vmem:[#allocation137_spill] sm:$0xff] }
 0x3a3   : > { %v3492_v56 = vadd.f32 %v18398_v62, %v3108_v35  ;;  %v3109_v4 = vadd.f32 %v18406_v10, %v2438_v11  ;;  %v3587_v36 = vmax.f32 %v3491_v12, 0.0  ;;  %v3484_v62 = vadd.f32 %v18413_v1, %v3100_v47  ;;  %v18416_v12 = vld [vmem:[#allocation146_spill] sm:$0xff]  ;;  %v18417_v10 = vld [vmem:[#allocation59_spill] sm:$0xff] }
 0x3a4   : > { %v2441_v31 = vpop.f32.mrf.mxu1  ;;  %v3584_v35 = vmax.f32 %v3488_v6, 0.0  ;;  %v3482_v27 = vadd.f32 %v18416_v12, %v3098_v26  ;;  %v3483_v47 = vadd.f32 %v18413_v1, %v3099_v52  ;;  %v3583_v50 = vmax.f32 %v3487_v34, 0.0  ;;  %v18418_v13 = vld [vmem:[#allocation151_spill] sm:$0xff] }
 0x3a5   : > { %v2442_v38 = vadd.f32 %v2441_v31, %v18412_v33  ;;  %v3588_v51 = vmax.f32 %v3492_v56, 0.0  ;;  %v3493_v11 = vadd.f32 %v14561_v41, %v3109_v4  ;;  %v3731_v6 = vpack.c.bf16 %v3587_v36, %v3585_v54  ;;  %v18420_v36 = vld [vmem:[#allocation124_spill] sm:$0xff] }
 0x3a6   : > { %v14567_v22 = vpop.f32.mrf.mxu1  ;;  %v3480_v24 = vadd.f32 %v18418_v13, %v3096_v44  ;;  %v3481_v4 = vadd.f32 %v18416_v12, %v3097_v46  ;;  %v3730_v17 = vpack.c.bf16 %v3584_v35, %v3582_v60  ;;  %v3580_v26 = vmax.f32 %v3484_v62, 0.0  ;;  %v18421_v44 = vld [vmem:[#allocation150_spill] sm:$0xff] }
 0x3a7   : > { %v3111_v55 = vadd.f32 %v18415_v16, %v2442_v38  ;;  %v3732_v9 = vpack.c.bf16 %v3588_v51, %v3586_v37  ;;  %v3581_v52 = vmax.f32 %v3485_v49, 0.0  ;;  %v3589_v40 = vmax.f32 %v3493_v11, 0.0  ;;  %v18423_v49 = vld [vmem:[#allocation61_spill] sm:$0xff]  ;;  %v18424_v11 = vld [vmem:[#allocation123_spill] sm:$0xff] }
 0x3a8   : > { %v2447_v2 = vpop.f32.mrf.mxu1  ;;  %v3091_v33 = vadd.f32 %v18420_v36, %v14506_v20  ;;  %v3478_v38 = vadd.f32 %v18421_v44, %v14518_v53  ;;  %v3479_v46 = vadd.f32 %v18418_v13, %v3095_v61  ;;  %v3578_v1 = vmax.f32 %v3482_v27, 0.0  ;;  %v14601_v61 = vpop.f32.mrf.mxu0 }
 0x3a9   : > { %v3495_v56 = vadd.f32 %v14574_v39, %v3111_v55  ;;  %v2448_v57 = vadd.f32 %v2447_v2, %v18417_v10  ;;  %4213 = vmatprep.subr.bf16.mxu1 %v3732_v9  ;;  %v3579_v62 = vmax.f32 %v3483_v47, 0.0  ;;  %v3729_v51 = vpack.c.bf16 %v3583_v50, %v3581_v52  ;;  %v18425_v55 = vld [vmem:[#allocation155_spill] sm:$0xff]  ;;  %18426 = vst [vmem:[#allocation52_spill] sm:$0xff] %v14601_v61  ;;  %v18427_v9 = vld [vmem:[#allocation140_spill] sm:$0xff]  ;;  %v18431_v52 = vld [vmem:[#allocation158_spill] sm:$0xff] }
 0x3aa   : > { %v14582_v45 = vpop.f32.mrf.mxu1  ;;  %4214 = vmatpush1.bf16.msra.mxu1 %v3731_v6  ;;  %v3089_v16 = vadd.f32 %v18424_v11, %v14498_v15  ;;  %v3476_v20 = vadd.f32 %v18425_v55, %v14509_v42  ;;  %v3728_v53 = vpack.c.bf16 %v3580_v26, %v3578_v1  ;;  %v3576_v60 = vmax.f32 %v3480_v24, 0.0  ;;  %v18428_v15 = vld [vmem:[#allocation122_spill] sm:$0xff]  ;;  %v18429_v42 = vld [vmem:[#allocation153_spill] sm:$0xff] }
 0x3ab   : > { %v3591_v31 = vmax.f32 %v3495_v56, 0.0  ;;  %v3113_v34 = vadd.f32 %v18419_v32, %v2448_v57  ;;  %4215 = vmatprep.subr.bf16.mxu1 %v3730_v17  ;;  %v3477_v27 = vadd.f32 %v18421_v44, %v14512_v43  ;;  %v3577_v47 = vmax.f32 %v3481_v4, 0.0  ;;  %v18430_v4 = vld [vmem:[#allocation63_spill] sm:$0xff]  ;;  %v18433_v1 = vld [vmem:[#allocation50_spill] sm:$0xff] }
 0x3ac   : > { %v2451_v37 = vpop.f32.mrf.mxu1  ;;  %v3086_v6 = vadd.f32 %v18428_v15, %v14489_v28  ;;  %v3474_v56 = vadd.f32 %v18429_v42, %v14501_v30  ;;  %v3475_v10 = vadd.f32 %v18425_v55, %v3091_v33  ;;  %v3574_v57 = vmax.f32 %v3478_v38, 0.0  ;;  %v18432_v38 = vld [vmem:[#allocation145_spill] sm:$0xff]  ;;  %v18469_v61 = vld [vmem:[#allocation70_spill] sm:$0xff] }
 0x3ad   : > { %v14592_v35 = vpack.c.bf16 %v3591_v31, %v3589_v40  ;;  %v2452_v54 = vadd.f32 %v2451_v37, %v18423_v49  ;;  %v3497_v2 = vadd.f32 %v14527_v58, %v3113_v34  ;;  %v3575_v24 = vmax.f32 %v3479_v46, 0.0  ;;  %v14619_v34 = vpop.f32.mrf.mxu0  ;;  %v18434_v37 = vld [vmem:[#allocation163_spill] sm:$0xff]  ;;  %v18436_v49 = vld [vmem:[#allocation157_spill] sm:$0xff] }
 0x3ae   : > { %v14599_v12 = vpop.f32.mrf.mxu1  ;;  %4216 = vmatpush1.bf16.msra.mxu1 %v3729_v51  ;;  %v3727_v17 = vpack.c.bf16 %v3579_v62, %v3577_v47  ;;  %v3472_v40 = vadd.f32 %v18431_v52, %v14492_v29  ;;  %v3473_v31 = vadd.f32 %v18429_v42, %v3089_v16  ;;  %v3726_v32 = vpack.c.bf16 %v3576_v60, %v3574_v57  ;;  %v18435_v51 = vld [vmem:[#allocation121_spill] sm:$0xff]  ;;  %v18439_v47 = vld [vmem:[#allocation120_spill] sm:$0xff] }
 0x3af   : > { %18422 = vst [vmem:[#allocation51_spill] sm:$0xff] %v14592_v35  ;;  %v3115_v50 = vadd.f32 %v18427_v9, %v2452_v54  ;;  %4217 = vmatprep.subr.bf16.mxu1 %v3728_v53  ;;  %v3572_v30 = vmax.f32 %v3476_v20, 0.0  ;;  %v3573_v36 = vmax.f32 %v3477_v27, 0.0  ;;  %v3593_v33 = vmax.f32 %v3497_v2, 0.0  ;;  %v18438_v60 = vld [vmem:[#allocation65_spill] sm:$0xff]  ;;  %v18440_v9 = vld [vmem:[#allocation162_spill] sm:$0xff] }
 0x3b0   : > { %v2457_v13 = vpop.f32.mrf.mxu1  ;;  %v2360_v62 = vadd.f32 %v18434_v37, %v18433_v1  ;;  %v3082_v29 = vadd.f32 %v18435_v51, %v14481_v18  ;;  %v3470_v54 = vadd.f32 %v18436_v49, %v3086_v6  ;;  %v3570_v11 = vmax.f32 %v3474_v56, 0.0  ;;  %v14636_v6 = vpop.f32.mrf.mxu0  ;;  %v18442_v57 = vld [vmem:[#allocation149_spill] sm:$0xff] }
 0x3b1   : > { %v3499_v43 = vadd.f32 %v14539_v0, %v3115_v50  ;;  %v2458_v26 = vadd.f32 %v2457_v13, %v18430_v4  ;;  %v3571_v55 = vmax.f32 %v3475_v10, 0.0  ;;  %v3725_v20 = vpack.c.bf16 %v3575_v24, %v3573_v36  ;;  %18441 = vst [vmem:[#allocation141_spill] sm:$0xff] %v14636_v6  ;;  %v18443_v24 = vld [vmem:[#allocation119_spill] sm:$0xff]  ;;  %v18447_v1 = vld [vmem:[#allocation165_spill] sm:$0xff] }
 0x3b2   : > { %v14617_v28 = vpop.f32.mrf.mxu1  ;;  %4218 = vmatpush1.bf16.msra.mxu1 %v3727_v17  ;;  %v3080_v2 = vadd.f32 %v18439_v47, %v14477_v21  ;;  %v3468_v50 = vadd.f32 %v18440_v9, %v14485_v25  ;;  %v3724_v18 = vpack.c.bf16 %v3572_v30, %v3570_v11  ;;  %v3568_v42 = vmax.f32 %v3472_v40, 0.0  ;;  %v18445_v40 = vld [vmem:[#allocation166_spill] sm:$0xff]  ;;  %v18502_v35 = vld [vmem:[#allocation185_spill] sm:$0xff] }
 0x3b3   : > { %v3595_v44 = vmax.f32 %v3499_v43, 0.0  ;;  %v3117_v46 = vadd.f32 %v18432_v38, %v2458_v26  ;;  %4219 = vmatprep.subr.bf16.mxu1 %v3726_v32  ;;  %v3569_v56 = vmax.f32 %v3473_v31, 0.0  ;;  %v3078_v17 = vadd.f32 %v18443_v24, %v2360_v62  ;;  %v18444_v43 = vld [vmem:[#allocation160_spill] sm:$0xff]  ;;  %v18457_v24 = vld [vmem:[#allocation169_spill] sm:$0xff] }
 0x3b4   : > { %v2461_v16 = vpop.f32.mrf.mxu1  ;;  %v3466_v4 = vadd.f32 %v18444_v43, %v3082_v29  ;;  %v3566_v21 = vmax.f32 %v3470_v54, 0.0  ;;  %v3464_v32 = vadd.f32 %v18445_v40, %v3080_v2  ;;  %v3564_v36 = vmax.f32 %v3468_v50, 0.0  ;;  %v14651_v29 = vpop.permute.xlu1 %3458 }
 0x3b5   : > { %v14627_v53 = vpack.c.bf16 %v3595_v44, %v3593_v33  ;;  %v2462_v27 = vadd.f32 %v2461_v16, %v18438_v60  ;;  %v3501_v10 = vadd.f32 %v14473_v7, %v3117_v46  ;;  %v3723_v25 = vpack.c.bf16 %v3571_v55, %v3569_v56  ;;  %v14646_v33 = vpop.f32.mrf.mxu0  ;;  %v14648_v44 = vpop.permute.xlu0 %3453  ;;  %18448 = vst [vmem:[#allocation55_spill] sm:$0xff] %v14651_v29  ;;  %v18492_v29 = vld [vmem:[#allocation78_spill] sm:$0xff] }
 0x3b6   : > { %v14634_v15 = vpop.f32.mrf.mxu1  ;;  %4220 = vmatpush1.bf16.msra.mxu1 %v3725_v20  ;;  %v3722_v31 = vpack.c.bf16 %v3568_v42, %v3566_v21  ;;  %18446 = vst [vmem:[#allocation132_spill] sm:$0xff] %v14648_v44  ;;  %v3462_v37 = vadd.f32 %v18447_v1, %v3078_v17  ;;  %v3562_v62 = vmax.f32 %v3466_v4, 0.0  ;;  %v3560_v16 = vmax.f32 %v3464_v32, 0.0  ;;  %v18451_v20 = vld [vmem:[#allocation177_spill] sm:$0xff]  ;;  %v18454_v42 = vld [vmem:[#allocation172_spill] sm:$0xff] }
 0x3b7   : > { %18437 = vst [vmem:[#allocation53_spill] sm:$0xff] %v14627_v53  ;;  %v3119_v13 = vadd.f32 %v18442_v57, %v2462_v27  ;;  %4221 = vmatprep.subr.bf16.mxu1 %v3724_v18  ;;  %v3597_v38 = vmax.f32 %v3501_v10, 0.0  ;;  %v14655_v55 = vpop.f32.mrf.mxu0 }
 0x3b8   : > { %v14642_v26 = vpop.f32.mrf.mxu1  ;;  %v3720_v11 = vpack.c.bf16 %v3564_v36, %v3562_v62  ;;  %18450 = vst [vmem:[#allocation130_spill] sm:$0xff] %v14655_v55  ;;  %v3558_v60 = vmax.f32 %v3462_v37, 0.0  ;;  %v14662_v18 = vpop.permute.xlu1 %3448  ;;  %v18470_v55 = vld [vmem:[#allocation71_spill] sm:$0xff] }
 0x3b9   : > { %v3503_v52 = vadd.f32 %v14495_v63, %v3119_v13  ;;  %v14658_v47 = vpop.permute.xlu0 %3443  ;;  %v14660_v50 = vpop.f32.mrf.mxu0  ;;  %18453 = vst [vmem:[#allocation139_spill] sm:$0xff] %v14662_v18 }
 0x3ba   : > { %v2469_v30 = vpop.f32.mrf.mxu1  ;;  %4222 = vmatpush1.bf16.msra.mxu1 %v3723_v25  ;;  %18452 = vst [vmem:[#allocation144_spill] sm:$0xff] %v14658_v47  ;;  %v3718_v9 = vpack.c.bf16 %v3560_v16, %v3558_v60 }
 0x3bb   : > { %v3599_v46 = vmax.f32 %v3503_v52, 0.0  ;;  %4223 = vmatprep.subr.bf16.mxu1 %v3722_v31  ;;  %v14665_v57 = vpop.f32.mrf.mxu0 }
 0x3bc   : > { %v2471_v51 = vpop.f32.mrf.mxu1  ;;  %18455 = vst [vmem:[#allocation131_spill] sm:$0xff] %v14665_v57  ;;  %v14670_v43 = vpop.permute.xlu1 %3438 }
 0x3bd   : > { %v14653_v49 = vpack.c.bf16 %v3599_v46, %v3597_v38  ;;  %v14667_v13 = vpop.permute.xlu0 %3433  ;;  %18458 = vst [vmem:[#allocation126_spill] sm:$0xff] %v14670_v43  ;;  %v14672_v21 = vpop.f32.mrf.mxu0  ;;  %v18486_v43 = vld [vmem:[#allocation80_spill] sm:$0xff] }
 0x3be   : > { %v2473_v54 = vpop.f32.mrf.mxu1  ;;  %4224 = vmatpush1.bf16.msra.mxu1 %v18451_v20  ;;  %18456 = vst [vmem:[#allocation133_spill] sm:$0xff] %v14667_v13  ;;  %v18466_v20 = vld [vmem:[#allocation66_spill] sm:$0xff] }
 0x3bf   : > { %18449 = vst [vmem:[#allocation125_spill] sm:$0xff] %v14653_v49  ;;  %4225 = vmatprep.subr.bf16.mxu1 %v3720_v11  ;;  %v14676_v32 = vpop.f32.mrf.mxu0  ;;  %v18465_v11 = vld [vmem:[#allocation62_spill] sm:$0xff]  ;;  %v2464_v60 = vadd.f32 %v14634_v15, %v18466_v20  ;;  %v2474_v6 = vadd.f32 %v2473_v54, %v18469_v61  ;;  %v18473_v15 = vld [vmem:[#allocation72_spill] sm:$0xff] }
 0x3c0   : > { %v2477_v27 = vpop.f32.mrf.mxu1  ;;  %18460 = vst [vmem:[#allocation129_spill] sm:$0xff] %v14676_v32  ;;  %v14678_v31 = vpop.permute.xlu1 %3428  ;;  %v2454_v16 = vadd.f32 %v14599_v12, %v18465_v11  ;;  %v18471_v32 = vld [vmem:[#allocation58_spill] sm:$0xff]  ;;  %v18472_v12 = vld [vmem:[#allocation60_spill] sm:$0xff] }
 0x3c1   : > { %v14674_v52 = vpop.permute.xlu0 %3423  ;;  %18461 = vst [vmem:[#allocation143_spill] sm:$0xff] %v14678_v31  ;;  %v14680_v46 = vpop.f32.mrf.mxu0  ;;  %v2478_v57 = vadd.f32 %v2477_v27, %v18470_v55  ;;  %v14703_v11 = vadd.f32 %v14582_v45, %v18472_v12  ;;  %v18476_v54 = vld [vmem:[#allocation152_spill] sm:$0xff]  ;;  %v18477_v27 = vld [vmem:[#allocation82_spill] sm:$0xff]  ;;  %v18479_v45 = vld [vmem:[#allocation67_spill] sm:$0xff] }
 0x3c2   : > { %v2479_v2 = vpop.f32.mrf.mxu1  ;;  %4226 = vmatpush1.bf16.msra.mxu1 %v18454_v42  ;;  %18459 = vst [vmem:[#allocation128_spill] sm:$0xff] %v14674_v52  ;;  %18462 = vst [vmem:[#allocation127_spill] sm:$0xff] %v14680_v46  ;;  %v18474_v52 = vld [vmem:[#allocation142_spill] sm:$0xff]  ;;  %v14714_v55 = vadd.f32 %v18476_v54, %v2464_v60  ;;  %v18481_v12 = vld [vmem:[#allocation83_spill] sm:$0xff] }
 0x3c3   : > { %4227 = vmatprep.subr.bf16.mxu1 %v3718_v9  ;;  %v14690_v42 = vpop.f32.mrf.mxu0  ;;  %v2480_v20 = vadd.f32 %v2479_v2, %v18473_v15  ;;  %v14723_v2 = vadd.f32 %v14642_v26, %v18479_v45  ;;  %v18482_v15 = vld [vmem:[#allocation84_spill] sm:$0xff]  ;;  %v18483_v60 = vld [vmem:[#allocation69_spill] sm:$0xff]  ;;  %v18487_v45 = vld [vmem:[#allocation167_spill] sm:$0xff] }
 0x3c4   : > { %v2481_v56 = vpop.f32.mrf.mxu1  ;;  %v14684_v62 = vpop.permute.xlu1 %3418  ;;  %18467 = vst [vmem:[#allocation135_spill] sm:$0xff] %v14690_v42  ;;  %v14707_v42 = vadd.f32 %v18474_v52, %v2454_v16  ;;  %v18480_v52 = vld [vmem:[#allocation156_spill] sm:$0xff]  ;;  %v14731_v54 = vadd.f32 %v2471_v51, %v18483_v60  ;;  %v18491_v51 = vld [vmem:[#allocation74_spill] sm:$0xff] }
 0x3c5   : > { %v14682_v1 = vpop.permute.xlu0 %3413  ;;  %18464 = vst [vmem:[#allocation148_spill] sm:$0xff] %v14684_v62  ;;  %v14699_v62 = vadd.f32 %v14567_v22, %v18471_v32  ;;  %v14717_v32 = vpop.f32.mrf.mxu0  ;;  %v14741_v18 = vadd.f32 %v18487_v45, %v2480_v20  ;;  %v18495_v20 = vld [vmem:[#allocation79_spill] sm:$0xff] }
 0x3c6   : > { %v2483_v10 = vpop.f32.mrf.mxu1  ;;  %4228 = vmatpush1.bf16.msra.mxu1 %v18457_v24  ;;  %18463 = vst [vmem:[#allocation57_spill] sm:$0xff] %v14682_v1  ;;  %v18468_v24 = vld [vmem:[#allocation68_spill] sm:$0xff]  ;;  %18478 = vst [vmem:[#allocation146_spill] sm:$0xff] %v14717_v32 }
 0x3c7   : > { %v2470_v5 = vadd.f32 %v2469_v30, %v18468_v24  ;;  %v18475_v30 = vld [vmem:[#allocation64_spill] sm:$0xff]  ;;  %v2484_v60 = vadd.f32 %v2483_v10, %v18491_v51  ;;  %v18498_v10 = vld [vmem:[#allocation75_spill] sm:$0xff] }
 0x3c8   : > { %v2487_v17 = vpop.f32.mrf.mxu1  ;;  %v14711_v61 = vadd.f32 %v14617_v28, %v18475_v30  ;;  %v14719_v31 = vpop.permute.xlu1 %3408  ;;  %v18485_v32 = vld [vmem:[#allocation164_spill] sm:$0xff] }
 0x3c9   : > { %v14695_v1 = vpop.permute.xlu0 %3403  ;;  %v14726_v16 = vadd.f32 %v18480_v52, %v2470_v5  ;;  %v14737_v13 = vadd.f32 %v18485_v32, %v2478_v57  ;;  %v18488_v5 = vld [vmem:[#allocation73_spill] sm:$0xff] }
 0x3ca   : > { %v2489_v4 = vpop.f32.mrf.mxu1  ;;  %v2482_v52 = vadd.f32 %v2481_v56, %v18488_v5  ;;  %v18496_v56 = vld [vmem:[#allocation190_spill] sm:$0xff] }
 0x3cc   : > { %v2491_v25 = vpop.f32.mrf.mxu1 }
 0x3ce   : > { %v2493_v40 = vpop.f32.mrf.mxu1 }
 0x3d0   : > { %v2497_v36 = vpop.f32.mrf.mxu1 }
 0x3d1   : > { %v2498_v45 = vadd.f32 %v2497_v36, %v18495_v20  ;;  %v18503_v36 = vld [vmem:[#allocation176_spill] sm:$0xff] }
 0x3d2   : > { %v2499_v38 = vpop.f32.mrf.mxu1 }
 0x3d3   : > { %v2500_v47 = vadd.f32 %v2499_v38, %v18486_v43  ;;  %v14750_v43 = vpop.f32.mrf.mxu0  ;;  %v14752_v38 = vpop.permute.xlu0 %3393 }
 0x3d4   : > { %v2501_v37 = vpop.f32.mrf.mxu1  ;;  %18494 = vst [vmem:[#allocation59_spill] sm:$0xff] %v14750_v43  ;;  %v14762_v43 = vpop.permute.xlu1 %3398 }
 0x3d6   : > { %v2503_v9 = vpop.f32.mrf.mxu1 }
 0x3d7   : > { %v2504_v24 = vadd.f32 %v2503_v9, %v18477_v27  ;;  %v18484_v9 = vld [vmem:[#allocation161_spill] sm:$0xff] }
 0x3d8   : > { %v2507_v46 = vpop.f32.mrf.mxu1  ;;  %v14734_v27 = vadd.f32 %v18484_v9, %v2474_v6  ;;  %v2494_v6 = vadd.f32 %v2493_v40, %v18492_v29  ;;  %v18493_v9 = vld [vmem:[#allocation188_spill] sm:$0xff] }
 0x3d9   : > { %v2508_v28 = vadd.f32 %v2507_v46, %v18481_v12  ;;  %v18489_v46 = vld [vmem:[#allocation81_spill] sm:$0xff]  ;;  %v3136_v44 = vadd.f32 %v18493_v9, %v2504_v24  ;;  %v18499_v29 = vld [vmem:[#allocation76_spill] sm:$0xff] }
 0x3da   : > { %v2509_v22 = vpop.f32.mrf.mxu1  ;;  %v2502_v12 = vadd.f32 %v2501_v37, %v18489_v46  ;;  %v2490_v40 = vadd.f32 %v2489_v4, %v18499_v29  ;;  %v18500_v24 = vld [vmem:[#allocation77_spill] sm:$0xff]  ;;  %v18507_v4 = vld [vmem:[#allocation180_spill] sm:$0xff] }
 0x3db   : > { %v2510_v30 = vadd.f32 %v2509_v22, %v18482_v15  ;;  %v18490_v22 = vld [vmem:[#allocation85_spill] sm:$0xff]  ;;  %v3137_v5 = vadd.f32 %v18496_v56, %v2508_v28  ;;  %v2492_v51 = vadd.f32 %v2491_v25, %v18500_v24  ;;  %v18508_v25 = vld [vmem:[#allocation174_spill] sm:$0xff]  ;;  %v14774_v24 = vpop.f32.mrf.mxu0 }
 0x3dc   : > { %v2511_v26 = vpop.f32.mrf.mxu1  ;;  %v3135_v53 = vadd.f32 %v18502_v35, %v2502_v12  ;;  %18510 = vst [vmem:[#allocation137_spill] sm:$0xff] %v14774_v24  ;;  %v18517_v24 = vld [vmem:[#allocation171_spill] sm:$0xff] }
 0x3dd   : > { %v2512_v15 = vadd.f32 %v2511_v26, %v18490_v22  ;;  %v3138_v57 = vadd.f32 %v14471_v48, %v2510_v30  ;;  %v18497_v26 = vld [vmem:[#allocation86_spill] sm:$0xff]  ;;  %v2488_v22 = vadd.f32 %v2487_v17, %v18498_v10  ;;  %v18501_v48 = vld [vmem:[#allocation183_spill] sm:$0xff]  ;;  %v3520_v10 = vadd.f32 %v18507_v4, %v3136_v44 }
 0x3de   : > { %v2513_v32 = vpop.f32.mrf.mxu1  ;;  %v3134_v30 = vadd.f32 %v18501_v48, %v2500_v47  ;;  %v18506_v17 = vld [vmem:[#allocation178_spill] sm:$0xff]  ;;  %v18511_v48 = vld [vmem:[#allocation181_spill] sm:$0xff]  ;;  %v3521_v12 = vadd.f32 %v18508_v25, %v3137_v5 }
 0x3df   : > { %v3139_v37 = vadd.f32 %v14515_v14, %v2512_v15  ;;  %v2514_v46 = vadd.f32 %v2513_v32, %v18497_v26  ;;  %v18504_v14 = vld [vmem:[#allocation87_spill] sm:$0xff]  ;;  %v18505_v32 = vld [vmem:[#allocation168_spill] sm:$0xff]  ;;  %v3132_v26 = vadd.f32 %v18506_v17, %v2494_v6  ;;  %v3522_v29 = vadd.f32 %v18508_v25, %v3138_v57  ;;  %v18518_v25 = vld [vmem:[#allocation89_spill] sm:$0xff] }
 0x3e0   : > { %v2517_v9 = vpop.f32.mrf.mxu1  ;;  %v3127_v56 = vadd.f32 %v18505_v32, %v2482_v52  ;;  %v3133_v35 = vadd.f32 %v18511_v48, %v2498_v45  ;;  %v18515_v32 = vld [vmem:[#allocation179_spill] sm:$0xff]  ;;  %v3129_v49 = vadd.f32 %v18517_v24, %v2488_v22  ;;  %v3519_v45 = vadd.f32 %v18507_v4, %v3135_v53  ;;  %v14797_v53 = vpop.permute.xlu1 %3388 }
 0x3e1   : > { %v3523_v20 = vadd.f32 %v18503_v36, %v3139_v37  ;;  %v3140_v28 = vadd.f32 %v14537_v19, %v2514_v46  ;;  %v2518_v15 = vadd.f32 %v2517_v9, %v18504_v14  ;;  %v18512_v46 = vld [vmem:[#allocation170_spill] sm:$0xff]  ;;  %v18513_v9 = vld [vmem:[#allocation173_spill] sm:$0xff]  ;;  %v18514_v14 = vld [vmem:[#allocation175_spill] sm:$0xff]  ;;  %v3518_v57 = vadd.f32 %v18515_v32, %v3134_v30 }
 0x3e2   : > { %v14772_v47 = vpop.f32.mrf.mxu1  ;;  %v3128_v52 = vadd.f32 %v18512_v46, %v2484_v60  ;;  %v3130_v6 = vadd.f32 %v18513_v9, %v2490_v40  ;;  %v3131_v44 = vadd.f32 %v18514_v14, %v2492_v51  ;;  %v3616_v48 = vmax.f32 %v3520_v10, 0.0  ;;  %v14792_v51 = vpop.f32.mrf.mxu0 }
 0x3e3   : > { %18509 = vst [vmem:[#allocation151_spill] sm:$0xff] %v14772_v47  ;;  %v3524_v19 = vadd.f32 %v18503_v36, %v3140_v28  ;;  %v3141_v37 = vadd.f32 %v14551_v23, %v2518_v15  ;;  %v14784_v47 = vpop.permute.xlu0 %3383  ;;  %v3619_v5 = vmax.f32 %v3523_v20, 0.0  ;;  %v18519_v28 = vld [vmem:[#allocation184_spill] sm:$0xff]  ;;  %v3618_v15 = vmax.f32 %v3522_v29, 0.0  ;;  %v18520_v20 = vld [vmem:[#allocation182_spill] sm:$0xff] }
 0x3e4   : > { %v2521_v17 = vpop.f32.mrf.mxu1  ;;  %18516 = vst [vmem:[#allocation124_spill] sm:$0xff] %v14784_v47  ;;  %v3516_v23 = vadd.f32 %v18519_v28, %v3132_v26  ;;  %v3517_v30 = vadd.f32 %v18515_v32, %v3133_v35  ;;  %v3617_v46 = vmax.f32 %v3521_v12, 0.0  ;;  %v3514_v4 = vadd.f32 %v18520_v20, %v3130_v6  ;;  %v18522_v12 = vld [vmem:[#allocation187_spill] sm:$0xff] }
 0x3e5   : > { %v2522_v36 = vadd.f32 %v2521_v17, %v18518_v25  ;;  %v3620_v40 = vmax.f32 %v3524_v19, 0.0  ;;  %v3525_v9 = vadd.f32 %v14784_v47, %v3141_v37  ;;  %v3515_v26 = vadd.f32 %v18519_v28, %v3131_v44  ;;  %v18521_v25 = vld [vmem:[#allocation91_spill] sm:$0xff]  ;;  %v14807_v47 = vpop.f32.mrf.mxu0 }
 0x3e6   : > { %v14790_v60 = vpop.f32.mrf.mxu1  ;;  %v3614_v29 = vmax.f32 %v3518_v57, 0.0  ;;  %v3615_v19 = vmax.f32 %v3519_v45, 0.0  ;;  %v3747_v10 = vpack.c.bf16 %v3619_v5, %v3617_v46  ;;  %v3512_v32 = vadd.f32 %v18522_v12, %v3128_v52  ;;  %v18523_v5 = vld [vmem:[#allocation159_spill] sm:$0xff]  ;;  %v18524_v52 = vld [vmem:[#allocation186_spill] sm:$0xff] }
 0x3e7   : > { %v3143_v22 = vadd.f32 %v14584_v3, %v2522_v36  ;;  %v3748_v14 = vpack.c.bf16 %v3620_v40, %v3618_v15  ;;  %v3513_v37 = vadd.f32 %v18520_v20, %v3129_v49  ;;  %v3612_v6 = vmax.f32 %v3516_v23, 0.0 }
 0x3e8   : > { %v2527_v24 = vpop.f32.mrf.mxu1  ;;  %v3746_v36 = vpack.c.bf16 %v3616_v48, %v3614_v29  ;;  %v3613_v44 = vmax.f32 %v3517_v30, 0.0  ;;  %v3621_v57 = vmax.f32 %v3525_v9, 0.0  ;;  %v3123_v15 = vadd.f32 %v18523_v5, %v14731_v54  ;;  %v18526_v30 = vld [vmem:[#allocation93_spill] sm:$0xff] }
 0x3e9   : > { %v3527_v17 = vadd.f32 %v14797_v53, %v3143_v22  ;;  %v2528_v35 = vadd.f32 %v2527_v24, %v18521_v25  ;;  %4229 = vmatprep.subr.bf16.mxu1 %v3748_v14  ;;  %v3510_v40 = vadd.f32 %v18524_v52, %v14741_v18  ;;  %v3511_v49 = vadd.f32 %v18522_v12, %v3127_v56  ;;  %v14824_v56 = vpop.f32.mrf.mxu0 }
 0x3ea   : > { %v14805_v3 = vpop.f32.mrf.mxu1  ;;  %4230 = vmatpush2.bf16.msra.mxu1 %v3747_v10  ;;  %v3610_v46 = vmax.f32 %v3514_v4, 0.0  ;;  %v3611_v23 = vmax.f32 %v3515_v26, 0.0  ;;  %v3745_v22 = vpack.c.bf16 %v3615_v19, %v3613_v44  ;;  %v3508_v54 = vadd.f32 %v14464_v8, %v14734_v27  ;;  %v18529_v27 = vld [vmem:[#allocation189_spill] sm:$0xff] }
 0x3eb   : > { %v3623_v28 = vmax.f32 %v3527_v17, 0.0  ;;  %v3145_v45 = vadd.f32 %v14619_v34, %v2528_v35  ;;  %4231 = vmatprep.subr.bf16.mxu1 %v3746_v36  ;;  %v18527_v34 = vld [vmem:[#allocation154_spill] sm:$0xff]  ;;  %v3608_v14 = vmax.f32 %v3512_v32, 0.0  ;;  %v3509_v4 = vadd.f32 %v18524_v52, %v14737_v13 }
 0x3ec   : > { %v2531_v48 = vpop.f32.mrf.mxu1  ;;  %v3121_v29 = vadd.f32 %v18527_v34, %v14723_v2  ;;  %v3744_v18 = vpack.c.bf16 %v3612_v6, %v3610_v46  ;;  %v3609_v26 = vmax.f32 %v3513_v37, 0.0  ;;  %v18528_v2 = vld [vmem:[#allocation147_spill] sm:$0xff]  ;;  %v3506_v25 = vadd.f32 %v18529_v27, %v14726_v16  ;;  %v18532_v46 = vld [vmem:[#allocation138_spill] sm:$0xff]  ;;  %v18534_v34 = vld [vmem:[#allocation97_spill] sm:$0xff] }
 0x3ed   : > { %v14815_v20 = vpack.c.bf16 %v3623_v28, %v3621_v57  ;;  %v2532_v9 = vadd.f32 %v2531_v48, %v18526_v30  ;;  %v3529_v19 = vadd.f32 %v14752_v38, %v3145_v45  ;;  %v3118_v17 = vadd.f32 %v18528_v2, %v14711_v61  ;;  %v18530_v37 = vld [vmem:[#allocation95_spill] sm:$0xff]  ;;  %v14842_v45 = vpop.f32.mrf.mxu0 }
 0x3ee   : > { %v14822_v24 = vpop.f32.mrf.mxu1  ;;  %4232 = vmatpush2.bf16.msra.mxu1 %v3745_v22  ;;  %v3507_v35 = vadd.f32 %v14464_v8, %v3123_v15  ;;  %v3606_v12 = vmax.f32 %v3510_v40, 0.0  ;;  %v3607_v36 = vmax.f32 %v3511_v49, 0.0  ;;  %v3743_v6 = vpack.c.bf16 %v3611_v23, %v3609_v26  ;;  %v18531_v40 = vld [vmem:[#allocation56_spill] sm:$0xff] }
 0x3ef   : > { %18525 = vst [vmem:[#allocation150_spill] sm:$0xff] %v14815_v20  ;;  %v3147_v10 = vadd.f32 %v14646_v33, %v2532_v9  ;;  %4233 = vmatprep.subr.bf16.mxu1 %v3744_v18  ;;  %v3504_v33 = vadd.f32 %v14495_v63, %v14714_v55  ;;  %v3505_v57 = vadd.f32 %v18529_v27, %v3121_v29  ;;  %v3604_v16 = vmax.f32 %v3508_v54, 0.0 }
 0x3f0   : > { %v2537_v32 = vpop.f32.mrf.mxu1  ;;  %v3742_v28 = vpack.c.bf16 %v3608_v14, %v3606_v12  ;;  %v3605_v8 = vmax.f32 %v3509_v4, 0.0  ;;  %v3625_v5 = vmax.f32 %v3529_v19, 0.0  ;;  %v2440_v49 = vadd.f32 %v14549_v59, %v18531_v40  ;;  %v18539_v40 = vld [vmem:[#allocation53_spill] sm:$0xff] }
 0x3f1   : > { %v3531_v13 = vadd.f32 %v14762_v43, %v3147_v10  ;;  %v2538_v44 = vadd.f32 %v2537_v32, %v18530_v37  ;;  %v3114_v63 = vadd.f32 %v18532_v46, %v14703_v11  ;;  %v3502_v55 = vadd.f32 %v14473_v7, %v3118_v17  ;;  %v14859_v7 = vpop.f32.mrf.mxu0  ;;  %v18536_v10 = vld [vmem:[#allocation134_spill] sm:$0xff] }
 0x3f2   : > { %v14840_v61 = vpop.f32.mrf.mxu1  ;;  %4234 = vmatpush2.bf16.msra.mxu1 %v3743_v6  ;;  %v3602_v48 = vmax.f32 %v3506_v25, 0.0  ;;  %v3603_v22 = vmax.f32 %v3507_v35, 0.0  ;;  %v3741_v30 = vpack.c.bf16 %v3607_v36, %v3605_v8  ;;  %v3500_v59 = vadd.f32 %v14539_v0, %v14707_v42 }
 0x3f3   : > { %v3627_v15 = vmax.f32 %v3531_v13, 0.0  ;;  %v3149_v52 = vadd.f32 %v14660_v50, %v2538_v44  ;;  %4235 = vmatprep.subr.bf16.mxu1 %v3742_v28  ;;  %v18535_v50 = vld [vmem:[#allocation136_spill] sm:$0xff]  ;;  %v3600_v14 = vmax.f32 %v3504_v33, 0.0  ;;  %v3601_v4 = vmax.f32 %v3505_v57, 0.0  ;;  %v14871_v36 = vpop.f32.mrf.mxu0 }
 0x3f4   : > { %v2541_v23 = vpop.f32.mrf.mxu1  ;;  %v3112_v54 = vadd.f32 %v18535_v50, %v14699_v62  ;;  %v3740_v11 = vpack.c.bf16 %v3604_v16, %v3602_v48  ;;  %v3110_v2 = vadd.f32 %v18536_v10, %v2440_v49  ;;  %v3498_v17 = vadd.f32 %v14527_v58, %v3114_v63  ;;  %v18538_v16 = vld [vmem:[#allocation125_spill] sm:$0xff]  ;;  %v12468_v63 = vld [vmem:[%s18377_s1] ss:$12 sps:$4 sm:$0xff]  }
 0x3f5   : > { %v14850_v9 = vpack.c.bf16 %v3627_v15, %v3625_v5  ;;  %v2542_v29 = vadd.f32 %v2541_v23, %v18534_v34  ;;  %v3533_v26 = vadd.f32 %v14695_v1, %v3149_v52  ;;  %v3598_v62 = vmax.f32 %v3502_v55, 0.0  ;;  %v14880_v28 = vpop.f32.mrf.mxu0  ;;  %v18540_v48 = vld [vmem:[#allocation51_spill] sm:$0xff] }
 0x3f6   : > { %v14857_v18 = vpop.f32.mrf.mxu1  ;;  %4236 = vmatpush2.bf16.msra.mxu1 %v3741_v30  ;;  %v3739_v0 = vpack.c.bf16 %v3603_v22, %v3601_v4  ;;  %v3496_v25 = vadd.f32 %v14574_v39, %v3112_v54  ;;  %v3596_v32 = vmax.f32 %v3500_v59, 0.0  ;;  %v3494_v58 = vadd.f32 %v14561_v41, %v3110_v2  ;;  %v12473_v23 = vld [vmem:[%s18377_s1 + $0x1c] ss:$12 sps:$4 sm:$0xff]   ;;  %v12471_v54 = vld [vmem:[%s18377_s1 + $0x18] ss:$12 sps:$4 sm:$0xff]  }
 0x3f7   : > { %18533 = vst [vmem:[#allocation61_spill] sm:$0xff] %v14850_v9  ;;  %v3151_v19 = vadd.f32 %v14672_v21, %v2542_v29  ;;  %4237 = vmatprep.subr.bf16.mxu1 %v3740_v11  ;;  %v3738_v12 = vpack.c.bf16 %v3600_v14, %v3598_v62  ;;  %v3629_v21 = vmax.f32 %v3533_v26, 0.0  ;;  %v3594_v13 = vmax.f32 %v3498_v17, 0.0  ;;  %v14887_v52 = vpop.f32.mrf.mxu0  ;;  %v12476_v11 = vld [vmem:[%s18377_s1 + $0x34] ss:$12 sps:$4 sm:$0xff]  }
 0x3f8   : > { %v14865_v27 = vpop.f32.mrf.mxu1  ;;  %v3592_v57 = vmax.f32 %v3496_v25, 0.0  ;;  %v3590_v8 = vmax.f32 %v3494_v58, 0.0  ;;  %v12474_v2 = vld [vmem:[%s18377_s1 + $0x30] ss:$12 sps:$4 sm:$0xff]   ;;  %v12479_v62 = vld [vmem:[%s18377_s1 + $0x4c] ss:$12 sps:$4 sm:$0xff]  }
 0x3f9   : > { %v3535_v42 = vadd.f32 %v14719_v31, %v3151_v19  ;;  %v3736_v39 = vpack.c.bf16 %v3596_v32, %v3594_v13  ;;  %v3060_v55 = vpop.f32.mrf.mxu0  ;;  %v18543_v58 = vld [vmem:[#allocation116_spill] sm:$0xff] }
 0x3fa   : > { %v14869_v35 = vpop.f32.mrf.mxu1  ;;  %4238 = vmatpush2.bf16.msra.mxu1 %v3739_v0  ;;  %v3734_v15 = vpack.c.bf16 %v3592_v57, %v3590_v8  ;;  %v18545_v8 = vld [vmem:[#allocation94_spill] sm:$0xff] }
 0x3fb   : > { %v3631_v6 = vmax.f32 %v3535_v42, 0.0  ;;  %4239 = vmatprep.subr.bf16.mxu1 %v3738_v12  ;;  %v3062_v34 = vpop.f32.mrf.mxu0  ;;  %v18541_v42 = vld [vmem:[#allocation114_spill] sm:$0xff] }
 0x3fc   : > { %v14874_v37 = vpop.f32.mrf.mxu1 }
 0x3fd   : > { %v14876_v44 = vpack.c.bf16 %v3631_v6, %v3629_v21  ;;  %v3064_v59 = vpop.f32.mrf.mxu0  ;;  %v18542_v21 = vld [vmem:[#allocation115_spill] sm:$0xff] }
 0x3fe   : > { %v14878_v33 = vpop.f32.mrf.mxu1  ;;  %4240 = vmatpush2.bf16.msra.mxu1 %v18538_v16 }
 0x3ff   : > { %18537 = vst [vmem:[#allocation123_spill] sm:$0xff] %v14876_v44  ;;  %4241 = vmatprep.subr.bf16.mxu1 %v3736_v39  ;;  %v3068_v26 = vpop.f32.mrf.mxu0  ;;  %v18544_v39 = vld [vmem:[#allocation112_spill] sm:$0xff] }
 0x400   : > { %v14883_v5 = vpop.f32.mrf.mxu1 }
 0x401   : > { %v3070_v17 = vpop.f32.mrf.mxu0 }
 0x402   : > { %v14885_v41 = vpop.f32.mrf.mxu1  ;;  %4242 = vmatpush2.bf16.msra.mxu1 %v18539_v40  ;;  %v18546_v40 = vld [vmem:[#allocation98_spill] sm:$0xff] }
 0x403   : > { %4243 = vmatprep.subr.bf16.mxu1 %v3734_v15  ;;  %v3072_v32 = vpop.f32.mrf.mxu0  ;;  %v14905_v15 = vadd.f32 %v14822_v24, %v18545_v8  ;;  %v12477_v24 = vld [vmem:[%s18377_s1 + $0x48] ss:$12 sps:$4 sm:$0xff]  }
 0x404   : > { %v14890_v49 = vpop.f32.mrf.mxu1 }
 0x406   : > { %v2563_v46 = vpop.f32.mrf.mxu1  ;;  %4244 = vmatpush2.bf16.msra.mxu1 %v18540_v48  ;;  %v18547_v48 = vld [vmem:[#allocation113_spill] sm:$0xff] }
 0x408   : > { %v2567_v22 = vpop.f32.mrf.mxu1 }
 0x409   : > { %4246 = vmatmul.mubr.bf16.vlgmr.msra.gmra.mxu1 %v12468_v63  ;;  %v14909_v63 = vadd.f32 %v14857_v18, %v18546_v40  ;;  %v18552_v18 = vld [vmem:[#allocation118_spill] sm:$0xff] }
 0x40a   : > { %v2569_v30 = vpop.f32.mrf.mxu1  ;;  %4255 = vmatprep.mubr.bf16.mxu1 %v12473_v23 }
 0x40c   : > { %v2571_v29 = vpop.f32.mrf.mxu1 }
 0x40e   : > { %v2573_v50 = vpop.f32.mrf.mxu1 }
 0x410   : > { %v2577_v14 = vpop.f32.mrf.mxu1 }
 0x411   : > { %4256 = vmatmul.mubr.bf16.gmra.mxu1 %v12471_v54  ;;  %v18548_v54 = vld [vmem:[#allocation117_spill] sm:$0xff] }
 0x412   : > { %v2579_v4 = vpop.f32.mrf.mxu1  ;;  %4265 = vmatprep.mubr.bf16.mxu1 %v12476_v11 }
 0x413   : > { %v2580_v57 = vadd.f32 %v2579_v4, %v18544_v39 }
 0x414   : > { %v2581_v19 = vpop.f32.mrf.mxu1 }
 0x415   : > { %v2582_v23 = vadd.f32 %v2581_v19, %v18547_v48  ;;  %v12482_v19 = vld [vmem:[%s18377_s1 + $0x64] ss:$12 sps:$4 sm:$0xff]  }
 0x416   : > { %v2583_v10 = vpop.f32.mrf.mxu1  ;;  %v18553_v48 = vld [vmem:[#allocation102_spill] sm:$0xff] }
 0x417   : > { %v2584_v25 = vadd.f32 %v2583_v10, %v18541_v42  ;;  %v18549_v10 = vld [vmem:[#allocation100_spill] sm:$0xff] }
 0x418   : > { %v2587_v0 = vpop.f32.mrf.mxu1 }
 0x419   : > { %4266 = vmatmul.mubr.bf16.gmra.mxu1 %v12474_v2  ;;  %v2588_v6 = vadd.f32 %v2587_v0, %v18542_v21  ;;  %v14915_v2 = vadd.f32 %v14869_v35, %v18549_v10  ;;  %v3168_v0 = vadd.f32 %v3064_v59, %v2584_v25  ;;  %v3074_v21 = vpop.f32.mrf.mxu0  ;;  %v18555_v10 = vld [vmem:[#allocation109_spill] sm:$0xff]  ;;  %v3167_v59 = vadd.f32 %v3062_v34, %v2582_v23 }
 0x41a   : > { %v2589_v12 = vpop.f32.mrf.mxu1  ;;  %4275 = vmatprep.mubr.bf16.mxu1 %v12479_v62  ;;  %v18550_v62 = vld [vmem:[#allocation110_spill] sm:$0xff]  ;;  %v2572_v9 = vadd.f32 %v2571_v29, %v18555_v10  ;;  %v18562_v29 = vld [vmem:[#allocation105_spill] sm:$0xff] }
 0x41b   : > { %v2590_v13 = vadd.f32 %v2589_v12, %v18543_v58  ;;  %v2574_v4 = vadd.f32 %v2573_v50, %v18550_v62  ;;  %v18551_v58 = vld [vmem:[#allocation111_spill] sm:$0xff]  ;;  %v3169_v8 = vadd.f32 %v3068_v26, %v2588_v6  ;;  %v3166_v50 = vadd.f32 %v3060_v55, %v2580_v57  ;;  %v18559_v6 = vld [vmem:[#allocation106_spill] sm:$0xff]  ;;  %v18563_v57 = vld [vmem:[#allocation144_spill] sm:$0xff] }
 0x41c   : > { %v2591_v16 = vpop.f32.mrf.mxu1  ;;  %v2578_v39 = vadd.f32 %v2577_v14, %v18551_v58  ;;  %v18558_v14 = vld [vmem:[#allocation104_spill] sm:$0xff] }
 0x41d   : > { %v2592_v11 = vadd.f32 %v2591_v16, %v18548_v54  ;;  %v3170_v42 = vadd.f32 %v3070_v17, %v2590_v13  ;;  %v2554_v16 = vadd.f32 %v14878_v33, %v18553_v48  ;;  %v18554_v54 = vld [vmem:[#allocation108_spill] sm:$0xff]  ;;  %v18557_v13 = vld [vmem:[#allocation55_spill] sm:$0xff]  ;;  %v2560_v26 = vadd.f32 %v14885_v41, %v18558_v14 }
 0x41e   : > { %v2593_v12 = vpop.f32.mrf.mxu1  ;;  %v2570_v35 = vadd.f32 %v2569_v30, %v18554_v54  ;;  %v18556_v17 = vld [vmem:[#allocation132_spill] sm:$0xff]  ;;  %v18561_v30 = vld [vmem:[#allocation107_spill] sm:$0xff]  ;;  %v3165_v55 = vadd.f32 %v14887_v52, %v2578_v39  ;;  %v2562_v41 = vadd.f32 %v14890_v49, %v18562_v29  ;;  %v3550_v23 = vadd.f32 %v18563_v57, %v3166_v50 }
 0x41f   : > { %v2594_v40 = vadd.f32 %v2593_v12, %v18552_v18  ;;  %v3171_v20 = vadd.f32 %v3072_v32, %v2592_v11  ;;  %v3554_v25 = vadd.f32 %v18556_v17, %v3170_v42  ;;  %v2564_v32 = vadd.f32 %v2563_v46, %v18559_v6  ;;  %v18560_v12 = vld [vmem:[#allocation139_spill] sm:$0xff] }
 0x420   : > { %v3164_v11 = vadd.f32 %v14880_v28, %v2574_v4  ;;  %v3552_v33 = vadd.f32 %v18560_v12, %v3168_v0  ;;  %v2568_v58 = vadd.f32 %v2567_v22, %v18561_v30  ;;  %v3553_v34 = vadd.f32 %v18556_v17, %v3169_v8  ;;  %v18564_v42 = vld [vmem:[#allocation103_spill] sm:$0xff] }
 0x421   : > { %v3555_v62 = vadd.f32 %v18557_v13, %v3171_v20  ;;  %v3172_v44 = vadd.f32 %v3074_v21, %v2594_v40  ;;  %4276 = vmatmul.mubr.bf16.gmra.mxu1 %v12477_v24  ;;  %v3162_v46 = vadd.f32 %v14859_v7, %v2570_v35  ;;  %v3163_v28 = vadd.f32 %v14871_v36, %v2572_v9  ;;  %v18565_v24 = vld [vmem:[#allocation126_spill] sm:$0xff]  ;;  %v12485_v40 = vld [vmem:[%s18377_s1 + $0x7c] ss:$12 sps:$4 sm:$0xff]  }
 0x422   : > { %4285 = vmatprep.mubr.bf16.mxu1 %v12482_v19  ;;  %v3551_v22 = vadd.f32 %v18560_v12, %v3167_v59  ;;  %v3650_v4 = vmax.f32 %v3554_v25, 0.0  ;;  %v2558_v21 = vadd.f32 %v14883_v5, %v18564_v42  ;;  %v3548_v39 = vadd.f32 %v18565_v24, %v3164_v11  ;;  %v12480_v8 = vld [vmem:[%s18377_s1 + $0x60] ss:$12 sps:$4 sm:$0xff]   ;;  %v18566_v19 = vld [vmem:[#allocation101_spill] sm:$0xff]  ;;  %v18572_v12 = vld [vmem:[#allocation96_spill] sm:$0xff] }
 0x423   : > { %v3556_v20 = vadd.f32 %v18557_v13, %v3172_v44  ;;  %v3651_v52 = vmax.f32 %v3555_v62, 0.0  ;;  %v3160_v44 = vadd.f32 %v14824_v56, %v2564_v32  ;;  %v3648_v49 = vmax.f32 %v3552_v33, 0.0  ;;  %v18567_v35 = vld [vmem:[#allocation133_spill] sm:$0xff]  ;;  %v18569_v13 = vld [vmem:[#allocation143_spill] sm:$0xff] }
 0x424   : > { %v3161_v7 = vadd.f32 %v14842_v45, %v2568_v58  ;;  %v3549_v9 = vadd.f32 %v18563_v57, %v3165_v55  ;;  %v3649_v36 = vmax.f32 %v3553_v34, 0.0  ;;  %v2552_v48 = vadd.f32 %v14874_v37, %v18566_v19  ;;  %v18568_v45 = vld [vmem:[#allocation59_spill] sm:$0xff]  ;;  %v18574_v58 = vld [vmem:[#allocation128_spill] sm:$0xff] }
 0x425   : > { %v3652_v0 = vmax.f32 %v3556_v20, 0.0  ;;  %v3158_v54 = vadd.f32 %v14792_v51, %v2560_v26  ;;  %v3546_v5 = vadd.f32 %v18567_v35, %v3162_v46  ;;  %v3646_v10 = vmax.f32 %v3550_v23, 0.0  ;;  %v18570_v37 = vld [vmem:[#allocation99_spill] sm:$0xff]  ;;  %v18571_v26 = vld [vmem:[#allocation137_spill] sm:$0xff]  ;;  %v18577_v23 = vld [vmem:[#allocation148_spill] sm:$0xff] }
 0x426   : > { %v3159_v56 = vadd.f32 %v14807_v47, %v2562_v41  ;;  %v3547_v50 = vadd.f32 %v18565_v24, %v3163_v28  ;;  %v3647_v59 = vmax.f32 %v3551_v22, 0.0  ;;  %v3763_v17 = vpack.c.bf16 %v3651_v52, %v3649_v36  ;;  %v18576_v28 = vld [vmem:[#allocation129_spill] sm:$0xff]  ;;  %v18579_v24 = vld [vmem:[#allocation92_spill] sm:$0xff]  ;;  %v18582_v36 = vld [vmem:[#allocation90_spill] sm:$0xff] }
 0x427   : > { %v3764_v18 = vpack.c.bf16 %v3652_v0, %v3650_v4  ;;  %v3156_v25 = vadd.f32 %v18568_v45, %v2554_v16  ;;  %v3544_v62 = vadd.f32 %v18569_v13, %v3160_v44  ;;  %v3644_v14 = vmax.f32 %v3548_v39, 0.0  ;;  %v18573_v16 = vld [vmem:[#allocation135_spill] sm:$0xff]  ;;  %v12483_v52 = vld [vmem:[%s18377_s1 + $0x78] ss:$12 sps:$4 sm:$0xff]   ;;  %v12488_v44 = vld [vmem:[%s18377_s1 + $0x94] ss:$12 sps:$4 sm:$0xff]  }
 0x428   : > { %v3762_v6 = vpack.c.bf16 %v3648_v49, %v3646_v10  ;;  %v2548_v51 = vadd.f32 %v14865_v27, %v18570_v37  ;;  %v3157_v32 = vadd.f32 %v18571_v26, %v2558_v21  ;;  %v3545_v11 = vadd.f32 %v18567_v35, %v3161_v7  ;;  %v18575_v27 = vld [vmem:[#allocation146_spill] sm:$0xff]  ;;  %v18580_v49 = vld [vmem:[#allocation131_spill] sm:$0xff]  ;;  %v18581_v7 = vld [vmem:[#allocation57_spill] sm:$0xff] }
 0x429   : > { %4406 = vmatprep.subr.bf16.mxu1 %v3764_v18  ;;  %4286 = vmatmul.mubr.bf16.gmra.mxu1 %v12480_v8  ;;  %v3645_v47 = vmax.f32 %v3549_v9, 0.0  ;;  %v2540_v33 = vadd.f32 %v14840_v61, %v18572_v12  ;;  %v3154_v30 = vadd.f32 %v18573_v16, %v14915_v2  ;;  %v3542_v55 = vadd.f32 %v18574_v58, %v3158_v54  ;;  %v18578_v2 = vld [vmem:[#allocation127_spill] sm:$0xff]  ;;  %v18583_v54 = vld [vmem:[#allocation130_spill] sm:$0xff]  ;;  %v18586_v45 = vld [vmem:[#allocation141_spill] sm:$0xff] }
 0x42a   : > { %4407 = vmatpush1.bf16.msra.mxu1 %v3763_v17  ;;  %4295 = vmatprep.mubr.bf16.mxu1 %v12485_v40  ;;  %v3642_v34 = vmax.f32 %v3546_v5, 0.0  ;;  %v3155_v20 = vadd.f32 %v18575_v27, %v2552_v48  ;;  %v3543_v29 = vadd.f32 %v18569_v13, %v3159_v56  ;;  %v3643_v41 = vmax.f32 %v3547_v50, 0.0  ;;  %v18588_v12 = vld [vmem:[#allocation54_spill] sm:$0xff] }
 0x42b   : > { %4408 = vmatprep.subr.bf16.mxu1 %v3762_v6  ;;  %v3761_v46 = vpack.c.bf16 %v3647_v59, %v3645_v47  ;;  %v3152_v57 = vadd.f32 %v18576_v28, %v14909_v63  ;;  %v3540_v22 = vadd.f32 %v18577_v23, %v3156_v25  ;;  %v3640_v61 = vmax.f32 %v3544_v62, 0.0  ;;  %v18585_v59 = vld [vmem:[#allocation151_spill] sm:$0xff]  ;;  %v12494_v28 = vld [vmem:[%s18377_s1 + $0xc4] ss:$12 sps:$4 sm:$0xff]  }
 0x42c   : > { %v3760_v4 = vpack.c.bf16 %v3644_v14, %v3642_v34  ;;  %v3153_v0 = vadd.f32 %v18578_v2, %v2548_v51  ;;  %v3541_v42 = vadd.f32 %v18574_v58, %v3157_v32  ;;  %v3641_v21 = vmax.f32 %v3545_v11, 0.0  ;;  %v18587_v14 = vld [vmem:[#allocation52_spill] sm:$0xff]  ;;  %v12491_v47 = vld [vmem:[%s18377_s1 + $0xac] ss:$12 sps:$4 sm:$0xff]  }
 0x42d   : > { %v2530_v39 = vadd.f32 %v14805_v3, %v18579_v24  ;;  %v3150_v8 = vadd.f32 %v18580_v49, %v2540_v33  ;;  %v3538_v9 = vadd.f32 %v18581_v7, %v3154_v30  ;;  %v3638_v63 = vmax.f32 %v3542_v55, 0.0  ;;  %v12486_v32 = vld [vmem:[%s18377_s1 + $0x90] ss:$12 sps:$4 sm:$0xff]   ;;  %v12500_v2 = vld [vmem:[%s18377_s1 + $0xf4] ss:$12 sps:$4 sm:$0xff]  }
 0x42e   : > { %4409 = vmatpush1.bf16.msra.mxu1 %v3761_v46  ;;  %v2524_v18 = vadd.f32 %v14790_v60, %v18582_v36  ;;  %v3539_v40 = vadd.f32 %v18577_v23, %v3155_v20  ;;  %v3639_v19 = vmax.f32 %v3543_v29, 0.0  ;;  %v3759_v48 = vpack.c.bf16 %v3643_v41, %v3641_v21  ;;  %v18584_v60 = vld [vmem:[#allocation88_spill] sm:$0xff]  ;;  %v18590_v46 = vld [vmem:[#allocation123_spill] sm:$0xff]  ;;  %v18591_v23 = vld [vmem:[#allocation61_spill] sm:$0xff] }
 0x42f   : > { %4410 = vmatprep.subr.bf16.mxu1 %v3760_v4  ;;  %v3148_v35 = vadd.f32 %v18583_v54, %v14905_v15  ;;  %v3536_v5 = vadd.f32 %v14719_v31, %v3152_v57  ;;  %v3636_v10 = vmax.f32 %v3540_v22, 0.0  ;;  %v3758_v3 = vpack.c.bf16 %v3640_v61, %v3638_v63  ;;  %v18589_v34 = vld [vmem:[#allocation124_spill] sm:$0xff]  ;;  %v12492_v22 = vld [vmem:[%s18377_s1 + $0xc0] ss:$12 sps:$4 sm:$0xff]   ;;  %v12497_v4 = vld [vmem:[%s18377_s1 + $0xdc] ss:$12 sps:$4 sm:$0xff]  }
 0x430   : > { %v3537_v56 = vadd.f32 %v18581_v7, %v3153_v0  ;;  %v3637_v50 = vmax.f32 %v3541_v42, 0.0  ;;  %v2520_v17 = vadd.f32 %v18585_v59, %v18584_v60  ;;  %v3146_v25 = vadd.f32 %v18586_v45, %v2530_v39  ;;  %v18592_v61 = vld [vmem:[#allocation150_spill] sm:$0xff]  ;;  %v12498_v0 = vld [vmem:[%s18377_s1 + $0xf0] ss:$12 sps:$4 sm:$0xff]   ;;  %v12503_v42 = vld [vmem:[%s18377_s1 + $0x10c] ss:$12 sps:$4 sm:$0xff]  }
 0x431   : > { %4296 = vmatmul.mubr.bf16.gmra.mxu1 %v12483_v52  ;;  %v3534_v13 = vadd.f32 %v14695_v1, %v3150_v8  ;;  %v3634_v15 = vmax.f32 %v3538_v9, 0.0  ;;  %v3635_v31 = vmax.f32 %v3539_v40, 0.0  ;;  %v3144_v6 = vadd.f32 %v18587_v14, %v2524_v18  ;;  %v12495_v52 = vld [vmem:[%s18377_s1 + $0xd8] ss:$12 sps:$4 sm:$0xff]   ;;  %v12501_v21 = vld [vmem:[%s18377_s1 + $0x108] ss:$12 sps:$4 sm:$0xff]  }
 0x432   : > { %4411 = vmatpush1.bf16.msra.mxu1 %v3759_v48  ;;  %4305 = vmatprep.mubr.bf16.mxu1 %v12488_v44  ;;  %v3757_v62 = vpack.c.bf16 %v3639_v19, %v3637_v50  ;;  %v3532_v37 = vadd.f32 %v14762_v43, %v3148_v35  ;;  %v3632_v51 = vmax.f32 %v3536_v5, 0.0  ;;  %v3633_v11 = vmax.f32 %v3537_v56, 0.0  ;;  %v12506_v44 = vld [vmem:[%s18377_s1 + $0x124] ss:$12 sps:$4 sm:$0xff]   ;;  %v12504_v24 = vld [vmem:[%s18377_s1 + $0x120] ss:$12 sps:$4 sm:$0xff]  }
 0x433   : > { %4412 = vmatprep.subr.bf16.mxu1 %v3758_v3  ;;  %v3756_v26 = vpack.c.bf16 %v3636_v10, %v3634_v15  ;;  %v3142_v33 = vadd.f32 %v18588_v12, %v2520_v17  ;;  %v3530_v16 = vadd.f32 %v14752_v38, %v3146_v25  ;;  %v3630_v1 = vmax.f32 %v3534_v13, 0.0  ;;  %v12489_v38 = vld [vmem:[%s18377_s1 + $0xa8] ss:$12 sps:$4 sm:$0xff]   ;;  %v12507_v49 = vld [vmem:[%s18377_s1 + $0x138] ss:$12 sps:$4 sm:$0xff]  }
 0x434   : > { %v3755_v30 = vpack.c.bf16 %v3635_v31, %v3633_v11  ;;  %v3528_v58 = vadd.f32 %v14797_v53, %v3144_v6  ;;  %v3628_v55 = vmax.f32 %v3532_v37, 0.0  ;;  %v12509_v39 = vld [vmem:[%s18377_s1 + $0x13c] ss:$12 sps:$4 sm:$0xff]   ;;  %v12512_v8 = vld [vmem:[%s18377_s1 + $0x154] ss:$12 sps:$4 sm:$0xff]   ;;  %v18593_v36 = vmov 0  }
 0x435   : > { %v3754_v43 = vpack.c.bf16 %v3632_v51, %v3630_v1  ;;  %v3526_v27 = vadd.f32 %v18589_v34, %v3142_v33  ;;  %v3626_v20 = vmax.f32 %v3530_v16, 0.0  ;;  %v12510_v7 = vld [vmem:[%s18377_s1 + $0x150] ss:$12 sps:$4 sm:$0xff]   ;;  %v12515_v9 = vld [vmem:[%s18377_s1 + $0x16c] ss:$12 sps:$4 sm:$0xff]   ;;  %v15083_v1 = vpop.permute.xlu0 %3949 }
 0x436   : > { %4413 = vmatpush1.bf16.msra.mxu1 %v3757_v62  ;;  %v3624_v29 = vmax.f32 %v3528_v58, 0.0  ;;  %v12513_v63 = vld [vmem:[%s18377_s1 + $0x168] ss:$12 sps:$4 sm:$0xff]   ;;  %v12517_v40 = vld [vmem:[%s18377_s1 + $0x20] ss:$12 sps:$4 sm:$0xff]   ;;  %18598 = vst [vmem:[#allocation63_spill] sm:$0xff] %v15083_v1 }
 0x437   : > { %4414 = vmatprep.subr.bf16.mxu1 %v3756_v26  ;;  %v3752_v41 = vpack.c.bf16 %v3628_v55, %v3626_v20  ;;  %v3622_v53 = vmax.f32 %v3526_v27, 0.0  ;;  %v12516_v18 = vld [vmem:[%s18377_s1 + $0x8] ss:$12 sps:$4 sm:$0xff]   ;;  %v12518_v19 = vld [vmem:[%s18377_s1 + $0x38] ss:$12 sps:$4 sm:$0xff]  }
 0x438   : > { %v12519_v48 = vld [vmem:[%s18377_s1 + $0x50] ss:$12 sps:$4 sm:$0xff]   ;;  %v12520_v54 = vld [vmem:[%s18377_s1 + $0x68] ss:$12 sps:$4 sm:$0xff]   ;;  %v12521_v35 = vld [vmem:[%s18377_s1 + $0x80] ss:$12 sps:$4 sm:$0xff]  }
 0x439   : > { %4306 = vmatmul.mubr.bf16.gmra.mxu1 %v12486_v32  ;;  %v3750_v57 = vpack.c.bf16 %v3624_v29, %v3622_v53  ;;  %v12522_v5 = vld [vmem:[%s18377_s1 + $0x98] ss:$12 sps:$4 sm:$0xff]   ;;  %v12523_v10 = vld [vmem:[%s18377_s1 + $0xb0] ss:$12 sps:$4 sm:$0xff]   ;;  %v12524_v3 = vld [vmem:[%s18377_s1 + $0xc8] ss:$12 sps:$4 sm:$0xff]   ;;  %v15095_v27 = vpop.permute.xlu0 %3869 }
 0x43a   : > { %4415 = vmatpush1.bf16.msra.mxu1 %v3755_v30  ;;  %4315 = vmatprep.mubr.bf16.mxu1 %v12491_v47  ;;  %v12525_v59 = vld [vmem:[%s18377_s1 + $0xe0] ss:$12 sps:$4 sm:$0xff]   ;;  %v12526_v15 = vld [vmem:[%s18377_s1 + $0xf8] ss:$12 sps:$4 sm:$0xff]   ;;  %v12527_v37 = vld [vmem:[%s18377_s1 + $0x110] ss:$12 sps:$4 sm:$0xff]  }
 0x43b   : > { %4416 = vmatprep.subr.bf16.mxu1 %v3754_v43  ;;  %v12528_v47 = vld [vmem:[%s18377_s1 + $0x128] ss:$12 sps:$4 sm:$0xff]   ;;  %v12529_v58 = vld [vmem:[%s18377_s1 + $0x140] ss:$12 sps:$4 sm:$0xff]   ;;  %v15090_v43 = vpop.permute.xlu1 %3954 }
 0x43c   : > { %18599 = vst [vmem:[#allocation158_spill] sm:$0xff] %v15090_v43 }
 0x43e   : > { %4417 = vmatpush1.bf16.msra.mxu1 %v18590_v46 }
 0x43f   : > { %4418 = vmatprep.subr.bf16.mxu1 %v3752_v41  ;;  %v12530_v41 = vld [vmem:[%s18377_s1 + $0x158] ss:$12 sps:$4 sm:$0xff]  }
 0x441   : > { %4316 = vmatmul.mubr.bf16.gmra.mxu1 %v12489_v38  ;;  %v15102_v38 = vpop.permute.xlu1 %3874 }
 0x442   : > { %4419 = vmatpush1.bf16.msra.mxu1 %v18591_v23  ;;  %4325 = vmatprep.mubr.bf16.mxu1 %v12494_v28  ;;  %v15106_v28 = vpop.permute.xlu0 %3939 }
 0x443   : > { %4420 = vmatprep.subr.bf16.mxu1 %v3750_v57  ;;  %18600 = vst [vmem:[#allocation145_spill] sm:$0xff] %v15106_v28 }
 0x445   : > { %v15113_v23 = vpop.permute.xlu1 %3944 }
 0x446   : > { %4421 = vmatpush1.bf16.msra.mxu1 %v18592_v61  ;;  %18601 = vst [vmem:[#allocation50_spill] sm:$0xff] %v15113_v23  ;;  %v12531_v61 = vld [vmem:[%s18377_s1 + $0x170] ss:$12 sps:$4 sm:$0xff]   ;;  %s18947_s1 = smov %s18946_s28 }
 0x449   : > { %4326 = vmatmul.mubr.bf16.gmra.mxu1 %v12492_v22 }
 0x44a   : > { %4335 = vmatprep.mubr.bf16.mxu1 %v12497_v4  ;;  %v15118_v4 = vpop.permute.xlu0 %3859 }
 0x451   : > { %4336 = vmatmul.mubr.bf16.gmra.mxu1 %v12495_v52 }
 0x452   : > { %4345 = vmatprep.mubr.bf16.mxu1 %v12500_v2 }
 0x459   : > { %4346 = vmatmul.mubr.bf16.gmra.mxu1 %v12498_v0  ;;  %v15124_v0 = vpop.permute.xlu1 %3864 }
 0x45a   : > { %4355 = vmatprep.mubr.bf16.mxu1 %v12503_v42 }
 0x461   : > { %4356 = vmatmul.mubr.bf16.gmra.mxu1 %v12501_v21  ;;  %v15128_v21 = vpop.permute.xlu0 %3929 }
 0x462   : > { %4365 = vmatprep.mubr.bf16.mxu1 %v12506_v44  ;;  %18602 = vst [vmem:[#allocation163_spill] sm:$0xff] %v15128_v21 }
 0x469   : > { %4366 = vmatmul.mubr.bf16.gmra.mxu1 %v12504_v24 }
 0x46a   : > { %4375 = vmatprep.mubr.bf16.mxu1 %v12509_v39  ;;  %v15134_v39 = vpop.permute.xlu1 %3934 }
 0x46b   : > { %18603 = vst [vmem:[#allocation121_spill] sm:$0xff] %v15134_v39 }
 0x471   : > { %4376 = vmatmul.mubr.bf16.gmra.mxu1 %v12507_v49 }
 0x472   : > { %4385 = vmatprep.mubr.bf16.mxu1 %v12512_v8  ;;  %v15138_v8 = vpop.permute.xlu0 %3849 }
 0x479   : > { %4386 = vmatmul.mubr.bf16.gmra.mxu1 %v12510_v7 }
 0x47a   : > { %4395 = vmatprep.mubr.bf16.mxu1 %v12515_v9 }
 0x481   : > { %4396 = vmatmul.mubr.bf16.gmra.mxu1 %v12513_v63  ;;  %v15144_v63 = vpop.permute.xlu1 %3854 }
 0x482   : > { %4438 = vmatprep.mubr.bf16.mxu1 %v18593_v36 }
 0x489   : > { %4439 = vmatmul.mubr.bf16.vlgmr.msra.gmra.mxu1 %v12516_v18 }
 0x48a   : > { %4448 = vmatprep.mubr.bf16.mxu1 %v18593_v36 }
 0x491   : > { %4449 = vmatmul.mubr.bf16.gmra.mxu1 %v12517_v40  ;;  %v15148_v40 = vpop.permute.xlu0 %3919 }
 0x492   : > { %4458 = vmatprep.mubr.bf16.mxu1 %v18593_v36  ;;  %18605 = vst [vmem:[#allocation65_spill] sm:$0xff] %v15148_v40 }
 0x499   : > { %4459 = vmatmul.mubr.bf16.gmra.mxu1 %v12518_v19 }
 0x49a   : > { %4468 = vmatprep.mubr.bf16.mxu1 %v18593_v36 }
 0x4a1   : > { %4469 = vmatmul.mubr.bf16.gmra.mxu1 %v12519_v48 }
 0x4a2   : > { %4478 = vmatprep.mubr.bf16.mxu1 %v18593_v36 }
 0x4a9   : > { %4479 = vmatmul.mubr.bf16.gmra.mxu1 %v12520_v54  ;;  %v15154_v54 = vpop.permute.xlu1 %3924 }
 0x4aa   : > { %4488 = vmatprep.mubr.bf16.mxu1 %v18593_v36  ;;  %18606 = vst [vmem:[#allocation120_spill] sm:$0xff] %v15154_v54 }
 0x4b1   : > { %4489 = vmatmul.mubr.bf16.gmra.mxu1 %v12521_v35 }
 0x4b2   : > { %4498 = vmatprep.mubr.bf16.mxu1 %v18593_v36 }
 0x4b9   : > { %4499 = vmatmul.mubr.bf16.gmra.mxu1 %v12522_v5  ;;  %v15158_v5 = vpop.permute.xlu0 %3839 }
 0x4ba   : > { %4508 = vmatprep.mubr.bf16.mxu1 %v18593_v36 }
 0x4c1   : > { %4509 = vmatmul.mubr.bf16.gmra.mxu1 %v12523_v10 }
 0x4c2   : > { %4518 = vmatprep.mubr.bf16.mxu1 %v18593_v36 }
 0x4c9   : > { %v15038_v56 = vpop.f32.mrf.mxu1  ;;  %4519 = vmatmul.mubr.bf16.gmra.mxu1 %v12524_v3 }
 0x4ca   : > { %4528 = vmatprep.mubr.bf16.mxu1 %v18593_v36 }
 0x4cb   : > { %v15041_v50 = vpop.f32.mrf.mxu1 }
 0x4cd   : > { %v15043_v60 = vpop.f32.mrf.mxu1 }
 0x4cf   : > { %v15046_v17 = vpop.f32.mrf.mxu1 }
 0x4d0   : > { %18594 = vst [vmem:[#allocation155_spill] sm:$0xff] %v15046_v17 }
 0x4d1   : > { %v15048_v45 = vpop.f32.mrf.mxu1  ;;  %4529 = vmatmul.mubr.bf16.gmra.mxu1 %v12525_v59  ;;  %v15164_v59 = vpop.permute.xlu1 %3844 }
 0x4d2   : > { %4538 = vmatprep.mubr.bf16.mxu1 %v18593_v36 }
 0x4d3   : > { %v15051_v25 = vpop.f32.mrf.mxu1 }
 0x4d5   : > { %v15053_v13 = vpop.f32.mrf.mxu1 }
 0x4d7   : > { %v15056_v31 = vpop.f32.mrf.mxu1 }
 0x4d8   : > { %18595 = vst [vmem:[#allocation140_spill] sm:$0xff] %v15056_v31 }
 0x4d9   : > { %v15058_v62 = vpop.f32.mrf.mxu1  ;;  %4539 = vmatmul.mubr.bf16.gmra.mxu1 %v12526_v15 }
 0x4da   : > { %4548 = vmatprep.mubr.bf16.mxu1 %v18593_v36 }
 0x4db   : > { %v15061_v14 = vpop.f32.mrf.mxu1 }
 0x4dd   : > { %v15063_v6 = vpop.f32.mrf.mxu1 }
 0x4df   : > { %v15066_v51 = vpop.f32.mrf.mxu1 }
 0x4e0   : > { %18596 = vst [vmem:[#allocation122_spill] sm:$0xff] %v15066_v51 }
 0x4e1   : > { %v15068_v26 = vpop.f32.mrf.mxu1  ;;  %4549 = vmatmul.mubr.bf16.gmra.mxu1 %v12527_v37  ;;  %v15168_v37 = vpop.permute.xlu0 %3909 }
 0x4e2   : > { %4558 = vmatprep.mubr.bf16.mxu1 %v18593_v36  ;;  %18611 = vst [vmem:[#allocation166_spill] sm:$0xff] %v15168_v37 }
 0x4e3   : > { %v15071_v32 = vpop.f32.mrf.mxu1 }
 0x4e5   : > { %v15073_v11 = vpop.f32.mrf.mxu1 }
 0x4e7   : > { %v15076_v12 = vpop.f32.mrf.mxu1 }
 0x4e8   : > { %18597 = vst [vmem:[#allocation153_spill] sm:$0xff] %v15076_v12 }
 0x4e9   : > { %v15078_v33 = vpop.f32.mrf.mxu1  ;;  %4559 = vmatmul.mubr.bf16.gmra.mxu1 %v12528_v47 }
 0x4ea   : > { %4568 = vmatprep.mubr.bf16.mxu1 %v18593_v36 }
 0x4eb   : > { %v15081_v16 = vpop.f32.mrf.mxu1 }
 0x4ed   : > { %v15085_v30 = vpop.f32.mrf.mxu1 }
 0x4ef   : > { %v15088_v55 = vpop.f32.mrf.mxu1 }
 0x4f1   : > { %v15092_v34 = vpop.f32.mrf.mxu1  ;;  %4569 = vmatmul.mubr.bf16.gmra.mxu1 %v12529_v58 }
 0x4f2   : > { %4578 = vmatprep.mubr.bf16.mxu1 %v18593_v36 }
 0x4f3   : > { %v15097_v20 = vpop.f32.mrf.mxu1 }
 0x4f5   : > { %v15099_v29 = vpop.f32.mrf.mxu1 }
 0x4f7   : > { %v15104_v46 = vpop.f32.mrf.mxu1 }
 0x4f9   : > { %v15108_v53 = vpop.f32.mrf.mxu1  ;;  %4579 = vmatmul.mubr.bf16.gmra.mxu1 %v12530_v41  ;;  %v15174_v41 = vpop.permute.xlu1 %3914 }
 0x4fa   : > { %4588 = vmatprep.mubr.bf16.mxu1 %v18593_v36  ;;  %18614 = vst [vmem:[#allocation172_spill] sm:$0xff] %v15174_v41  ;;  %v15178_v36 = vpop.permute.xlu0 %3829 }
 0x4fb   : > { %v15111_v57 = vpop.f32.mrf.mxu1 }
 0x4fd   : > { %v15115_v22 = vpop.f32.mrf.mxu1  ;;  %v15184_v31 = vpop.permute.xlu1 %3834 }
 0x4ff   : > { %v15120_v52 = vpop.f32.mrf.mxu1 }
 0x501   : > { %v15122_v2 = vpop.f32.mrf.mxu1  ;;  %4589 = vmatmul.mubr.bf16.gmra.mxu1 %v12531_v61 }
 0x503   : > { %v15126_v42 = vpop.f32.mrf.mxu1 }
 0x505   : > { %v15130_v44 = vpop.f32.mrf.mxu1 }
 0x507   : > { %v15132_v24 = vpop.f32.mrf.mxu1 }
 0x509   : > { %v15136_v49 = vpop.f32.mrf.mxu1 }
 0x50b   : > { %v15140_v7 = vpop.f32.mrf.mxu1 }
 0x50d   : > { %v15142_v9 = vpop.f32.mrf.mxu1 }
 0x50f   : > { %v15146_v18 = vpop.f32.mrf.mxu1 }
 0x510   : > { %18604 = vst [vmem:[#allocation157_spill] sm:$0xff] %v15146_v18 }
 0x511   : > { %v15150_v19 = vpop.f32.mrf.mxu1 }
 0x513   : > { %v15152_v48 = vpop.f32.mrf.mxu1 }
 0x515   : > { %v15156_v35 = vpop.f32.mrf.mxu1 }
 0x516   : > { %18607 = vst [vmem:[#allocation162_spill] sm:$0xff] %v15156_v35 }
 0x517   : > { %v15160_v10 = vpop.f32.mrf.mxu1 }
 0x518   : > { %18608 = vst [vmem:[#allocation149_spill] sm:$0xff] %v15160_v10 }
 0x519   : > { %v15162_v3 = vpop.f32.mrf.mxu1 }
 0x51a   : > { %18609 = vst [vmem:[#allocation119_spill] sm:$0xff] %v15162_v3  ;;  %v15188_v3 = vpop.permute.xlu0 %3899 }
 0x51b   : > { %v15166_v15 = vpop.f32.mrf.mxu1  ;;  %18619 = vst [vmem:[#allocation70_spill] sm:$0xff] %v15188_v3 }
 0x51c   : > { %18610 = vst [vmem:[#allocation160_spill] sm:$0xff] %v15166_v15 }
 0x51d   : > { %v15170_v47 = vpop.f32.mrf.mxu1 }
 0x51e   : > { %18612 = vst [vmem:[#allocation165_spill] sm:$0xff] %v15170_v47  ;;  %v15194_v47 = vpop.permute.xlu1 %3904 }
 0x51f   : > { %v15172_v58 = vpop.f32.mrf.mxu1  ;;  %18622 = vst [vmem:[#allocation60_spill] sm:$0xff] %v15194_v47 }
 0x520   : > { %18613 = vst [vmem:[#allocation177_spill] sm:$0xff] %v15172_v58 }
 0x521   : > { %v15176_v61 = vpop.f32.mrf.mxu1 }
 0x522   : > { %18615 = vst [vmem:[#allocation169_spill] sm:$0xff] %v15176_v61  ;;  %v3820_v61 = vpop.permute.xlu0 %3819  ;;  %v15202_v12 = vpop.permute.xlu1 %3824 }
 0x523   : > { %v15180_v17 = vpop.f32.mrf.mxu1 }
 0x524   : > { %18616 = vst [vmem:[#allocation62_spill] sm:$0xff] %v15180_v17 }
 0x525   : > { %v15182_v18 = vpop.f32.mrf.mxu1 }
 0x526   : > { %18617 = vst [vmem:[#allocation66_spill] sm:$0xff] %v15182_v18  ;;  %v15206_v18 = vpop.permute.xlu0 %3889  ;;  %v15212_v41 = vpop.permute.xlu1 %3894 }
 0x527   : > { %v15186_v10 = vpop.f32.mrf.mxu1 }
 0x528   : > { %18618 = vst [vmem:[#allocation68_spill] sm:$0xff] %v15186_v10 }
 0x529   : > { %v15190_v15 = vpop.f32.mrf.mxu1 }
 0x52a   : > { %18620 = vst [vmem:[#allocation71_spill] sm:$0xff] %v15190_v15  ;;  %v3810_v1 = vpop.permute.xlu0 %3809  ;;  %v15220_v39 = vpop.permute.xlu1 %3814 }
 0x52b   : > { %v15192_v51 = vpop.f32.mrf.mxu1 }
 0x52c   : > { %18621 = vst [vmem:[#allocation58_spill] sm:$0xff] %v15192_v51 }
 0x52d   : > { %v15196_v58 = vpop.f32.mrf.mxu1 }
 0x52e   : > { %18623 = vst [vmem:[#allocation72_spill] sm:$0xff] %v15196_v58 }
 0x52f   : > { %v15198_v37 = vpop.f32.mrf.mxu1 }
 0x530   : > { %18624 = vst [vmem:[#allocation142_spill] sm:$0xff] %v15198_v37 }
 0x531   : > { %v15200_v17 = vpop.f32.mrf.mxu1 }
 0x532   : > { %18625 = vst [vmem:[#allocation64_spill] sm:$0xff] %v15200_v17 }
 0x533   : > { %v15204_v43 = vpop.f32.mrf.mxu1 }
 0x534   : > { %18626 = vst [vmem:[#allocation152_spill] sm:$0xff] %v15204_v43  ;;  %v15224_v43 = vpop.permute.xlu0 %3879 }
 0x535   : > { %v15208_v3 = vpop.f32.mrf.mxu1 }
 0x536   : > { %18627 = vst [vmem:[#allocation82_spill] sm:$0xff] %v15208_v3 }
 0x537   : > { %v15210_v10 = vpop.f32.mrf.mxu1 }
 0x538   : > { %18628 = vst [vmem:[#allocation67_spill] sm:$0xff] %v15210_v10  ;;  %v15230_v10 = vpop.permute.xlu1 %3884 }
 0x539   : > { %v15214_v47 = vpop.f32.mrf.mxu1 }
 0x53a   : > { %18629 = vst [vmem:[#allocation156_spill] sm:$0xff] %v15214_v47  ;;  %v3800_v47 = vpop.permute.xlu0 %3799 }
 0x53b   : > { %v15216_v23 = vpop.f32.mrf.mxu1  ;;  %v4250_v54 = vadd.f32 %v15041_v50, %v3800_v47  ;;  %v4260_v50 = vadd.f32 %v15051_v25, %v3810_v1 }
 0x53c   : > { %18630 = vst [vmem:[#allocation83_spill] sm:$0xff] %v15216_v23  ;;  %v4248_v23 = vadd.f32 %v15038_v56, %v3800_v47  ;;  %v4258_v56 = vadd.f32 %v15048_v45, %v3810_v1  ;;  %v4262_v47 = vadd.f32 %v15053_v13, %v15220_v39  ;;  %v4270_v45 = vadd.f32 %v15061_v14, %v3820_v61 }
 0x53d   : > { %v15218_v28 = vpop.f32.mrf.mxu1  ;;  %v4272_v1 = vadd.f32 %v15063_v6, %v15202_v12  ;;  %v4280_v14 = vadd.f32 %v15071_v32, %v15178_v36  ;;  %v4282_v6 = vadd.f32 %v15073_v11, %v15184_v31  ;;  %v4292_v11 = vadd.f32 %v15085_v30, %v15164_v59 }
 0x53e   : > { %18631 = vst [vmem:[#allocation84_spill] sm:$0xff] %v15218_v28 }
 0x53f   : > { %v15222_v17 = vpop.f32.mrf.mxu1 }
 0x540   : > { %18632 = vst [vmem:[#allocation69_spill] sm:$0xff] %v15222_v17  ;;  %v15240_v17 = vpop.permute.xlu1 %3804 }
 0x541   : > { %v15226_v21 = vpop.f32.mrf.mxu1 }
 0x542   : > { %18633 = vst [vmem:[#allocation161_spill] sm:$0xff] %v15226_v21 }
 0x543   : > { %v15228_v3 = vpop.f32.mrf.mxu1 }
 0x544   : > { %18634 = vst [vmem:[#allocation164_spill] sm:$0xff] %v15228_v3  ;;  %v4252_v3 = vadd.f32 %v15043_v60, %v15240_v17 }
 0x545   : > { %v15232_v37 = vpop.f32.mrf.mxu1 }
 0x546   : > { %18635 = vst [vmem:[#allocation80_spill] sm:$0xff] %v15232_v37 }
 0x547   : > { %v15234_v58 = vpop.f32.mrf.mxu1 }
 0x548   : > { %18636 = vst [vmem:[#allocation167_spill] sm:$0xff] %v15234_v58 }
 0x549   : > { %v4440_v28 = vpop.f32.mrf.mxu1 }
 0x54a   : > { %v15238_v51 = vadd.f32 %v4440_v28, %v4248_v23 }
 0x54b   : > { %v4442_v15 = vpop.f32.mrf.mxu1 }
 0x54c   : > { %18637 = vst [vmem:[#allocation73_spill] sm:$0xff] %v15238_v51  ;;  %v15244_v21 = vadd.f32 %v4442_v15, %v4250_v54 }
 0x54d   : > { %v4444_v40 = vpop.f32.mrf.mxu1 }
 0x54e   : > { %18638 = vst [vmem:[#allocation81_spill] sm:$0xff] %v15244_v21  ;;  %v15246_v37 = vadd.f32 %v4444_v40, %v4252_v3  ;;  %v4268_v3 = vadd.f32 %v15058_v62, %v3820_v61 }
 0x54f   : > { %v15248_v35 = vpop.f32.mrf.mxu1 }
 0x550   : > { %18639 = vst [vmem:[#allocation85_spill] sm:$0xff] %v15246_v37 }
 0x551   : > { %v4450_v58 = vpop.f32.mrf.mxu1 }
 0x552   : > { %v15252_v28 = vadd.f32 %v4450_v58, %v4258_v56 }
 0x553   : > { %v4452_v23 = vpop.f32.mrf.mxu1 }
 0x554   : > { %18640 = vst [vmem:[#allocation74_spill] sm:$0xff] %v15252_v28  ;;  %v15256_v51 = vadd.f32 %v4452_v23, %v4260_v50  ;;  %v4278_v23 = vadd.f32 %v15068_v26, %v15178_v36  ;;  %v4288_v26 = vadd.f32 %v15078_v33, %v15158_v5  ;;  %v4290_v36 = vadd.f32 %v15081_v16, %v15158_v5 }
 0x555   : > { %v4454_v60 = vpop.f32.mrf.mxu1  ;;  %v4298_v16 = vadd.f32 %v15092_v34, %v15138_v8  ;;  %v4302_v34 = vadd.f32 %v15099_v29, %v15144_v63  ;;  %v4308_v29 = vadd.f32 %v15108_v53, %v15118_v4  ;;  %v4312_v53 = vadd.f32 %v15115_v22, %v15124_v0 }
 0x556   : > { %18641 = vst [vmem:[#allocation78_spill] sm:$0xff] %v15256_v51  ;;  %v15258_v54 = vadd.f32 %v4454_v60, %v4262_v47  ;;  %v4318_v22 = vadd.f32 %v15122_v2, %v15095_v27  ;;  %v4322_v2 = vadd.f32 %v15130_v44, %v15102_v38  ;;  %v4328_v44 = vadd.f32 %v15136_v49, %v15224_v43 }
 0x557   : > { %v15260_v40 = vpop.f32.mrf.mxu1  ;;  %v4332_v49 = vadd.f32 %v15142_v9, %v15230_v10  ;;  %v4340_v9 = vadd.f32 %v15152_v48, %v15206_v18 }
 0x558   : > { %18642 = vst [vmem:[#allocation188_spill] sm:$0xff] %v15258_v54 }
 0x559   : > { %v4460_v15 = vpop.f32.mrf.mxu1 }
 0x55a   : > { %v15264_v21 = vadd.f32 %v4460_v15, %v4268_v3 }
 0x55b   : > { %v4462_v25 = vpop.f32.mrf.mxu1 }
 0x55c   : > { %v15268_v58 = vadd.f32 %v4462_v25, %v4270_v45 }
 0x55d   : > { %v4464_v13 = vpop.f32.mrf.mxu1 }
 0x55e   : > { %v15270_v56 = vadd.f32 %v4464_v13, %v4272_v1 }
 0x55f   : > { %v15272_v50 = vpop.f32.mrf.mxu1 }
 0x560   : > { %18643 = vst [vmem:[#allocation79_spill] sm:$0xff] %v15270_v56 }
 0x561   : > { %v4470_v62 = vpop.f32.mrf.mxu1 }
 0x562   : > { %v15278_v61 = vadd.f32 %v4470_v62, %v4278_v23  ;;  %v4294_v62 = vadd.f32 %v15088_v55, %v15164_v59  ;;  %v4300_v55 = vadd.f32 %v15097_v20, %v15138_v8  ;;  %v4304_v20 = vadd.f32 %v15104_v46, %v15144_v63 }
 0x563   : > { %v4472_v47 = vpop.f32.mrf.mxu1  ;;  %v4310_v46 = vadd.f32 %v15111_v57, %v15118_v4  ;;  %v4314_v57 = vadd.f32 %v15120_v52, %v15124_v0  ;;  %v4320_v52 = vadd.f32 %v15126_v42, %v15095_v27  ;;  %v4324_v27 = vadd.f32 %v15132_v24, %v15102_v38 }
 0x564   : > { %v15282_v60 = vadd.f32 %v4472_v47, %v4280_v14  ;;  %v4330_v38 = vadd.f32 %v15140_v7, %v15224_v43 }
 0x565   : > { %v4474_v3 = vpop.f32.mrf.mxu1 }
 0x566   : > { %v15284_v15 = vadd.f32 %v4474_v3, %v4282_v6 }
 0x567   : > { %v15286_v45 = vpop.f32.mrf.mxu1 }
 0x569   : > { %v4480_v25 = vpop.f32.mrf.mxu1 }
 0x56a   : > { %v15292_v32 = vadd.f32 %v4480_v25, %v4288_v26 }
 0x56b   : > { %v4482_v1 = vpop.f32.mrf.mxu1 }
 0x56c   : > { %18644 = vst [vmem:[#allocation190_spill] sm:$0xff] %v15292_v32  ;;  %v15296_v13 = vadd.f32 %v4482_v1, %v4290_v36  ;;  %v17989_v14 = vmax.f32 %v15292_v32, 0.0 }
 0x56d   : > { %v4484_v23 = vpop.f32.mrf.mxu1 }
 0x56e   : > { %18645 = vst [vmem:[#allocation86_spill] sm:$0xff] %v15296_v13  ;;  %v17988_v33 = vmax.f32 %v15296_v13, 0.0  ;;  %v15302_v47 = vadd.f32 %v4484_v23, %v4292_v11 }
 0x56f   : > { %v4486_v6 = vpop.f32.mrf.mxu1 }
 0x570   : > { %18646 = vst [vmem:[#allocation75_spill] sm:$0xff] %v15302_v47  ;;  %v15306_v5 = vadd.f32 %v4486_v6, %v4294_v62  ;;  %v4687_v30 = vadd.f32 %v17988_v33, %v17989_v14  ;;  %v17985_v59 = vmax.f32 %v15302_v47, 0.0 }
 0x571   : > { %v4490_v3 = vpop.f32.mrf.mxu1 }
 0x572   : > { %18647 = vst [vmem:[#allocation76_spill] sm:$0xff] %v15306_v5  ;;  %v17986_v26 = vmax.f32 %v15306_v5, 0.0  ;;  %v15316_v25 = vadd.f32 %v4490_v3, %v4298_v16  ;;  %4688 = vadd.xlane.f32.xlu1 %v4687_v30  ;;  %v18668_v5 = vld [vmem:[#allocation142_spill] sm:$0xff] }
 0x573   : > { %v4492_v36 = vpop.f32.mrf.mxu1 }
 0x574   : > { %18648 = vst [vmem:[#allocation77_spill] sm:$0xff] %v15316_v25  ;;  %v15320_v1 = vadd.f32 %v4492_v36, %v4300_v55  ;;  %v4690_v11 = vadd.f32 %v17986_v26, %v17985_v59  ;;  %v17993_v8 = vmax.f32 %v15316_v25, 0.0 }
 0x575   : > { %v4494_v23 = vpop.f32.mrf.mxu1 }
 0x576   : > { %18649 = vst [vmem:[#allocation183_spill] sm:$0xff] %v15320_v1  ;;  %v17992_v62 = vmax.f32 %v15320_v1, 0.0  ;;  %v15330_v6 = vadd.f32 %v4494_v23, %v4302_v34  ;;  %4691 = vadd.xlane.f32.xlu0 %v4690_v11  ;;  %v18676_v1 = vld [vmem:[#allocation82_spill] sm:$0xff] }
 0x577   : > { %v4496_v16 = vpop.f32.mrf.mxu1 }
 0x578   : > { %18650 = vst [vmem:[#allocation185_spill] sm:$0xff] %v15330_v6  ;;  %v15334_v30 = vadd.f32 %v4496_v16, %v4304_v20  ;;  %v4693_v3 = vadd.f32 %v17992_v62, %v17993_v8  ;;  %v17987_v63 = vmax.f32 %v15330_v6, 0.0  ;;  %v18663_v8 = vld [vmem:[#allocation58_spill] sm:$0xff] }
 0x579   : > { %v4500_v55 = vpop.f32.mrf.mxu1 }
 0x57a   : > { %18651 = vst [vmem:[#allocation176_spill] sm:$0xff] %v15334_v30  ;;  %v17990_v36 = vmax.f32 %v15334_v30, 0.0  ;;  %v15344_v34 = vadd.f32 %v4500_v55, %v4308_v29  ;;  %4694 = vadd.xlane.f32.xlu1 %v4693_v3 }
 0x57b   : > { %v4502_v11 = vpop.f32.mrf.mxu1 }
 0x57c   : > { %v15348_v23 = vadd.f32 %v4502_v11, %v4310_v46  ;;  %v4696_v20 = vadd.f32 %v17990_v36, %v17987_v63  ;;  %v17998_v4 = vmax.f32 %v15344_v34, 0.0 }
 0x57d   : > { %v4504_v16 = vpop.f32.mrf.mxu1 }
 0x57e   : > { %v17997_v29 = vmax.f32 %v15348_v23, 0.0  ;;  %v15358_v3 = vadd.f32 %v4504_v16, %v4312_v53  ;;  %4697 = vadd.xlane.f32.xlu0 %v4696_v20 }
 0x57f   : > { %v4506_v55 = vpop.f32.mrf.mxu1 }
 0x580   : > { %18652 = vst [vmem:[#allocation87_spill] sm:$0xff] %v15358_v3  ;;  %v15362_v46 = vadd.f32 %v4506_v55, %v4314_v57  ;;  %v4699_v11 = vadd.f32 %v17997_v29, %v17998_v4  ;;  %v17991_v0 = vmax.f32 %v15358_v3, 0.0  ;;  %v18665_v29 = vld [vmem:[#allocation120_spill] sm:$0xff] }
 0x581   : > { %v4510_v59 = vpop.f32.mrf.mxu1  ;;  %v18666_v4 = vld [vmem:[#allocation72_spill] sm:$0xff]  ;;  %v4374_v6 = vadd.f32 %v18668_v5, %v18665_v29 }
 0x582   : > { %18653 = vst [vmem:[#allocation168_spill] sm:$0xff] %v15362_v46  ;;  %v17994_v53 = vmax.f32 %v15362_v46, 0.0  ;;  %v15372_v20 = vadd.f32 %v4510_v59, %v4318_v22  ;;  %4700 = vadd.xlane.f32.xlu1 %v4699_v11  ;;  %v18673_v5 = vld [vmem:[#allocation152_spill] sm:$0xff] }
 0x583   : > { %v4512_v16 = vpop.f32.mrf.mxu1 }
 0x584   : > { %v15376_v57 = vadd.f32 %v4512_v16, %v4320_v52  ;;  %v4702_v55 = vadd.f32 %v17994_v53, %v17991_v0  ;;  %v18000_v42 = vmax.f32 %v15372_v20, 0.0 }
 0x585   : > { %v4514_v26 = vpop.f32.mrf.mxu1 }
 0x586   : > { %v17999_v59 = vmax.f32 %v15376_v57, 0.0  ;;  %v15386_v22 = vadd.f32 %v4514_v26, %v4322_v2  ;;  %4703 = vadd.xlane.f32.xlu0 %v4702_v55 }
 0x587   : > { %v4516_v11 = vpop.f32.mrf.mxu1 }
 0x588   : > { %v4705_v52 = vadd.f32 %v17999_v59, %v18000_v42  ;;  %v15394_v16 = vadd.f32 %v4516_v11, %v4324_v27  ;;  %v17996_v24 = vmax.f32 %v15386_v22, 0.0  ;;  %v4372_v59 = vadd.f32 %v18666_v4, %v18665_v29 }
 0x589   : > { %v4520_v63 = vpop.f32.mrf.mxu1 }
 0x58a   : > { %v17995_v26 = vmax.f32 %v15394_v16, 0.0  ;;  %v15400_v2 = vadd.f32 %v4520_v63, %v4328_v44  ;;  %4706 = vadd.xlane.f32.xlu0 %v4705_v52  ;;  %v4338_v63 = vadd.f32 %v15150_v19, %v15206_v18 }
 0x58b   : > { %v4522_v55 = vpop.f32.mrf.mxu1 }
 0x58c   : > { %18654 = vst [vmem:[#allocation178_spill] sm:$0xff] %v15400_v2  ;;  %v15404_v33 = vadd.f32 %v4522_v55, %v4330_v38  ;;  %v4708_v27 = vadd.f32 %v17995_v26, %v17996_v24  ;;  %v18658_v55 = vld [vmem:[#allocation162_spill] sm:$0xff] }
 0x58d   : > { %v4524_v11 = vpop.f32.mrf.mxu1  ;;  %v4342_v14 = vadd.f32 %v18658_v55, %v15212_v41 }
 0x58e   : > { %18655 = vst [vmem:[#allocation180_spill] sm:$0xff] %v15404_v33  ;;  %v15410_v43 = vadd.f32 %v4524_v11, %v4332_v49  ;;  %4709 = vadd.xlane.f32.xlu0 %v4708_v27 }
 0x58f   : > { %v15412_v7 = vpop.f32.mrf.mxu1 }
 0x590   : > { %18656 = vst [vmem:[#allocation174_spill] sm:$0xff] %v15410_v43 }
 0x591   : > { %v4530_v44 = vpop.f32.mrf.mxu1 }
 0x592   : > { %v15418_v52 = vadd.f32 %v4530_v44, %v4338_v63 }
 0x593   : > { %v4532_v38 = vpop.f32.mrf.mxu1 }
 0x594   : > { %18657 = vst [vmem:[#allocation181_spill] sm:$0xff] %v15418_v52  ;;  %v15422_v36 = vadd.f32 %v4532_v38, %v4340_v9  ;;  %v18662_v38 = vld [vmem:[#allocation71_spill] sm:$0xff] }
 0x595   : > { %v4534_v49 = vpop.f32.mrf.mxu1 }
 0x596   : > { %18659 = vst [vmem:[#allocation170_spill] sm:$0xff] %v15422_v36  ;;  %v15424_v11 = vadd.f32 %v4534_v49, %v4342_v14  ;;  %v18661_v14 = vld [vmem:[#allocation65_spill] sm:$0xff] }
 0x597   : > { %v15426_v27 = vpop.f32.mrf.mxu1  ;;  %v4368_v55 = vadd.f32 %v18662_v38, %v18661_v14  ;;  %v4370_v53 = vadd.f32 %v18663_v8, %v18661_v14  ;;  %v18670_v8 = vld [vmem:[#allocation163_spill] sm:$0xff]  ;;  %v18671_v14 = vld [vmem:[#allocation64_spill] sm:$0xff] }
 0x598   : > { %18660 = vst [vmem:[#allocation173_spill] sm:$0xff] %v15424_v11  ;;  %v4380_v29 = vadd.f32 %v18673_v5, %v18670_v8 }
 0x599   : > { %v15428_v0 = vpop.f32.mrf.mxu1 }
 0x59b   : > { %v15430_v19 = vpop.f32.mrf.mxu1 }
 0x59d   : > { %v15432_v62 = vpop.f32.mrf.mxu1 }
 0x59f   : > { %v15434_v18 = vpop.f32.mrf.mxu1 }
 0x5a1   : > { %v15436_v48 = vpop.f32.mrf.mxu1 }
 0x5a3   : > { %v15438_v63 = vpop.f32.mrf.mxu1 }
 0x5a5   : > { %v15440_v44 = vpop.f32.mrf.mxu1 }
 0x5a7   : > { %v15442_v9 = vpop.f32.mrf.mxu1 }
 0x5a9   : > { %v4560_v49 = vpop.f32.mrf.mxu1 }
 0x5aa   : > { %v15448_v26 = vadd.f32 %v4560_v49, %v4368_v55  ;;  %v4378_v55 = vadd.f32 %v18671_v14, %v18670_v8  ;;  %v18675_v14 = vld [vmem:[#allocation121_spill] sm:$0xff]  ;;  %v18678_v8 = vld [vmem:[#allocation67_spill] sm:$0xff] }
 0x5ab   : > { %v4562_v24 = vpop.f32.mrf.mxu1  ;;  %v4384_v5 = vadd.f32 %v18678_v8, %v18675_v14 }
 0x5ac   : > { %18664 = vst [vmem:[#allocation175_spill] sm:$0xff] %v15448_v26  ;;  %v15452_v42 = vadd.f32 %v4562_v24, %v4370_v53  ;;  %v18014_v13 = vmax.f32 %v15448_v26, 0.0  ;;  %v4382_v26 = vadd.f32 %v18676_v1, %v18675_v14  ;;  %v18680_v1 = vld [vmem:[#allocation145_spill] sm:$0xff]  ;;  %v18683_v14 = vld [vmem:[#allocation83_spill] sm:$0xff] }
 0x5ad   : > { %v4564_v47 = vpop.f32.mrf.mxu1  ;;  %v4390_v8 = vadd.f32 %v18683_v14, %v18680_v1 }
 0x5ae   : > { %18667 = vst [vmem:[#allocation179_spill] sm:$0xff] %v15452_v42  ;;  %v18011_v38 = vmax.f32 %v15452_v42, 0.0  ;;  %v15458_v32 = vadd.f32 %v4564_v47, %v4372_v59 }
 0x5af   : > { %v4566_v30 = vpop.f32.mrf.mxu1 }
 0x5b0   : > { %18669 = vst [vmem:[#allocation171_spill] sm:$0xff] %v15458_v32  ;;  %v4735_v4 = vadd.f32 %v18011_v38, %v18014_v13  ;;  %v15466_v53 = vadd.f32 %v4566_v30, %v4374_v6  ;;  %v18012_v49 = vmax.f32 %v15458_v32, 0.0 }
 0x5b1   : > { %v4570_v24 = vpop.f32.mrf.mxu1 }
 0x5b2   : > { %18672 = vst [vmem:[#allocation89_spill] sm:$0xff] %v15466_v53  ;;  %v18013_v47 = vmax.f32 %v15466_v53, 0.0  ;;  %v15472_v59 = vadd.f32 %v4570_v24, %v4378_v55  ;;  %4736 = vadd.xlane.f32.xlu1 %v4735_v4  ;;  %v18686_v53 = vld [vmem:[#allocation84_spill] sm:$0xff] }
 0x5b3   : > { %v4572_v3 = vpop.f32.mrf.mxu1 }
 0x5b4   : > { %18674 = vst [vmem:[#allocation184_spill] sm:$0xff] %v15472_v59  ;;  %v15476_v25 = vadd.f32 %v4572_v3, %v4380_v29  ;;  %v4738_v6 = vadd.f32 %v18013_v47, %v18012_v49  ;;  %v18022_v38 = vmax.f32 %v15472_v59, 0.0  ;;  %v18681_v3 = vld [vmem:[#allocation156_spill] sm:$0xff] }
 0x5b5   : > { %v4574_v30 = vpop.f32.mrf.mxu1  ;;  %v4388_v29 = vadd.f32 %v18681_v3, %v18680_v1  ;;  %v18685_v3 = vld [vmem:[#allocation50_spill] sm:$0xff]  ;;  %v18688_v1 = vld [vmem:[#allocation69_spill] sm:$0xff] }
 0x5b6   : > { %18677 = vst [vmem:[#allocation182_spill] sm:$0xff] %v15476_v25  ;;  %v18019_v55 = vmax.f32 %v15476_v25, 0.0  ;;  %v15486_v4 = vadd.f32 %v4574_v30, %v4382_v26  ;;  %4739 = vadd.xlane.f32.xlu0 %v4738_v6  ;;  %v4392_v42 = vadd.f32 %v18686_v53, %v18685_v3  ;;  %v4394_v14 = vadd.f32 %v18688_v1, %v18685_v3  ;;  %v18690_v53 = vld [vmem:[#allocation63_spill] sm:$0xff]  ;;  %v18694_v3 = vld [vmem:[#allocation68_spill] sm:$0xff] }
 0x5b7   : > { %v4576_v24 = vpop.f32.mrf.mxu1 }
 0x5b8   : > { %18679 = vst [vmem:[#allocation91_spill] sm:$0xff] %v15486_v4  ;;  %v4741_v49 = vadd.f32 %v18019_v55, %v18022_v38  ;;  %v15494_v47 = vadd.f32 %v4576_v24, %v4384_v5  ;;  %v18020_v32 = vmax.f32 %v15486_v4, 0.0  ;;  %v18693_v38 = vld [vmem:[#allocation172_spill] sm:$0xff] }
 0x5b9   : > { %v4580_v13 = vpop.f32.mrf.mxu1  ;;  %v4364_v1 = vadd.f32 %v18694_v3, %v18693_v38 }
 0x5ba   : > { %18682 = vst [vmem:[#allocation187_spill] sm:$0xff] %v15494_v47  ;;  %v18021_v26 = vmax.f32 %v15494_v47, 0.0  ;;  %v15500_v6 = vadd.f32 %v4580_v13, %v4388_v29  ;;  %4742 = vadd.xlane.f32.xlu1 %v4741_v49  ;;  %v18695_v47 = vld [vmem:[#allocation164_spill] sm:$0xff] }
 0x5bb   : > { %v4582_v30 = vpop.f32.mrf.mxu1  ;;  %v15537_v3 = vadd.f32 %v15442_v9, %v4364_v1 }
 0x5bc   : > { %18684 = vst [vmem:[#allocation159_spill] sm:$0xff] %v15500_v6  ;;  %v15504_v59 = vadd.f32 %v4582_v30, %v4390_v8  ;;  %v4744_v5 = vadd.f32 %v18021_v26, %v18020_v32  ;;  %v18028_v55 = vmax.f32 %v15500_v6, 0.0  ;;  %v18691_v8 = vld [vmem:[#allocation161_spill] sm:$0xff] }
 0x5bd   : > { %v4584_v24 = vpop.f32.mrf.mxu1  ;;  %v4398_v30 = vadd.f32 %v18691_v8, %v18690_v53  ;;  %v18697_v8 = vld [vmem:[#allocation66_spill] sm:$0xff]  ;;  %18700 = vst [vmem:[#allocation189_spill] sm:$0xff] %v15537_v3 }
 0x5be   : > { %18687 = vst [vmem:[#allocation186_spill] sm:$0xff] %v15504_v59  ;;  %v18027_v13 = vmax.f32 %v15504_v59, 0.0  ;;  %v15514_v49 = vadd.f32 %v4584_v24, %v4392_v42  ;;  %4745 = vadd.xlane.f32.xlu0 %v4744_v5  ;;  %v4400_v42 = vadd.f32 %v18695_v47, %v18690_v53  ;;  %v4362_v59 = vadd.f32 %v18697_v8, %v18693_v38  ;;  %v18703_v53 = vld [vmem:[#allocation166_spill] sm:$0xff]  ;;  %v18705_v8 = vld [vmem:[#allocation167_spill] sm:$0xff] }
 0x5bf   : > { %v4586_v29 = vpop.f32.mrf.mxu1 }
 0x5c0   : > { %18689 = vst [vmem:[#allocation93_spill] sm:$0xff] %v15514_v49  ;;  %v4747_v32 = vadd.f32 %v18027_v13, %v18028_v55  ;;  %v15522_v26 = vadd.f32 %v4586_v29, %v4394_v14  ;;  %v18031_v5 = vmax.f32 %v15514_v49, 0.0  ;;  %v18698_v14 = vld [vmem:[#allocation158_spill] sm:$0xff]  ;;  %v18699_v29 = vld [vmem:[#allocation80_spill] sm:$0xff]  ;;  %v15552_v9 = vadd.f32 %v15440_v44, %v4362_v59 }
 0x5c1   : > { %v4590_v4 = vpop.f32.mrf.mxu1  ;;  %v4402_v55 = vadd.f32 %v18699_v29, %v18698_v14  ;;  %v4404_v46 = vadd.f32 %v18705_v8, %v18698_v14  ;;  %v18036_v44 = vmax.f32 %v15537_v3, 0.0  ;;  %v18712_v8 = vld [vmem:[#allocation177_spill] sm:$0xff] }
 0x5c2   : > { %18692 = vst [vmem:[#allocation154_spill] sm:$0xff] %v15522_v26  ;;  %v18032_v24 = vmax.f32 %v15522_v26, 0.0  ;;  %v15530_v25 = vadd.f32 %v4590_v4, %v4398_v30  ;;  %4748 = vadd.xlane.f32.xlu1 %v4747_v32  ;;  %v18702_v4 = vld [vmem:[#allocation153_spill] sm:$0xff]  ;;  %v18704_v30 = vld [vmem:[#allocation62_spill] sm:$0xff]  ;;  %18706 = vst [vmem:[#allocation56_spill] sm:$0xff] %v15552_v9 }
 0x5c3   : > { %v4592_v13 = vpop.f32.mrf.mxu1  ;;  %v4284_v32 = vadd.f32 %v18702_v4, %v15184_v31  ;;  %v4360_v38 = vadd.f32 %v18704_v30, %v18703_v53 }
 0x5c4   : > { %18696 = vst [vmem:[#allocation147_spill] sm:$0xff] %v15530_v25  ;;  %v15539_v6 = vadd.f32 %v4592_v13, %v4400_v42  ;;  %v4750_v47 = vadd.f32 %v18032_v24, %v18031_v5  ;;  %v18034_v13 = vmax.f32 %v15530_v25, 0.0  ;;  %v18708_v5 = vld [vmem:[#allocation169_spill] sm:$0xff] }
 0x5c5   : > { %v4594_v29 = vpop.f32.mrf.mxu1  ;;  %v4358_v31 = vadd.f32 %v18708_v5, %v18703_v53  ;;  %v15561_v4 = vadd.f32 %v15286_v45, %v4284_v32  ;;  %v15564_v14 = vadd.f32 %v15438_v63, %v4360_v38  ;;  %v18035_v45 = vmax.f32 %v15552_v9, 0.0  ;;  %v18714_v53 = vld [vmem:[#allocation165_spill] sm:$0xff] }
 0x5c6   : > { %18701 = vst [vmem:[#allocation95_spill] sm:$0xff] %v15539_v6  ;;  %v18033_v1 = vmax.f32 %v15539_v6, 0.0  ;;  %v15556_v42 = vadd.f32 %v4594_v29, %v4402_v55  ;;  %4751 = vadd.xlane.f32.xlu0 %v4750_v47  ;;  %v18711_v47 = vld [vmem:[#allocation60_spill] sm:$0xff] }
 0x5c7   : > { %v4596_v30 = vpop.f32.mrf.mxu1  ;;  %18709 = vst [vmem:[#allocation97_spill] sm:$0xff] %v15564_v14  ;;  %v4354_v29 = vadd.f32 %v18712_v8, %v18711_v47  ;;  %v15576_v5 = vadd.f32 %v15436_v48, %v4358_v31  ;;  %v4352_v38 = vadd.f32 %v18714_v53, %v18711_v47  ;;  %v18064_v24 = vmax.f32 %v15561_v4, 0.0  ;;  %v18717_v8 = vld [vmem:[#allocation70_spill] sm:$0xff]  ;;  %v18718_v53 = vld [vmem:[#allocation160_spill] sm:$0xff] }
 0x5c8   : > { %18707 = vst [vmem:[#allocation138_spill] sm:$0xff] %v15556_v42  ;;  %v4753_v59 = vadd.f32 %v18033_v1, %v18034_v13  ;;  %v15571_v55 = vadd.f32 %v4596_v30, %v4404_v46  ;;  %v18044_v63 = vmax.f32 %v15556_v42, 0.0  ;;  %v18038_v30 = vmax.f32 %v15564_v14, 0.0  ;;  %v4869_v14 = vld [vmem:[%s18736_s2 + $0xe8] sm:$0xff]  ;;  %v4871_v42 = vld [vmem:[%s18736_s2 + $0xf8] sm:$0xff] }
 0x5c9   : > { %18713 = vst [vmem:[#allocation134_spill] sm:$0xff] %v15576_v5  ;;  %v15585_v46 = vadd.f32 %v15434_v18, %v4354_v29  ;;  %v4732_v48 = vadd.f32 %v18036_v44, %v18035_v45  ;;  %v4350_v1 = vadd.f32 %v18718_v53, %v18717_v8  ;;  %v18063_v18 = vmax.f32 %v15284_v15, 0.0  ;;  %v18720_v45 = vld [vmem:[#allocation119_spill] sm:$0xff] }
 0x5ca   : > { %18710 = vst [vmem:[#allocation136_spill] sm:$0xff] %v15571_v55  ;;  %v18037_v32 = vmax.f32 %v15571_v55, 0.0  ;;  %4754 = vadd.xlane.f32.xlu0 %v4753_v59  ;;  %v18716_v59 = vld [vmem:[#allocation122_spill] sm:$0xff]  ;;  %v15602_v29 = vadd.f32 %v15432_v62, %v4352_v38  ;;  %v18043_v13 = vmax.f32 %v15576_v5, 0.0  ;;  %v4348_v44 = vadd.f32 %v18720_v45, %v18717_v8  ;;  %v4870_v5 = vld [vmem:[%s18736_s2 + $0xf0] sm:$0xff] }
 0x5cb   : > { %18715 = vst [vmem:[#allocation125_spill] sm:$0xff] %v15585_v46  ;;  %v4274_v47 = vadd.f32 %v18716_v59, %v15202_v12  ;;  %v18065_v12 = vmax.f32 %v15282_v60, 0.0  ;;  %v15612_v59 = vadd.f32 %v15430_v19, %v4350_v1  ;;  %v18040_v53 = vmax.f32 %v15585_v46, 0.0  ;;  %v4868_v55 = vld [vmem:[%s18736_s2 + $0xe0] sm:$0xff] }
 0x5cc   : > { %v4756_v31 = vadd.f32 %v18037_v32, %v18044_v63  ;;  %18719 = vst [vmem:[#allocation53_spill] sm:$0xff] %v15602_v29  ;;  %v4729_v62 = vadd.f32 %v18038_v30, %v18043_v13  ;;  %v4684_v45 = vadd.f32 %v18064_v24, %v18063_v18  ;;  %v15627_v19 = vadd.f32 %v15428_v0, %v4348_v44  ;;  %v18726_v44 = vld [vmem:[#allocation140_spill] sm:$0xff] }
 0x5cd   : > { %v15608_v32 = vadd.f32 %v15272_v50, %v4274_v47  ;;  %18722 = vst [vmem:[#allocation114_spill] sm:$0xff] %v15612_v59  ;;  %v18723_v50 = vld [vmem:[#allocation149_spill] sm:$0xff]  ;;  %v18039_v1 = vmax.f32 %v15602_v29, 0.0  ;;  %v18048_v13 = vmax.f32 %v15418_v52, 0.0 }
 0x5ce   : > { %4733 = vadd.xlane.f32.xlu0 %v4732_v48  ;;  %4757 = vadd.xlane.f32.xlu1 %v4756_v31  ;;  %v4344_v38 = vadd.f32 %v18723_v50, %v15212_v41  ;;  %v18066_v48 = vmax.f32 %v15278_v61, 0.0  ;;  %18724 = vst [vmem:[#allocation115_spill] sm:$0xff] %v15627_v19  ;;  %v18041_v41 = vmax.f32 %v15612_v59, 0.0  ;;  %v18042_v50 = vmax.f32 %v15627_v19, 0.0 }
 0x5cf   : > { %18721 = vst [vmem:[#allocation51_spill] sm:$0xff] %v15608_v32  ;;  %v18058_v31 = vmax.f32 %v15608_v32, 0.0  ;;  %v4726_v0 = vadd.f32 %v18040_v53, %v18039_v1 }
 0x5d0   : > { %v4681_v47 = vadd.f32 %v18065_v12, %v18066_v48  ;;  %v15636_v8 = vadd.f32 %v15426_v27, %v4344_v38  ;;  %v18059_v27 = vmax.f32 %v15268_v58, 0.0  ;;  %v4723_v1 = vadd.f32 %v18041_v41, %v18042_v50 }
 0x5d1   : > { %v18047_v50 = vmax.f32 %v15422_v36, 0.0 }
 0x5d2   : > { %4730 = vadd.xlane.f32.xlu1 %v4729_v62  ;;  %4685 = vadd.xlane.f32.xlu0 %v4684_v45  ;;  %18725 = vst [vmem:[#allocation116_spill] sm:$0xff] %v15636_v8  ;;  %v4264_v62 = vadd.f32 %v18726_v44, %v15220_v39  ;;  %v18051_v45 = vmax.f32 %v15270_v56, 0.0  ;;  %v18046_v38 = vmax.f32 %v15636_v8, 0.0  ;;  %v18045_v44 = vmax.f32 %v15424_v11, 0.0 }
 0x5d4   : > { %v15648_v30 = vadd.f32 %v15260_v40, %v4264_v62  ;;  %v4678_v39 = vadd.f32 %v18058_v31, %v18051_v45  ;;  %v18062_v40 = vmax.f32 %v15264_v21, 0.0  ;;  %v18734_v45 = vld [vmem:[#allocation73_spill] sm:$0xff] }
 0x5d6   : > { %4727 = vadd.xlane.f32.xlu0 %v4726_v0  ;;  %4682 = vadd.xlane.f32.xlu1 %v4681_v47  ;;  %18727 = vst [vmem:[#allocation112_spill] sm:$0xff] %v15648_v30  ;;  %v18728_v0 = vld [vmem:[#allocation157_spill] sm:$0xff]  ;;  %v18050_v62 = vmax.f32 %v15648_v30, 0.0  ;;  %v4675_v53 = vadd.f32 %v18059_v27, %v18062_v40 }
 0x5d7   : > { %v4334_v47 = vadd.f32 %v18728_v0, %v15230_v10  ;;  %v4720_v10 = vadd.f32 %v18046_v38, %v18045_v44  ;;  %v18049_v0 = vmax.f32 %v15258_v54, 0.0  ;;  %v4717_v44 = vadd.f32 %v18047_v50, %v18048_v13 }
 0x5d8   : > { %v18060_v50 = vmax.f32 %v15246_v37, 0.0 }
 0x5d9   : > { %v15670_v41 = vadd.f32 %v15412_v7, %v4334_v47  ;;  %v18054_v7 = vmax.f32 %v15256_v51, 0.0 }
 0x5da   : > { %4724 = vadd.xlane.f32.xlu1 %v4723_v1  ;;  %4679 = vadd.xlane.f32.xlu0 %v4678_v39  ;;  %v18730_v1 = vld [vmem:[#allocation155_spill] sm:$0xff] }
 0x5db   : > { %18729 = vst [vmem:[#allocation94_spill] sm:$0xff] %v15670_v41  ;;  %v4254_v39 = vadd.f32 %v18730_v1, %v15240_v17  ;;  %v18053_v47 = vmax.f32 %v15670_v41, 0.0  ;;  %v4672_v17 = vadd.f32 %v18050_v62, %v18049_v0 }
 0x5dd   : > { %v15682_v63 = vadd.f32 %v15248_v35, %v4254_v39  ;;  %v18055_v39 = vmax.f32 %v15404_v33, 0.0 }
 0x5de   : > { %4721 = vadd.xlane.f32.xlu0 %v4720_v10  ;;  %4676 = vadd.xlane.f32.xlu1 %v4675_v53  ;;  %v18057_v10 = vmax.f32 %v15252_v28, 0.0  ;;  %v18052_v53 = vmax.f32 %v15410_v43, 0.0 }
 0x5df   : > { %18731 = vst [vmem:[#allocation98_spill] sm:$0xff] %v15682_v63  ;;  %v18061_v35 = vmax.f32 %v15682_v63, 0.0 }
 0x5e0   : > { %v4669_v1 = vadd.f32 %v18054_v7, %v18057_v10  ;;  %v4714_v38 = vadd.f32 %v18053_v47, %v18052_v53  ;;  %v18068_v53 = vmax.f32 %v18734_v45, 0.0  ;;  %v4867_v45 = vld [vmem:[%s18736_s2 + $0xd8] sm:$0xff] }
 0x5e1   : > { %v4666_v62 = vadd.f32 %v18061_v35, %v18060_v50 }
 0x5e2   : > { %4718 = vadd.xlane.f32.xlu1 %v4717_v44  ;;  %4673 = vadd.xlane.f32.xlu0 %v4672_v17  ;;  %v18056_v44 = vmax.f32 %v15400_v2, 0.0  ;;  %v18733_v17 = vld [vmem:[#allocation81_spill] sm:$0xff] }
 0x5e3   : > { %v18067_v13 = vmax.f32 %v18733_v17, 0.0 }
 0x5e4   : > { %v4711_v0 = vadd.f32 %v18055_v39, %v18056_v44 }
 0x5e6   : > { %4715 = vadd.xlane.f32.xlu0 %v4714_v38  ;;  %4670 = vadd.xlane.f32.xlu1 %v4669_v1  ;;  %v4663_v38 = vadd.f32 %v18067_v13, %v18068_v53  ;;  %v12534_v1 = vld [vmem:[%s18732_s14 + $0x4] ss:$8 sps:$4 sm:$0xff]  }
 0x5e7   : > { %5064 = vmatprep.mubr.bf16.mxu0 %v12534_v1 }
 0x5ea   : > { %4712 = vadd.xlane.f32.xlu1 %v4711_v0  ;;  %4667 = vadd.xlane.f32.xlu0 %v4666_v62 }
 0x5ee   : > { %4664 = vadd.xlane.f32.xlu1 %v4663_v38 }
 0x5fb   : > { %v4689_v10 = vpop.xlane.xlu1 %4688 }
 0x5ff   : > { %v4692_v47 = vpop.xlane.xlu0 %4691 }
 0x603   : > { %v4695_v31 = vpop.xlane.xlu1 %4694 }
 0x607   : > { %v4698_v7 = vpop.xlane.xlu0 %4697 }
 0x60b   : > { %v4701_v50 = vpop.xlane.xlu1 %4700 }
 0x60c   : > { %v4772_v59 = vmul.f32 0.00390625, %v4701_v50  ;;  %v4768_v50 = vmul.f32 0.00390625, %v4689_v10 }
 0x60f   : > { %v4704_v39 = vpop.xlane.xlu0 %4703 }
 0x610   : > { %v4773_v11 = vmul.f32 0.00390625, %v4704_v39 }
 0x612   : > { %v4830_v9 = vpack.c.bf16 %v4773_v11, %v4772_v59 }
 0x613   : > { %v4707_v44 = vpop.xlane.xlu0 %4706 }
 0x614   : > { %v4774_v41 = vmul.f32 0.00390625, %v4707_v44  ;;  %v4770_v44 = vmul.f32 0.00390625, %v4695_v31 }
 0x617   : > { %v4710_v27 = vpop.xlane.xlu0 %4709 }
 0x618   : > { %v4775_v48 = vmul.f32 0.00390625, %v4710_v27  ;;  %v4771_v27 = vmul.f32 0.00390625, %v4698_v7 }
 0x61a   : > { %v4831_v8 = vpack.c.bf16 %v4775_v48, %v4774_v41  ;;  %v4829_v48 = vpack.c.bf16 %v4771_v27, %v4770_v44 }
 0x63b   : > { %v4737_v40 = vpop.xlane.xlu1 %4736 }
 0x63f   : > { %v4740_v35 = vpop.xlane.xlu0 %4739 }
 0x643   : > { %v4743_v62 = vpop.xlane.xlu1 %4742 }
 0x644   : > { %v4786_v19 = vmul.f32 0.00390625, %v4743_v62 }
 0x647   : > { %v4746_v0 = vpop.xlane.xlu0 %4745 }
 0x648   : > { %v4787_v29 = vmul.f32 0.00390625, %v4746_v0 }
 0x64b   : > { %v4749_v24 = vpop.xlane.xlu1 %4748 }
 0x64c   : > { %v4788_v33 = vmul.f32 0.00390625, %v4749_v24  ;;  %v4769_v24 = vmul.f32 0.00390625, %v4692_v47 }
 0x64f   : > { %v4752_v18 = vpop.xlane.xlu0 %4751 }
 0x650   : > { %v4789_v53 = vmul.f32 0.00390625, %v4752_v18 }
 0x652   : > { %v4838_v46 = vpack.c.bf16 %v4789_v53, %v4788_v33 }
 0x653   : > { %v4755_v12 = vpop.xlane.xlu0 %4754 }
 0x654   : > { %v4790_v1 = vmul.f32 0.00390625, %v4755_v12  ;;  %v4785_v12 = vmul.f32 0.00390625, %v4740_v35 }
 0x657   : > { %v4734_v13 = vpop.xlane.xlu0 %4733  ;;  %v4758_v38 = vpop.xlane.xlu1 %4757 }
 0x658   : > { %v4791_v43 = vmul.f32 0.00390625, %v4758_v38  ;;  %v4837_v38 = vpack.c.bf16 %v4787_v29, %v4786_v19 }
 0x65a   : > { %v4839_v2 = vpack.c.bf16 %v4791_v43, %v4790_v1  ;;  %v4784_v43 = vmul.f32 0.00390625, %v4737_v40 }
 0x65b   : > { %v4731_v36 = vpop.xlane.xlu1 %4730  ;;  %v4686_v52 = vpop.xlane.xlu0 %4685 }
 0x65c   : > { %11897 = vmatprep.subr.bf16.mxu0 %v4839_v2  ;;  %v4836_v33 = vpack.c.bf16 %v4785_v12, %v4784_v43  ;;  %v4782_v2 = vmul.f32 0.00390625, %v4731_v36  ;;  %v4767_v19 = vmul.f32 0.00390625, %v4686_v52 }
 0x65d   : > { %11898 = vmatpush3.bf16.msra.mxu0 %v4831_v8  ;;  %v4783_v8 = vmul.f32 0.00390625, %v4734_v13 }
 0x65e   : > { %11899 = vmatprep.subr.bf16.mxu0 %v4838_v46  ;;  %v4828_v46 = vpack.c.bf16 %v4769_v24, %v4768_v50  ;;  %v12532_v50 = vld [vmem:[%s18732_s14] ss:$8 sps:$4 sm:$0xff]  }
 0x65f   : > { %v4728_v3 = vpop.xlane.xlu0 %4727  ;;  %v4683_v18 = vpop.xlane.xlu1 %4682  ;;  %v4835_v53 = vpack.c.bf16 %v4783_v8, %v4782_v2  ;;  %v12537_v8 = vld [vmem:[%s18732_s14 + $0x14] ss:$8 sps:$4 sm:$0xff]  }
 0x660   : > { %v4766_v11 = vmul.f32 0.00390625, %v4683_v18 }
 0x661   : > { %11900 = vmatpush3.bf16.msra.mxu0 %v4830_v9  ;;  %v4781_v9 = vmul.f32 0.00390625, %v4728_v3 }
 0x662   : > { %11901 = vmatprep.subr.bf16.mxu0 %v4837_v38  ;;  %v4827_v31 = vpack.c.bf16 %v4767_v19, %v4766_v11  ;;  %v12535_v11 = vld [vmem:[%s18732_s14 + $0x10] ss:$8 sps:$4 sm:$0xff]   ;;  %v12546_v19 = vld [vmem:[%s18732_s14 + $0x44] ss:$8 sps:$4 sm:$0xff]  }
 0x663   : > { %v4725_v41 = vpop.xlane.xlu1 %4724  ;;  %v4680_v39 = vpop.xlane.xlu0 %4679 }
 0x664   : > { %v4780_v29 = vmul.f32 0.00390625, %v4725_v41  ;;  %v4765_v10 = vmul.f32 0.00390625, %v4680_v39 }
 0x665   : > { %11902 = vmatpush3.bf16.msra.mxu0 %v4829_v48 }
 0x666   : > { %11903 = vmatprep.subr.bf16.mxu0 %v4836_v33  ;;  %v4834_v0 = vpack.c.bf16 %v4781_v9, %v4780_v29  ;;  %v12541_v29 = vld [vmem:[%s18732_s14 + $0x30] ss:$8 sps:$4 sm:$0xff]   ;;  %v12544_v9 = vld [vmem:[%s18732_s14 + $0x40] ss:$8 sps:$4 sm:$0xff]  }
 0x667   : > { %v4722_v59 = vpop.xlane.xlu0 %4721  ;;  %v4677_v7 = vpop.xlane.xlu1 %4676 }
 0x668   : > { %v4764_v40 = vmul.f32 0.00390625, %v4677_v7  ;;  %v4779_v13 = vmul.f32 0.00390625, %v4722_v59  ;;  %v12540_v59 = vld [vmem:[%s18732_s14 + $0x24] ss:$8 sps:$4 sm:$0xff]   ;;  %v12538_v7 = vld [vmem:[%s18732_s14 + $0x20] ss:$8 sps:$4 sm:$0xff]  }
 0x669   : > { %11904 = vmatpush3.bf16.msra.mxu0 %v4828_v46  ;;  %v18735_v46 = vmov 0  }
 0x66a   : > { %11905 = vmatprep.subr.bf16.mxu0 %v4835_v53  ;;  %v4826_v62 = vpack.c.bf16 %v4765_v10, %v4764_v40  ;;  %v12543_v53 = vld [vmem:[%s18732_s14 + $0x34] ss:$8 sps:$4 sm:$0xff]   ;;  %v12547_v40 = vld [vmem:[%s18732_s14 + $0x50] ss:$8 sps:$4 sm:$0xff]   ;;  %v12558_v10 = vld [vmem:[%s18732_s14 + $0x84] ss:$8 sps:$4 sm:$0xff]  }
 0x66b   : > { %v4719_v47 = vpop.xlane.xlu1 %4718  ;;  %v4674_v35 = vpop.xlane.xlu0 %4673 }
 0x66c   : > { %v4778_v36 = vmul.f32 0.00390625, %v4719_v47  ;;  %v4763_v12 = vmul.f32 0.00390625, %v4674_v35  ;;  %v12552_v47 = vld [vmem:[%s18732_s14 + $0x64] ss:$8 sps:$4 sm:$0xff]   ;;  %v12550_v35 = vld [vmem:[%s18732_s14 + $0x60] ss:$8 sps:$4 sm:$0xff]  }
 0x66d   : > { %11906 = vmatpush3.bf16.msra.mxu0 %v4827_v31  ;;  %v12549_v31 = vld [vmem:[%s18732_s14 + $0x54] ss:$8 sps:$4 sm:$0xff]  }
 0x66e   : > { %11907 = vmatprep.subr.bf16.mxu0 %v4834_v0  ;;  %v4833_v18 = vpack.c.bf16 %v4779_v13, %v4778_v36  ;;  %v12555_v0 = vld [vmem:[%s18732_s14 + $0x74] ss:$8 sps:$4 sm:$0xff]   ;;  %v12553_v36 = vld [vmem:[%s18732_s14 + $0x70] ss:$8 sps:$4 sm:$0xff]   ;;  %v12556_v13 = vld [vmem:[%s18732_s14 + $0x80] ss:$8 sps:$4 sm:$0xff]  }
 0x66f   : > { %v4716_v1 = vpop.xlane.xlu0 %4715  ;;  %v4671_v27 = vpop.xlane.xlu1 %4670 }
 0x670   : > { %v4762_v52 = vmul.f32 0.00390625, %v4671_v27  ;;  %v4777_v44 = vmul.f32 0.00390625, %v4716_v1  ;;  %v12559_v1 = vld [vmem:[%s18732_s14 + $0x90] ss:$8 sps:$4 sm:$0xff]   ;;  %v12564_v27 = vld [vmem:[%s18732_s14 + $0xa4] ss:$8 sps:$4 sm:$0xff]  }
 0x671   : > { %11908 = vmatpush3.bf16.msra.mxu0 %v4826_v62  ;;  %v12561_v62 = vld [vmem:[%s18732_s14 + $0x94] ss:$8 sps:$4 sm:$0xff]  }
 0x672   : > { %v4825_v3 = vpack.c.bf16 %v4763_v12, %v4762_v52  ;;  %11909 = vmatprep.subr.bf16.mxu0 %v4833_v18  ;;  %v12562_v18 = vld [vmem:[%s18732_s14 + $0xa0] ss:$8 sps:$4 sm:$0xff]   ;;  %v12567_v12 = vld [vmem:[%s18732_s14 + $0xb4] ss:$8 sps:$4 sm:$0xff]   ;;  %v12565_v52 = vld [vmem:[%s18732_s14 + $0xb0] ss:$8 sps:$4 sm:$0xff]  }
 0x673   : > { %v4713_v38 = vpop.xlane.xlu1 %4712  ;;  %v4668_v24 = vpop.xlane.xlu0 %4667 }
 0x674   : > { %v4776_v43 = vmul.f32 0.00390625, %v4713_v38  ;;  %v4761_v39 = vmul.f32 0.00390625, %v4668_v24  ;;  %v12568_v38 = vld [vmem:[%s18732_s14 + $0xc0] ss:$8 sps:$4 sm:$0xff]   ;;  %v12576_v24 = vld [vmem:[%s18732_s14 + $0xe4] ss:$8 sps:$4 sm:$0xff]  }
 0x675   : > { %11910 = vmatpush3.bf16.msra.mxu0 %v4825_v3  ;;  %v12570_v3 = vld [vmem:[%s18732_s14 + $0xc4] ss:$8 sps:$4 sm:$0xff]  }
 0x676   : > { %v4832_v48 = vpack.c.bf16 %v4777_v44, %v4776_v43  ;;  %v12573_v44 = vld [vmem:[%s18732_s14 + $0xd4] ss:$8 sps:$4 sm:$0xff]   ;;  %v12571_v43 = vld [vmem:[%s18732_s14 + $0xd0] ss:$8 sps:$4 sm:$0xff]  }
 0x677   : > { %v4665_v41 = vpop.xlane.xlu1 %4664 }
 0x678   : > { %v4760_v33 = vmul.f32 0.00390625, %v4665_v41  ;;  %11911 = vmatprep.subr.bf16.mxu0 %v4832_v48  ;;  %v12574_v48 = vld [vmem:[%s18732_s14 + $0xe0] ss:$8 sps:$4 sm:$0xff]   ;;  %v12579_v41 = vld [vmem:[%s18732_s14 + $0xf4] ss:$8 sps:$4 sm:$0xff]  }
 0x67a   : > { %v4824_v2 = vpack.c.bf16 %v4761_v39, %v4760_v33  ;;  %v12577_v39 = vld [vmem:[%s18732_s14 + $0xf0] ss:$8 sps:$4 sm:$0xff]  }
 0x67c   : > { %11912 = vmatpush3.bf16.msra.mxu0 %v4824_v2 }
 0x67d   : > { %6554 = vmatprep.subr.bf16.mxu0 %v18735_v46 }
 0x67f   : > { %5065 = vmatmul.mubr.bf16.vlgmr.msra.gmra.mxu0 %v12532_v50 }
 0x680   : > { %5072 = vmatprep.mubr.bf16.mxu0 %v12537_v8  ;;  %v4840_v8 = vld [vmem:[%s18736_s2] sm:$0xff] }
 0x687   : > { %5073 = vmatmul.mubr.bf16.gmra.mxu0 %v12535_v11 }
 0x688   : > { %5080 = vmatprep.mubr.bf16.mxu0 %v12540_v59  ;;  %v4841_v59 = vld [vmem:[%s18736_s2 + $0x8] sm:$0xff] }
 0x68f   : > { %5081 = vmatmul.mubr.bf16.gmra.mxu0 %v12538_v7 }
 0x690   : > { %5088 = vmatprep.mubr.bf16.mxu0 %v12543_v53 }
 0x697   : > { %5089 = vmatmul.mubr.bf16.gmra.mxu0 %v12541_v29 }
 0x698   : > { %5096 = vmatprep.mubr.bf16.mxu0 %v12546_v19 }
 0x69f   : > { %5097 = vmatmul.mubr.bf16.gmra.mxu0 %v12544_v9 }
 0x6a0   : > { %5104 = vmatprep.mubr.bf16.mxu0 %v12549_v31 }
 0x6a7   : > { %5105 = vmatmul.mubr.bf16.gmra.mxu0 %v12547_v40 }
 0x6a8   : > { %5112 = vmatprep.mubr.bf16.mxu0 %v12552_v47 }
 0x6af   : > { %5113 = vmatmul.mubr.bf16.gmra.mxu0 %v12550_v35 }
 0x6b0   : > { %5120 = vmatprep.mubr.bf16.mxu0 %v12555_v0  ;;  %v4842_v0 = vld [vmem:[%s18736_s2 + $0x10] sm:$0xff] }
 0x6b7   : > { %5121 = vmatmul.mubr.bf16.gmra.mxu0 %v12553_v36 }
 0x6b8   : > { %5128 = vmatprep.mubr.bf16.mxu0 %v12558_v10 }
 0x6bf   : > { %5129 = vmatmul.mubr.bf16.gmra.mxu0 %v12556_v13  ;;  %v4843_v13 = vld [vmem:[%s18736_s2 + $0x18] sm:$0xff] }
 0x6c0   : > { %5136 = vmatprep.mubr.bf16.mxu0 %v12561_v62 }
 0x6c7   : > { %5137 = vmatmul.mubr.bf16.gmra.mxu0 %v12559_v1 }
 0x6c8   : > { %5144 = vmatprep.mubr.bf16.mxu0 %v12564_v27 }
 0x6cf   : > { %5145 = vmatmul.mubr.bf16.gmra.mxu0 %v12562_v18 }
 0x6d0   : > { %5152 = vmatprep.mubr.bf16.mxu0 %v12567_v12 }
 0x6d7   : > { %5153 = vmatmul.mubr.bf16.gmra.mxu0 %v12565_v52 }
 0x6d8   : > { %5160 = vmatprep.mubr.bf16.mxu0 %v12570_v3 }
 0x6df   : > { %5161 = vmatmul.mubr.bf16.gmra.mxu0 %v12568_v38 }
 0x6e0   : > { %5168 = vmatprep.mubr.bf16.mxu0 %v12573_v44 }
 0x6e7   : > { %5169 = vmatmul.mubr.bf16.gmra.mxu0 %v12571_v43  ;;  %v4844_v43 = vld [vmem:[%s18736_s2 + $0x20] sm:$0xff] }
 0x6e8   : > { %5176 = vmatprep.mubr.bf16.mxu0 %v12576_v24 }
 0x6ef   : > { %5177 = vmatmul.mubr.bf16.gmra.mxu0 %v12574_v48 }
 0x6f0   : > { %5184 = vmatprep.mubr.bf16.mxu0 %v12579_v41  ;;  %v4845_v41 = vld [vmem:[%s18736_s2 + $0x28] sm:$0xff] }
 0x6f7   : > { %5185 = vmatmul.mubr.bf16.gmra.mxu0 %v12577_v39 }
 0x73f   : > { %v11913_v33 = vpop.f32.mrf.mxu0 }
 0x741   : > { %v11914_v2 = vpop.f32.mrf.mxu0 }
 0x742   : > { %v11915_v50 = vadd.f32 %v11914_v2, %v11913_v33 }
 0x743   : > { %v11916_v11 = vpop.f32.mrf.mxu0 }
 0x744   : > { %v5067_v53 = vadd.f32 %v11915_v50, %v4840_v8 }
 0x745   : > { %v11917_v7 = vpop.f32.mrf.mxu0 }
 0x746   : > { %v11918_v29 = vadd.f32 %v11917_v7, %v11916_v11  ;;  %v5193_v40 = vmax.f32 %v5067_v53, 0.0 }
 0x747   : > { %v11919_v19 = vpop.f32.mrf.mxu0 }
 0x748   : > { %v5070_v9 = vadd.f32 %v11918_v29, %v4841_v59  ;;  %v4846_v29 = vld [vmem:[%s18736_s2 + $0x30] sm:$0xff] }
 0x749   : > { %v11920_v31 = vpop.f32.mrf.mxu0 }
 0x74a   : > { %v5194_v47 = vmax.f32 %v5070_v9, 0.0  ;;  %v11921_v35 = vadd.f32 %v11920_v31, %v11919_v19  ;;  %v4847_v31 = vld [vmem:[%s18736_s2 + $0x38] sm:$0xff] }
 0x74b   : > { %v11922_v36 = vpop.f32.mrf.mxu0 }
 0x74c   : > { %v15758_v10 = vpack.c.bf16 %v5194_v47, %v5193_v40  ;;  %v5075_v1 = vadd.f32 %v11921_v35, %v4842_v0 }
 0x74d   : > { %v11923_v62 = vpop.f32.mrf.mxu0 }
 0x74e   : > { %v11924_v27 = vadd.f32 %v11923_v62, %v11922_v36  ;;  %v5195_v3 = vmax.f32 %v5075_v1, 0.0 }
 0x74f   : > { %v11925_v18 = vpop.f32.mrf.mxu0 }
 0x750   : > { %v5078_v12 = vadd.f32 %v11924_v27, %v4843_v13 }
 0x751   : > { %v11926_v52 = vpop.f32.mrf.mxu0 }
 0x752   : > { %v5196_v38 = vmax.f32 %v5078_v12, 0.0  ;;  %v11927_v44 = vadd.f32 %v11926_v52, %v11925_v18  ;;  %v4848_v18 = vld [vmem:[%s18736_s2 + $0x40] sm:$0xff] }
 0x753   : > { %v11928_v24 = vpop.f32.mrf.mxu0  ;;  %v12582_v52 = vld [vmem:[%s18737_s16 + $0x4] ss:$8 sps:$4 sm:$0xff]  }
 0x754   : > { %v15762_v48 = vpack.c.bf16 %v5196_v38, %v5195_v3  ;;  %v5083_v33 = vadd.f32 %v11927_v44, %v4844_v43  ;;  %v4849_v38 = vld [vmem:[%s18736_s2 + $0x48] sm:$0xff]  ;;  %5497 = vmatprep.mubr.bf16.mxu1 %v12582_v52 }
 0x755   : > { %v11929_v39 = vpop.f32.mrf.mxu0 }
 0x756   : > { %v11930_v2 = vadd.f32 %v11929_v39, %v11928_v24  ;;  %v5197_v59 = vmax.f32 %v5083_v33, 0.0 }
 0x757   : > { %v11931_v50 = vpop.f32.mrf.mxu0 }
 0x758   : > { %v5086_v8 = vadd.f32 %v11930_v2, %v4845_v41 }
 0x759   : > { %v11932_v11 = vpop.f32.mrf.mxu0 }
 0x75a   : > { %v5198_v7 = vmax.f32 %v5086_v8, 0.0  ;;  %v11933_v53 = vadd.f32 %v11932_v11, %v11931_v50  ;;  %v4850_v11 = vld [vmem:[%s18736_s2 + $0x50] sm:$0xff] }
 0x75b   : > { %v11934_v19 = vpop.f32.mrf.mxu0 }
 0x75c   : > { %v15766_v9 = vpack.c.bf16 %v5198_v7, %v5197_v59  ;;  %v5091_v47 = vadd.f32 %v11933_v53, %v4846_v29  ;;  %v4851_v53 = vld [vmem:[%s18736_s2 + $0x58] sm:$0xff] }
 0x75d   : > { %v11935_v40 = vpop.f32.mrf.mxu0 }
 0x75e   : > { %v11936_v35 = vadd.f32 %v11935_v40, %v11934_v19  ;;  %v5199_v62 = vmax.f32 %v5091_v47, 0.0 }
 0x75f   : > { %v11937_v0 = vpop.f32.mrf.mxu0 }
 0x760   : > { %v5094_v36 = vadd.f32 %v11936_v35, %v4847_v31 }
 0x761   : > { %v11938_v13 = vpop.f32.mrf.mxu0 }
 0x762   : > { %v5200_v1 = vmax.f32 %v5094_v36, 0.0  ;;  %v11939_v27 = vadd.f32 %v11938_v13, %v11937_v0 }
 0x763   : > { %v11940_v12 = vpop.f32.mrf.mxu0 }
 0x764   : > { %v15771_v3 = vpack.c.bf16 %v5200_v1, %v5199_v62  ;;  %v5099_v43 = vadd.f32 %v11939_v27, %v4848_v18  ;;  %v4852_v62 = vld [vmem:[%s18736_s2 + $0x60] sm:$0xff]  ;;  %v4853_v18 = vld [vmem:[%s18736_s2 + $0x68] sm:$0xff] }
 0x765   : > { %v11941_v44 = vpop.f32.mrf.mxu0 }
 0x766   : > { %v11942_v24 = vadd.f32 %v11941_v44, %v11940_v12  ;;  %v5201_v2 = vmax.f32 %v5099_v43, 0.0 }
 0x767   : > { %v11943_v41 = vpop.f32.mrf.mxu0 }
 0x768   : > { %v5102_v39 = vadd.f32 %v11942_v24, %v4849_v38 }
 0x769   : > { %v11944_v33 = vpop.f32.mrf.mxu0 }
 0x76a   : > { %v5202_v50 = vmax.f32 %v5102_v39, 0.0  ;;  %v11945_v8 = vadd.f32 %v11944_v33, %v11943_v41 }
 0x76b   : > { %v11946_v59 = vpop.f32.mrf.mxu0 }
 0x76c   : > { %v15775_v7 = vpack.c.bf16 %v5202_v50, %v5201_v2  ;;  %v5107_v19 = vadd.f32 %v11945_v8, %v4850_v11  ;;  %v4854_v2 = vld [vmem:[%s18736_s2 + $0x70] sm:$0xff]  ;;  %v4855_v11 = vld [vmem:[%s18736_s2 + $0x78] sm:$0xff] }
 0x76d   : > { %v11947_v29 = vpop.f32.mrf.mxu0 }
 0x76e   : > { %v11948_v31 = vadd.f32 %v11947_v29, %v11946_v59  ;;  %v5203_v0 = vmax.f32 %v5107_v19, 0.0 }
 0x76f   : > { %v11949_v40 = vpop.f32.mrf.mxu0 }
 0x770   : > { %v5110_v47 = vadd.f32 %v11948_v31, %v4851_v53 }
 0x771   : > { %v11950_v35 = vpop.f32.mrf.mxu0 }
 0x772   : > { %v5204_v36 = vmax.f32 %v5110_v47, 0.0  ;;  %v11951_v13 = vadd.f32 %v11950_v35, %v11949_v40 }
 0x773   : > { %v11952_v1 = vpop.f32.mrf.mxu0 }
 0x774   : > { %v15779_v27 = vpack.c.bf16 %v5204_v36, %v5203_v0  ;;  %v5115_v52 = vadd.f32 %v11951_v13, %v4852_v62  ;;  %v4856_v36 = vld [vmem:[%s18736_s2 + $0x80] sm:$0xff] }
 0x775   : > { %v11953_v12 = vpop.f32.mrf.mxu0 }
 0x776   : > { %v11954_v38 = vadd.f32 %v11953_v12, %v11952_v1  ;;  %v5205_v41 = vmax.f32 %v5115_v52, 0.0  ;;  %v4857_v1 = vld [vmem:[%s18736_s2 + $0x88] sm:$0xff] }
 0x777   : > { %v11955_v44 = vpop.f32.mrf.mxu0 }
 0x778   : > { %v5118_v43 = vadd.f32 %v11954_v38, %v4853_v18 }
 0x779   : > { %v11956_v24 = vpop.f32.mrf.mxu0 }
 0x77a   : > { %v5206_v39 = vmax.f32 %v5118_v43, 0.0  ;;  %v11957_v33 = vadd.f32 %v11956_v24, %v11955_v44 }
 0x77b   : > { %v11958_v50 = vpop.f32.mrf.mxu0 }
 0x77c   : > { %v15783_v8 = vpack.c.bf16 %v5206_v39, %v5205_v41  ;;  %v5123_v53 = vadd.f32 %v11957_v33, %v4854_v2  ;;  %v4858_v33 = vld [vmem:[%s18736_s2 + $0x90] sm:$0xff] }
 0x77d   : > { %v11959_v59 = vpop.f32.mrf.mxu0 }
 0x77e   : > { %v11960_v29 = vadd.f32 %v11959_v59, %v11958_v50  ;;  %v5207_v47 = vmax.f32 %v5123_v53, 0.0 }
 0x77f   : > { %v11961_v19 = vpop.f32.mrf.mxu0 }
 0x780   : > { %v5126_v31 = vadd.f32 %v11960_v29, %v4855_v11  ;;  %v4859_v11 = vld [vmem:[%s18736_s2 + $0x98] sm:$0xff] }
 0x781   : > { %v11962_v40 = vpop.f32.mrf.mxu0 }
 0x782   : > { %v5208_v35 = vmax.f32 %v5126_v31, 0.0  ;;  %v11963_v0 = vadd.f32 %v11962_v40, %v11961_v19 }
 0x783   : > { %v11964_v13 = vpop.f32.mrf.mxu0 }
 0x784   : > { %v15787_v62 = vpack.c.bf16 %v5208_v35, %v5207_v47  ;;  %v5131_v12 = vadd.f32 %v11963_v0, %v4856_v36 }
 0x785   : > { %v11965_v18 = vpop.f32.mrf.mxu0 }
 0x786   : > { %v11966_v52 = vadd.f32 %v11965_v18, %v11964_v13  ;;  %v5209_v24 = vmax.f32 %v5131_v12, 0.0 }
 0x787   : > { %v11967_v38 = vpop.f32.mrf.mxu0 }
 0x788   : > { %v5134_v44 = vadd.f32 %v11966_v52, %v4857_v1 }
 0x789   : > { %v11968_v43 = vpop.f32.mrf.mxu0 }
 0x78a   : > { %v5210_v41 = vmax.f32 %v5134_v44, 0.0  ;;  %v11969_v39 = vadd.f32 %v11968_v43, %v11967_v38 }
 0x78b   : > { %v11970_v2 = vpop.f32.mrf.mxu0 }
 0x78c   : > { %v15791_v50 = vpack.c.bf16 %v5210_v41, %v5209_v24  ;;  %v5139_v53 = vadd.f32 %v11969_v39, %v4858_v33 }
 0x78d   : > { %v11971_v59 = vpop.f32.mrf.mxu0 }
 0x78e   : > { %v11972_v29 = vadd.f32 %v11971_v59, %v11970_v2  ;;  %v5211_v47 = vmax.f32 %v5139_v53, 0.0 }
 0x78f   : > { %v15794_v19 = vpop.f32.mrf.mxu0 }
 0x790   : > { %v5142_v31 = vadd.f32 %v11972_v29, %v4859_v11 }
 0x791   : > { %v15796_v40 = vpop.f32.mrf.mxu0 }
 0x792   : > { %v5212_v35 = vmax.f32 %v5142_v31, 0.0 }
 0x793   : > { %v11976_v0 = vpop.f32.mrf.mxu0 }
 0x794   : > { %v15798_v36 = vpack.c.bf16 %v5212_v35, %v5211_v47 }
 0x795   : > { %v11977_v13 = vpop.f32.mrf.mxu0 }
 0x797   : > { %v11979_v1 = vpop.f32.mrf.mxu0 }
 0x799   : > { %v11980_v18 = vpop.f32.mrf.mxu0 }
 0x79b   : > { %v11982_v12 = vpop.f32.mrf.mxu0 }
 0x79d   : > { %v11983_v52 = vpop.f32.mrf.mxu0 }
 0x79f   : > { %v11985_v38 = vpop.f32.mrf.mxu0 }
 0x7a1   : > { %v11986_v44 = vpop.f32.mrf.mxu0 }
 0x7a2   : > { %v11987_v28 = vadd.f32 %v11986_v44, %v11985_v38  ;;  %v12597_v44 = vld [vmem:[%s18737_s16 + $0x54] ss:$8 sps:$4 sm:$0xff]  }
 0x7a3   : > { %v11988_v43 = vpop.f32.mrf.mxu0 }
 0x7a5   : > { %v11989_v24 = vpop.f32.mrf.mxu0 }
 0x7a7   : > { %v11991_v41 = vpop.f32.mrf.mxu0 }
 0x7a9   : > { %v11992_v39 = vpop.f32.mrf.mxu0 }
 0x7aa   : > { %v11993_v54 = vadd.f32 %v11992_v39, %v11991_v41  ;;  %v12598_v41 = vld [vmem:[%s18737_s16 + $0x60] ss:$8 sps:$4 sm:$0xff]   ;;  %v12603_v39 = vld [vmem:[%s18737_s16 + $0x74] ss:$8 sps:$4 sm:$0xff]  }
 0x7ab   : > { %v11994_v33 = vpop.f32.mrf.mxu0 }
 0x7ad   : > { %v11995_v2 = vpop.f32.mrf.mxu0 }
 0x7ae   : > { %v11996_v25 = vadd.f32 %v11995_v2, %v11994_v33  ;;  %v12601_v2 = vld [vmem:[%s18737_s16 + $0x70] ss:$8 sps:$4 sm:$0xff]  }
 0x7af   : > { %v11997_v11 = vpop.f32.mrf.mxu0 }
 0x7b1   : > { %v11998_v59 = vpop.f32.mrf.mxu0 }
 0x7b2   : > { %v11999_v26 = vadd.f32 %v11998_v59, %v11997_v11  ;;  %v4865_v59 = vld [vmem:[%s18736_s2 + $0xc8] sm:$0xff] }
 0x7b3   : > { %v12000_v53 = vpop.f32.mrf.mxu0 }
 0x7b4   : > { %v5179_v30 = vadd.f32 %v11999_v26, %v4868_v55  ;;  %v4862_v55 = vld [vmem:[%s18736_s2 + $0xb0] sm:$0xff] }
 0x7b5   : > { %v12001_v29 = vpop.f32.mrf.mxu0 }
 0x7b6   : > { %v12002_v35 = vadd.f32 %v12001_v29, %v12000_v53  ;;  %v11990_v53 = vadd.f32 %v11989_v24, %v11988_v43  ;;  %v4866_v29 = vld [vmem:[%s18736_s2 + $0xd0] sm:$0xff]  ;;  %v5221_v33 = vmax.f32 %v5179_v30, 0.0  ;;  %v12600_v24 = vld [vmem:[%s18737_s16 + $0x64] ss:$8 sps:$4 sm:$0xff]  }
 0x7b7   : > { %v12003_v31 = vpop.f32.mrf.mxu0  ;;  %v5171_v32 = vadd.f32 %v11993_v54, %v4866_v29  ;;  %v12595_v43 = vld [vmem:[%s18737_s16 + $0x50] ss:$8 sps:$4 sm:$0xff]   ;;  %v12609_v29 = vld [vmem:[%s18737_s16 + $0x94] ss:$8 sps:$4 sm:$0xff]  }
 0x7b8   : > { %v5182_v37 = vadd.f32 %v12002_v35, %v4869_v14  ;;  %v12606_v35 = vld [vmem:[%s18737_s16 + $0x84] ss:$8 sps:$4 sm:$0xff]  }
 0x7b9   : > { %v12004_v47 = vpop.f32.mrf.mxu0 }
 0x7ba   : > { %v12005_v46 = vadd.f32 %v12004_v47, %v12003_v31  ;;  %v5174_v31 = vadd.f32 %v11996_v25, %v4867_v45  ;;  %v5222_v47 = vmax.f32 %v5182_v37, 0.0  ;;  %v11981_v37 = vadd.f32 %v11980_v18, %v11979_v1  ;;  %v4861_v45 = vld [vmem:[%s18736_s2 + $0xa8] sm:$0xff] }
 0x7bb   : > { %v12006_v49 = vpop.f32.mrf.mxu0 }
 0x7bc   : > { %v5187_v63 = vadd.f32 %v12005_v46, %v4870_v5  ;;  %v4864_v5 = vld [vmem:[%s18736_s2 + $0xc0] sm:$0xff]  ;;  %v5220_v46 = vmax.f32 %v5174_v31, 0.0  ;;  %v5271_v26 = vpack.c.bf16 %v5222_v47, %v5221_v33  ;;  %v12607_v31 = vld [vmem:[%s18737_s16 + $0x90] ss:$8 sps:$4 sm:$0xff]  }
 0x7bd   : > { %v12007_v6 = vpop.f32.mrf.mxu0  ;;  %v5163_v25 = vadd.f32 %v11987_v28, %v4864_v5  ;;  %v12612_v47 = vld [vmem:[%s18737_s16 + $0xa4] ss:$8 sps:$4 sm:$0xff]   ;;  %v12613_v33 = vld [vmem:[%s18737_s16 + $0xb0] ss:$8 sps:$4 sm:$0xff]   ;;  %v12616_v5 = vld [vmem:[%s18737_s16 + $0xc0] ss:$8 sps:$4 sm:$0xff]  }
 0x7be   : > { %v12008_v17 = vadd.f32 %v12007_v6, %v12006_v49  ;;  %v5223_v51 = vmax.f32 %v5187_v63, 0.0  ;;  %v11984_v6 = vadd.f32 %v11983_v52, %v11982_v12  ;;  %v5166_v49 = vadd.f32 %v11990_v53, %v4865_v59  ;;  %v12604_v53 = vld [vmem:[%s18737_s16 + $0x80] ss:$8 sps:$4 sm:$0xff]   ;;  %v12615_v59 = vld [vmem:[%s18737_s16 + $0xb4] ss:$8 sps:$4 sm:$0xff]  }
 0x7bf   : > { %v11978_v63 = vadd.f32 %v11977_v13, %v11976_v0  ;;  %v5155_v12 = vadd.f32 %v11981_v37, %v4862_v55  ;;  %v5217_v52 = vmax.f32 %v5163_v25, 0.0  ;;  %v12625_v37 = vld [vmem:[%s18737_s16 + $0xf0] ss:$8 sps:$4 sm:$0xff]  }
 0x7c0   : > { %v5190_v56 = vadd.f32 %v12008_v17, %v4871_v42  ;;  %v4863_v42 = vld [vmem:[%s18736_s2 + $0xb8] sm:$0xff]  ;;  %v5218_v30 = vmax.f32 %v5166_v49, 0.0  ;;  %v11975_v17 = vadd.f32 %v15796_v40, %v15794_v19  ;;  %v12588_v40 = vld [vmem:[%s18737_s16 + $0x24] ss:$8 sps:$4 sm:$0xff]  }
 0x7c1   : > { %v5158_v54 = vadd.f32 %v11984_v6, %v4863_v42  ;;  %v5150_v38 = vadd.f32 %v11978_v63, %v4861_v45  ;;  %v5215_v0 = vmax.f32 %v5155_v12, 0.0  ;;  %v12621_v6 = vld [vmem:[%s18737_s16 + $0xd4] ss:$8 sps:$4 sm:$0xff]   ;;  %v12619_v49 = vld [vmem:[%s18737_s16 + $0xd0] ss:$8 sps:$4 sm:$0xff]  }
 0x7c2   : > { %v5224_v11 = vmax.f32 %v5190_v56, 0.0  ;;  %v5219_v56 = vmax.f32 %v5171_v32, 0.0  ;;  %v5269_v28 = vpack.c.bf16 %v5218_v30, %v5217_v52  ;;  %v12627_v42 = vld [vmem:[%s18737_s16 + $0xf4] ss:$8 sps:$4 sm:$0xff]  }
 0x7c3   : > { %v5216_v1 = vmax.f32 %v5158_v54, 0.0  ;;  %v5214_v13 = vmax.f32 %v5150_v38, 0.0 }
 0x7c4   : > { %v5272_v14 = vpack.c.bf16 %v5224_v11, %v5223_v51  ;;  %v5270_v51 = vpack.c.bf16 %v5220_v46, %v5219_v56  ;;  %v12610_v11 = vld [vmem:[%s18737_s16 + $0xa0] ss:$8 sps:$4 sm:$0xff]   ;;  %v12624_v46 = vld [vmem:[%s18737_s16 + $0xe4] ss:$8 sps:$4 sm:$0xff]  }
 0x7c5   : > { %v5268_v18 = vpack.c.bf16 %v5216_v1, %v5215_v0 }
 0x7c6   : > { %12009 = vmatprep.subr.bf16.mxu1 %v5272_v14  ;;  %v12618_v14 = vld [vmem:[%s18737_s16 + $0xc4] ss:$8 sps:$4 sm:$0xff]  }
 0x7c7   : > { %12010 = vmatpush3.bf16.msra.mxu1 %v15787_v62  ;;  %v4860_v62 = vld [vmem:[%s18736_s2 + $0xa0] sm:$0xff]  ;;  %s18949_s2 = smov %s18948_s26 }
 0x7c8   : > { %12011 = vmatprep.subr.bf16.mxu1 %v5271_v26  ;;  %v5147_v32 = vadd.f32 %v11975_v17, %v4860_v62  ;;  %v12622_v26 = vld [vmem:[%s18737_s16 + $0xe0] ss:$8 sps:$4 sm:$0xff]  }
 0x7cb   : > { %12012 = vmatpush3.bf16.msra.mxu1 %v15783_v8  ;;  %v5213_v8 = vmax.f32 %v5147_v32, 0.0 }
 0x7cc   : > { %12013 = vmatprep.subr.bf16.mxu1 %v5270_v51 }
 0x7cd   : > { %v5267_v19 = vpack.c.bf16 %v5214_v13, %v5213_v8 }
 0x7cf   : > { %12014 = vmatpush3.bf16.msra.mxu1 %v15779_v27  ;;  %v12585_v27 = vld [vmem:[%s18737_s16 + $0x14] ss:$8 sps:$4 sm:$0xff]  }
 0x7d0   : > { %12015 = vmatprep.subr.bf16.mxu1 %v5269_v28 }
 0x7d3   : > { %12016 = vmatpush3.bf16.msra.mxu1 %v15775_v7  ;;  %v12580_v7 = vld [vmem:[%s18737_s16] ss:$8 sps:$4 sm:$0xff]  }
 0x7d4   : > { %12017 = vmatprep.subr.bf16.mxu1 %v5268_v18  ;;  %v5281_v18 = vld [vmem:[%s18738_s18 + $0x40] sm:$0xff] }
 0x7d7   : > { %12018 = vmatpush3.bf16.msra.mxu1 %v15771_v3  ;;  %v12583_v3 = vld [vmem:[%s18737_s16 + $0x10] ss:$8 sps:$4 sm:$0xff]  }
 0x7d8   : > { %12019 = vmatprep.subr.bf16.mxu1 %v5267_v19 }
 0x7db   : > { %12020 = vmatpush3.bf16.msra.mxu1 %v15766_v9  ;;  %v12586_v9 = vld [vmem:[%s18737_s16 + $0x20] ss:$8 sps:$4 sm:$0xff]  }
 0x7dc   : > { %12021 = vmatprep.subr.bf16.mxu1 %v15798_v36  ;;  %v12592_v36 = vld [vmem:[%s18737_s16 + $0x40] ss:$8 sps:$4 sm:$0xff]  }
 0x7df   : > { %12022 = vmatpush3.bf16.msra.mxu1 %v15762_v48  ;;  %v12591_v48 = vld [vmem:[%s18737_s16 + $0x34] ss:$8 sps:$4 sm:$0xff]  }
 0x7e0   : > { %12023 = vmatprep.subr.bf16.mxu1 %v15791_v50  ;;  %v12589_v50 = vld [vmem:[%s18737_s16 + $0x30] ss:$8 sps:$4 sm:$0xff]  }
 0x7e3   : > { %12024 = vmatpush3.bf16.msra.mxu1 %v15758_v10  ;;  %v12594_v10 = vld [vmem:[%s18737_s16 + $0x44] ss:$8 sps:$4 sm:$0xff]  }
 0x7e6   : > { %5498 = vmatmul.mubr.bf16.vlgmr.msra.gmra.mxu1 %v12580_v7 }
 0x7e7   : > { %5505 = vmatprep.mubr.bf16.mxu1 %v12585_v27 }
 0x7ee   : > { %5506 = vmatmul.mubr.bf16.gmra.mxu1 %v12583_v3  ;;  %v5279_v3 = vld [vmem:[%s18738_s18 + $0x30] sm:$0xff] }
 0x7ef   : > { %5513 = vmatprep.mubr.bf16.mxu1 %v12588_v40 }
 0x7f6   : > { %5514 = vmatmul.mubr.bf16.gmra.mxu1 %v12586_v9 }
 0x7f7   : > { %5521 = vmatprep.mubr.bf16.mxu1 %v12591_v48 }
 0x7fe   : > { %5522 = vmatmul.mubr.bf16.gmra.mxu1 %v12589_v50 }
 0x7ff   : > { %5529 = vmatprep.mubr.bf16.mxu1 %v12594_v10 }
 0x806   : > { %5530 = vmatmul.mubr.bf16.gmra.mxu1 %v12592_v36  ;;  %v5283_v36 = vld [vmem:[%s18738_s18 + $0x50] sm:$0xff] }
 0x807   : > { %5537 = vmatprep.mubr.bf16.mxu1 %v12597_v44 }
 0x80e   : > { %5538 = vmatmul.mubr.bf16.gmra.mxu1 %v12595_v43 }
 0x80f   : > { %5545 = vmatprep.mubr.bf16.mxu1 %v12600_v24 }
 0x816   : > { %5546 = vmatmul.mubr.bf16.gmra.mxu1 %v12598_v41 }
 0x817   : > { %5553 = vmatprep.mubr.bf16.mxu1 %v12603_v39 }
 0x81e   : > { %5554 = vmatmul.mubr.bf16.gmra.mxu1 %v12601_v2  ;;  %v5284_v2 = vld [vmem:[%s18738_s18 + $0x58] sm:$0xff] }
 0x81f   : > { %5561 = vmatprep.mubr.bf16.mxu1 %v12606_v35 }
 0x826   : > { %5562 = vmatmul.mubr.bf16.gmra.mxu1 %v12604_v53 }
 0x827   : > { %5569 = vmatprep.mubr.bf16.mxu1 %v12609_v29 }
 0x82e   : > { %5570 = vmatmul.mubr.bf16.gmra.mxu1 %v12607_v31 }
 0x82f   : > { %5577 = vmatprep.mubr.bf16.mxu1 %v12612_v47 }
 0x836   : > { %5578 = vmatmul.mubr.bf16.gmra.mxu1 %v12610_v11 }
 0x837   : > { %5585 = vmatprep.mubr.bf16.mxu1 %v12615_v59  ;;  %v5277_v59 = vld [vmem:[%s18738_s18 + $0x20] sm:$0xff] }
 0x83e   : > { %5586 = vmatmul.mubr.bf16.gmra.mxu1 %v12613_v33  ;;  %v5285_v33 = vld [vmem:[%s18738_s18 + $0x60] sm:$0xff] }
 0x83f   : > { %5593 = vmatprep.mubr.bf16.mxu1 %v12618_v14 }
 0x846   : > { %5594 = vmatmul.mubr.bf16.gmra.mxu1 %v12616_v5 }
 0x847   : > { %5601 = vmatprep.mubr.bf16.mxu1 %v12621_v6 }
 0x84e   : > { %5602 = vmatmul.mubr.bf16.gmra.mxu1 %v12619_v49 }
 0x84f   : > { %5609 = vmatprep.mubr.bf16.mxu1 %v12624_v46 }
 0x856   : > { %5610 = vmatmul.mubr.bf16.gmra.mxu1 %v12622_v26 }
 0x857   : > { %5617 = vmatprep.mubr.bf16.mxu1 %v12627_v42  ;;  %v5282_v42 = vld [vmem:[%s18738_s18 + $0x48] sm:$0xff] }
 0x85e   : > { %5618 = vmatmul.mubr.bf16.gmra.mxu1 %v12625_v37 }
 0x8a6   : > { %v12025_v25 = vpop.f32.mrf.mxu1 }
 0x8a8   : > { %v12026_v56 = vpop.f32.mrf.mxu1 }
 0x8a9   : > { %v15855_v55 = vadd.f32 %v12026_v56, %v12025_v25  ;;  %v5286_v56 = vld [vmem:[%s18738_s18 + $0x68] sm:$0xff] }
 0x8aa   : > { %v15857_v63 = vpop.f32.mrf.mxu1 }
 0x8ac   : > { %v15859_v54 = vpop.f32.mrf.mxu1 }
 0x8ae   : > { %v15861_v30 = vpop.f32.mrf.mxu1 }
 0x8b0   : > { %v15863_v51 = vpop.f32.mrf.mxu1 }
 0x8b2   : > { %v15865_v45 = vpop.f32.mrf.mxu1 }
 0x8b4   : > { %v15867_v17 = vpop.f32.mrf.mxu1 }
 0x8b6   : > { %v12037_v12 = vpop.f32.mrf.mxu1 }
 0x8b8   : > { %v12038_v52 = vpop.f32.mrf.mxu1 }
 0x8b9   : > { %v12039_v47 = vadd.f32 %v12038_v52, %v12037_v12 }
 0x8ba   : > { %v15869_v62 = vpop.f32.mrf.mxu1 }
 0x8bb   : > { %v5516_v26 = vadd.f32 %v12039_v47, %v5277_v59  ;;  %v5273_v59 = vld [vmem:[%s18738_s18] sm:$0xff] }
 0x8bc   : > { %v15871_v38 = vpop.f32.mrf.mxu1 }
 0x8be   : > { %v12043_v1 = vpop.f32.mrf.mxu1 }
 0x8c0   : > { %v12044_v28 = vpop.f32.mrf.mxu1 }
 0x8c1   : > { %v12045_v7 = vadd.f32 %v12044_v28, %v12043_v1 }
 0x8c2   : > { %v12046_v32 = vpop.f32.mrf.mxu1 }
 0x8c3   : > { %v5524_v50 = vadd.f32 %v12045_v7, %v5279_v3  ;;  %v11634_v7 = vmul.f32 -1.442695, %v5516_v26  ;;  %v5287_v3 = vld [vmem:[%s18738_s18 + $0x70] sm:$0xff] }
 0x8c4   : > { %v12047_v0 = vpop.f32.mrf.mxu1 }
 0x8c5   : > { %v11636_v24 = vmul.f32 -1.442695, %v5524_v50  ;;  %v12048_v28 = vadd.f32 %v12047_v0, %v12046_v32  ;;  %v12033_v32 = vadd.f32 %v15863_v51, %v15861_v30 }
 0x8c6   : > { %v12049_v13 = vpop.f32.mrf.mxu1 }
 0x8c8   : > { %v12050_v8 = vpop.f32.mrf.mxu1 }
 0x8c9   : > { %v12051_v19 = vadd.f32 %v12050_v8, %v12049_v13 }
 0x8ca   : > { %v12052_v27 = vpop.f32.mrf.mxu1 }
 0x8cb   : > { %v5532_v40 = vadd.f32 %v12051_v19, %v5281_v18  ;;  %v5280_v18 = vld [vmem:[%s18738_s18 + $0x38] sm:$0xff] }
 0x8cc   : > { %v12053_v9 = vpop.f32.mrf.mxu1 }
 0x8cd   : > { %v11638_v48 = vmul.f32 -1.442695, %v5532_v40  ;;  %v12054_v49 = vadd.f32 %v12053_v9, %v12052_v27  ;;  %v5527_v9 = vadd.f32 %v12048_v28, %v5280_v18  ;;  %v5274_v28 = vld [vmem:[%s18738_s18 + $0x8] sm:$0xff] }
 0x8ce   : > { %v12055_v10 = vpop.f32.mrf.mxu1 }
 0x8cf   : > { %12918 = vpow2.f32 %v11638_v48  ;;  %v5535_v8 = vadd.f32 %v12054_v49, %v5282_v42  ;;  %v5500_v42 = vadd.f32 %v15855_v55, %v5273_v59 }
 0x8d0   : > { %v12056_v44 = vpop.f32.mrf.mxu1  ;;  %12920 = vpow2.f32 %v11636_v24 }
 0x8d1   : > { %v12057_v43 = vadd.f32 %v12056_v44, %v12055_v10  ;;  %v11639_v0 = vmul.f32 -1.442695, %v5535_v8  ;;  %v5275_v44 = vld [vmem:[%s18738_s18 + $0x10] sm:$0xff] }
 0x8d2   : > { %v12058_v41 = vpop.f32.mrf.mxu1  ;;  %v5508_v51 = vadd.f32 %v12033_v32, %v5275_v44 }
 0x8d3   : > { %v5540_v39 = vadd.f32 %v12057_v43, %v5283_v36  ;;  %v12042_v43 = vadd.f32 %v15871_v38, %v15869_v62 }
 0x8d4   : > { %v12059_v35 = vpop.f32.mrf.mxu1 }
 0x8d5   : > { %v11640_v53 = vmul.f32 -1.442695, %v5540_v39  ;;  %v12060_v29 = vadd.f32 %v12059_v35, %v12058_v41  ;;  %v5278_v39 = vld [vmem:[%s18738_s18 + $0x28] sm:$0xff] }
 0x8d6   : > { %v12061_v31 = vpop.f32.mrf.mxu1  ;;  %v5519_v62 = vadd.f32 %v12042_v43, %v5278_v39 }
 0x8d7   : > { %12922 = vpow2.f32 %v11640_v53  ;;  %v5543_v11 = vadd.f32 %v12060_v29, %v5284_v2  ;;  %v5288_v2 = vld [vmem:[%s18738_s18 + $0x78] sm:$0xff]  ;;  %v11637_v53 = vmul.f32 -1.442695, %v5527_v9 }
 0x8d8   : > { %v12062_v14 = vpop.f32.mrf.mxu1 }
 0x8d9   : > { %v11641_v5 = vmul.f32 -1.442695, %v5543_v11  ;;  %v12063_v6 = vadd.f32 %v12062_v14, %v12061_v31 }
 0x8da   : > { %v12064_v46 = vpop.f32.mrf.mxu1 }
 0x8db   : > { %12924 = vpow2.f32 %v11641_v5  ;;  %v5548_v37 = vadd.f32 %v12063_v6, %v5285_v33  ;;  %v12036_v33 = vadd.f32 %v15867_v17, %v15865_v45  ;;  %v5276_v5 = vld [vmem:[%s18738_s18 + $0x18] sm:$0xff]  ;;  %v12030_v45 = vadd.f32 %v15859_v54, %v15857_v63 }
 0x8dc   : > { %v12919_v25 = vpop.eup %12918  ;;  %v12065_v1 = vpop.f32.mrf.mxu1 }
 0x8dd   : > { %v5730_v12 = vadd.f32 1.0, %v12919_v25  ;;  %v11642_v52 = vmul.f32 -1.442695, %v5548_v37  ;;  %v12066_v13 = vadd.f32 %v12065_v1, %v12064_v46  ;;  %v12921_v36 = vpop.eup %12920  ;;  %v11632_v37 = vmul.f32 -1.442695, %v5508_v51 }
 0x8de   : > { %v12067_v19 = vpop.f32.mrf.mxu1  ;;  %v5728_v47 = vadd.f32 1.0, %v12921_v36  ;;  %v5511_v17 = vadd.f32 %v12036_v33, %v5276_v5  ;;  %v5503_v8 = vadd.f32 %v12030_v45, %v5274_v28  ;;  %v5297_v28 = vld [vmem:[%s18738_s18 + $0xc0] sm:$0xff] }
 0x8df   : > { %12926 = vrcp.f32 %v5730_v12  ;;  %v5551_v27 = vadd.f32 %v12066_v13, %v5286_v56  ;;  %v11635_v56 = vmul.f32 -1.442695, %v5519_v62  ;;  %v11630_v13 = vmul.f32 -1.442695, %v5500_v42 }
 0x8e0   : > { %12928 = vpow2.f32 %v11642_v52  ;;  %v12068_v40 = vpop.f32.mrf.mxu1  ;;  %v11631_v9 = vmul.f32 -1.442695, %v5503_v8 }
 0x8e1   : > { %v11643_v48 = vmul.f32 -1.442695, %v5551_v27  ;;  %v12069_v50 = vadd.f32 %v12068_v40, %v12067_v19  ;;  %12930 = vpow2.f32 %v11634_v7  ;;  %v11633_v19 = vmul.f32 -1.442695, %v5511_v17 }
 0x8e2   : > { %v12070_v10 = vpop.f32.mrf.mxu1 }
 0x8e3   : > { %v5556_v24 = vadd.f32 %v12069_v50, %v5287_v3  ;;  %12932 = vpow2.f32 %v11643_v48 }
 0x8e4   : > { %v12923_v41 = vpop.eup %12922  ;;  %v12071_v35 = vpop.f32.mrf.mxu1  ;;  %12934 = vpow2.f32 %v11639_v0 }
 0x8e5   : > { %v5732_v29 = vadd.f32 1.0, %v12923_v41  ;;  %v11644_v31 = vmul.f32 -1.442695, %v5556_v24  ;;  %v12072_v30 = vadd.f32 %v12071_v35, %v12070_v10 }
 0x8e6   : > { %v12073_v11 = vpop.f32.mrf.mxu1 }
 0x8e7   : > { %12936 = vrcp.f32 %v5732_v29  ;;  %v5559_v38 = vadd.f32 %v12072_v30, %v5288_v2 }
 0x8e8   : > { %v12925_v14 = vpop.eup %12924  ;;  %12938 = vpow2.f32 %v11644_v31  ;;  %v12074_v6 = vpop.f32.mrf.mxu1 }
 0x8e9   : > { %12940 = vpow2.f32 %v11637_v53  ;;  %v5733_v49 = vadd.f32 1.0, %v12925_v14  ;;  %v11645_v46 = vmul.f32 -1.442695, %v5559_v38  ;;  %v15894_v26 = vadd.f32 %v12074_v6, %v12073_v11 }
 0x8ea   : > { %12942 = vrcp.f32 %v5728_v47  ;;  %v15897_v25 = vpop.f32.mrf.mxu1 }
 0x8eb   : > { %12944 = vrcp.f32 %v5733_v49 }
 0x8ec   : > { %v12927_v1 = vpop.eup %12926  ;;  %12946 = vpow2.f32 %v11645_v46  ;;  %v15902_v12 = vpop.f32.mrf.mxu1 }
 0x8ed   : > { %v12929_v52 = vpop.eup %12928  ;;  %5860 = vperm.xlu0 %12387, %v12927_v1   ;;  %12948 = vpow2.f32 %v11632_v37 }
 0x8ee   : > { %v5734_v55 = vadd.f32 1.0, %v12929_v52  ;;  %v15904_v18 = vpop.f32.mrf.mxu1  ;;  %12950 = vpow2.f32 %v11635_v56  ;;  %v12931_v7 = vpop.eup %12930 }
 0x8ef   : > { %v5726_v29 = vadd.f32 1.0, %v12931_v7 }
 0x8f0   : > { %12952 = vrcp.f32 %v5734_v55  ;;  %v15906_v63 = vpop.f32.mrf.mxu1  ;;  %v12933_v54 = vpop.eup %12932 }
 0x8f1   : > { %12954 = vpow2.f32 %v11630_v13  ;;  %v5735_v27 = vadd.f32 1.0, %v12933_v54  ;;  %v12935_v40 = vpop.eup %12934 }
 0x8f2   : > { %v15908_v3 = vpop.f32.mrf.mxu1  ;;  %12956 = vpow2.f32 %v11633_v19  ;;  %v5731_v43 = vadd.f32 1.0, %v12935_v40 }
 0x8f3   : > { %12958 = vrcp.f32 %v5735_v27 }
 0x8f4   : > { %v12937_v48 = vpop.eup %12936  ;;  %v15910_v50 = vpop.f32.mrf.mxu1  ;;  %12960 = vpow2.f32 %v11631_v9 }
 0x8f5   : > { %v12939_v32 = vpop.eup %12938  ;;  %5870 = vperm.xlu0 %12387, %v12937_v48  }
 0x8f6   : > { %v12941_v0 = vpop.eup %12940  ;;  %v5736_v10 = vadd.f32 1.0, %v12939_v32  ;;  %v15912_v36 = vpop.f32.mrf.mxu1  ;;  %v5299_v32 = vld [vmem:[%s18738_s18 + $0xd0] sm:$0xff] }
 0x8f7   : > { %v12943_v44 = vpop.eup %12942  ;;  %v5729_v30 = vadd.f32 1.0, %v12941_v0 }
 0x8f8   : > { %v12945_v24 = vpop.eup %12944  ;;  %12962 = vrcp.f32 %v5736_v10  ;;  %v15914_v41 = vpop.f32.mrf.mxu1 }
 0x8f9   : > { %v12947_v39 = vpop.eup %12946  ;;  %5875 = vperm.xlu1 %12388, %v12945_v24   ;;  %5850 = vperm.xlu0 %12387, %v12943_v44   ;;  %12964 = vrcp.f32 %v5731_v43 }
 0x8fa   : > { %v5737_v2 = vadd.f32 1.0, %v12947_v39  ;;  %v15916_v35 = vpop.f32.mrf.mxu1  ;;  %v12949_v53 = vpop.eup %12948 }
 0x8fb   : > { %v12951_v31 = vpop.eup %12950  ;;  %v5724_v33 = vadd.f32 1.0, %v12949_v53 }
 0x8fc   : > { %12966 = vrcp.f32 %v5737_v2  ;;  %v15918_v51 = vpop.f32.mrf.mxu1  ;;  %v5727_v38 = vadd.f32 1.0, %v12951_v31  ;;  %v5300_v2 = vld [vmem:[%s18738_s18 + $0xd8] sm:$0xff] }
 0x8fd   : > { %v12953_v47 = vpop.eup %12952  ;;  %12968 = vrcp.f32 %v5726_v29 }
 0x8fe   : > { %5880 = vperm.xlu1 %12388, %v12953_v47   ;;  %v15920_v11 = vpop.f32.mrf.mxu1  ;;  %v12955_v59 = vpop.eup %12954  ;;  %12970 = vrcp.f32 %v5729_v30 }
 0x8ff   : > { %v12957_v62 = vpop.eup %12956  ;;  %v5722_v49 = vadd.f32 1.0, %v12955_v59  ;;  %12972 = vrcp.f32 %v5724_v33  ;;  %v5301_v33 = vld [vmem:[%s18738_s18 + $0xe0] sm:$0xff] }
 0x900   : > { %v12092_v14 = vpop.f32.mrf.mxu1  ;;  %v12959_v5 = vpop.eup %12958  ;;  %v5725_v42 = vadd.f32 1.0, %v12957_v62  ;;  %12974 = vrcp.f32 %v5727_v38 }
 0x901   : > { %v12961_v46 = vpop.eup %12960  ;;  %12976 = vrcp.f32 %v5722_v49 }
 0x902   : > { %5885 = vperm.xlu1 %12388, %v12959_v5   ;;  %v15922_v6 = vpop.f32.mrf.mxu1  ;;  %v5723_v1 = vadd.f32 1.0, %v12961_v46  ;;  %12978 = vrcp.f32 %v5725_v42  ;;  %v12093_v46 = vadd.f32 %v12092_v14, %v15920_v11 }
 0x904   : > { %v15924_v37 = vpop.f32.mrf.mxu1  ;;  %12980 = vrcp.f32 %v5723_v1  ;;  %v5302_v1 = vld [vmem:[%s18738_s18 + $0xe8] sm:$0xff] }
 0x905   : > { %v12963_v45 = vpop.eup %12962 }
 0x906   : > { %5890 = vperm.xlu1 %12388, %v12963_v45   ;;  %v12097_v17 = vpop.f32.mrf.mxu1  ;;  %v12965_v56 = vpop.eup %12964  ;;  %v5295_v45 = vld [vmem:[%s18738_s18 + $0xb0] sm:$0xff] }
 0x908   : > { %v12098_v52 = vpop.f32.mrf.mxu1 }
 0x909   : > { %v12967_v13 = vpop.eup %12966  ;;  %v12099_v55 = vadd.f32 %v12098_v52, %v12097_v17  ;;  %v12087_v52 = vadd.f32 %v15914_v41, %v15912_v36  ;;  %v12081_v36 = vadd.f32 %v15906_v63, %v15904_v18 }
 0x90a   : > { %5865 = vperm.xlu1 %12388, %v12965_v56   ;;  %5895 = vperm.xlu0 %12387, %v12967_v13   ;;  %v12100_v8 = vpop.f32.mrf.mxu1  ;;  %v12969_v7 = vpop.eup %12968 }
 0x90b   : > { %v5596_v19 = vadd.f32 %v12099_v55, %v5297_v28  ;;  %v12971_v27 = vpop.eup %12970 }
 0x90c   : > { %v12101_v54 = vpop.f32.mrf.mxu1  ;;  %v12973_v48 = vpop.eup %12972 }
 0x90d   : > { %v11654_v40 = vmul.f32 -1.442695, %v5596_v19  ;;  %v12975_v10 = vpop.eup %12974  ;;  %v12102_v11 = vadd.f32 %v12101_v54, %v12100_v8  ;;  %v5291_v8 = vld [vmem:[%s18738_s18 + $0x90] sm:$0xff]  ;;  %v12096_v54 = vadd.f32 %v15924_v37, %v15922_v6 }
 0x90e   : > { %5855 = vperm.xlu1 %12388, %v12971_v27   ;;  %5840 = vperm.xlu0 %12387, %v12969_v7   ;;  %v12103_v9 = vpop.f32.mrf.mxu1  ;;  %v12977_v39 = vpop.eup %12976  ;;  %v5293_v7 = vld [vmem:[%s18738_s18 + $0xa0] sm:$0xff]  ;;  %v5588_v27 = vadd.f32 %v12093_v46, %v5295_v45  ;;  %v5572_v18 = vadd.f32 %v12081_v36, %v5291_v8 }
 0x90f   : > { %12982 = vpow2.f32 %v11654_v40  ;;  %v12979_v29 = vpop.eup %12978  ;;  %v5298_v40 = vld [vmem:[%s18738_s18 + $0xc8] sm:$0xff] }
 0x910   : > { %v12104_v0 = vpop.f32.mrf.mxu1  ;;  %v11652_v41 = vmul.f32 -1.442695, %v5588_v27 }
 0x911   : > { %v12105_v44 = vadd.f32 %v12104_v0, %v12103_v9  ;;  %v12981_v38 = vpop.eup %12980  ;;  %v5580_v0 = vadd.f32 %v12087_v52, %v5293_v7 }
 0x912   : > { %5845 = vperm.xlu1 %12388, %v12975_v10   ;;  %5830 = vperm.xlu0 %12387, %v12973_v48   ;;  %v12106_v43 = vpop.f32.mrf.mxu1  ;;  %v5303_v48 = vld [vmem:[%s18738_s18 + $0xf0] sm:$0xff] }
 0x913   : > { %v5604_v24 = vadd.f32 %v12105_v44, %v5299_v32 }
 0x914   : > { %v12107_v53 = vpop.f32.mrf.mxu1 }
 0x915   : > { %v11656_v31 = vmul.f32 -1.442695, %v5604_v24  ;;  %v12108_v30 = vadd.f32 %v12107_v53, %v12106_v43  ;;  %v5599_v43 = vadd.f32 %v12102_v11, %v5298_v40  ;;  %v5296_v53 = vld [vmem:[%s18738_s18 + $0xb8] sm:$0xff] }
 0x916   : > { %5835 = vperm.xlu1 %12388, %v12979_v29   ;;  %5820 = vperm.xlu0 %12387, %v12977_v39   ;;  %v12109_v47 = vpop.f32.mrf.mxu1  ;;  %v5304_v29 = vld [vmem:[%s18738_s18 + $0xf8] sm:$0xff] }
 0x917   : > { %12984 = vpow2.f32 %v11656_v31  ;;  %v5607_v59 = vadd.f32 %v12108_v30, %v5300_v2  ;;  %v11650_v30 = vmul.f32 -1.442695, %v5580_v0  ;;  %v11655_v63 = vmul.f32 -1.442695, %v5599_v43 }
 0x918   : > { %v12110_v62 = vpop.f32.mrf.mxu1 }
 0x919   : > { %v11657_v5 = vmul.f32 -1.442695, %v5607_v59  ;;  %v12111_v49 = vadd.f32 %v12110_v62, %v12109_v47  ;;  %v5289_v62 = vld [vmem:[%s18738_s18 + $0x80] sm:$0xff] }
 0x91a   : > { %5825 = vperm.xlu1 %12388, %v12981_v38   ;;  %v12112_v42 = vpop.f32.mrf.mxu1  ;;  %v12090_v38 = vadd.f32 %v15918_v51, %v15916_v35  ;;  %v5564_v45 = vadd.f32 %v15894_v26, %v5289_v62 }
 0x91b   : > { %12986 = vpow2.f32 %v11657_v5  ;;  %v5612_v17 = vadd.f32 %v12111_v49, %v5301_v33  ;;  %v5591_v5 = vadd.f32 %v12096_v54, %v5296_v53  ;;  %v5294_v49 = vld [vmem:[%s18738_s18 + $0xa8] sm:$0xff] }
 0x91c   : > { %v12983_v56 = vpop.eup %12982  ;;  %v12113_v28 = vpop.f32.mrf.mxu1 }
 0x91d   : > { %v5746_v13 = vadd.f32 1.0, %v12983_v56  ;;  %v11658_v55 = vmul.f32 -1.442695, %v5612_v17  ;;  %v12114_v19 = vadd.f32 %v12113_v28, %v12112_v42  ;;  %v11648_v17 = vmul.f32 -1.442695, %v5572_v18  ;;  %v5292_v28 = vld [vmem:[%s18738_s18 + $0x98] sm:$0xff] }
 0x91e   : > { %v12115_v14 = vpop.f32.mrf.mxu1  ;;  %v12084_v56 = vadd.f32 %v15910_v50, %v15908_v3  ;;  %v11653_v35 = vmul.f32 -1.442695, %v5591_v5 }
 0x91f   : > { %12988 = vrcp.f32 %v5746_v13  ;;  %v5615_v9 = vadd.f32 %v12114_v19, %v5302_v1  ;;  %v5583_v1 = vadd.f32 %v12090_v38, %v5294_v49  ;;  %v11646_v13 = vmul.f32 -1.442695, %v5564_v45  ;;  %v5290_v19 = vld [vmem:[%s18738_s18 + $0x88] sm:$0xff] }
 0x920   : > { %12990 = vpow2.f32 %v11658_v55  ;;  %v12116_v32 = vpop.f32.mrf.mxu1  ;;  %v12078_v55 = vadd.f32 %v15902_v12, %v15897_v25  ;;  %v5575_v7 = vadd.f32 %v12084_v56, %v5292_v28 }
 0x921   : > { %v11659_v10 = vmul.f32 -1.442695, %v5615_v9  ;;  %v12117_v44 = vadd.f32 %v12116_v32, %v12115_v14  ;;  %v11651_v27 = vmul.f32 -1.442695, %v5583_v1 }
 0x922   : > { %v12118_v24 = vpop.f32.mrf.mxu1  ;;  %v5567_v50 = vadd.f32 %v12078_v55, %v5290_v19  ;;  %v11649_v40 = vmul.f32 -1.442695, %v5575_v7  ;;  %v18739_v19 = vmax.f32 %v15372_v20, 0.0  ;;  %v18745_v20 = vld [vmem:[#allocation168_spill] sm:$0xff] }
 0x923   : > { %v5620_v39 = vadd.f32 %v12117_v44, %v5303_v48  ;;  %12992 = vpow2.f32 %v11659_v10 }
 0x924   : > { %v12985_v2 = vpop.eup %12984  ;;  %v12119_v31 = vpop.f32.mrf.mxu1  ;;  %12994 = vpow2.f32 %v11652_v41  ;;  %v11647_v25 = vmul.f32 -1.442695, %v5567_v50 }
 0x925   : > { %v5748_v47 = vadd.f32 1.0, %v12985_v2  ;;  %v11660_v59 = vmul.f32 -1.442695, %v5620_v39  ;;  %v12120_v33 = vadd.f32 %v12119_v31, %v12118_v24 }
 0x927   : > { %12996 = vrcp.f32 %v5748_v47  ;;  %v5623_v6 = vadd.f32 %v12120_v33, %v5304_v29 }
 0x928   : > { %v12987_v37 = vpop.eup %12986  ;;  %12998 = vpow2.f32 %v11660_v59 }
 0x929   : > { %13000 = vpow2.f32 %v11650_v30  ;;  %v5749_v46 = vadd.f32 1.0, %v12987_v37  ;;  %v11661_v42 = vmul.f32 -1.442695, %v5623_v6 }
 0x92a   : > { %13002 = vpow2.f32 %v11655_v63 }
 0x92b   : > { %13004 = vrcp.f32 %v5749_v46 }
 0x92c   : > { %v12989_v51 = vpop.eup %12988  ;;  %13006 = vpow2.f32 %v11661_v42 }
 0x92d   : > { %v12991_v52 = vpop.eup %12990  ;;  %5940 = vperm.xlu0 %12387, %v12989_v51   ;;  %13008 = vpow2.f32 %v11648_v17 }
 0x92e   : > { %v5750_v26 = vadd.f32 1.0, %v12991_v52  ;;  %13010 = vpow2.f32 %v11653_v35 }
 0x930   : > { %13012 = vrcp.f32 %v5750_v26  ;;  %v12993_v3 = vpop.eup %12992 }
 0x931   : > { %13014 = vpow2.f32 %v11646_v13  ;;  %v5751_v11 = vadd.f32 1.0, %v12993_v3  ;;  %v12995_v14 = vpop.eup %12994 }
 0x932   : > { %13016 = vpow2.f32 %v11651_v27  ;;  %v5744_v10 = vadd.f32 1.0, %v12995_v14  ;;  %v18740_v27 = vmax.f32 %v15376_v57, 0.0 }
 0x933   : > { %13018 = vrcp.f32 %v5751_v11  ;;  %v18741_v11 = vmax.f32 %v15344_v34, 0.0  ;;  %v18747_v34 = vld [vmem:[#allocation77_spill] sm:$0xff] }
 0x934   : > { %v12997_v9 = vpop.eup %12996  ;;  %13020 = vpow2.f32 %v11649_v40  ;;  %v18742_v40 = vmax.f32 %v15348_v23, 0.0  ;;  %v18749_v23 = vld [vmem:[#allocation183_spill] sm:$0xff] }
 0x935   : > { %v12999_v48 = vpop.eup %12998  ;;  %5950 = vperm.xlu0 %12387, %v12997_v9  }
 0x936   : > { %v13001_v32 = vpop.eup %13000  ;;  %v5752_v12 = vadd.f32 1.0, %v12999_v48 }
 0x937   : > { %v13003_v0 = vpop.eup %13002  ;;  %v5742_v24 = vadd.f32 1.0, %v13001_v32 }
 0x938   : > { %v13005_v44 = vpop.eup %13004  ;;  %13022 = vrcp.f32 %v5752_v12  ;;  %v5747_v54 = vadd.f32 1.0, %v13003_v0  ;;  %v18744_v0 = vmax.f32 %v15394_v16, 0.0  ;;  %v18753_v16 = vld [vmem:[#allocation176_spill] sm:$0xff] }
 0x939   : > { %v13007_v36 = vpop.eup %13006  ;;  %5955 = vperm.xlu1 %12388, %v13005_v44   ;;  %13024 = vpow2.f32 %v11647_v25  ;;  %v18743_v25 = vmax.f32 %v15386_v22, 0.0  ;;  %v18746_v44 = vmax.f32 %v18745_v20, 0.0 }
 0x93a   : > { %v5753_v41 = vadd.f32 1.0, %v13007_v36  ;;  %v13009_v43 = vpop.eup %13008  ;;  %13026 = vrcp.f32 %v5744_v10 }
 0x93b   : > { %v13011_v8 = vpop.eup %13010  ;;  %v5740_v53 = vadd.f32 1.0, %v13009_v43 }
 0x93c   : > { %13028 = vrcp.f32 %v5753_v41  ;;  %v5745_v31 = vadd.f32 1.0, %v13011_v8 }
 0x93d   : > { %v13013_v39 = vpop.eup %13012  ;;  %13030 = vrcp.f32 %v5742_v24  ;;  %v18748_v24 = vmax.f32 %v18747_v34, 0.0  ;;  %v18773_v34 = vld [vmem:[#allocation74_spill] sm:$0xff] }
 0x93e   : > { %5960 = vperm.xlu0 %12387, %v13013_v39   ;;  %v13015_v2 = vpop.eup %13014  ;;  %13032 = vrcp.f32 %v5747_v54  ;;  %v18750_v54 = vmax.f32 %v18749_v23, 0.0 }
 0x93f   : > { %v13017_v29 = vpop.eup %13016  ;;  %v5738_v47 = vadd.f32 1.0, %v13015_v2  ;;  %13034 = vrcp.f32 %v5740_v53  ;;  %v18751_v2 = vld [vmem:[#allocation87_spill] sm:$0xff] }
 0x940   : > { %v13019_v30 = vpop.eup %13018  ;;  %v5743_v33 = vadd.f32 1.0, %v13017_v29  ;;  %13036 = vrcp.f32 %v5745_v31  ;;  %v18752_v53 = vmax.f32 %v18751_v2, 0.0 }
 0x941   : > { %5965 = vperm.xlu1 %12388, %v13019_v30   ;;  %v13021_v59 = vpop.eup %13020  ;;  %13038 = vrcp.f32 %v5738_v47  ;;  %v18754_v30 = vmax.f32 %v18753_v16, 0.0 }
 0x942   : > { %v5741_v38 = vadd.f32 1.0, %v13021_v59  ;;  %13040 = vrcp.f32 %v5743_v33  ;;  %v18755_v33 = vld [vmem:[#allocation190_spill] sm:$0xff] }
 0x944   : > { %13042 = vrcp.f32 %v5741_v38 }
 0x945   : > { %v13023_v18 = vpop.eup %13022 }
 0x946   : > { %5970 = vperm.xlu0 %12387, %v13023_v18   ;;  %v13025_v63 = vpop.eup %13024  ;;  %v18756_v18 = vmax.f32 %v18755_v33, 0.0 }
 0x947   : > { %v13027_v62 = vpop.eup %13026  ;;  %v5739_v37 = vadd.f32 1.0, %v13025_v63 }
 0x949   : > { %v13029_v5 = vpop.eup %13028  ;;  %13044 = vrcp.f32 %v5739_v37 }
 0x94a   : > { %5975 = vperm.xlu1 %12388, %v13029_v5   ;;  %5930 = vperm.xlu0 %12387, %v13027_v62   ;;  %v13031_v6 = vpop.eup %13030  ;;  %v18757_v62 = vld [vmem:[#allocation86_spill] sm:$0xff] }
 0x94b   : > { %v13033_v49 = vpop.eup %13032  ;;  %v18758_v38 = vmax.f32 %v18757_v62, 0.0 }
 0x94c   : > { %v13035_v46 = vpop.eup %13034 }
 0x94d   : > { %v13037_v42 = vpop.eup %13036 }
 0x94e   : > { %5945 = vperm.xlu1 %12388, %v13033_v49   ;;  %5920 = vperm.xlu0 %12387, %v13031_v6   ;;  %v13039_v45 = vpop.eup %13038  ;;  %v18759_v6 = vld [vmem:[#allocation185_spill] sm:$0xff] }
 0x94f   : > { %v13041_v17 = vpop.eup %13040  ;;  %v18760_v37 = vmax.f32 %v18759_v6, 0.0 }
 0x951   : > { %v13043_v56 = vpop.eup %13042 }
 0x952   : > { %5935 = vperm.xlu1 %12388, %v13037_v42   ;;  %5910 = vperm.xlu0 %12387, %v13035_v46  }
 0x956   : > { %5925 = vperm.xlu1 %12388, %v13041_v17   ;;  %5900 = vperm.xlu0 %12387, %v13039_v45   ;;  %v13045_v1 = vpop.eup %13044 }
 0x95a   : > { %5915 = vperm.xlu1 %12388, %v13043_v56   ;;  %v18761_v56 = vld [vmem:[#allocation76_spill] sm:$0xff] }
 0x95e   : > { %5905 = vperm.xlu1 %12388, %v13045_v1   ;;  %v18762_v1 = vmax.f32 %v18761_v56, 0.0 }
 0x968   : > { %v5861_v51 = vpop.permute.xlu0 %5860 }
 0x969   : > { %v5994_v63 = vmul.f32 %v5861_v51, %v18756_v18  ;;  %v5995_v5 = vmul.f32 %v5861_v51, %v18758_v38  ;;  %v18781_v18 = vld [vmem:[#allocation188_spill] sm:$0xff]  ;;  %v18783_v38 = vld [vmem:[#allocation73_spill] sm:$0xff] }
 0x970   : > { %v5871_v52 = vpop.permute.xlu0 %5870 }
 0x971   : > { %v5998_v8 = vmul.f32 %v5871_v52, %v18748_v24  ;;  %v5999_v39 = vmul.f32 %v5871_v52, %v18750_v54  ;;  %v18774_v24 = vmax.f32 %v18773_v34, 0.0  ;;  %v18777_v54 = vld [vmem:[#allocation79_spill] sm:$0xff] }
 0x973   : > { %v6072_v46 = vadd.f32 %v5999_v39, %v5998_v8 }
 0x974   : > { %v5876_v35 = vpop.permute.xlu1 %5875  ;;  %v5851_v55 = vpop.permute.xlu0 %5850 }
 0x975   : > { %v6001_v47 = vmul.f32 %v5876_v35, %v18754_v30  ;;  %v6000_v49 = vmul.f32 %v5876_v35, %v18760_v37  ;;  %v18765_v35 = vld [vmem:[#allocation75_spill] sm:$0xff]  ;;  %v18785_v37 = vld [vmem:[#allocation81_spill] sm:$0xff] }
 0x977   : > { %v6229_v52 = vpack.c.bf16 %v6001_v47, %v5999_v39 }
 0x979   : > { %v5881_v28 = vpop.permute.xlu1 %5880 }
 0x97a   : > { %v6002_v14 = vmul.f32 %v5881_v28, %v18741_v11  ;;  %v6003_v9 = vmul.f32 %v5881_v28, %v18742_v40  ;;  %v6075_v11 = vadd.f32 %v6001_v47, %v6000_v49  ;;  %v18767_v40 = vmax.f32 %v15561_v4, 0.0 }
 0x97c   : > { %v6078_v29 = vadd.f32 %v6003_v9, %v6002_v14 }
 0x97d   : > { %v5886_v13 = vpop.permute.xlu1 %5885 }
 0x97e   : > { %v6005_v57 = vmul.f32 %v5886_v13, %v18746_v44  ;;  %v6004_v22 = vmul.f32 %v5886_v13, %v18752_v53  ;;  %v18763_v13 = vmax.f32 %v15278_v61, 0.0 }
 0x980   : > { %v6231_v59 = vpack.c.bf16 %v6005_v57, %v6003_v9  ;;  %v6081_v42 = vadd.f32 %v6005_v57, %v6004_v22  ;;  %v6230_v45 = vpack.c.bf16 %v6004_v22, %v6002_v14  ;;  %v6228_v14 = vpack.c.bf16 %v6000_v49, %v5998_v8  ;;  %v18771_v57 = vld [vmem:[#allocation51_spill] sm:$0xff]  ;;  %v18775_v8 = vld [vmem:[#allocation78_spill] sm:$0xff] }
 0x981   : > { %v5891_v26 = vpop.permute.xlu1 %5890  ;;  %v18776_v23 = vmax.f32 %v18775_v8, 0.0  ;;  %v18786_v49 = vmax.f32 %v18785_v37, 0.0 }
 0x982   : > { %v6006_v7 = vmul.f32 %v5891_v26, %v18739_v19  ;;  %v6007_v3 = vmul.f32 %v5891_v26, %v18740_v27  ;;  %v5990_v26 = vmul.f32 %v5851_v55, %v18763_v13  ;;  %v18764_v19 = vmax.f32 %v15282_v60, 0.0 }
 0x983   : > { %v18766_v27 = vmax.f32 %v18765_v35, 0.0  ;;  %v18768_v60 = vmax.f32 %v15284_v15, 0.0 }
 0x984   : > { %v6084_v50 = vadd.f32 %v6007_v3, %v6006_v7  ;;  %v5991_v51 = vmul.f32 %v5851_v55, %v18764_v19 }
 0x985   : > { %v5866_v48 = vpop.permute.xlu1 %5865  ;;  %v5896_v32 = vpop.permute.xlu0 %5895 }
 0x986   : > { %v6008_v12 = vmul.f32 %v5896_v32, %v18743_v25  ;;  %v6009_v10 = vmul.f32 %v5896_v32, %v18744_v0  ;;  %6085 = vadd.xlane.f32.xlu0 %v6084_v50  ;;  %v5997_v28 = vmul.f32 %v5866_v48, %v18762_v1  ;;  %v6066_v50 = vadd.f32 %v5995_v5, %v5994_v63 }
 0x987   : > { %v6060_v25 = vadd.f32 %v5991_v51, %v5990_v26 }
 0x988   : > { %v6232_v36 = vpack.c.bf16 %v6008_v12, %v6006_v7  ;;  %v6233_v41 = vpack.c.bf16 %v6009_v10, %v6007_v3  ;;  %v6087_v43 = vadd.f32 %v6009_v10, %v6008_v12  ;;  %v5996_v3 = vmul.f32 %v5866_v48, %v18766_v27 }
 0x989   : > { %v5856_v31 = vpop.permute.xlu1 %5855  ;;  %v5841_v17 = vpop.permute.xlu0 %5840  ;;  %v6227_v32 = vpack.c.bf16 %v5997_v28, %v5995_v5  ;;  %v18769_v12 = vmax.f32 %v15264_v21, 0.0  ;;  %v18770_v48 = vmax.f32 %v15268_v58, 0.0  ;;  %v18778_v58 = vmax.f32 %v18777_v54, 0.0 }
 0x98a   : > { %7259 = vmatprep.subr.bf16.mxu1 %v6233_v41  ;;  %6088 = vadd.xlane.f32.xlu1 %v6087_v43  ;;  %v5993_v9 = vmul.f32 %v5856_v31, %v18767_v40  ;;  %v5992_v55 = vmul.f32 %v5856_v31, %v18768_v60  ;;  %v6069_v20 = vadd.f32 %v5997_v28, %v5996_v3  ;;  %v18779_v31 = vld [vmem:[#allocation112_spill] sm:$0xff]  ;;  %v18784_v5 = vmax.f32 %v18783_v38, 0.0 }
 0x98b   : > { %6079 = vadd.xlane.f32.xlu0 %v6078_v29  ;;  %7260 = vmatpush1.bf16.msra.mxu1 %v6232_v36  ;;  %v5986_v0 = vmul.f32 %v5841_v17, %v18769_v12  ;;  %v5987_v10 = vmul.f32 %v5841_v17, %v18770_v48  ;;  %v6226_v44 = vpack.c.bf16 %v5996_v3, %v5994_v63  ;;  %v18772_v36 = vmax.f32 %v18771_v57, 0.0  ;;  %v18787_v17 = vld [vmem:[#allocation98_spill] sm:$0xff] }
 0x98c   : > { %7261 = vmatprep.subr.bf16.mxu1 %v6231_v59  ;;  %v6225_v43 = vpack.c.bf16 %v5993_v9, %v5991_v51  ;;  %v6063_v53 = vadd.f32 %v5993_v9, %v5992_v55  ;;  %v6224_v22 = vpack.c.bf16 %v5992_v55, %v5990_v26  ;;  %v18780_v16 = vmax.f32 %v18779_v31, 0.0  ;;  %v18793_v55 = vld [vmem:[#allocation95_spill] sm:$0xff] }
 0x98d   : > { %v5846_v7 = vpop.permute.xlu1 %5845  ;;  %v5831_v61 = vpop.permute.xlu0 %5830  ;;  %v6054_v2 = vadd.f32 %v5987_v10, %v5986_v0  ;;  %v18782_v63 = vmax.f32 %v18781_v18, 0.0  ;;  %v18788_v56 = vmax.f32 %v18787_v17, 0.0  ;;  %v18794_v12 = vmax.f32 %v18793_v55, 0.0 }
 0x98e   : > { %6073 = vadd.xlane.f32.xlu1 %v6072_v46  ;;  %v5989_v41 = vmul.f32 %v5846_v7, %v18772_v36  ;;  %v5982_v15 = vmul.f32 %v5831_v61, %v18774_v24  ;;  %v5983_v21 = vmul.f32 %v5831_v61, %v18776_v23  ;;  %v5988_v39 = vmul.f32 %v5846_v7, %v18778_v58  ;;  %v18791_v61 = vld [vmem:[#allocation147_spill] sm:$0xff] }
 0x98f   : > { %6082 = vadd.xlane.f32.xlu0 %v6081_v42  ;;  %7262 = vmatpush1.bf16.msra.mxu1 %v6230_v45 }
 0x990   : > { %7263 = vmatprep.subr.bf16.mxu1 %v6229_v52  ;;  %v6223_v47 = vpack.c.bf16 %v5989_v41, %v5987_v10  ;;  %v6048_v33 = vadd.f32 %v5983_v21, %v5982_v15  ;;  %v6057_v42 = vadd.f32 %v5989_v41, %v5988_v39  ;;  %v6222_v45 = vpack.c.bf16 %v5988_v39, %v5986_v0  ;;  %v18789_v52 = vld [vmem:[#allocation85_spill] sm:$0xff]  ;;  %v18795_v10 = vld [vmem:[#allocation159_spill] sm:$0xff] }
 0x991   : > { %v5836_v4 = vpop.permute.xlu1 %5835  ;;  %v5821_v29 = vpop.permute.xlu0 %5820  ;;  %v18790_v13 = vmax.f32 %v18789_v52, 0.0  ;;  %v18805_v39 = vld [vmem:[#allocation93_spill] sm:$0xff]  ;;  %v18817_v52 = vld [vmem:[#allocation179_spill] sm:$0xff] }
 0x992   : > { %6067 = vadd.xlane.f32.xlu1 %v6066_v50  ;;  %v5985_v30 = vmul.f32 %v5836_v4, %v18780_v16  ;;  %v5984_v62 = vmul.f32 %v5836_v4, %v18782_v63  ;;  %v5978_v6 = vmul.f32 %v5821_v29, %v18784_v5  ;;  %v5979_v46 = vmul.f32 %v5821_v29, %v18786_v49  ;;  %v18797_v4 = vld [vmem:[#allocation186_spill] sm:$0xff]  ;;  %v18811_v5 = vld [vmem:[#allocation187_spill] sm:$0xff] }
 0x993   : > { %6076 = vadd.xlane.f32.xlu0 %v6075_v11  ;;  %7264 = vmatpush1.bf16.msra.mxu1 %v6228_v14  ;;  %v18798_v57 = vmax.f32 %v18797_v4, 0.0 }
 0x994   : > { %7265 = vmatprep.subr.bf16.mxu1 %v6227_v32  ;;  %v6221_v28 = vpack.c.bf16 %v5985_v30, %v5983_v21  ;;  %v6051_v19 = vadd.f32 %v5985_v30, %v5984_v62  ;;  %v6042_v51 = vadd.f32 %v5979_v46, %v5978_v6  ;;  %v6220_v7 = vpack.c.bf16 %v5984_v62, %v5982_v15  ;;  %v18801_v15 = vld [vmem:[#allocation136_spill] sm:$0xff]  ;;  %v18803_v21 = vld [vmem:[#allocation154_spill] sm:$0xff] }
 0x995   : > { %v5826_v59 = vpop.permute.xlu1 %5825  ;;  %v18802_v8 = vmax.f32 %v18801_v15, 0.0  ;;  %v18804_v54 = vmax.f32 %v18803_v21, 0.0  ;;  %v18807_v30 = vld [vmem:[#allocation184_spill] sm:$0xff] }
 0x996   : > { %6061 = vadd.xlane.f32.xlu1 %v6060_v25  ;;  %v5981_v1 = vmul.f32 %v5826_v59, %v18788_v56  ;;  %v5980_v26 = vmul.f32 %v5826_v59, %v18790_v13  ;;  %v18792_v25 = vmax.f32 %v18791_v61, 0.0  ;;  %v18815_v56 = vld [vmem:[#allocation175_spill] sm:$0xff]  ;;  %v18818_v13 = vmax.f32 %v18817_v52, 0.0 }
 0x997   : > { %6070 = vadd.xlane.f32.xlu0 %v6069_v20  ;;  %7266 = vmatpush1.bf16.msra.mxu1 %v6226_v44  ;;  %v18796_v20 = vmax.f32 %v18795_v10, 0.0 }
 0x998   : > { %7267 = vmatprep.subr.bf16.mxu1 %v6225_v43  ;;  %v6219_v35 = vpack.c.bf16 %v5981_v1, %v5979_v46  ;;  %v6045_v27 = vadd.f32 %v5981_v1, %v5980_v26  ;;  %v6218_v3 = vpack.c.bf16 %v5980_v26, %v5978_v6  ;;  %v18799_v43 = vld [vmem:[#allocation138_spill] sm:$0xff]  ;;  %v18812_v6 = vmax.f32 %v18811_v5, 0.0  ;;  %v18813_v46 = vld [vmem:[#allocation91_spill] sm:$0xff] }
 0x999   : > { %v18800_v34 = vmax.f32 %v18799_v43, 0.0  ;;  %v18816_v1 = vmax.f32 %v18815_v56, 0.0  ;;  %v18841_v5 = vld [vmem:[#allocation170_spill] sm:$0xff] }
 0x99a   : > { %6055 = vadd.xlane.f32.xlu1 %v6054_v2  ;;  %v18806_v2 = vmax.f32 %v18805_v39, 0.0 }
 0x99b   : > { %6064 = vadd.xlane.f32.xlu0 %v6063_v53  ;;  %7268 = vmatpush1.bf16.msra.mxu1 %v6224_v22 }
 0x99c   : > { %7269 = vmatprep.subr.bf16.mxu1 %v6223_v47  ;;  %v18808_v47 = vmax.f32 %v18807_v30, 0.0 }
 0x99e   : > { %6049 = vadd.xlane.f32.xlu1 %v6048_v33  ;;  %v18809_v33 = vld [vmem:[#allocation182_spill] sm:$0xff] }
 0x99f   : > { %6058 = vadd.xlane.f32.xlu0 %v6057_v42  ;;  %7270 = vmatpush1.bf16.msra.mxu1 %v6222_v45  ;;  %v18810_v18 = vmax.f32 %v18809_v33, 0.0  ;;  %v18814_v42 = vmax.f32 %v18813_v46, 0.0 }
 0x9a0   : > { %7271 = vmatprep.subr.bf16.mxu1 %v6221_v28 }
 0x9a2   : > { %6043 = vadd.xlane.f32.xlu1 %v6042_v51 }
 0x9a3   : > { %6052 = vadd.xlane.f32.xlu0 %v6051_v19  ;;  %7272 = vmatpush1.bf16.msra.mxu1 %v6220_v7 }
 0x9a4   : > { %7273 = vmatprep.subr.bf16.mxu1 %v6219_v35 }
 0x9a7   : > { %6046 = vadd.xlane.f32.xlu0 %v6045_v27  ;;  %7274 = vmatpush1.bf16.msra.mxu1 %v6218_v3  ;;  %v18819_v27 = vld [vmem:[#allocation89_spill] sm:$0xff] }
 0x9a8   : > { %v5941_v50 = vpop.permute.xlu0 %5940  ;;  %v18820_v3 = vmax.f32 %v18819_v27, 0.0  ;;  %v18849_v27 = vld [vmem:[#allocation180_spill] sm:$0xff] }
 0x9a9   : > { %v6026_v28 = vmul.f32 %v5941_v50, %v18816_v1  ;;  %v6027_v26 = vmul.f32 %v5941_v50, %v18818_v13  ;;  %v18825_v50 = vld [vmem:[#allocation97_spill] sm:$0xff] }
 0x9ab   : > { %v6114_v10 = vadd.f32 %v6027_v26, %v6026_v28 }
 0x9b0   : > { %v5951_v11 = vpop.permute.xlu0 %5950 }
 0x9b1   : > { %v6030_v59 = vmul.f32 %v5951_v11, %v18808_v47  ;;  %v6031_v63 = vmul.f32 %v5951_v11, %v18810_v18  ;;  %v18837_v47 = vld [vmem:[#allocation53_spill] sm:$0xff] }
 0x9b3   : > { %v6120_v51 = vadd.f32 %v6031_v63, %v6030_v59 }
 0x9b4   : > { %v5956_v14 = vpop.permute.xlu1 %5955 }
 0x9b5   : > { %v6033_v37 = vmul.f32 %v5956_v14, %v18812_v6  ;;  %v6032_v45 = vmul.f32 %v5956_v14, %v18814_v42  ;;  %v18821_v14 = vld [vmem:[#allocation171_spill] sm:$0xff]  ;;  %v18842_v6 = vmax.f32 %v18841_v5, 0.0 }
 0x9b7   : > { %v6123_v61 = vadd.f32 %v6033_v37, %v6032_v45 }
 0x9b9   : > { %v5961_v40 = vpop.permute.xlu0 %5960 }
 0x9ba   : > { %v6034_v44 = vmul.f32 %v5961_v40, %v18796_v20  ;;  %v6035_v36 = vmul.f32 %v5961_v40, %v18798_v57  ;;  %v6245_v40 = vpack.c.bf16 %v6033_v37, %v6031_v63  ;;  %v6244_v20 = vpack.c.bf16 %v6032_v45, %v6030_v59  ;;  %v18839_v63 = vld [vmem:[#allocation181_spill] sm:$0xff]  ;;  %v18843_v45 = vld [vmem:[#allocation116_spill] sm:$0xff] }
 0x9bb   : > { %v18838_v59 = vmax.f32 %v18837_v47, 0.0 }
 0x9bc   : > { %v5966_v9 = vpop.permute.xlu1 %5965  ;;  %v6126_v38 = vadd.f32 %v6035_v36, %v6034_v44 }
 0x9bd   : > { %v6037_v58 = vmul.f32 %v5966_v9, %v18804_v54  ;;  %v6036_v53 = vmul.f32 %v5966_v9, %v18806_v2  ;;  %v18822_v9 = vmax.f32 %v18821_v14, 0.0  ;;  %v18833_v54 = vld [vmem:[#allocation114_spill] sm:$0xff] }
 0x9bf   : > { %v6247_v49 = vpack.c.bf16 %v6037_v58, %v6035_v36  ;;  %v6129_v17 = vadd.f32 %v6037_v58, %v6036_v53  ;;  %v6246_v7 = vpack.c.bf16 %v6036_v53, %v6034_v44  ;;  %v18827_v44 = vld [vmem:[#allocation189_spill] sm:$0xff]  ;;  %v18834_v58 = vmax.f32 %v18833_v54, 0.0  ;;  %v7537_v54 = vld [vmem:[%s18855_s10 + $0x28] sm:$0xff] }
 0x9c0   : > { %v18828_v4 = vmax.f32 %v18827_v44, 0.0 }
 0x9c1   : > { %v5971_v32 = vpop.permute.xlu0 %5970 }
 0x9c2   : > { %v6038_v60 = vmul.f32 %v5971_v32, %v18792_v25  ;;  %v6039_v0 = vmul.f32 %v5971_v32, %v18794_v12  ;;  %v18823_v25 = vld [vmem:[#allocation134_spill] sm:$0xff]  ;;  %v18826_v12 = vmax.f32 %v18825_v50, 0.0 }
 0x9c4   : > { %v6132_v48 = vadd.f32 %v6039_v0, %v6038_v60 }
 0x9c5   : > { %v5976_v41 = vpop.permute.xlu1 %5975  ;;  %v5931_v29 = vpop.permute.xlu0 %5930 }
 0x9c6   : > { %v6040_v24 = vmul.f32 %v5976_v41, %v18800_v34  ;;  %v6041_v23 = vmul.f32 %v5976_v41, %v18802_v8  ;;  %6133 = vadd.xlane.f32.xlu1 %v6132_v48  ;;  %v18829_v41 = vld [vmem:[#allocation56_spill] sm:$0xff]  ;;  %v18831_v8 = vld [vmem:[#allocation115_spill] sm:$0xff] }
 0x9c7   : > { %v18830_v43 = vmax.f32 %v18829_v41, 0.0  ;;  %v7545_v41 = vld [vmem:[%s18855_s10 + $0x68] sm:$0xff] }
 0x9c8   : > { %v6248_v22 = vpack.c.bf16 %v6040_v24, %v6038_v60  ;;  %v6135_v31 = vadd.f32 %v6041_v23, %v6040_v24  ;;  %v6249_v16 = vpack.c.bf16 %v6041_v23, %v6039_v0  ;;  %v18824_v60 = vmax.f32 %v18823_v25, 0.0 }
 0x9c9   : > { %v5946_v62 = vpop.permute.xlu1 %5945  ;;  %v5921_v35 = vpop.permute.xlu0 %5920  ;;  %v6023_v0 = vmul.f32 %v5931_v29, %v18826_v12  ;;  %v18832_v23 = vmax.f32 %v18831_v8, 0.0  ;;  %v7540_v8 = vld [vmem:[%s18855_s10 + $0x40] sm:$0xff] }
 0x9ca   : > { %6136 = vadd.xlane.f32.xlu0 %v6135_v31  ;;  %7275 = vmatprep.subr.bf16.mxu1 %v6249_v16  ;;  %v6029_v11 = vmul.f32 %v5946_v62, %v18820_v3  ;;  %v6028_v32 = vmul.f32 %v5946_v62, %v18822_v9  ;;  %v6022_v55 = vmul.f32 %v5931_v29, %v18824_v60  ;;  %v18835_v29 = vld [vmem:[#allocation125_spill] sm:$0xff]  ;;  %v18840_v62 = vmax.f32 %v18839_v63, 0.0  ;;  %v18851_v9 = vld [vmem:[#allocation94_spill] sm:$0xff] }
 0x9cb   : > { %6127 = vadd.xlane.f32.xlu1 %v6126_v38  ;;  %7276 = vmatpush2.bf16.msra.mxu1 %v6248_v22  ;;  %v6018_v21 = vmul.f32 %v5921_v35, %v18832_v23  ;;  %v6019_v39 = vmul.f32 %v5921_v35, %v18834_v58  ;;  %v18836_v31 = vmax.f32 %v18835_v29, 0.0  ;;  %v18850_v3 = vmax.f32 %v18849_v27, 0.0  ;;  %v18853_v60 = vld [vmem:[#allocation174_spill] sm:$0xff]  ;;  %v7539_v23 = vld [vmem:[%s18855_s10 + $0x38] sm:$0xff] }
 0x9cc   : > { %7277 = vmatprep.subr.bf16.mxu1 %v6247_v49  ;;  %v6243_v36 = vpack.c.bf16 %v6029_v11, %v6027_v26  ;;  %v6117_v15 = vadd.f32 %v6029_v11, %v6028_v32  ;;  %v6108_v2 = vadd.f32 %v6023_v0, %v6022_v55  ;;  %v6242_v53 = vpack.c.bf16 %v6028_v32, %v6026_v28  ;;  %v18845_v28 = vld [vmem:[#allocation173_spill] sm:$0xff]  ;;  %v7536_v58 = vld [vmem:[%s18855_s10 + $0x20] sm:$0xff] }
 0x9cd   : > { %v5936_v19 = vpop.permute.xlu1 %5935  ;;  %v5911_v24 = vpop.permute.xlu0 %5910  ;;  %v6102_v49 = vadd.f32 %v6019_v39, %v6018_v21  ;;  %v18846_v52 = vmax.f32 %v18845_v28, 0.0  ;;  %v18852_v32 = vmax.f32 %v18851_v9, 0.0  ;;  %v7532_v29 = vld [vmem:[%s18855_s10] sm:$0xff]  ;;  %v7559_v9 = vld [vmem:[%s18855_s10 + $0xd8] sm:$0xff] }
 0x9ce   : > { %6130 = vadd.xlane.f32.xlu0 %v6129_v17  ;;  %v6025_v57 = vmul.f32 %v5936_v19, %v18828_v4  ;;  %v6024_v34 = vmul.f32 %v5936_v19, %v18830_v43  ;;  %v6014_v38 = vmul.f32 %v5911_v24, %v18840_v62  ;;  %v6015_v37 = vmul.f32 %v5911_v24, %v18842_v6  ;;  %v7546_v4 = vld [vmem:[%s18855_s10 + $0x70] sm:$0xff]  ;;  %v7544_v43 = vld [vmem:[%s18855_s10 + $0x60] sm:$0xff]  ;;  %v7579_v6 = vld [vmem:[%s18855_s10 + $0x178] sm:$0xff] }
 0x9cf   : > { %6121 = vadd.xlane.f32.xlu1 %v6120_v51  ;;  %7278 = vmatpush2.bf16.msra.mxu1 %v6246_v7  ;;  %v18844_v17 = vmax.f32 %v18843_v45, 0.0  ;;  %v18847_v51 = vld [vmem:[#allocation178_spill] sm:$0xff]  ;;  %v7542_v24 = vld [vmem:[%s18855_s10 + $0x50] sm:$0xff] }
 0x9d0   : > { %7279 = vmatprep.subr.bf16.mxu1 %v6245_v40  ;;  %v6241_v30 = vpack.c.bf16 %v6025_v57, %v6023_v0  ;;  %v6111_v18 = vadd.f32 %v6025_v57, %v6024_v34  ;;  %v6240_v46 = vpack.c.bf16 %v6024_v34, %v6022_v55  ;;  %v18848_v7 = vmax.f32 %v18847_v51, 0.0  ;;  %v12630_v57 = vld [vmem:[%s18856_s11 + $0x4] ss:$8 sps:$4 sm:$0xff]   ;;  %v7543_v34 = vld [vmem:[%s18855_s10 + $0x58] sm:$0xff] }
 0x9d1   : > { %v5926_v48 = vpop.permute.xlu1 %5925  ;;  %v5901_v42 = vpop.permute.xlu0 %5900  ;;  %v6096_v40 = vadd.f32 %v6015_v37, %v6014_v38  ;;  %v18854_v55 = vmax.f32 %v18853_v60, 0.0  ;;  %6586 = vmatprep.mubr.bf16.mxu0 %v12630_v57  ;;  %v7560_v28 = vld [vmem:[%s18855_s10 + $0xe0] sm:$0xff] }
 0x9d2   : > { %6124 = vadd.xlane.f32.xlu0 %v6123_v61  ;;  %v6021_v16 = vmul.f32 %v5926_v48, %v18836_v31  ;;  %v6020_v33 = vmul.f32 %v5926_v48, %v18838_v59  ;;  %v6010_v35 = vmul.f32 %v5901_v42, %v18848_v7  ;;  %v6011_v11 = vmul.f32 %v5901_v42, %v18850_v3  ;;  %v7563_v59 = vld [vmem:[%s18855_s10 + $0xf8] sm:$0xff]  ;;  %v7577_v7 = vld [vmem:[%s18855_s10 + $0x168] sm:$0xff]  ;;  %v7556_v57 = vld [vmem:[%s18855_s10 + $0xc0] sm:$0xff] }
 0x9d3   : > { %6115 = vadd.xlane.f32.xlu1 %v6114_v10  ;;  %7280 = vmatpush2.bf16.msra.mxu1 %v6244_v20 }
 0x9d4   : > { %7281 = vmatprep.subr.bf16.mxu1 %v6243_v36  ;;  %v6239_v1 = vpack.c.bf16 %v6021_v16, %v6019_v39  ;;  %v6105_v19 = vadd.f32 %v6021_v16, %v6020_v33  ;;  %v6238_v14 = vpack.c.bf16 %v6020_v33, %v6018_v21  ;;  %v6090_v0 = vadd.f32 %v6011_v11, %v6010_v35  ;;  %v7547_v36 = vld [vmem:[%s18855_s10 + $0x78] sm:$0xff]  ;;  %v7538_v21 = vld [vmem:[%s18855_s10 + $0x30] sm:$0xff] }
 0x9d5   : > { %v5916_v22 = vpop.permute.xlu1 %5915  ;;  %v7535_v39 = vld [vmem:[%s18855_s10 + $0x18] sm:$0xff]  ;;  %v7562_v33 = vld [vmem:[%s18855_s10 + $0xf0] sm:$0xff] }
 0x9d6   : > { %6118 = vadd.xlane.f32.xlu0 %v6117_v15  ;;  %v6017_v56 = vmul.f32 %v5916_v22, %v18844_v17  ;;  %v6016_v13 = vmul.f32 %v5916_v22, %v18846_v52  ;;  %v7541_v15 = vld [vmem:[%s18855_s10 + $0x48] sm:$0xff] }
 0x9d7   : > { %6109 = vadd.xlane.f32.xlu1 %v6108_v2  ;;  %7282 = vmatpush2.bf16.msra.mxu1 %v6242_v53  ;;  %v7534_v2 = vld [vmem:[%s18855_s10 + $0x10] sm:$0xff]  ;;  %v7533_v22 = vld [vmem:[%s18855_s10 + $0x8] sm:$0xff] }
 0x9d8   : > { %7283 = vmatprep.subr.bf16.mxu1 %v6241_v30  ;;  %v6237_v25 = vpack.c.bf16 %v6017_v56, %v6015_v37  ;;  %v6099_v12 = vadd.f32 %v6017_v56, %v6016_v13  ;;  %v6236_v48 = vpack.c.bf16 %v6016_v13, %v6014_v38  ;;  %v7578_v37 = vld [vmem:[%s18855_s10 + $0x170] sm:$0xff] }
 0x9d9   : > { %v5906_v26 = vpop.permute.xlu1 %5905 }
 0x9da   : > { %6112 = vadd.xlane.f32.xlu0 %v6111_v18  ;;  %v6013_v61 = vmul.f32 %v5906_v26, %v18852_v32  ;;  %v6012_v50 = vmul.f32 %v5906_v26, %v18854_v55  ;;  %v7558_v32 = vld [vmem:[%s18855_s10 + $0xd0] sm:$0xff] }
 0x9db   : > { %6103 = vadd.xlane.f32.xlu1 %v6102_v49  ;;  %7284 = vmatpush2.bf16.msra.mxu1 %v6240_v46  ;;  %v18857_v49 = vmov 0  }
 0x9dc   : > { %7285 = vmatprep.subr.bf16.mxu1 %v6239_v1  ;;  %v6235_v10 = vpack.c.bf16 %v6013_v61, %v6011_v11  ;;  %v6093_v20 = vadd.f32 %v6013_v61, %v6012_v50  ;;  %v6234_v44 = vpack.c.bf16 %v6012_v50, %v6010_v35  ;;  %v7561_v1 = vld [vmem:[%s18855_s10 + $0xe8] sm:$0xff]  ;;  %v7576_v35 = vld [vmem:[%s18855_s10 + $0x160] sm:$0xff] }
 0x9de   : > { %6106 = vadd.xlane.f32.xlu0 %v6105_v19 }
 0x9df   : > { %6097 = vadd.xlane.f32.xlu1 %v6096_v40  ;;  %7286 = vmatpush2.bf16.msra.mxu1 %v6238_v14 }
 0x9e0   : > { %7287 = vmatprep.subr.bf16.mxu1 %v6237_v25 }
 0x9e2   : > { %6100 = vadd.xlane.f32.xlu0 %v6099_v12  ;;  %v7575_v12 = vld [vmem:[%s18855_s10 + $0x158] sm:$0xff] }
 0x9e3   : > { %6091 = vadd.xlane.f32.xlu1 %v6090_v0  ;;  %7288 = vmatpush2.bf16.msra.mxu1 %v6236_v48  ;;  %v7574_v0 = vld [vmem:[%s18855_s10 + $0x150] sm:$0xff] }
 0x9e4   : > { %7289 = vmatprep.subr.bf16.mxu1 %v6235_v10 }
 0x9e6   : > { %6094 = vadd.xlane.f32.xlu0 %v6093_v20 }
 0x9e7   : > { %7290 = vmatpush2.bf16.msra.mxu1 %v6234_v44 }
 0x9f4   : > { %7652 = vperm.xlu1 %12388, %v7546_v4   ;;  %v7557_v4 = vld [vmem:[%s18855_s10 + $0xc8] sm:$0xff] }
 0x9f8   : > { %7657 = vperm.xlu1 %12388, %v7547_v36  }
 0x9fc   : > { %7647 = vperm.xlu1 %12388, %v7545_v41   ;;  %7642 = vperm.xlu0 %12387, %v7544_v43  }
 0xa00   : > { %7637 = vperm.xlu1 %12388, %v7543_v34   ;;  %7632 = vperm.xlu0 %12387, %v7542_v24  }
 0xa04   : > { %7627 = vperm.xlu1 %12388, %v7541_v15   ;;  %7622 = vperm.xlu0 %12387, %v7540_v8   ;;  %v7573_v15 = vld [vmem:[%s18855_s10 + $0x148] sm:$0xff]  ;;  %v7572_v8 = vld [vmem:[%s18855_s10 + $0x140] sm:$0xff] }
 0xa08   : > { %7617 = vperm.xlu1 %12388, %v7539_v23   ;;  %7612 = vperm.xlu0 %12387, %v7538_v21   ;;  %v7555_v21 = vld [vmem:[%s18855_s10 + $0xb8] sm:$0xff] }
 0xa0c   : > { %7607 = vperm.xlu1 %12388, %v7537_v54   ;;  %7602 = vperm.xlu0 %12387, %v7536_v58   ;;  %v7554_v54 = vld [vmem:[%s18855_s10 + $0xb0] sm:$0xff]  ;;  %v7571_v58 = vld [vmem:[%s18855_s10 + $0x138] sm:$0xff] }
 0xa0f   : > { %v6086_v53 = vpop.xlane.xlu0 %6085 }
 0xa10   : > { %7597 = vperm.xlu1 %12388, %v7535_v39   ;;  %7592 = vperm.xlu0 %12387, %v7534_v2   ;;  %v6152_v30 = vmul.f32 0.00390625, %v6086_v53  ;;  %v7570_v39 = vld [vmem:[%s18855_s10 + $0x130] sm:$0xff]  ;;  %v7553_v2 = vld [vmem:[%s18855_s10 + $0xa8] sm:$0xff]  ;;  %v7552_v53 = vld [vmem:[%s18855_s10 + $0xa0] sm:$0xff] }
 0xa13   : > { %v6089_v31 = vpop.xlane.xlu1 %6088 }
 0xa14   : > { %7587 = vperm.xlu1 %12388, %v7533_v22   ;;  %v6080_v16 = vpop.xlane.xlu0 %6079  ;;  %7582 = vperm.xlu0 %12387, %v7532_v29   ;;  %v6153_v47 = vmul.f32 0.00390625, %v6089_v31 }
 0xa15   : > { %v6150_v38 = vmul.f32 0.00390625, %v6080_v16 }
 0xa16   : > { %v6305_v18 = vpack.c.bf16 %v6153_v47, %v6152_v30 }
 0xa17   : > { %v6074_v63 = vpop.xlane.xlu1 %6073 }
 0xa18   : > { %7737 = vperm.xlu1 %12388, %v7563_v59   ;;  %v6083_v62 = vpop.xlane.xlu0 %6082  ;;  %7732 = vperm.xlu0 %12387, %v7562_v33   ;;  %v6148_v17 = vmul.f32 0.00390625, %v6074_v63 }
 0xa19   : > { %v6151_v5 = vmul.f32 0.00390625, %v6083_v62  ;;  %6555 = vmatpush1.bf16.msra.mxu0 %v6305_v18 }
 0xa1a   : > { %6556 = vmatprep.subr.bf16.mxu0 %v18857_v49 }
 0xa1b   : > { %v6304_v46 = vpack.c.bf16 %v6151_v5, %v6150_v38  ;;  %v6068_v42 = vpop.xlane.xlu1 %6067 }
 0xa1c   : > { %7817 = vperm.xlu1 %12388, %v7579_v6   ;;  %v6077_v45 = vpop.xlane.xlu0 %6076  ;;  %7812 = vperm.xlu0 %12387, %v7578_v37   ;;  %v6146_v19 = vmul.f32 0.00390625, %v6068_v42 }
 0xa1d   : > { %v6149_v56 = vmul.f32 0.00390625, %v6077_v45  ;;  %6557 = vmatpush1.bf16.msra.mxu0 %v6304_v46 }
 0xa1e   : > { %6558 = vmatprep.subr.bf16.mxu0 %v18857_v49 }
 0xa1f   : > { %v6303_v52 = vpack.c.bf16 %v6149_v56, %v6148_v17  ;;  %v6062_v13 = vpop.xlane.xlu1 %6061 }
 0xa20   : > { %7727 = vperm.xlu1 %12388, %v7561_v1   ;;  %v6071_v26 = vpop.xlane.xlu0 %6070  ;;  %7722 = vperm.xlu0 %12387, %v7560_v28   ;;  %v6144_v40 = vmul.f32 0.00390625, %v6062_v13 }
 0xa21   : > { %v6147_v51 = vmul.f32 0.00390625, %v6071_v26  ;;  %6559 = vmatpush1.bf16.msra.mxu0 %v6303_v52 }
 0xa22   : > { %6560 = vmatprep.subr.bf16.mxu0 %v18857_v49 }
 0xa23   : > { %v6302_v27 = vpack.c.bf16 %v6147_v51, %v6146_v19  ;;  %v6056_v3 = vpop.xlane.xlu1 %6055 }
 0xa24   : > { %7807 = vperm.xlu1 %12388, %v7577_v7   ;;  %v6065_v11 = vpop.xlane.xlu0 %6064  ;;  %7802 = vperm.xlu0 %12387, %v7576_v35   ;;  %v6142_v55 = vmul.f32 0.00390625, %v6056_v3  ;;  %v12673_v7 = vld [vmem:[%s18858_s27] ss:$8 sps:$4 sm:$0xff]   ;;  %v12675_v35 = vld [vmem:[%s18858_s27 + $0x4] ss:$8 sps:$4 sm:$0xff]  }
 0xa25   : > { %v6145_v14 = vmul.f32 0.00390625, %v6065_v11  ;;  %6561 = vmatpush1.bf16.msra.mxu0 %v6302_v27  ;;  %7291 = vmatprep.mubr.bf16.mxu1 %v12675_v35  ;;  %v12741_v35 = vld [vmem:[%s18858_s27 + $0xd4] ss:$8 sps:$4 sm:$0xff]  }
 0xa26   : > { %6562 = vmatprep.subr.bf16.mxu0 %v18857_v49  ;;  %7292 = vmatmul.mubr.bf16.vlgmr.msra.gmra.mxu1 %v12673_v7  ;;  %v12739_v7 = vld [vmem:[%s18858_s27 + $0xd0] ss:$8 sps:$4 sm:$0xff]  }
 0xa27   : > { %v6301_v61 = vpack.c.bf16 %v6145_v14, %v6144_v40  ;;  %v6050_v25 = vpop.xlane.xlu1 %6049 }
 0xa28   : > { %7717 = vperm.xlu1 %12388, %v7559_v9   ;;  %v6059_v60 = vpop.xlane.xlu0 %6058  ;;  %7712 = vperm.xlu0 %12387, %v7558_v32   ;;  %v6140_v20 = vmul.f32 0.00390625, %v6050_v25 }
 0xa29   : > { %v6143_v50 = vmul.f32 0.00390625, %v6059_v60  ;;  %6563 = vmatpush1.bf16.msra.mxu0 %v6301_v61 }
 0xa2a   : > { %6564 = vmatprep.subr.bf16.mxu0 %v18857_v49 }
 0xa2b   : > { %v6300_v48 = vpack.c.bf16 %v6143_v50, %v6142_v55  ;;  %v6044_v36 = vpop.xlane.xlu1 %6043  ;;  %v12679_v55 = vld [vmem:[%s18858_s27 + $0x10] ss:$8 sps:$4 sm:$0xff]   ;;  %v12681_v50 = vld [vmem:[%s18858_s27 + $0x14] ss:$8 sps:$4 sm:$0xff]  }
 0xa2c   : > { %7797 = vperm.xlu1 %12388, %v7575_v12   ;;  %v6053_v10 = vpop.xlane.xlu0 %6052  ;;  %7792 = vperm.xlu0 %12387, %v7574_v0   ;;  %v6138_v34 = vmul.f32 0.00390625, %v6044_v36  ;;  %v12636_v36 = vld [vmem:[%s18856_s11 + $0x24] ss:$8 sps:$4 sm:$0xff]  }
 0xa2d   : > { %v6141_v44 = vmul.f32 0.00390625, %v6053_v10  ;;  %6565 = vmatpush1.bf16.msra.mxu0 %v6300_v48  ;;  %7301 = vmatprep.mubr.bf16.mxu1 %v12681_v50  ;;  %v12628_v10 = vld [vmem:[%s18856_s11] ss:$8 sps:$4 sm:$0xff]   ;;  %v12750_v50 = vld [vmem:[%s18858_s27 + $0x104] ss:$8 sps:$4 sm:$0xff]  }
 0xa2e   : > { %6566 = vmatprep.subr.bf16.mxu0 %v18857_v49  ;;  %7302 = vmatmul.mubr.bf16.gmra.mxu1 %v12679_v55  ;;  %v12748_v55 = vld [vmem:[%s18858_s27 + $0x100] ss:$8 sps:$4 sm:$0xff]  }
 0xa2f   : > { %v6299_v41 = vpack.c.bf16 %v6141_v44, %v6140_v20  ;;  %v12633_v20 = vld [vmem:[%s18856_s11 + $0x14] ss:$8 sps:$4 sm:$0xff]   ;;  %v12685_v44 = vld [vmem:[%s18858_s27 + $0x20] ss:$8 sps:$4 sm:$0xff]  }
 0xa30   : > { %7707 = vperm.xlu1 %12388, %v7557_v4   ;;  %v6047_v43 = vpop.xlane.xlu0 %6046  ;;  %7702 = vperm.xlu0 %12387, %v7556_v57   ;;  %v12687_v4 = vld [vmem:[%s18858_s27 + $0x24] ss:$8 sps:$4 sm:$0xff]   ;;  %v12631_v57 = vld [vmem:[%s18856_s11 + $0x10] ss:$8 sps:$4 sm:$0xff]  }
 0xa31   : > { %v6139_v24 = vmul.f32 0.00390625, %v6047_v43  ;;  %6567 = vmatpush1.bf16.msra.mxu0 %v6299_v41  ;;  %7311 = vmatprep.mubr.bf16.mxu1 %v12687_v4  ;;  %v12691_v41 = vld [vmem:[%s18858_s27 + $0x30] ss:$8 sps:$4 sm:$0xff]   ;;  %v12693_v43 = vld [vmem:[%s18858_s27 + $0x34] ss:$8 sps:$4 sm:$0xff]  }
 0xa32   : > { %6568 = vmatprep.subr.bf16.mxu0 %v18857_v49  ;;  %v12754_v4 = vld [vmem:[%s18858_s27 + $0x120] ss:$8 sps:$4 sm:$0xff]  }
 0xa33   : > { %v6298_v23 = vpack.c.bf16 %v6139_v24, %v6138_v34  ;;  %v12634_v34 = vld [vmem:[%s18856_s11 + $0x20] ss:$8 sps:$4 sm:$0xff]   ;;  %v12639_v24 = vld [vmem:[%s18856_s11 + $0x34] ss:$8 sps:$4 sm:$0xff]  }
 0xa34   : > { %7787 = vperm.xlu1 %12388, %v7573_v15   ;;  %7782 = vperm.xlu0 %12387, %v7572_v8   ;;  %v12697_v15 = vld [vmem:[%s18858_s27 + $0x40] ss:$8 sps:$4 sm:$0xff]   ;;  %v12699_v8 = vld [vmem:[%s18858_s27 + $0x44] ss:$8 sps:$4 sm:$0xff]  }
 0xa35   : > { %6569 = vmatpush1.bf16.msra.mxu0 %v6298_v23  ;;  %v12637_v23 = vld [vmem:[%s18856_s11 + $0x30] ss:$8 sps:$4 sm:$0xff]  }
 0xa36   : > { %6570 = vmatprep.subr.bf16.mxu0 %v18857_v49  ;;  %7312 = vmatmul.mubr.bf16.gmra.mxu1 %v12685_v44  ;;  %v12690_v44 = vld [vmem:[%s18856_s11 + $0x114] ss:$8 sps:$4 sm:$0xff]  }
 0xa37   : > { %7321 = vmatprep.mubr.bf16.mxu1 %v12693_v43  ;;  %v12757_v43 = vld [vmem:[%s18858_s27 + $0x130] ss:$8 sps:$4 sm:$0xff]  }
 0xa38   : > { %7697 = vperm.xlu1 %12388, %v7555_v21   ;;  %7692 = vperm.xlu0 %12387, %v7554_v54   ;;  %v12642_v21 = vld [vmem:[%s18856_s11 + $0x44] ss:$8 sps:$4 sm:$0xff]   ;;  %v12703_v54 = vld [vmem:[%s18858_s27 + $0x50] ss:$8 sps:$4 sm:$0xff]  }
 0xa3c   : > { %7777 = vperm.xlu1 %12388, %v7571_v58   ;;  %7772 = vperm.xlu0 %12387, %v7570_v39   ;;  %v12705_v58 = vld [vmem:[%s18858_s27 + $0x54] ss:$8 sps:$4 sm:$0xff]   ;;  %v12640_v39 = vld [vmem:[%s18856_s11 + $0x40] ss:$8 sps:$4 sm:$0xff]  }
 0xa3e   : > { %7322 = vmatmul.mubr.bf16.gmra.mxu1 %v12691_v41  ;;  %v12696_v41 = vld [vmem:[%s18856_s11 + $0x124] ss:$8 sps:$4 sm:$0xff]  }
 0xa3f   : > { %7331 = vmatprep.mubr.bf16.mxu1 %v12699_v8  ;;  %v12760_v8 = vld [vmem:[%s18858_s27 + $0x140] ss:$8 sps:$4 sm:$0xff]  }
 0xa40   : > { %7687 = vperm.xlu1 %12388, %v7553_v2   ;;  %7682 = vperm.xlu0 %12387, %v7552_v53   ;;  %v12645_v2 = vld [vmem:[%s18856_s11 + $0x54] ss:$8 sps:$4 sm:$0xff]   ;;  %v12709_v53 = vld [vmem:[%s18858_s27 + $0x60] ss:$8 sps:$4 sm:$0xff]  }
 0xa46   : > { %7332 = vmatmul.mubr.bf16.gmra.mxu1 %v12697_v15  ;;  %v12702_v15 = vld [vmem:[%s18856_s11 + $0x134] ss:$8 sps:$4 sm:$0xff]  }
 0xa47   : > { %7341 = vmatprep.mubr.bf16.mxu1 %v12705_v58  ;;  %v12763_v58 = vld [vmem:[%s18858_s27 + $0x150] ss:$8 sps:$4 sm:$0xff]  }
 0xa4e   : > { %7342 = vmatmul.mubr.bf16.gmra.mxu1 %v12703_v54  ;;  %v12708_v54 = vld [vmem:[%s18856_s11 + $0x144] ss:$8 sps:$4 sm:$0xff]  }
 0xa4f   : > { %v6134_v22 = vpop.xlane.xlu1 %6133 }
 0xa50   : > { %v6168_v31 = vmul.f32 0.00390625, %v6134_v22  ;;  %v12711_v22 = vld [vmem:[%s18858_s27 + $0x64] ss:$8 sps:$4 sm:$0xff]  }
 0xa51   : > { %7351 = vmatprep.mubr.bf16.mxu1 %v12711_v22  ;;  %v12766_v22 = vld [vmem:[%s18858_s27 + $0x160] ss:$8 sps:$4 sm:$0xff]  }
 0xa53   : > { %v6137_v29 = vpop.xlane.xlu0 %6136 }
 0xa54   : > { %v6128_v16 = vpop.xlane.xlu1 %6127  ;;  %v6169_v30 = vmul.f32 0.00390625, %v6137_v29  ;;  %v12643_v29 = vld [vmem:[%s18856_s11 + $0x50] ss:$8 sps:$4 sm:$0xff]  }
 0xa55   : > { %v6166_v33 = vmul.f32 0.00390625, %v6128_v16  ;;  %v12715_v16 = vld [vmem:[%s18858_s27 + $0x70] ss:$8 sps:$4 sm:$0xff]  }
 0xa56   : > { %v6313_v47 = vpack.c.bf16 %v6169_v30, %v6168_v31  ;;  %7352 = vmatmul.mubr.bf16.gmra.mxu1 %v12709_v53  ;;  %v12648_v31 = vld [vmem:[%s18856_s11 + $0x64] ss:$8 sps:$4 sm:$0xff]   ;;  %v12717_v30 = vld [vmem:[%s18858_s27 + $0x74] ss:$8 sps:$4 sm:$0xff]  }
 0xa57   : > { %v6131_v59 = vpop.xlane.xlu0 %6130  ;;  %7361 = vmatprep.mubr.bf16.mxu1 %v12717_v30  ;;  %v12714_v53 = vld [vmem:[%s18856_s11 + $0x154] ss:$8 sps:$4 sm:$0xff]   ;;  %v12769_v30 = vld [vmem:[%s18858_s27 + $0x170] ss:$8 sps:$4 sm:$0xff]  }
 0xa58   : > { %v6122_v18 = vpop.xlane.xlu1 %6121  ;;  %v6167_v63 = vmul.f32 0.00390625, %v6131_v59  ;;  %6571 = vmatpush2.bf16.msra.mxu0 %v6313_v47  ;;  %v12646_v47 = vld [vmem:[%s18856_s11 + $0x60] ss:$8 sps:$4 sm:$0xff]   ;;  %v12651_v59 = vld [vmem:[%s18856_s11 + $0x74] ss:$8 sps:$4 sm:$0xff]  }
 0xa59   : > { %6572 = vmatprep.subr.bf16.mxu0 %v18857_v49  ;;  %v6164_v5 = vmul.f32 0.00390625, %v6122_v18  ;;  %v12723_v18 = vld [vmem:[%s18858_s27 + $0x84] ss:$8 sps:$4 sm:$0xff]  }
 0xa5a   : > { %v6312_v62 = vpack.c.bf16 %v6167_v63, %v6166_v33  ;;  %v12721_v33 = vld [vmem:[%s18858_s27 + $0x80] ss:$8 sps:$4 sm:$0xff]   ;;  %v12649_v63 = vld [vmem:[%s18856_s11 + $0x70] ss:$8 sps:$4 sm:$0xff]  }
 0xa5b   : > { %v6125_v38 = vpop.xlane.xlu0 %6124 }
 0xa5c   : > { %v6116_v6 = vpop.xlane.xlu1 %6115  ;;  %v6165_v37 = vmul.f32 0.00390625, %v6125_v38  ;;  %6573 = vmatpush2.bf16.msra.mxu0 %v6312_v62  ;;  %v12654_v62 = vld [vmem:[%s18856_s11 + $0x84] ss:$8 sps:$4 sm:$0xff]   ;;  %v12727_v38 = vld [vmem:[%s18858_s27 + $0x90] ss:$8 sps:$4 sm:$0xff]  }
 0xa5d   : > { %6574 = vmatprep.subr.bf16.mxu0 %v18857_v49  ;;  %v6162_v45 = vmul.f32 0.00390625, %v6116_v6  ;;  %v12652_v6 = vld [vmem:[%s18856_s11 + $0x80] ss:$8 sps:$4 sm:$0xff]  }
 0xa5e   : > { %v6311_v46 = vpack.c.bf16 %v6165_v37, %v6164_v5  ;;  %7362 = vmatmul.mubr.bf16.gmra.mxu1 %v12715_v16  ;;  %v12729_v5 = vld [vmem:[%s18858_s27 + $0x94] ss:$8 sps:$4 sm:$0xff]   ;;  %v12720_v16 = vld [vmem:[%s18856_s11 + $0x164] ss:$8 sps:$4 sm:$0xff]  }
 0xa5f   : > { %v6119_v42 = vpop.xlane.xlu0 %6118  ;;  %7371 = vmatprep.mubr.bf16.mxu1 %v12723_v18  ;;  %v12657_v37 = vld [vmem:[%s18856_s11 + $0x94] ss:$8 sps:$4 sm:$0xff]   ;;  %v12724_v18 = vld [vmem:[%s18856_s11 + $0x170] ss:$8 sps:$4 sm:$0xff]  }
 0xa60   : > { %v6110_v17 = vpop.xlane.xlu1 %6109  ;;  %v6163_v56 = vmul.f32 0.00390625, %v6119_v42  ;;  %6575 = vmatpush2.bf16.msra.mxu0 %v6311_v46  ;;  %v12730_v46 = vld [vmem:[%s18858_s27 + $0xa0] ss:$8 sps:$4 sm:$0xff]   ;;  %v12732_v42 = vld [vmem:[%s18858_s27 + $0xa4] ss:$8 sps:$4 sm:$0xff]  }
 0xa61   : > { %6576 = vmatprep.subr.bf16.mxu0 %v18857_v49  ;;  %v6160_v52 = vmul.f32 0.00390625, %v6110_v17  ;;  %v12660_v17 = vld [vmem:[%s18856_s11 + $0xa4] ss:$8 sps:$4 sm:$0xff]  }
 0xa62   : > { %v6310_v1 = vpack.c.bf16 %v6163_v56, %v6162_v45  ;;  %v12655_v45 = vld [vmem:[%s18856_s11 + $0x90] ss:$8 sps:$4 sm:$0xff]  }
 0xa63   : > { %v6113_v28 = vpop.xlane.xlu0 %6112  ;;  %v12733_v56 = vld [vmem:[%s18858_s27 + $0xb0] ss:$8 sps:$4 sm:$0xff]  }
 0xa64   : > { %v6104_v13 = vpop.xlane.xlu1 %6103  ;;  %v6161_v26 = vmul.f32 0.00390625, %v6113_v28  ;;  %6577 = vmatpush2.bf16.msra.mxu0 %v6310_v1  ;;  %v12735_v1 = vld [vmem:[%s18858_s27 + $0xb4] ss:$8 sps:$4 sm:$0xff]   ;;  %v12658_v28 = vld [vmem:[%s18856_s11 + $0xa0] ss:$8 sps:$4 sm:$0xff]  }
 0xa65   : > { %6578 = vmatprep.subr.bf16.mxu0 %v18857_v49  ;;  %v6158_v27 = vmul.f32 0.00390625, %v6104_v13  ;;  %v12736_v13 = vld [vmem:[%s18858_s27 + $0xc0] ss:$8 sps:$4 sm:$0xff]  }
 0xa66   : > { %v6309_v19 = vpack.c.bf16 %v6161_v26, %v6160_v52  ;;  %7372 = vmatmul.mubr.bf16.gmra.mxu1 %v12721_v33  ;;  %v12663_v52 = vld [vmem:[%s18856_s11 + $0xb4] ss:$8 sps:$4 sm:$0xff]   ;;  %v12738_v26 = vld [vmem:[%s18858_s27 + $0xc4] ss:$8 sps:$4 sm:$0xff]  }
 0xa67   : > { %v6107_v51 = vpop.xlane.xlu0 %6106  ;;  %7381 = vmatprep.mubr.bf16.mxu1 %v12729_v5  ;;  %v12726_v33 = vld [vmem:[%s18856_s11 + $0x174] ss:$8 sps:$4 sm:$0xff]  }
 0xa68   : > { %v6098_v3 = vpop.xlane.xlu1 %6097  ;;  %v6159_v11 = vmul.f32 0.00390625, %v6107_v51  ;;  %6579 = vmatpush2.bf16.msra.mxu0 %v6309_v19  ;;  %v12661_v19 = vld [vmem:[%s18856_s11 + $0xb0] ss:$8 sps:$4 sm:$0xff]   ;;  %v12666_v51 = vld [vmem:[%s18856_s11 + $0xc4] ss:$8 sps:$4 sm:$0xff]  }
 0xa69   : > { %6580 = vmatprep.subr.bf16.mxu0 %v18857_v49  ;;  %v6156_v9 = vmul.f32 0.00390625, %v6098_v3  ;;  %v12669_v3 = vld [vmem:[%s18856_s11 + $0xd4] ss:$8 sps:$4 sm:$0xff]  }
 0xa6a   : > { %v6308_v40 = vpack.c.bf16 %v6159_v11, %v6158_v27  ;;  %v12664_v27 = vld [vmem:[%s18856_s11 + $0xc0] ss:$8 sps:$4 sm:$0xff]  }
 0xa6b   : > { %v6101_v14 = vpop.xlane.xlu0 %6100  ;;  %v12742_v11 = vld [vmem:[%s18858_s27 + $0xe0] ss:$8 sps:$4 sm:$0xff]  }
 0xa6c   : > { %v6157_v32 = vmul.f32 0.00390625, %v6101_v14  ;;  %6581 = vmatpush2.bf16.msra.mxu0 %v6308_v40  ;;  %v6092_v61 = vpop.xlane.xlu1 %6091  ;;  %v12744_v40 = vld [vmem:[%s18858_s27 + $0xe4] ss:$8 sps:$4 sm:$0xff]   ;;  %v12667_v14 = vld [vmem:[%s18856_s11 + $0xd0] ss:$8 sps:$4 sm:$0xff]  }
 0xa6d   : > { %6582 = vmatprep.subr.bf16.mxu0 %v18857_v49  ;;  %v6154_v12 = vmul.f32 0.00390625, %v6092_v61  ;;  %v12747_v61 = vld [vmem:[%s18858_s27 + $0xf4] ss:$8 sps:$4 sm:$0xff]  }
 0xa6e   : > { %v6307_v25 = vpack.c.bf16 %v6157_v32, %v6156_v9  ;;  %7382 = vmatmul.mubr.bf16.gmra.mxu1 %v12727_v38  ;;  %v12672_v9 = vld [vmem:[%s18856_s11 + $0xe4] ss:$8 sps:$4 sm:$0xff]   ;;  %v12745_v32 = vld [vmem:[%s18858_s27 + $0xf0] ss:$8 sps:$4 sm:$0xff]  }
 0xa6f   : > { %v6095_v60 = vpop.xlane.xlu0 %6094  ;;  %7391 = vmatprep.mubr.bf16.mxu1 %v12732_v42 }
 0xa70   : > { %v6155_v0 = vmul.f32 0.00390625, %v6095_v60  ;;  %6583 = vmatpush2.bf16.msra.mxu0 %v6307_v25  ;;  %v12670_v25 = vld [vmem:[%s18856_s11 + $0xe0] ss:$8 sps:$4 sm:$0xff]   ;;  %v12678_v60 = vld [vmem:[%s18856_s11 + $0xf4] ss:$8 sps:$4 sm:$0xff]  }
 0xa71   : > { %6584 = vmatprep.subr.bf16.mxu0 %v18857_v49 }
 0xa72   : > { %v6306_v48 = vpack.c.bf16 %v6155_v0, %v6154_v12  ;;  %v12676_v12 = vld [vmem:[%s18856_s11 + $0xf0] ss:$8 sps:$4 sm:$0xff]   ;;  %v12684_v0 = vld [vmem:[%s18856_s11 + $0x104] ss:$8 sps:$4 sm:$0xff]  }
 0xa74   : > { %6585 = vmatpush2.bf16.msra.mxu0 %v6306_v48  ;;  %v12751_v48 = vld [vmem:[%s18858_s27 + $0x110] ss:$8 sps:$4 sm:$0xff]  }
 0xa76   : > { %7392 = vmatmul.mubr.bf16.gmra.mxu1 %v12730_v46 }
 0xa77   : > { %6587 = vmatmul.mubr.bf16.vlgmr.msra.gmra.mxu0 %v12628_v10  ;;  %7401 = vmatprep.mubr.bf16.mxu1 %v12735_v1  ;;  %v12753_v10 = vld [vmem:[%s18858_s27 + $0x114] ss:$8 sps:$4 sm:$0xff]  }
 0xa78   : > { %6594 = vmatprep.mubr.bf16.mxu0 %v12633_v20  ;;  %v12682_v20 = vld [vmem:[%s18856_s11 + $0x100] ss:$8 sps:$4 sm:$0xff]  }
 0xa7e   : > { %7402 = vmatmul.mubr.bf16.gmra.mxu1 %v12733_v56 }
 0xa7f   : > { %6595 = vmatmul.mubr.bf16.gmra.mxu0 %v12631_v57  ;;  %7411 = vmatprep.mubr.bf16.mxu1 %v12738_v26  ;;  %v12756_v57 = vld [vmem:[%s18858_s27 + $0x124] ss:$8 sps:$4 sm:$0xff]  }
 0xa80   : > { %6602 = vmatprep.mubr.bf16.mxu0 %v12636_v36  ;;  %v12688_v36 = vld [vmem:[%s18856_s11 + $0x110] ss:$8 sps:$4 sm:$0xff]  }
 0xa86   : > { %7412 = vmatmul.mubr.bf16.gmra.mxu1 %v12736_v13 }
 0xa87   : > { %6603 = vmatmul.mubr.bf16.gmra.mxu0 %v12634_v34  ;;  %7421 = vmatprep.mubr.bf16.mxu1 %v12741_v35  ;;  %v12759_v34 = vld [vmem:[%s18858_s27 + $0x134] ss:$8 sps:$4 sm:$0xff]  }
 0xa88   : > { %6610 = vmatprep.mubr.bf16.mxu0 %v12639_v24  ;;  %v12694_v24 = vld [vmem:[%s18856_s11 + $0x120] ss:$8 sps:$4 sm:$0xff]  }
 0xa8e   : > { %7422 = vmatmul.mubr.bf16.gmra.mxu1 %v12739_v7 }
 0xa8f   : > { %6611 = vmatmul.mubr.bf16.gmra.mxu0 %v12637_v23  ;;  %7431 = vmatprep.mubr.bf16.mxu1 %v12744_v40  ;;  %v12762_v23 = vld [vmem:[%s18858_s27 + $0x144] ss:$8 sps:$4 sm:$0xff]  }
 0xa90   : > { %6618 = vmatprep.mubr.bf16.mxu0 %v12642_v21  ;;  %v12700_v21 = vld [vmem:[%s18856_s11 + $0x130] ss:$8 sps:$4 sm:$0xff]  }
 0xa96   : > { %7432 = vmatmul.mubr.bf16.gmra.mxu1 %v12742_v11 }
 0xa97   : > { %6619 = vmatmul.mubr.bf16.gmra.mxu0 %v12640_v39  ;;  %7441 = vmatprep.mubr.bf16.mxu1 %v12747_v61  ;;  %v12765_v39 = vld [vmem:[%s18858_s27 + $0x154] ss:$8 sps:$4 sm:$0xff]  }
 0xa98   : > { %6626 = vmatprep.mubr.bf16.mxu0 %v12645_v2  ;;  %v12706_v2 = vld [vmem:[%s18856_s11 + $0x140] ss:$8 sps:$4 sm:$0xff]  }
 0xa9e   : > { %7442 = vmatmul.mubr.bf16.gmra.mxu1 %v12745_v32 }
 0xa9f   : > { %6627 = vmatmul.mubr.bf16.gmra.mxu0 %v12643_v29  ;;  %7451 = vmatprep.mubr.bf16.mxu1 %v12750_v50  ;;  %v12768_v29 = vld [vmem:[%s18858_s27 + $0x164] ss:$8 sps:$4 sm:$0xff]  }
 0xaa0   : > { %6634 = vmatprep.mubr.bf16.mxu0 %v12648_v31  ;;  %v12712_v31 = vld [vmem:[%s18856_s11 + $0x150] ss:$8 sps:$4 sm:$0xff]  }
 0xaa6   : > { %7452 = vmatmul.mubr.bf16.gmra.mxu1 %v12748_v55 }
 0xaa7   : > { %6635 = vmatmul.mubr.bf16.gmra.mxu0 %v12646_v47  ;;  %7461 = vmatprep.mubr.bf16.mxu1 %v12753_v10  ;;  %v12771_v47 = vld [vmem:[%s18858_s27 + $0x174] ss:$8 sps:$4 sm:$0xff]  }
 0xaa8   : > { %6642 = vmatprep.mubr.bf16.mxu0 %v12651_v59  ;;  %v12718_v59 = vld [vmem:[%s18856_s11 + $0x160] ss:$8 sps:$4 sm:$0xff]  }
 0xaae   : > { %7462 = vmatmul.mubr.bf16.gmra.mxu1 %v12751_v48 }
 0xaaf   : > { %6643 = vmatmul.mubr.bf16.gmra.mxu0 %v12649_v63  ;;  %7471 = vmatprep.mubr.bf16.mxu1 %v12756_v57  ;;  %v16278_v57 = vpop.permute.xlu1 %7652 }
 0xab0   : > { %6650 = vmatprep.mubr.bf16.mxu0 %v12654_v62 }
 0xab6   : > { %7472 = vmatmul.mubr.bf16.gmra.mxu1 %v12754_v4 }
 0xab7   : > { %6651 = vmatmul.mubr.bf16.gmra.mxu0 %v12652_v6  ;;  %7481 = vmatprep.mubr.bf16.mxu1 %v12759_v34 }
 0xab8   : > { %6658 = vmatprep.mubr.bf16.mxu0 %v12657_v37 }
 0xabe   : > { %7482 = vmatmul.mubr.bf16.gmra.mxu1 %v12757_v43 }
 0xabf   : > { %6659 = vmatmul.mubr.bf16.gmra.mxu0 %v12655_v45  ;;  %7491 = vmatprep.mubr.bf16.mxu1 %v12762_v23 }
 0xac0   : > { %6666 = vmatprep.mubr.bf16.mxu0 %v12660_v17 }
 0xac6   : > { %7492 = vmatmul.mubr.bf16.gmra.mxu1 %v12760_v8  ;;  %v16286_v8 = vpop.permute.xlu1 %7657 }
 0xac7   : > { %6667 = vmatmul.mubr.bf16.gmra.mxu0 %v12658_v28  ;;  %7501 = vmatprep.mubr.bf16.mxu1 %v12765_v39 }
 0xac8   : > { %6674 = vmatprep.mubr.bf16.mxu0 %v12663_v52 }
 0xace   : > { %7502 = vmatmul.mubr.bf16.gmra.mxu1 %v12763_v58 }
 0xacf   : > { %6675 = vmatmul.mubr.bf16.gmra.mxu0 %v12661_v19  ;;  %7511 = vmatprep.mubr.bf16.mxu1 %v12768_v29 }
 0xad0   : > { %6682 = vmatprep.mubr.bf16.mxu0 %v12666_v51 }
 0xad6   : > { %7512 = vmatmul.mubr.bf16.gmra.mxu1 %v12766_v22 }
 0xad7   : > { %6683 = vmatmul.mubr.bf16.gmra.mxu0 %v12664_v27  ;;  %7521 = vmatprep.mubr.bf16.mxu1 %v12771_v47 }
 0xad8   : > { %6690 = vmatprep.mubr.bf16.mxu0 %v12669_v3 }
 0xade   : > { %7522 = vmatmul.mubr.bf16.gmra.mxu1 %v12769_v30 }
 0xadf   : > { %6691 = vmatmul.mubr.bf16.gmra.mxu0 %v12667_v14  ;;  %8797 = vmatprep.mubr.bf16.mxu1 %v18857_v49 }
 0xae0   : > { %6698 = vmatprep.mubr.bf16.mxu0 %v12672_v9 }
 0xae6   : > { %v16234_v63 = vpop.f32.mrf.mxu1 }
 0xae7   : > { %6699 = vmatmul.mubr.bf16.gmra.mxu0 %v12670_v25  ;;  %18859 = vst [vmem:[#allocation113_spill] sm:$0xff] %v16234_v63 }
 0xae8   : > { %6706 = vmatprep.mubr.bf16.mxu0 %v12678_v60  ;;  %v16236_v62 = vpop.f32.mrf.mxu1 }
 0xae9   : > { %18860 = vst [vmem:[#allocation117_spill] sm:$0xff] %v16236_v62 }
 0xaea   : > { %v16238_v38 = vpop.f32.mrf.mxu1 }
 0xaeb   : > { %18861 = vst [vmem:[#allocation100_spill] sm:$0xff] %v16238_v38 }
 0xaec   : > { %v16240_v5 = vpop.f32.mrf.mxu1 }
 0xaed   : > { %18862 = vst [vmem:[#allocation110_spill] sm:$0xff] %v16240_v5 }
 0xaee   : > { %v16242_v6 = vpop.f32.mrf.mxu1 }
 0xaef   : > { %6707 = vmatmul.mubr.bf16.gmra.mxu0 %v12676_v12  ;;  %18863 = vst [vmem:[#allocation111_spill] sm:$0xff] %v16242_v6 }
 0xaf0   : > { %6714 = vmatprep.mubr.bf16.mxu0 %v12684_v0  ;;  %v16244_v46 = vpop.f32.mrf.mxu1 }
 0xaf1   : > { %18864 = vst [vmem:[#allocation118_spill] sm:$0xff] %v16244_v46 }
 0xaf2   : > { %v16246_v45 = vpop.f32.mrf.mxu1 }
 0xaf3   : > { %18865 = vst [vmem:[#allocation102_spill] sm:$0xff] %v16246_v45 }
 0xaf4   : > { %v16248_v56 = vpop.f32.mrf.mxu1 }
 0xaf6   : > { %v16250_v28 = vpop.f32.mrf.mxu1 }
 0xaf7   : > { %6715 = vmatmul.mubr.bf16.gmra.mxu0 %v12682_v20 }
 0xaf8   : > { %6722 = vmatprep.mubr.bf16.mxu0 %v12690_v44  ;;  %v16252_v13 = vpop.f32.mrf.mxu1 }
 0xafa   : > { %v16254_v19 = vpop.f32.mrf.mxu1 }
 0xafc   : > { %v16256_v7 = vpop.f32.mrf.mxu1 }
 0xafe   : > { %v16258_v27 = vpop.f32.mrf.mxu1 }
 0xaff   : > { %6723 = vmatmul.mubr.bf16.gmra.mxu0 %v12688_v36 }
 0xb00   : > { %6730 = vmatprep.mubr.bf16.mxu0 %v12696_v41  ;;  %v16260_v11 = vpop.f32.mrf.mxu1 }
 0xb02   : > { %v16262_v14 = vpop.f32.mrf.mxu1 }
 0xb04   : > { %v16264_v32 = vpop.f32.mrf.mxu1 }
 0xb06   : > { %v16266_v25 = vpop.f32.mrf.mxu1 }
 0xb07   : > { %6731 = vmatmul.mubr.bf16.gmra.mxu0 %v12694_v24 }
 0xb08   : > { %6738 = vmatprep.mubr.bf16.mxu0 %v12702_v15  ;;  %v16268_v55 = vpop.f32.mrf.mxu1 }
 0xb0a   : > { %v16270_v12 = vpop.f32.mrf.mxu1 }
 0xb0c   : > { %v16272_v48 = vpop.f32.mrf.mxu1 }
 0xb0e   : > { %v16274_v20 = vpop.f32.mrf.mxu1 }
 0xb0f   : > { %6739 = vmatmul.mubr.bf16.gmra.mxu0 %v12700_v21 }
 0xb10   : > { %6746 = vmatprep.mubr.bf16.mxu0 %v12708_v54  ;;  %v16276_v4 = vpop.f32.mrf.mxu1 }
 0xb12   : > { %v16280_v41 = vpop.f32.mrf.mxu1 }
 0xb14   : > { %v16282_v34 = vpop.f32.mrf.mxu1 }
 0xb16   : > { %v16284_v15 = vpop.f32.mrf.mxu1 }
 0xb17   : > { %6747 = vmatmul.mubr.bf16.gmra.mxu0 %v12706_v2 }
 0xb18   : > { %6754 = vmatprep.mubr.bf16.mxu0 %v12714_v53  ;;  %v16288_v21 = vpop.f32.mrf.mxu1  ;;  %v16294_v53 = vpop.permute.xlu1 %7647 }
 0xb1a   : > { %v16290_v58 = vpop.f32.mrf.mxu1 }
 0xb1c   : > { %v16292_v2 = vpop.f32.mrf.mxu1 }
 0xb1e   : > { %v16296_v29 = vpop.f32.mrf.mxu1 }
 0xb1f   : > { %6755 = vmatmul.mubr.bf16.gmra.mxu0 %v12712_v31 }
 0xb20   : > { %6762 = vmatprep.mubr.bf16.mxu0 %v12720_v16  ;;  %v16298_v16 = vpop.permute.xlu0 %7642  ;;  %v16300_v30 = vpop.f32.mrf.mxu1 }
 0xb27   : > { %6763 = vmatmul.mubr.bf16.gmra.mxu0 %v12718_v59  ;;  %v16302_v59 = vpop.f32.mrf.mxu1 }
 0xb28   : > { %6770 = vmatprep.mubr.bf16.mxu0 %v12726_v33  ;;  %v16304_v33 = vpop.permute.xlu1 %7637 }
 0xb2f   : > { %6771 = vmatmul.mubr.bf16.gmra.mxu0 %v12724_v18 }
 0xb37   : > { %v6588_v37 = vpop.f32.mrf.mxu0 }
 0xb38   : > { %6781 = vperm.xlu0 %12387, %v6588_v37  }
 0xb39   : > { %v6590_v42 = vpop.f32.mrf.mxu0 }
 0xb3a   : > { %v16306_v42 = vpop.permute.xlu0 %7632 }
 0xb3b   : > { %v6591_v17 = vpop.f32.mrf.mxu0 }
 0xb3c   : > { %6786 = vperm.xlu1 %12388, %v6591_v17   ;;  %v16308_v17 = vpop.f32.mrf.mxu1 }
 0xb3d   : > { %v6593_v1 = vpop.f32.mrf.mxu0 }
 0xb3f   : > { %v6596_v52 = vpop.f32.mrf.mxu0 }
 0xb40   : > { %6791 = vperm.xlu0 %12387, %v6596_v52   ;;  %v16310_v52 = vpop.permute.xlu1 %7627 }
 0xb41   : > { %v6598_v26 = vpop.f32.mrf.mxu0 }
 0xb43   : > { %v6599_v51 = vpop.f32.mrf.mxu0 }
 0xb44   : > { %6796 = vperm.xlu1 %12388, %v6599_v51   ;;  %v16312_v51 = vpop.f32.mrf.mxu1 }
 0xb45   : > { %v6601_v35 = vpop.f32.mrf.mxu0  ;;  %18866 = vst [vmem:[#allocation108_spill] sm:$0xff] %v16312_v51 }
 0xb47   : > { %v6604_v3 = vpop.f32.mrf.mxu0 }
 0xb48   : > { %6801 = vperm.xlu0 %12387, %v6604_v3   ;;  %v16314_v3 = vpop.permute.xlu0 %7622 }
 0xb49   : > { %v6606_v40 = vpop.f32.mrf.mxu0 }
 0xb4b   : > { %v6607_v9 = vpop.f32.mrf.mxu0 }
 0xb4c   : > { %6806 = vperm.xlu1 %12388, %v6607_v9   ;;  %v16316_v9 = vpop.f32.mrf.mxu1 }
 0xb4d   : > { %v6609_v61 = vpop.f32.mrf.mxu0  ;;  %18867 = vst [vmem:[#allocation109_spill] sm:$0xff] %v16316_v9 }
 0xb4e   : > { %v16318_v61 = vpop.permute.xlu1 %7617 }
 0xb4f   : > { %v6612_v60 = vpop.f32.mrf.mxu0 }
 0xb50   : > { %6811 = vperm.xlu0 %12387, %v6612_v60  }
 0xb51   : > { %v6614_v50 = vpop.f32.mrf.mxu0 }
 0xb53   : > { %v6615_v0 = vpop.f32.mrf.mxu0 }
 0xb54   : > { %6816 = vperm.xlu1 %12388, %v6615_v0   ;;  %v16322_v0 = vpop.permute.xlu0 %7612 }
 0xb55   : > { %v6617_v10 = vpop.f32.mrf.mxu0 }
 0xb56   : > { %v16324_v10 = vpop.f32.mrf.mxu1 }
 0xb57   : > { %v6620_v44 = vpop.f32.mrf.mxu0  ;;  %18868 = vst [vmem:[#allocation132_spill] sm:$0xff] %v16324_v10 }
 0xb58   : > { %6821 = vperm.xlu0 %12387, %v6620_v44  }
 0xb59   : > { %v6622_v36 = vpop.f32.mrf.mxu0 }
 0xb5a   : > { %v16328_v36 = vpop.permute.xlu1 %7607 }
 0xb5b   : > { %v6623_v43 = vpop.f32.mrf.mxu0 }
 0xb5c   : > { %6826 = vperm.xlu1 %12388, %v6623_v43  }
 0xb5d   : > { %v6625_v24 = vpop.f32.mrf.mxu0 }
 0xb5e   : > { %v16330_v24 = vpop.f32.mrf.mxu1 }
 0xb5f   : > { %v6628_v23 = vpop.f32.mrf.mxu0  ;;  %18870 = vst [vmem:[#allocation104_spill] sm:$0xff] %v16330_v24 }
 0xb60   : > { %6831 = vperm.xlu0 %12387, %v6628_v23  }
 0xb61   : > { %v6630_v54 = vpop.f32.mrf.mxu0 }
 0xb62   : > { %v16332_v54 = vpop.permute.xlu0 %7602 }
 0xb63   : > { %v6631_v39 = vpop.f32.mrf.mxu0  ;;  %18871 = vst [vmem:[#allocation106_spill] sm:$0xff] %v16332_v54 }
 0xb64   : > { %6836 = vperm.xlu1 %12388, %v6631_v39  }
 0xb65   : > { %v6633_v22 = vpop.f32.mrf.mxu0 }
 0xb66   : > { %v16334_v22 = vpop.f32.mrf.mxu1 }
 0xb67   : > { %v6636_v31 = vpop.f32.mrf.mxu0  ;;  %18872 = vst [vmem:[#allocation139_spill] sm:$0xff] %v16334_v22 }
 0xb68   : > { %6841 = vperm.xlu0 %12387, %v6636_v31   ;;  %v16336_v31 = vpop.permute.xlu1 %7597 }
 0xb69   : > { %v6638_v47 = vpop.f32.mrf.mxu0  ;;  %18873 = vst [vmem:[#allocation107_spill] sm:$0xff] %v16336_v31 }
 0xb6b   : > { %v6639_v18 = vpop.f32.mrf.mxu0 }
 0xb6c   : > { %6846 = vperm.xlu1 %12388, %v6639_v18  }
 0xb6d   : > { %v6641_v37 = vpop.f32.mrf.mxu0 }
 0xb6e   : > { %v16338_v37 = vpop.permute.xlu0 %7592 }
 0xb6f   : > { %v6644_v1 = vpop.f32.mrf.mxu0  ;;  %18874 = vst [vmem:[#allocation105_spill] sm:$0xff] %v16338_v37 }
 0xb70   : > { %6851 = vperm.xlu1 %12388, %v6644_v1   ;;  %v16340_v1 = vpop.f32.mrf.mxu1 }
 0xb71   : > { %v6646_v26 = vpop.f32.mrf.mxu0  ;;  %18875 = vst [vmem:[#allocation144_spill] sm:$0xff] %v16340_v1 }
 0xb73   : > { %v6647_v35 = vpop.f32.mrf.mxu0 }
 0xb74   : > { %6856 = vperm.xlu0 %12387, %v6647_v35   ;;  %v16342_v35 = vpop.permute.xlu1 %7587 }
 0xb75   : > { %v6649_v40 = vpop.f32.mrf.mxu0  ;;  %18876 = vst [vmem:[#allocation103_spill] sm:$0xff] %v16342_v35 }
 0xb77   : > { %v16320_v60 = vpop.f32.mrf.mxu0 }
 0xb79   : > { %v6654_v50 = vpop.f32.mrf.mxu0 }
 0xb7a   : > { %v16344_v50 = vpop.f32.mrf.mxu1 }
 0xb7b   : > { %v16326_v44 = vpop.f32.mrf.mxu0  ;;  %18877 = vst [vmem:[#allocation126_spill] sm:$0xff] %v16344_v50 }
 0xb7c   : > { %18869 = vst [vmem:[#allocation55_spill] sm:$0xff] %v16326_v44  ;;  %v16348_v49 = vpop.f32.mrf.mxu1 }
 0xb7d   : > { %v6657_v43 = vpop.f32.mrf.mxu0  ;;  %18879 = vst [vmem:[#allocation133_spill] sm:$0xff] %v16348_v49 }
 0xb7f   : > { %v6660_v23 = vpop.f32.mrf.mxu0 }
 0xb80   : > { %6871 = vperm.xlu0 %12387, %v6660_v23   ;;  %v16346_v23 = vpop.permute.xlu0 %7582 }
 0xb81   : > { %v6662_v39 = vpop.f32.mrf.mxu0  ;;  %18878 = vst [vmem:[#allocation101_spill] sm:$0xff] %v16346_v23 }
 0xb83   : > { %v6663_v47 = vpop.f32.mrf.mxu0 }
 0xb84   : > { %6876 = vperm.xlu1 %12388, %v6663_v47   ;;  %v16350_v47 = vpop.permute.xlu1 %7737  ;;  %v16352_v10 = vpop.permute.xlu0 %7732 }
 0xb85   : > { %v6665_v18 = vpop.f32.mrf.mxu0  ;;  %18880 = vst [vmem:[#allocation59_spill] sm:$0xff] %v16350_v47  ;;  %18881 = vst [vmem:[#allocation143_spill] sm:$0xff] %v16352_v10 }
 0xb87   : > { %v6668_v26 = vpop.f32.mrf.mxu0 }
 0xb88   : > { %6881 = vperm.xlu0 %12387, %v6668_v26   ;;  %v16354_v26 = vpop.f32.mrf.mxu1 }
 0xb89   : > { %v6670_v40 = vpop.f32.mrf.mxu0  ;;  %18882 = vst [vmem:[#allocation99_spill] sm:$0xff] %v16354_v26 }
 0xb8a   : > { %v16356_v40 = vpop.permute.xlu1 %7817  ;;  %v16358_v50 = vpop.f32.mrf.mxu1 }
 0xb8b   : > { %v6671_v43 = vpop.f32.mrf.mxu0  ;;  %18883 = vst [vmem:[#allocation137_spill] sm:$0xff] %v16356_v40  ;;  %18884 = vst [vmem:[#allocation96_spill] sm:$0xff] %v16358_v50 }
 0xb8c   : > { %6886 = vperm.xlu1 %12388, %v6671_v43   ;;  %v16362_v1 = vpop.f32.mrf.mxu1 }
 0xb8d   : > { %v6673_v39 = vpop.f32.mrf.mxu0  ;;  %18886 = vst [vmem:[#allocation128_spill] sm:$0xff] %v16362_v1 }
 0xb8e   : > { %v16360_v39 = vpop.permute.xlu0 %7812 }
 0xb8f   : > { %v6676_v18 = vpop.f32.mrf.mxu0  ;;  %18885 = vst [vmem:[#allocation135_spill] sm:$0xff] %v16360_v39 }
 0xb90   : > { %6891 = vperm.xlu0 %12387, %v6676_v18   ;;  %v16364_v18 = vpop.permute.xlu1 %7727 }
 0xb91   : > { %v6678_v24 = vpop.f32.mrf.mxu0  ;;  %18887 = vst [vmem:[#allocation146_spill] sm:$0xff] %v16364_v18 }
 0xb92   : > { %v16366_v26 = vpop.permute.xlu0 %7722 }
 0xb93   : > { %v6679_v9 = vpop.f32.mrf.mxu0  ;;  %18888 = vst [vmem:[#allocation129_spill] sm:$0xff] %v16366_v26 }
 0xb94   : > { %6896 = vperm.xlu1 %12388, %v6679_v9   ;;  %v16368_v9 = vpop.f32.mrf.mxu1 }
 0xb95   : > { %v6681_v51 = vpop.f32.mrf.mxu0  ;;  %18889 = vst [vmem:[#allocation148_spill] sm:$0xff] %v16368_v9 }
 0xb96   : > { %v16370_v51 = vpop.permute.xlu1 %7807  ;;  %v16372_v47 = vpop.f32.mrf.mxu1 }
 0xb97   : > { %v6684_v43 = vpop.f32.mrf.mxu0  ;;  %18890 = vst [vmem:[#allocation127_spill] sm:$0xff] %v16370_v51  ;;  %18891 = vst [vmem:[#allocation92_spill] sm:$0xff] %v16372_v47 }
 0xb98   : > { %6901 = vperm.xlu0 %12387, %v6684_v43   ;;  %v16376_v1 = vpop.f32.mrf.mxu1 }
 0xb99   : > { %v6686_v49 = vpop.f32.mrf.mxu0  ;;  %18893 = vst [vmem:[#allocation57_spill] sm:$0xff] %v16376_v1 }
 0xb9a   : > { %v16374_v49 = vpop.permute.xlu0 %7802 }
 0xb9b   : > { %v6687_v24 = vpop.f32.mrf.mxu0  ;;  %18892 = vst [vmem:[#allocation131_spill] sm:$0xff] %v16374_v49 }
 0xb9c   : > { %6906 = vperm.xlu1 %12388, %v6687_v24   ;;  %v16378_v24 = vpop.permute.xlu1 %7717 }
 0xb9d   : > { %v6689_v22 = vpop.f32.mrf.mxu0  ;;  %18894 = vst [vmem:[#allocation90_spill] sm:$0xff] %v16378_v24 }
 0xb9e   : > { %v16380_v9 = vpop.permute.xlu0 %7712 }
 0xb9f   : > { %v6692_v40 = vpop.f32.mrf.mxu0  ;;  %18895 = vst [vmem:[#allocation130_spill] sm:$0xff] %v16380_v9 }
 0xba0   : > { %6911 = vperm.xlu0 %12387, %v6692_v40   ;;  %v16382_v40 = vpop.f32.mrf.mxu1 }
 0xba1   : > { %v6694_v50 = vpop.f32.mrf.mxu0  ;;  %18896 = vst [vmem:[#allocation88_spill] sm:$0xff] %v16382_v40 }
 0xba2   : > { %v16384_v50 = vpop.permute.xlu1 %7797  ;;  %v16386_v18 = vpop.f32.mrf.mxu1 }
 0xba3   : > { %v6695_v43 = vpop.f32.mrf.mxu0  ;;  %18897 = vst [vmem:[#allocation151_spill] sm:$0xff] %v16384_v50  ;;  %18898 = vst [vmem:[#allocation141_spill] sm:$0xff] %v16386_v18 }
 0xba4   : > { %6916 = vperm.xlu1 %12388, %v6695_v43   ;;  %v16390_v1 = vpop.f32.mrf.mxu1 }
 0xba5   : > { %v6697_v39 = vpop.f32.mrf.mxu0  ;;  %18900 = vst [vmem:[#allocation54_spill] sm:$0xff] %v16390_v1 }
 0xba6   : > { %v16388_v39 = vpop.permute.xlu0 %7792 }
 0xba7   : > { %v6700_v22 = vpop.f32.mrf.mxu0  ;;  %18899 = vst [vmem:[#allocation52_spill] sm:$0xff] %v16388_v39 }
 0xba8   : > { %6921 = vperm.xlu0 %12387, %v6700_v22   ;;  %v16392_v22 = vpop.permute.xlu1 %7707 }
 0xba9   : > { %v6702_v26 = vpop.f32.mrf.mxu0  ;;  %18901 = vst [vmem:[#allocation124_spill] sm:$0xff] %v16392_v22 }
 0xbaa   : > { %v16394_v40 = vpop.permute.xlu0 %7702 }
 0xbab   : > { %v6703_v51 = vpop.f32.mrf.mxu0  ;;  %18902 = vst [vmem:[#allocation123_spill] sm:$0xff] %v16394_v40 }
 0xbac   : > { %6926 = vperm.xlu1 %12388, %v6703_v51   ;;  %v16396_v51 = vpop.f32.mrf.mxu1 }
 0xbad   : > { %v6705_v47 = vpop.f32.mrf.mxu0  ;;  %18903 = vst [vmem:[#allocation61_spill] sm:$0xff] %v16396_v51 }
 0xbae   : > { %v16400_v47 = vpop.permute.xlu1 %7787  ;;  %v16402_v24 = vpop.f32.mrf.mxu1 }
 0xbaf   : > { %v6708_v43 = vpop.f32.mrf.mxu0  ;;  %18905 = vst [vmem:[#allocation162_spill] sm:$0xff] %v16400_v47  ;;  %18906 = vst [vmem:[#allocation65_spill] sm:$0xff] %v16402_v24 }
 0xbb0   : > { %6931 = vperm.xlu0 %12387, %v6708_v43   ;;  %v16408_v1 = vpop.f32.mrf.mxu1 }
 0xbb1   : > { %v6710_v49 = vpop.f32.mrf.mxu0  ;;  %18909 = vst [vmem:[#allocation120_spill] sm:$0xff] %v16408_v1 }
 0xbb2   : > { %v16406_v49 = vpop.permute.xlu0 %7782  ;;  %v16416_v51 = vpop.f32.mrf.mxu1 }
 0xbb3   : > { %v6711_v26 = vpop.f32.mrf.mxu0  ;;  %18908 = vst [vmem:[#allocation58_spill] sm:$0xff] %v16406_v49  ;;  %18912 = vst [vmem:[#allocation163_spill] sm:$0xff] %v16416_v51 }
 0xbb4   : > { %6936 = vperm.xlu1 %12388, %v6711_v26   ;;  %v16410_v26 = vpop.permute.xlu1 %7697  ;;  %v16422_v10 = vpop.f32.mrf.mxu1 }
 0xbb5   : > { %v6713_v9 = vpop.f32.mrf.mxu0  ;;  %18910 = vst [vmem:[#allocation72_spill] sm:$0xff] %v16410_v26  ;;  %18914 = vst [vmem:[#allocation152_spill] sm:$0xff] %v16422_v10 }
 0xbb6   : > { %v16414_v22 = vpop.permute.xlu0 %7692  ;;  %v16426_v26 = vpop.f32.mrf.mxu1 }
 0xbb7   : > { %v16398_v50 = vpop.f32.mrf.mxu0  ;;  %18911 = vst [vmem:[#allocation142_spill] sm:$0xff] %v16414_v22  ;;  %18916 = vst [vmem:[#allocation82_spill] sm:$0xff] %v16426_v26 }
 0xbb8   : > { %18904 = vst [vmem:[#allocation150_spill] sm:$0xff] %v16398_v50  ;;  %v16432_v23 = vpop.f32.mrf.mxu1 }
 0xbb9   : > { %v6718_v18 = vpop.f32.mrf.mxu0  ;;  %18919 = vst [vmem:[#allocation156_spill] sm:$0xff] %v16432_v23 }
 0xbba   : > { %v16420_v18 = vpop.permute.xlu1 %7777 }
 0xbbb   : > { %v16404_v43 = vpop.f32.mrf.mxu0  ;;  %18913 = vst [vmem:[#allocation64_spill] sm:$0xff] %v16420_v18 }
 0xbbc   : > { %18907 = vst [vmem:[#allocation71_spill] sm:$0xff] %v16404_v43 }
 0xbbd   : > { %v6721_v39 = vpop.f32.mrf.mxu0 }
 0xbbe   : > { %v16424_v39 = vpop.permute.xlu0 %7772  ;;  %v16428_v43 = vpop.permute.xlu1 %7687 }
 0xbbf   : > { %v16412_v9 = vpop.f32.mrf.mxu0  ;;  %18915 = vst [vmem:[#allocation121_spill] sm:$0xff] %v16424_v39  ;;  %18917 = vst [vmem:[#allocation67_spill] sm:$0xff] %v16428_v43 }
 0xbc1   : > { %v6726_v40 = vpop.f32.mrf.mxu0 }
 0xbc2   : > { %v16430_v51 = vpop.permute.xlu0 %7682  ;;  %v16434_v18 = vpop.permute.xlu1 %6786 }
 0xbc3   : > { %v16418_v47 = vpop.f32.mrf.mxu0  ;;  %18918 = vst [vmem:[#allocation145_spill] sm:$0xff] %v16430_v51  ;;  %18920 = vst [vmem:[#allocation83_spill] sm:$0xff] %v16434_v18 }
 0xbc5   : > { %v6729_v24 = vpop.f32.mrf.mxu0 }
 0xbc6   : > { %v16436_v63 = vpop.permute.xlu0 %6781 }
 0xbc7   : > { %v6732_v49 = vpop.f32.mrf.mxu0  ;;  %18921 = vst [vmem:[#allocation50_spill] sm:$0xff] %v16436_v63 }
 0xbc8   : > { %6961 = vperm.xlu0 %12387, %v6732_v49   ;;  %v16438_v49 = vpop.f32.mrf.mxu1 }
 0xbc9   : > { %v6734_v1 = vpop.f32.mrf.mxu0  ;;  %18922 = vst [vmem:[#allocation84_spill] sm:$0xff] %v16438_v49 }
 0xbca   : > { %v16440_v1 = vpop.permute.xlu1 %6796 }
 0xbcb   : > { %v6735_v40 = vpop.f32.mrf.mxu0 }
 0xbcc   : > { %6966 = vperm.xlu1 %12388, %v6735_v40   ;;  %v16442_v40 = vpop.permute.xlu0 %6791 }
 0xbcd   : > { %v6737_v22 = vpop.f32.mrf.mxu0 }
 0xbce   : > { %v16444_v22 = vpop.f32.mrf.mxu1  ;;  %v16446_v51 = vpop.permute.xlu1 %6806 }
 0xbcf   : > { %v6740_v24 = vpop.f32.mrf.mxu0  ;;  %18923 = vst [vmem:[#allocation69_spill] sm:$0xff] %v16444_v22 }
 0xbd0   : > { %6971 = vperm.xlu0 %12387, %v6740_v24   ;;  %v16448_v24 = vpop.permute.xlu0 %6801 }
 0xbd1   : > { %v6742_v10 = vpop.f32.mrf.mxu0 }
 0xbd2   : > { %v16450_v10 = vpop.f32.mrf.mxu1  ;;  %v16452_v35 = vpop.permute.xlu1 %6816 }
 0xbd3   : > { %v6743_v39 = vpop.f32.mrf.mxu0  ;;  %18924 = vst [vmem:[#allocation63_spill] sm:$0xff] %v16450_v10 }
 0xbd4   : > { %6976 = vperm.xlu1 %12388, %v6743_v39   ;;  %v16454_v39 = vpop.permute.xlu0 %6811 }
 0xbd5   : > { %v6745_v43 = vpop.f32.mrf.mxu0 }
 0xbd6   : > { %v16456_v43 = vpop.f32.mrf.mxu1 }
 0xbd7   : > { %v6748_v26 = vpop.f32.mrf.mxu0  ;;  %18925 = vst [vmem:[#allocation161_spill] sm:$0xff] %v16456_v43  ;;  %v16458_v38 = vpop.permute.xlu1 %6826 }
 0xbd8   : > { %6981 = vperm.xlu0 %12387, %v6748_v26   ;;  %v16460_v26 = vpop.permute.xlu0 %6821 }
 0xbd9   : > { %v6750_v23 = vpop.f32.mrf.mxu0 }
 0xbda   : > { %v16462_v23 = vpop.f32.mrf.mxu1 }
 0xbdb   : > { %v6751_v49 = vpop.f32.mrf.mxu0  ;;  %18926 = vst [vmem:[#allocation172_spill] sm:$0xff] %v16462_v23 }
 0xbdc   : > { %6986 = vperm.xlu1 %12388, %v6751_v49   ;;  %v6832_v6 = vpop.permute.xlu0 %6831  ;;  %v16464_v49 = vpop.f32.mrf.mxu1 }
 0xbdd   : > { %v6753_v50 = vpop.f32.mrf.mxu0  ;;  %18927 = vst [vmem:[#allocation68_spill] sm:$0xff] %v16464_v49 }
 0xbde   : > { %v16466_v18 = vpop.f32.mrf.mxu1 }
 0xbdf   : > { %v6756_v22 = vpop.f32.mrf.mxu0  ;;  %v6837_v62 = vpop.permute.xlu1 %6836  ;;  %18928 = vst [vmem:[#allocation164_spill] sm:$0xff] %v16466_v18 }
 0xbe0   : > { %6991 = vperm.xlu0 %12387, %v6756_v22   ;;  %v16471_v45 = vpop.f32.mrf.mxu1 }
 0xbe1   : > { %v6758_v37 = vpop.f32.mrf.mxu0 }
 0xbe3   : > { %v6759_v10 = vpop.f32.mrf.mxu0  ;;  %v6842_v5 = vpop.permute.xlu0 %6841 }
 0xbe4   : > { %6996 = vperm.xlu1 %12388, %v6759_v10   ;;  %v7356_v49 = vadd.f32 %v16288_v21, %v6842_v5  ;;  %v7354_v21 = vadd.f32 %v16284_v15, %v6842_v5 }
 0xbe5   : > { %v6761_v63 = vpop.f32.mrf.mxu0 }
 0xbe7   : > { %v6847_v50 = vpop.permute.xlu1 %6846  ;;  %v6764_v31 = vpop.f32.mrf.mxu0 }
 0xbe8   : > { %7001 = vperm.xlu0 %12387, %v6764_v31   ;;  %v7360_v63 = vadd.f32 %v16292_v2, %v6847_v50  ;;  %v7358_v31 = vadd.f32 %v16290_v58, %v6847_v50  ;;  %v7350_v2 = vadd.f32 %v16282_v34, %v6837_v62 }
 0xbe9   : > { %v6766_v43 = vpop.f32.mrf.mxu0 }
 0xbea   : > { %v7846_v34 = vadd.f32 %v16294_v53, %v7358_v31 }
 0xbeb   : > { %v6852_v22 = vpop.permute.xlu1 %6851  ;;  %v6767_v37 = vpop.f32.mrf.mxu0 }
 0xbec   : > { %v7364_v44 = vadd.f32 %v16296_v29, %v6852_v22  ;;  %v7366_v23 = vadd.f32 %v16300_v30, %v6852_v22  ;;  %7006 = vperm.xlu1 %12388, %v6767_v37   ;;  %v7847_v22 = vadd.f32 %v16294_v53, %v7360_v63 }
 0xbed   : > { %v6769_v10 = vpop.f32.mrf.mxu0 }
 0xbee   : > { %v7848_v18 = vadd.f32 %v16278_v57, %v7364_v44  ;;  %v7849_v46 = vadd.f32 %v16278_v57, %v7366_v23  ;;  %v7568_v10 = vld [vmem:[%s18855_s10 + $0x120] sm:$0xff]  ;;  %v16485_v44 = vpop.f32.mrf.mxu1  ;;  %v7346_v57 = vadd.f32 %v16276_v4, %v6832_v6  ;;  %v7569_v4 = vld [vmem:[%s18855_s10 + $0x128] sm:$0xff] }
 0xbef   : > { %v6772_v43 = vpop.f32.mrf.mxu0  ;;  %v6857_v54 = vpop.permute.xlu0 %6856 }
 0xbf0   : > { %v7368_v29 = vadd.f32 %v16302_v59, %v6857_v54  ;;  %v7370_v30 = vadd.f32 %v16308_v17, %v6857_v54  ;;  %7011 = vperm.xlu0 %12387, %v6772_v43   ;;  %v7348_v59 = vadd.f32 %v16280_v41, %v6837_v62  ;;  %v7845_v17 = vadd.f32 %v16298_v16, %v7356_v49  ;;  %v16497_v49 = vpop.f32.mrf.mxu1 }
 0xbf1   : > { %v6774_v37 = vpop.f32.mrf.mxu0  ;;  %v7944_v23 = vmax.f32 %v7848_v18, 0.0  ;;  %v7945_v5 = vmax.f32 %v7849_v46, 0.0  ;;  %v7843_v43 = vadd.f32 %v16304_v33, %v7350_v2  ;;  %v7344_v62 = vadd.f32 %v16274_v20, %v6832_v6 }
 0xbf2   : > { %v7850_v58 = vadd.f32 %v16286_v8, %v7368_v29  ;;  %v7851_v50 = vadd.f32 %v16286_v8, %v7370_v30  ;;  %v7340_v8 = vadd.f32 %v16272_v48, %v16458_v38  ;;  %v7943_v30 = vmax.f32 %v7847_v22, 0.0 }
 0xbf3   : > { %v6775_v54 = vpop.f32.mrf.mxu0  ;;  %v7844_v41 = vadd.f32 %v16298_v16, %v7354_v21  ;;  %v7336_v46 = vadd.f32 %v16268_v55, %v16460_v26  ;;  %v7841_v31 = vadd.f32 %v16306_v42, %v7346_v57  ;;  %v7941_v48 = vmax.f32 %v7845_v17, 0.0  ;;  %v7550_v55 = vld [vmem:[%s18855_s10 + $0x90] sm:$0xff]  ;;  %v7551_v17 = vld [vmem:[%s18855_s10 + $0x98] sm:$0xff] }
 0xbf4   : > { %v7946_v63 = vmax.f32 %v7850_v58, 0.0  ;;  %7762 = vperm.xlu0 %12387, %v7568_v10   ;;  %7016 = vperm.xlu1 %12388, %v6775_v54   ;;  %v7947_v15 = vmax.f32 %v7851_v50, 0.0  ;;  %v7338_v2 = vadd.f32 %v16270_v12, %v16458_v38  ;;  %v7842_v22 = vadd.f32 %v16304_v33, %v7348_v59  ;;  %v16513_v33 = vpop.f32.mrf.mxu1 }
 0xbf5   : > { %v6777_v29 = vpop.f32.mrf.mxu0  ;;  %v7942_v37 = vmax.f32 %v7846_v34, 0.0  ;;  %v7330_v6 = vadd.f32 %v16264_v32, %v16452_v35  ;;  %v7839_v20 = vadd.f32 %v16310_v52, %v7340_v8  ;;  %v8089_v16 = vpack.c.bf16 %v7943_v30, %v7941_v48  ;;  %v7566_v8 = vld [vmem:[%s18855_s10 + $0x110] sm:$0xff]  ;;  %v18930_v30 = vld [vmem:[#allocation106_spill] sm:$0xff] }
 0xbf6   : > { %v8091_v53 = vpack.c.bf16 %v7947_v15, %v7945_v5  ;;  %v8090_v18 = vpack.c.bf16 %v7946_v63, %v7944_v23  ;;  %v7939_v10 = vmax.f32 %v7843_v43, 0.0  ;;  %v7334_v21 = vadd.f32 %v16266_v25, %v16460_v26 }
 0xbf7   : > { %v7840_v38 = vadd.f32 %v16306_v42, %v7344_v62  ;;  %v7940_v12 = vmax.f32 %v7844_v41, 0.0  ;;  %v7837_v32 = vadd.f32 %v16314_v3, %v7336_v46  ;;  %v7937_v58 = vmax.f32 %v7841_v31, 0.0  ;;  %v18931_v41 = vld [vmem:[#allocation102_spill] sm:$0xff]  ;;  %v18933_v46 = vld [vmem:[#allocation83_spill] sm:$0xff] }
 0xbf8   : > { %6951 = vperm.xlu0 %12387, %v16412_v9   ;;  %7767 = vperm.xlu1 %12388, %v7569_v4   ;;  %v7326_v9 = vadd.f32 %v16260_v11, %v16454_v39  ;;  %v7328_v50 = vadd.f32 %v16262_v14, %v16452_v35  ;;  %v7838_v57 = vadd.f32 %v16310_v52, %v7338_v2  ;;  %v7938_v25 = vmax.f32 %v7842_v22, 0.0  ;;  %v16529_v52 = vpop.f32.mrf.mxu1  ;;  %v18934_v31 = vld [vmem:[#allocation110_spill] sm:$0xff]  ;;  %v18935_v2 = vld [vmem:[#allocation107_spill] sm:$0xff] }
 0xbf9   : > { %8572 = vmatprep.subr.bf16.mxu0 %v8091_v53  ;;  %v8088_v42 = vpack.c.bf16 %v7942_v37, %v7940_v12  ;;  %v7320_v26 = vadd.f32 %v16256_v7, %v16446_v51  ;;  %v7835_v59 = vadd.f32 %v16318_v61, %v7330_v6  ;;  %v8087_v11 = vpack.c.bf16 %v7939_v10, %v7937_v58  ;;  %v7567_v6 = vld [vmem:[%s18855_s10 + $0x118] sm:$0xff] }
 0xbfa   : > { %8573 = vmatpush1.bf16.msra.mxu0 %v8090_v18  ;;  %v7935_v34 = vmax.f32 %v7839_v20, 0.0  ;;  %v7324_v54 = vadd.f32 %v16258_v27, %v16454_v39  ;;  %v7836_v14 = vadd.f32 %v16314_v3, %v7334_v21  ;;  %v7936_v35 = vmax.f32 %v7840_v38, 0.0  ;;  %v18937_v21 = vld [vmem:[#allocation50_spill] sm:$0xff]  ;;  %v18938_v38 = vld [vmem:[#allocation117_spill] sm:$0xff] }
 0xbfb   : > { %8574 = vmatprep.subr.bf16.mxu0 %v8089_v16  ;;  %v7833_v7 = vadd.f32 %v16322_v0, %v7326_v9  ;;  %v7933_v23 = vmax.f32 %v7837_v32, 0.0  ;;  %v7318_v63 = vadd.f32 %v16254_v19, %v16446_v51  ;;  %v7834_v5 = vadd.f32 %v16318_v61, %v7328_v50  ;;  %v16545_v61 = vpop.f32.mrf.mxu1  ;;  %v18936_v16 = vld [vmem:[#allocation111_spill] sm:$0xff]  ;;  %v18939_v9 = vld [vmem:[#allocation105_spill] sm:$0xff]  ;;  %v18940_v50 = vld [vmem:[#allocation100_spill] sm:$0xff] }
 0xbfc   : > { %7672 = vperm.xlu0 %12387, %v7550_v55   ;;  %6956 = vperm.xlu1 %12388, %v16418_v47   ;;  %v7316_v47 = vadd.f32 %v16252_v13, %v16448_v24  ;;  %v7934_v27 = vmax.f32 %v7838_v57, 0.0  ;;  %v8086_v3 = vpack.c.bf16 %v7938_v25, %v7936_v35  ;;  %v7310_v39 = vadd.f32 %v16248_v56, %v16440_v1 }
 0xbfd   : > { %v7831_v15 = vadd.f32 %v16328_v36, %v7320_v26  ;;  %v8085_v13 = vpack.c.bf16 %v7935_v34, %v7933_v23  ;;  %v7931_v43 = vmax.f32 %v7835_v59, 0.0  ;;  %v7314_v29 = vadd.f32 %v16250_v28, %v16448_v24  ;;  %v16561_v10 = vpop.f32.mrf.mxu1  ;;  %v18942_v59 = vld [vmem:[#allocation103_spill] sm:$0xff]  ;;  %v7548_v34 = vld [vmem:[%s18855_s10 + $0x80] sm:$0xff] }
 0xbfe   : > { %8575 = vmatpush1.bf16.msra.mxu0 %v8088_v42  ;;  %v7832_v19 = vadd.f32 %v16322_v0, %v7324_v54  ;;  %v7932_v51 = vmax.f32 %v7836_v14, 0.0  ;;  %v7829_v56 = vadd.f32 %v18930_v30, %v7316_v47  ;;  %v7929_v62 = vmax.f32 %v7833_v7, 0.0  ;;  %v18932_v0 = vld [vmem:[#allocation55_spill] sm:$0xff]  ;;  %v18941_v42 = vld [vmem:[#allocation150_spill] sm:$0xff]  ;;  %v18943_v14 = vld [vmem:[#allocation113_spill] sm:$0xff] }
 0xbff   : > { %8576 = vmatprep.subr.bf16.mxu0 %v8087_v11  ;;  %v7308_v53 = vadd.f32 %v18931_v41, %v16440_v1  ;;  %v7830_v18 = vadd.f32 %v16328_v36, %v7318_v63  ;;  %v7930_v28 = vmax.f32 %v7834_v5, 0.0  ;;  %v7300_v48 = vadd.f32 %v18934_v31, %v18933_v46  ;;  %v16575_v23 = vpop.f32.mrf.mxu1  ;;  %v18944_v63 = vld [vmem:[#allocation101_spill] sm:$0xff]  ;;  %v12774_v31 = vld [vmem:[%s18948_s26 + $0x4] ss:$12 sps:$4 sm:$0xff]   ;;  %s18991_s26 = sld [smem:[#allocation36_spill]] }
 0xc00   : > { %6861 = vperm.xlu0 %12387, %v16320_v60   ;;  %7677 = vperm.xlu1 %12388, %v7551_v17   ;;  %v18929_v60 = vld [vmem:[#allocation118_spill] sm:$0xff]  ;;  %v8084_v24 = vpack.c.bf16 %v7934_v27, %v7932_v51  ;;  %v7827_v22 = vadd.f32 %v18935_v2, %v7310_v39  ;;  %v8083_v37 = vpack.c.bf16 %v7931_v43, %v7929_v62  ;;  %v7927_v20 = vmax.f32 %v7831_v15, 0.0  ;;  %v18945_v15 = vld [vmem:[#allocation71_spill] sm:$0xff] }
 0xc01   : > { %v7306_v4 = vadd.f32 %v18929_v60, %v16442_v40  ;;  %v7304_v55 = vadd.f32 %v18936_v16, %v16442_v40  ;;  %v7828_v1 = vadd.f32 %v18930_v30, %v7314_v29  ;;  %v7928_v36 = vmax.f32 %v7832_v19, 0.0  ;;  %v7564_v43 = vld [vmem:[%s18855_s10 + $0x100] sm:$0xff]  ;;  %v7549_v29 = vld [vmem:[%s18855_s10 + $0x88] sm:$0xff]  ;;  %8604 = vmatprep.mubr.bf16.mxu0 %v12774_v31  ;;  %v8134_v16 = vld [vmem:[%s18947_s1 + $0x50] sm:$0xff] }
 0xc02   : > { %8577 = vmatpush1.bf16.msra.mxu0 %v8086_v3  ;;  %v7296_v12 = vadd.f32 %v18938_v38, %v18937_v21  ;;  %v7925_v58 = vmax.f32 %v7829_v56, 0.0  ;;  %v7298_v57 = vadd.f32 %v18940_v50, %v18933_v46  ;;  %v7826_v25 = vadd.f32 %v18935_v2, %v7308_v53  ;;  %v8138_v53 = vld [vmem:[%s18946_s28 + $0x70] sm:$0xff]  ;;  %v8139_v2 = vld [vmem:[%s18947_s1 + $0x78] sm:$0xff]  ;;  %v8132_v38 = vld [vmem:[%s18947_s1 + $0x40] sm:$0xff]  ;;  %s18985_s28 = sld [smem:[#allocation34_spill]] }
 0xc03   : > { %8578 = vmatprep.subr.bf16.mxu0 %v8085_v13  ;;  %v7825_v32 = vadd.f32 %v18939_v9, %v7306_v4  ;;  %v7926_v40 = vmax.f32 %v7830_v18, 0.0  ;;  %v8082_v26 = vpack.c.bf16 %v7930_v28, %v7928_v36  ;;  %v7823_v11 = vadd.f32 %v18942_v59, %v7300_v48  ;;  %v16583_v4 = vpop.f32.mrf.mxu1  ;;  %v7565_v18 = vld [vmem:[%s18855_s10 + $0x108] sm:$0xff]  ;;  %v8136_v48 = vld [vmem:[%s18947_s1 + $0x60] sm:$0xff]  ;;  %v8130_v50 = vld [vmem:[%s18947_s1 + $0x30] sm:$0xff] }
 0xc04   : > { %7752 = vperm.xlu0 %12387, %v7566_v8   ;;  %6866 = vperm.xlu1 %12388, %v18932_v0   ;;  %v8081_v17 = vpack.c.bf16 %v7927_v20, %v7925_v58  ;;  %v7923_v54 = vmax.f32 %v7827_v22, 0.0  ;;  %v7294_v35 = vadd.f32 %v18943_v14, %v18937_v21  ;;  %v7824_v47 = vadd.f32 %v18939_v9, %v7304_v55  ;;  %v16594_v22 = vpop.permute.xlu1 %6876  ;;  %v8137_v20 = vld [vmem:[%s18947_s1 + $0x68] sm:$0xff]  ;;  %v8135_v21 = vld [vmem:[%s18947_s1 + $0x58] sm:$0xff]  ;;  %v18958_v31 = vld [vmem:[#allocation146_spill] sm:$0xff] }
 0xc05   : > { %v7924_v7 = vmax.f32 %v7828_v1, 0.0  ;;  %v7821_v5 = vadd.f32 %v18944_v63, %v7296_v12  ;;  %v7921_v27 = vmax.f32 %v7825_v32, 0.0  ;;  %v7822_v3 = vadd.f32 %v18942_v59, %v7298_v57  ;;  %v16587_v0 = vpop.f32.mrf.mxu1  ;;  %v8133_v58 = vld [vmem:[%s18947_s1 + $0x48] sm:$0xff] }
 0xc06   : > { %8579 = vmatpush1.bf16.msra.mxu0 %v8084_v24  ;;  %v7922_v39 = vmax.f32 %v7826_v25, 0.0  ;;  %v7919_v19 = vmax.f32 %v7823_v11, 0.0  ;;  %v7820_v51 = vadd.f32 %v18944_v63, %v7294_v35  ;;  %v7920_v60 = vmax.f32 %v7824_v47, 0.0  ;;  %v16589_v24 = vpop.permute.xlu0 %6871 }
 0xc07   : > { %8580 = vmatprep.subr.bf16.mxu0 %v8083_v37  ;;  %v8080_v13 = vpack.c.bf16 %v7926_v40, %v7924_v7  ;;  %v8079_v8 = vpack.c.bf16 %v7923_v54, %v7921_v27  ;;  %v7917_v30 = vmax.f32 %v7821_v5, 0.0  ;;  %v7918_v56 = vmax.f32 %v7822_v3, 0.0  ;;  %v16596_v37 = vpop.f32.mrf.mxu1  ;;  %v8126_v54 = vld [vmem:[%s18947_s1 + $0x10] sm:$0xff]  ;;  %v18952_v3 = vld [vmem:[#allocation161_spill] sm:$0xff] }
 0xc08   : > { %6941 = vperm.xlu0 %12387, %v18941_v42   ;;  %7757 = vperm.xlu1 %12388, %v7567_v6   ;;  %v8078_v62 = vpack.c.bf16 %v7922_v39, %v7920_v60  ;;  %v7916_v28 = vmax.f32 %v7820_v51, 0.0  ;;  %v16602_v55 = vpop.permute.xlu1 %6886  ;;  %v8131_v42 = vld [vmem:[%s18947_s1 + $0x38] sm:$0xff]  ;;  %v18950_v7 = vld [vmem:[#allocation172_spill] sm:$0xff]  ;;  %v18955_v60 = vld [vmem:[#allocation143_spill] sm:$0xff]  ;;  %s18986_s3 = smov %s18985_s28 }
 0xc09   : > { %v8077_v41 = vpack.c.bf16 %v7919_v19, %v7917_v30  ;;  %v16604_v1 = vpop.f32.mrf.mxu1  ;;  %v18951_v5 = vld [vmem:[#allocation68_spill] sm:$0xff]  ;;  %v18954_v19 = vld [vmem:[#allocation63_spill] sm:$0xff] }
 0xc0a   : > { %8581 = vmatpush1.bf16.msra.mxu0 %v8082_v26  ;;  %v8076_v46 = vpack.c.bf16 %v7918_v56, %v7916_v28  ;;  %v16598_v6 = vpop.permute.xlu0 %6881  ;;  %v8128_v26 = vld [vmem:[%s18947_s1 + $0x20] sm:$0xff]  ;;  %v18957_v28 = vld [vmem:[#allocation156_spill] sm:$0xff] }
 0xc0b   : > { %8582 = vmatprep.subr.bf16.mxu0 %v8081_v17  ;;  %v16612_v9 = vpop.f32.mrf.mxu1 }
 0xc0c   : > { %7662 = vperm.xlu0 %12387, %v7548_v34   ;;  %6946 = vperm.xlu1 %12388, %v18945_v15   ;;  %v8129_v34 = vld [vmem:[%s18947_s1 + $0x28] sm:$0xff]  ;;  %v8127_v15 = vld [vmem:[%s18947_s1 + $0x18] sm:$0xff] }
 0xc0d   : > { %v16620_v25 = vpop.f32.mrf.mxu1 }
 0xc0e   : > { %8583 = vmatpush1.bf16.msra.mxu0 %v8080_v13  ;;  %v16606_v36 = vpop.permute.xlu0 %6891  ;;  %v8124_v13 = vld [vmem:[%s18947_s1] sm:$0xff] }
 0xc0f   : > { %8584 = vmatprep.subr.bf16.mxu0 %v8079_v8  ;;  %v16610_v12 = vpop.permute.xlu1 %6896  ;;  %v16624_v11 = vpop.f32.mrf.mxu1 }
 0xc10   : > { %7742 = vperm.xlu0 %12387, %v7564_v43   ;;  %7667 = vperm.xlu1 %12388, %v7549_v29   ;;  %v18953_v43 = vld [vmem:[#allocation69_spill] sm:$0xff] }
 0xc11   : > { %v16628_v35 = vpop.f32.mrf.mxu1 }
 0xc12   : > { %8585 = vmatpush1.bf16.msra.mxu0 %v8078_v62 }
 0xc13   : > { %8586 = vmatprep.subr.bf16.mxu0 %v8077_v41  ;;  %v16614_v32 = vpop.permute.xlu0 %6901  ;;  %v16635_v8 = vpop.f32.mrf.mxu1  ;;  %v18956_v41 = vld [vmem:[#allocation164_spill] sm:$0xff] }
 0xc14   : > { %8228 = vperm.xlu0 %12387, %v8138_v53   ;;  %7747 = vperm.xlu1 %12388, %v7565_v18  }
 0xc16   : > { %8587 = vmatpush1.bf16.msra.mxu0 %v8076_v46 }
 0xc17   : > { %v16618_v57 = vpop.permute.xlu1 %6906 }
 0xc18   : > { %8218 = vperm.xlu0 %12387, %v8136_v48   ;;  %8233 = vperm.xlu1 %12388, %v8139_v2   ;;  %v8125_v2 = vld [vmem:[%s18947_s1 + $0x8] sm:$0xff] }
 0xc1b   : > { %v6912_v40 = vpop.permute.xlu0 %6911 }
 0xc1c   : > { %8223 = vperm.xlu1 %12388, %v8137_v20   ;;  %8208 = vperm.xlu0 %12387, %v8134_v16   ;;  %v8154_v20 = vld [vmem:[%s18947_s1 + $0xf0] sm:$0xff] }
 0xc1d   : > { %v18959_v16 = vld [vmem:[#allocation84_spill] sm:$0xff] }
 0xc1f   : > { %v6917_v59 = vpop.permute.xlu1 %6916 }
 0xc20   : > { %8213 = vperm.xlu1 %12388, %v8135_v21   ;;  %8198 = vperm.xlu0 %12387, %v8132_v38   ;;  %v7430_v46 = vadd.f32 %v18957_v28, %v6917_v59  ;;  %v18960_v38 = vld [vmem:[#allocation59_spill] sm:$0xff] }
 0xc23   : > { %v6922_v17 = vpop.permute.xlu0 %6921 }
 0xc24   : > { %8203 = vperm.xlu1 %12388, %v8133_v58   ;;  %8188 = vperm.xlu0 %12387, %v8130_v50   ;;  %v7436_v29 = vadd.f32 %v18953_v43, %v6922_v17  ;;  %v7434_v21 = vadd.f32 %v18959_v16, %v6922_v17  ;;  %v8155_v43 = vld [vmem:[%s18947_s1 + $0xf8] sm:$0xff] }
 0xc27   : > { %v6927_v14 = vpop.permute.xlu1 %6926 }
 0xc28   : > { %8193 = vperm.xlu1 %12388, %v8131_v42   ;;  %8178 = vperm.xlu0 %12387, %v8128_v26   ;;  %v7440_v39 = vadd.f32 %v18952_v3, %v6927_v14  ;;  %v7438_v51 = vadd.f32 %v18954_v19, %v6927_v14  ;;  %v16650_v42 = vpop.f32.mrf.mxu1  ;;  %v18961_v26 = vld [vmem:[#allocation152_spill] sm:$0xff]  ;;  %v18963_v14 = vld [vmem:[#allocation129_spill] sm:$0xff]  ;;  %v8152_v19 = vld [vmem:[%s18947_s1 + $0xe0] sm:$0xff] }
 0xc29   : > { %v18964_v3 = vld [vmem:[#allocation120_spill] sm:$0xff] }
 0xc2a   : > { %v7879_v48 = vadd.f32 %v18958_v31, %v7440_v39  ;;  %v7420_v39 = vadd.f32 %v18964_v3, %v16618_v57  ;;  %v18975_v3 = vld [vmem:[#allocation88_spill] sm:$0xff] }
 0xc2b   : > { %v6932_v47 = vpop.permute.xlu0 %6931 }
 0xc2c   : > { %v7444_v63 = vadd.f32 %v18950_v7, %v6932_v47  ;;  %v7446_v27 = vadd.f32 %v18951_v5, %v6932_v47  ;;  %8183 = vperm.xlu1 %12388, %v8129_v34   ;;  %8168 = vperm.xlu0 %12387, %v8126_v54   ;;  %v18962_v34 = vld [vmem:[#allocation82_spill] sm:$0xff]  ;;  %v7877_v47 = vadd.f32 %v18963_v14, %v7436_v29 }
 0xc2d   : > { %v7428_v54 = vadd.f32 %v18962_v34, %v6917_v59  ;;  %v7878_v7 = vadd.f32 %v18958_v31, %v7438_v51  ;;  %v7876_v29 = vadd.f32 %v18963_v14, %v7434_v21  ;;  %v18971_v21 = vld [vmem:[#allocation124_spill] sm:$0xff] }
 0xc2e   : > { %v7880_v30 = vadd.f32 %v18955_v60, %v7444_v63  ;;  %v7881_v62 = vadd.f32 %v18955_v60, %v7446_v27  ;;  %v7975_v60 = vmax.f32 %v7879_v48, 0.0  ;;  %v7973_v31 = vmax.f32 %v7877_v47, 0.0 }
 0xc2f   : > { %v6937_v56 = vpop.permute.xlu1 %6936  ;;  %v7972_v47 = vmax.f32 %v7876_v29, 0.0  ;;  %v8151_v29 = vld [vmem:[%s18947_s1 + $0xd8] sm:$0xff] }
 0xc30   : > { %v7448_v53 = vadd.f32 %v18956_v41, %v6937_v56  ;;  %v7450_v18 = vadd.f32 %v16471_v45, %v6937_v56  ;;  %8173 = vperm.xlu1 %12388, %v8127_v15   ;;  %8158 = vperm.xlu0 %12387, %v8124_v13   ;;  %v7426_v45 = vadd.f32 %v18961_v26, %v6912_v40  ;;  %v7976_v63 = vmax.f32 %v7880_v30, 0.0  ;;  %v18965_v15 = vld [vmem:[#allocation90_spill] sm:$0xff]  ;;  %v18966_v56 = vld [vmem:[#allocation163_spill] sm:$0xff]  ;;  %v16663_v41 = vpop.f32.mrf.mxu1  ;;  %v8150_v26 = vld [vmem:[%s18947_s1 + $0xd0] sm:$0xff] }
 0xc31   : > { %v7977_v17 = vmax.f32 %v7881_v62, 0.0  ;;  %v7875_v13 = vadd.f32 %v18965_v15, %v7430_v46  ;;  %v7424_v59 = vadd.f32 %v18966_v56, %v6912_v40  ;;  %v18967_v62 = vld [vmem:[#allocation61_spill] sm:$0xff]  ;;  %v7874_v48 = vadd.f32 %v18965_v15, %v7428_v54 }
 0xc32   : > { %v7882_v58 = vadd.f32 %v18960_v38, %v7448_v53  ;;  %v7883_v50 = vadd.f32 %v18960_v38, %v7450_v18  ;;  %v7416_v53 = vadd.f32 %v18967_v62, %v16614_v32  ;;  %v18968_v18 = vld [vmem:[#allocation130_spill] sm:$0xff]  ;;  %v18969_v46 = vld [vmem:[#allocation65_spill] sm:$0xff]  ;;  %v7974_v40 = vmax.f32 %v7878_v7, 0.0  ;;  %v16679_v54 = vpop.f32.mrf.mxu1  ;;  %v18978_v62 = vld [vmem:[#allocation92_spill] sm:$0xff] }
 0xc33   : > { %v7873_v28 = vadd.f32 %v18968_v18, %v7426_v45  ;;  %v7871_v38 = vadd.f32 %v18971_v21, %v7420_v39  ;;  %v7971_v34 = vmax.f32 %v7875_v13, 0.0  ;;  %v18972_v45 = vld [vmem:[#allocation54_spill] sm:$0xff]  ;;  %v18973_v7 = vld [vmem:[#allocation57_spill] sm:$0xff]  ;;  %v7408_v39 = vadd.f32 %v18975_v3, %v16610_v12 }
 0xc34   : > { %v7978_v5 = vmax.f32 %v7882_v58, 0.0  ;;  %8163 = vperm.xlu1 %12388, %v8125_v2   ;;  %8308 = vperm.xlu0 %12387, %v8154_v20   ;;  %v7979_v27 = vmax.f32 %v7883_v50, 0.0  ;;  %v7418_v2 = vadd.f32 %v18969_v46, %v16618_v57  ;;  %v18970_v20 = vld [vmem:[#allocation141_spill] sm:$0xff]  ;;  %v8105_v58 = vpack.c.bf16 %v7975_v60, %v7973_v31  ;;  %v8153_v50 = vld [vmem:[%s18947_s1 + $0xe8] sm:$0xff]  ;;  %v18977_v60 = vld [vmem:[#allocation72_spill] sm:$0xff] }
 0xc35   : > { %v7410_v16 = vadd.f32 %v18970_v20, %v16610_v12  ;;  %v7414_v14 = vadd.f32 %v18972_v45, %v16614_v32  ;;  %v7872_v57 = vadd.f32 %v18968_v18, %v7424_v59  ;;  %v7970_v15 = vmax.f32 %v7874_v48, 0.0  ;;  %v18979_v31 = vld [vmem:[#allocation96_spill] sm:$0xff] }
 0xc36   : > { %v8107_v51 = vpack.c.bf16 %v7979_v27, %v7977_v17  ;;  %v8106_v30 = vpack.c.bf16 %v7978_v5, %v7976_v63  ;;  %v7406_v63 = vadd.f32 %v18973_v7, %v16606_v36  ;;  %v18974_v5 = vld [vmem:[#allocation123_spill] sm:$0xff]  ;;  %v7969_v27 = vmax.f32 %v7873_v28, 0.0  ;;  %v16695_v28 = vpop.f32.mrf.mxu1  ;;  %v18981_v20 = vld [vmem:[#allocation128_spill] sm:$0xff] }
 0xc37   : > { %v7869_v17 = vadd.f32 %v18974_v5, %v7416_v53  ;;  %v7870_v32 = vadd.f32 %v18971_v21, %v7418_v2  ;;  %v8104_v13 = vpack.c.bf16 %v7974_v40, %v7972_v47  ;;  %v7867_v56 = vadd.f32 %v18977_v60, %v7410_v16  ;;  %v18980_v2 = vld [vmem:[#allocation142_spill] sm:$0xff]  ;;  %v8146_v45 = vld [vmem:[%s18947_s1 + $0xb0] sm:$0xff] }
 0xc38   : > { %8313 = vperm.xlu1 %12388, %v8155_v43   ;;  %8298 = vperm.xlu0 %12387, %v8152_v19   ;;  %v18976_v43 = vld [vmem:[#allocation148_spill] sm:$0xff]  ;;  %v8103_v59 = vpack.c.bf16 %v7971_v34, %v7969_v27  ;;  %v7404_v53 = vadd.f32 %v18978_v62, %v16606_v36  ;;  %v7868_v12 = vadd.f32 %v18974_v5, %v7414_v14  ;;  %v7968_v18 = vmax.f32 %v7872_v57, 0.0  ;;  %v8149_v34 = vld [vmem:[%s18947_s1 + $0xc8] sm:$0xff]  ;;  %v18984_v5 = vld [vmem:[#allocation145_spill] sm:$0xff] }
 0xc39   : > { %8588 = vmatprep.subr.bf16.mxu0 %v8107_v51  ;;  %v7400_v19 = vadd.f32 %v18976_v43, %v16602_v55  ;;  %v8148_v51 = vld [vmem:[%s18947_s1 + $0xc0] sm:$0xff]  ;;  %v7396_v46 = vadd.f32 %v18979_v31, %v16598_v6  ;;  %v7865_v48 = vadd.f32 %v18980_v2, %v7406_v63  ;;  %v7965_v40 = vmax.f32 %v7869_v17, 0.0  ;;  %v18983_v57 = vld [vmem:[#allocation99_spill] sm:$0xff]  ;;  %v16709_v63 = vpop.f32.mrf.mxu1 }
 0xc3a   : > { %8589 = vmatpush2.bf16.msra.mxu0 %v8106_v30  ;;  %v7967_v30 = vmax.f32 %v7871_v38, 0.0  ;;  %v7398_v16 = vadd.f32 %v18981_v20, %v16602_v55  ;;  %v7866_v36 = vadd.f32 %v18977_v60, %v7408_v39  ;;  %v7966_v21 = vmax.f32 %v7870_v32, 0.0  ;;  %v8145_v62 = vld [vmem:[%s18947_s1 + $0xa8] sm:$0xff]  ;;  %v9084_v20 = vld [vmem:[%s18985_s28 + $0x70] sm:$0xff]  ;;  %s19008_s28 = sld [smem:[#allocation38_spill]] }
 0xc3b   : > { %8590 = vmatprep.subr.bf16.mxu0 %v8105_v58  ;;  %v8102_v38 = vpack.c.bf16 %v7970_v15, %v7968_v18  ;;  %v18982_v58 = vld [vmem:[#allocation67_spill] sm:$0xff]  ;;  %v7963_v14 = vmax.f32 %v7867_v56, 0.0  ;;  %v7394_v47 = vadd.f32 %v18983_v57, %v16598_v6  ;;  %v7864_v7 = vadd.f32 %v18980_v2, %v7404_v53  ;;  %v8147_v6 = vld [vmem:[%s18947_s1 + $0xb8] sm:$0xff]  ;;  %v16716_v56 = vpop.f32.mrf.mxu1  ;;  %v8142_v53 = vld [vmem:[%s18947_s1 + $0x90] sm:$0xff] }
 0xc3c   : > { %8303 = vperm.xlu1 %12388, %v8153_v50   ;;  %8288 = vperm.xlu0 %12387, %v8150_v26   ;;  %v7863_v50 = vadd.f32 %v18982_v58, %v7400_v19  ;;  %v8101_v26 = vpack.c.bf16 %v7967_v30, %v7965_v40  ;;  %v7964_v55 = vmax.f32 %v7868_v12, 0.0  ;;  %v7861_v17 = vadd.f32 %v18984_v5, %v7396_v46  ;;  %v8143_v46 = vld [vmem:[%s18947_s1 + $0x98] sm:$0xff]  ;;  %v8140_v2 = vld [vmem:[%s18947_s1 + $0x80] sm:$0xff]  ;;  %v8141_v40 = vld [vmem:[%s18947_s1 + $0x88] sm:$0xff] }
 0xc3d   : > { %v7961_v27 = vmax.f32 %v7865_v48, 0.0  ;;  %v7862_v3 = vadd.f32 %v18982_v58, %v7398_v16  ;;  %v7962_v39 = vmax.f32 %v7866_v36, 0.0  ;;  %v7860_v19 = vadd.f32 %v18984_v5, %v7394_v47  ;;  %v16720_v18 = vpop.f32.mrf.mxu1  ;;  %v9085_v36 = vld [vmem:[%s18986_s3 + $0x78] sm:$0xff]  ;;  %v9078_v47 = vld [vmem:[%s18986_s3 + $0x40] sm:$0xff] }
 0xc3e   : > { %8591 = vmatpush2.bf16.msra.mxu0 %v8104_v13  ;;  %v8100_v32 = vpack.c.bf16 %v7966_v21, %v7964_v55  ;;  %v8144_v13 = vld [vmem:[%s18947_s1 + $0xa0] sm:$0xff]  ;;  %v7959_v43 = vmax.f32 %v7863_v50, 0.0  ;;  %v7960_v60 = vmax.f32 %v7864_v7, 0.0  ;;  %v9083_v50 = vld [vmem:[%s18986_s3 + $0x68] sm:$0xff]  ;;  %v9081_v57 = vld [vmem:[%s18986_s3 + $0x58] sm:$0xff]  ;;  %s18992_s1 = smov %s18991_s26 }
 0xc3f   : > { %8592 = vmatprep.subr.bf16.mxu0 %v8103_v59  ;;  %v8099_v15 = vpack.c.bf16 %v7963_v14, %v7961_v27  ;;  %v7957_v59 = vmax.f32 %v7861_v17, 0.0  ;;  %v7956_v12 = vmax.f32 %v7860_v19, 0.0  ;;  %v16724_v48 = vpop.f32.mrf.mxu1  ;;  %v9082_v21 = vld [vmem:[%s18986_s3 + $0x60] sm:$0xff]  ;;  %v9079_v17 = vld [vmem:[%s18986_s3 + $0x48] sm:$0xff]  ;;  %v9076_v27 = vld [vmem:[%s18986_s3 + $0x30] sm:$0xff] }
 0xc40   : > { %8293 = vperm.xlu1 %12388, %v8151_v29   ;;  %8278 = vperm.xlu0 %12387, %v8148_v51   ;;  %v7958_v29 = vmax.f32 %v7862_v3, 0.0  ;;  %v8098_v51 = vpack.c.bf16 %v7962_v39, %v7960_v60  ;;  %v9075_v60 = vld [vmem:[%s18986_s3 + $0x28] sm:$0xff] }
 0xc41   : > { %v8097_v30 = vpack.c.bf16 %v7959_v43, %v7957_v59  ;;  %v16728_v16 = vpop.f32.mrf.mxu1  ;;  %v9072_v59 = vld [vmem:[%s18986_s3 + $0x10] sm:$0xff] }
 0xc42   : > { %8593 = vmatpush2.bf16.msra.mxu0 %v8102_v38  ;;  %v8096_v31 = vpack.c.bf16 %v7958_v29, %v7956_v12 }
 0xc43   : > { %8594 = vmatprep.subr.bf16.mxu0 %v8101_v26  ;;  %v7515_v38 = vpop.f32.mrf.mxu1  ;;  %v6962_v58 = vpop.permute.xlu0 %6961  ;;  %v9080_v26 = vld [vmem:[%s18986_s3 + $0x50] sm:$0xff] }
 0xc44   : > { %8283 = vperm.xlu1 %12388, %v8149_v34   ;;  %8268 = vperm.xlu0 %12387, %v8146_v45  }
 0xc45   : > { %v7517_v45 = vpop.f32.mrf.mxu1 }
 0xc46   : > { %8595 = vmatpush2.bf16.msra.mxu0 %v8100_v32 }
 0xc47   : > { %8596 = vmatprep.subr.bf16.mxu0 %v8099_v15  ;;  %v16734_v34 = vpop.permute.xlu1 %6966  ;;  %v7519_v55 = vpop.f32.mrf.mxu1  ;;  %v9077_v15 = vld [vmem:[%s18986_s3 + $0x38] sm:$0xff] }
 0xc48   : > { %8273 = vperm.xlu1 %12388, %v8147_v6   ;;  %8258 = vperm.xlu0 %12387, %v8144_v13   ;;  %v9074_v6 = vld [vmem:[%s18986_s3 + $0x20] sm:$0xff] }
 0xc49   : > { %v7523_v39 = vpop.f32.mrf.mxu1 }
 0xc4a   : > { %8597 = vmatpush2.bf16.msra.mxu0 %v8098_v51 }
 0xc4b   : > { %8598 = vmatprep.subr.bf16.mxu0 %v8097_v30  ;;  %v16736_v14 = vpop.permute.xlu0 %6971  ;;  %v7525_v43 = vpop.f32.mrf.mxu1 }
 0xc4c   : > { %8263 = vperm.xlu1 %12388, %v8145_v62   ;;  %8248 = vperm.xlu0 %12387, %v8142_v53  }
 0xc4d   : > { %v7527_v29 = vpop.f32.mrf.mxu1 }
 0xc4e   : > { %8599 = vmatpush2.bf16.msra.mxu0 %v8096_v31  ;;  %v9073_v31 = vld [vmem:[%s18986_s3 + $0x18] sm:$0xff] }
 0xc4f   : > { %v16740_v7 = vpop.permute.xlu1 %6976 }
 0xc50   : > { %8253 = vperm.xlu1 %12388, %v8143_v46   ;;  %8238 = vperm.xlu0 %12387, %v8140_v2   ;;  %v9070_v46 = vld [vmem:[%s18986_s3] sm:$0xff]  ;;  %v18987_v2 = vld [vmem:[#allocation139_spill] sm:$0xff] }
 0xc53   : > { %v16742_v5 = vpop.permute.xlu0 %6981 }
 0xc54   : > { %8243 = vperm.xlu1 %12388, %v8141_v40   ;;  %9158 = vperm.xlu0 %12387, %v9084_v20   ;;  %v16758_v40 = vadd.f32 %v18987_v2, %v16589_v24  ;;  %v18988_v20 = vld [vmem:[#allocation144_spill] sm:$0xff] }
 0xc57   : > { %v16746_v3 = vpop.permute.xlu1 %6986 }
 0xc58   : > { %9163 = vperm.xlu1 %12388, %v9085_v36   ;;  %9148 = vperm.xlu0 %12387, %v9082_v21   ;;  %v16762_v36 = vadd.f32 %v18988_v20, %v16589_v24  ;;  %v18989_v21 = vld [vmem:[#allocation126_spill] sm:$0xff] }
 0xc5b   : > { %v16748_v32 = vpop.permute.xlu0 %6991 }
 0xc5c   : > { %9153 = vperm.xlu1 %12388, %v9083_v50   ;;  %9138 = vperm.xlu0 %12387, %v9080_v26   ;;  %v16766_v50 = vadd.f32 %v18989_v21, %v16594_v22  ;;  %v18990_v26 = vld [vmem:[#allocation133_spill] sm:$0xff] }
 0xc5f   : > { %v6997_v13 = vpop.permute.xlu1 %6996 }
 0xc60   : > { %9143 = vperm.xlu1 %12388, %v9081_v57   ;;  %9128 = vperm.xlu0 %12387, %v9078_v47   ;;  %v16770_v57 = vadd.f32 %v18990_v26, %v16594_v22  ;;  %v7529_v47 = vpop.f32.mrf.mxu1  ;;  %v16783_v22 = vadd.f32 %v16604_v1, %v16734_v34 }
 0xc63   : > { %v7002_v19 = vpop.permute.xlu0 %7001 }
 0xc64   : > { %9133 = vperm.xlu1 %12388, %v9079_v17   ;;  %9118 = vperm.xlu0 %12387, %v9076_v27   ;;  %v16776_v17 = vadd.f32 %v16596_v37, %v6962_v58  ;;  %v7516_v27 = vadd.f32 %v7515_v38, %v7002_v19 }
 0xc67   : > { %v7007_v51 = vpop.permute.xlu1 %7006 }
 0xc68   : > { %9123 = vperm.xlu1 %12388, %v9077_v15   ;;  %9108 = vperm.xlu0 %12387, %v9074_v6   ;;  %v7520_v53 = vadd.f32 %v7519_v55, %v7007_v51  ;;  %v16773_v55 = vadd.f32 %v16587_v0, %v6962_v58  ;;  %v7518_v24 = vadd.f32 %v7517_v45, %v7007_v51  ;;  %v18993_v6 = vld [vmem:[#allocation135_spill] sm:$0xff]  ;;  %v9453_v45 = vld [vmem:[%s18991_s26 + $0x70] sm:$0xff]  ;;  %s19103_s26 = sld [smem:[#allocation40_spill]] }
 0xc69   : > { %v7510_v0 = vadd.f32 %v16724_v48, %v6997_v13  ;;  %v9071_v58 = vld [vmem:[%s18986_s3 + $0x8] sm:$0xff]  ;;  %v16792_v51 = vadd.f32 %v16620_v25, %v16736_v14  ;;  %v7490_v48 = vadd.f32 %v16635_v8, %v16740_v7  ;;  %s19009_s3 = smov %s19008_s28 }
 0xc6a   : > { %v18997_v8 = vld [vmem:[#allocation151_spill] sm:$0xff] }
 0xc6b   : > { %v7012_v30 = vpop.permute.xlu0 %7011 }
 0xc6c   : > { %v7524_v62 = vadd.f32 %v7523_v39, %v7012_v30  ;;  %9113 = vperm.xlu1 %12388, %v9075_v60   ;;  %9098 = vperm.xlu0 %12387, %v9072_v59   ;;  %v7526_v12 = vadd.f32 %v7525_v43, %v7012_v30  ;;  %v18994_v30 = vld [vmem:[#allocation127_spill] sm:$0xff] }
 0xc6d   : > { %v7911_v37 = vadd.f32 %v18994_v30, %v7520_v53  ;;  %v7500_v53 = vadd.f32 %v16695_v28, %v16746_v3  ;;  %v7910_v20 = vadd.f32 %v18994_v30, %v7518_v24  ;;  %v7907_v28 = vadd.f32 %v18997_v8, %v7510_v0 }
 0xc6e   : > { %v7912_v43 = vadd.f32 %v18993_v6, %v7524_v62  ;;  %v7913_v38 = vadd.f32 %v18993_v6, %v7526_v12  ;;  %v18995_v62 = vld [vmem:[#allocation137_spill] sm:$0xff]  ;;  %v7506_v12 = vadd.f32 %v16716_v56, %v16748_v32 }
 0xc6f   : > { %v7017_v39 = vpop.permute.xlu1 %7016  ;;  %v16778_v15 = vpop.permute.xlu0 %7762  ;;  %v8007_v6 = vmax.f32 %v7911_v37, 0.0 }
 0xc70   : > { %v7528_v60 = vadd.f32 %v7527_v29, %v7017_v39  ;;  %v7530_v59 = vadd.f32 %v7529_v47, %v7017_v39  ;;  %9103 = vperm.xlu1 %12388, %v9073_v31   ;;  %9088 = vperm.xlu0 %12387, %v9070_v46   ;;  %v7514_v29 = vadd.f32 %v16728_v16, %v7002_v19  ;;  %v18996_v46 = vld [vmem:[#allocation131_spill] sm:$0xff]  ;;  %v8008_v21 = vmax.f32 %v7912_v43, 0.0  ;;  %v9454_v47 = vld [vmem:[%s18992_s1 + $0x78] sm:$0xff] }
 0xc71   : > { %v7909_v2 = vadd.f32 %v18996_v46, %v7516_v27  ;;  %v7508_v19 = vadd.f32 %v16720_v18, %v6997_v13  ;;  %v8009_v39 = vmax.f32 %v7913_v38, 0.0  ;;  %v7496_v27 = vadd.f32 %v16663_v41, %v16742_v5  ;;  %v9451_v13 = vld [vmem:[%s18992_s1 + $0x60] sm:$0xff] }
 0xc72   : > { %v7914_v31 = vadd.f32 %v18995_v62, %v7528_v60  ;;  %v7915_v1 = vadd.f32 %v18995_v62, %v7530_v59  ;;  %v7504_v60 = vadd.f32 %v16709_v63, %v16748_v32  ;;  %v7908_v18 = vadd.f32 %v18996_v46, %v7514_v29  ;;  %v18998_v59 = vld [vmem:[#allocation52_spill] sm:$0xff] }
 0xc73   : > { %v16804_v25 = vpop.permute.xlu1 %7767  ;;  %v16806_v16 = vpop.permute.xlu0 %6951  ;;  %v7498_v43 = vadd.f32 %v16679_v54, %v16746_v3  ;;  %v7905_v0 = vadd.f32 %v18998_v59, %v7506_v12  ;;  %v7486_v41 = vadd.f32 %v16624_v11, %v16736_v14  ;;  %v7488_v63 = vadd.f32 %v16628_v35, %v16740_v7  ;;  %v18999_v3 = vld [vmem:[#allocation162_spill] sm:$0xff]  ;;  %v19000_v12 = vld [vmem:[#allocation64_spill] sm:$0xff] }
 0xc74   : > { %v8010_v26 = vmax.f32 %v7914_v31, 0.0  ;;  %9093 = vperm.xlu1 %12388, %v9071_v58   ;;  %9543 = vperm.xlu0 %12387, %v9453_v45   ;;  %v8011_v56 = vmax.f32 %v7915_v1, 0.0  ;;  %v8005_v58 = vmax.f32 %v7909_v2, 0.0  ;;  %v7906_v32 = vadd.f32 %v18997_v8, %v7508_v19  ;;  %v9452_v31 = vld [vmem:[%s18992_s1 + $0x68] sm:$0xff]  ;;  %v9449_v46 = vld [vmem:[%s18992_s1 + $0x50] sm:$0xff]  ;;  %v19001_v2 = vld [vmem:[#allocation58_spill] sm:$0xff] }
 0xc75   : > { %v8006_v45 = vmax.f32 %v7910_v20, 0.0  ;;  %v7494_v54 = vadd.f32 %v16650_v42, %v16742_v5  ;;  %v7903_v29 = vadd.f32 %v18999_v3, %v7500_v53  ;;  %v8003_v1 = vmax.f32 %v7907_v28, 0.0  ;;  %v19002_v28 = vld [vmem:[#allocation121_spill] sm:$0xff] }
 0xc76   : > { %v8122_v24 = vpack.c.bf16 %v8010_v26, %v8008_v21  ;;  %v8123_v37 = vpack.c.bf16 %v8011_v56, %v8009_v39  ;;  %v8121_v62 = vpack.c.bf16 %v8007_v6, %v8005_v58  ;;  %v16833_v11 = vadd.f32 %v19000_v12, %v7490_v48 }
 0xc77   : > { %v16821_v30 = vpop.permute.xlu1 %6956  ;;  %v7673_v38 = vpop.permute.xlu0 %7672  ;;  %v7904_v35 = vadd.f32 %v18998_v59, %v7504_v60  ;;  %v8004_v14 = vmax.f32 %v7908_v18, 0.0  ;;  %v7901_v19 = vadd.f32 %v19001_v2, %v7496_v27  ;;  %v7902_v42 = vadd.f32 %v18999_v3, %v7498_v43 }
 0xc78   : > { %9548 = vperm.xlu1 %12388, %v9454_v47   ;;  %9533 = vperm.xlu0 %12387, %v9451_v13   ;;  %v7856_v7 = vadd.f32 %v7673_v38, %v16758_v40  ;;  %v7857_v5 = vadd.f32 %v7673_v38, %v16762_v36  ;;  %v8001_v48 = vmax.f32 %v7905_v0, 0.0  ;;  %v8002_v21 = vmax.f32 %v7906_v32, 0.0  ;;  %v9450_v36 = vld [vmem:[%s18992_s1 + $0x58] sm:$0xff] }
 0xc79   : > { %8765 = vmatprep.subr.bf16.mxu1 %v8123_v37  ;;  %v8120_v8 = vpack.c.bf16 %v8006_v45, %v8004_v14  ;;  %v7897_v47 = vadd.f32 %v19002_v28, %v7486_v41  ;;  %v7900_v39 = vadd.f32 %v19001_v2, %v7494_v54  ;;  %v7999_v6 = vmax.f32 %v7903_v29, 0.0 }
 0xc7a   : > { %8766 = vmatpush1.bf16.msra.mxu1 %v8122_v24  ;;  %v8119_v56 = vpack.c.bf16 %v8003_v1, %v8001_v48  ;;  %v8000_v27 = vmax.f32 %v7904_v35, 0.0  ;;  %v7952_v60 = vmax.f32 %v7856_v7, 0.0  ;;  %v9447_v24 = vld [vmem:[%s18992_s1 + $0x40] sm:$0xff]  ;;  %v7953_v43 = vmax.f32 %v7857_v5, 0.0  ;;  %v9446_v5 = vld [vmem:[%s18992_s1 + $0x38] sm:$0xff] }
 0xc7b   : > { %8767 = vmatprep.subr.bf16.mxu1 %v8121_v62  ;;  %v7678_v53 = vpop.permute.xlu1 %7677  ;;  %v16841_v20 = vpop.permute.xlu0 %6861  ;;  %v7997_v38 = vmax.f32 %v7901_v19, 0.0  ;;  %v7998_v37 = vmax.f32 %v7902_v42, 0.0  ;;  %v7995_v32 = vmax.f32 %v16833_v11, 0.0  ;;  %v7896_v45 = vadd.f32 %v19002_v28, %v16792_v51  ;;  %v9448_v62 = vld [vmem:[%s18992_s1 + $0x48] sm:$0xff]  ;;  %v19003_v42 = vld [vmem:[#allocation108_spill] sm:$0xff]  ;;  %v19004_v48 = vld [vmem:[#allocation109_spill] sm:$0xff] }
 0xc7c   : > { %v7858_v26 = vadd.f32 %v7678_v53, %v16766_v50  ;;  %v7859_v40 = vadd.f32 %v7678_v53, %v16770_v57  ;;  %9538 = vperm.xlu1 %12388, %v9452_v31   ;;  %9523 = vperm.xlu0 %12387, %v9449_v46   ;;  %v7480_v50 = vadd.f32 %v16612_v9, %v16734_v34  ;;  %v7996_v54 = vmax.f32 %v7900_v39, 0.0  ;;  %v9445_v31 = vld [vmem:[%s18992_s1 + $0x30] sm:$0xff]  ;;  %v9443_v53 = vld [vmem:[%s18992_s1 + $0x20] sm:$0xff] }
 0xc7d   : > { %v7898_v57 = vadd.f32 %v19000_v12, %v7488_v63  ;;  %v8118_v41 = vpack.c.bf16 %v8002_v21, %v8000_v27  ;;  %v8117_v63 = vpack.c.bf16 %v7999_v6, %v7997_v38  ;;  %v7893_v3 = vadd.f32 %v16778_v15, %v16776_v17  ;;  %v19005_v6 = vld [vmem:[#allocation132_spill] sm:$0xff] }
 0xc7e   : > { %v7954_v18 = vmax.f32 %v7858_v26, 0.0  ;;  %v7955_v13 = vmax.f32 %v7859_v40, 0.0  ;;  %8768 = vmatpush1.bf16.msra.mxu1 %v8120_v8  ;;  %v7895_v9 = vadd.f32 %v16804_v25, %v7480_v50  ;;  %v7894_v29 = vadd.f32 %v16804_v25, %v16783_v22 }
 0xc7f   : > { %8769 = vmatprep.subr.bf16.mxu1 %v8119_v56  ;;  %v6867_v59 = vpop.permute.xlu1 %6866  ;;  %v7753_v0 = vpop.permute.xlu0 %7752  ;;  %v7993_v1 = vmax.f32 %v7897_v47, 0.0  ;;  %v7994_v12 = vmax.f32 %v7898_v57, 0.0  ;;  %v7470_v51 = vadd.f32 %v16583_v4, %v16821_v30  ;;  %v7892_v14 = vadd.f32 %v16778_v15, %v16773_v55 }
 0xc80   : > { %v8094_v58 = vpack.c.bf16 %v7954_v18, %v7952_v60  ;;  %9528 = vperm.xlu1 %12388, %v9450_v36   ;;  %9513 = vperm.xlu0 %12387, %v9447_v24   ;;  %v8095_v34 = vpack.c.bf16 %v7955_v13, %v7953_v43  ;;  %v7464_v17 = vadd.f32 %v16545_v61, %v16806_v16  ;;  %v7991_v7 = vmax.f32 %v7895_v9, 0.0  ;;  %v9444_v18 = vld [vmem:[%s18992_s1 + $0x28] sm:$0xff]  ;;  %v9441_v13 = vld [vmem:[%s18992_s1 + $0x10] sm:$0xff] }
 0xc81   : > { %v8116_v22 = vpack.c.bf16 %v7998_v37, %v7996_v54  ;;  %v8115_v25 = vpack.c.bf16 %v7995_v32, %v7993_v1  ;;  %v7466_v46 = vadd.f32 %v16561_v10, %v16806_v16  ;;  %v7468_v4 = vadd.f32 %v16575_v23, %v16821_v30 }
 0xc82   : > { %8770 = vmatpush1.bf16.msra.mxu1 %v8118_v41  ;;  %8600 = vmatprep.subr.bf16.mxu0 %v8095_v34  ;;  %v7992_v19 = vmax.f32 %v7896_v45, 0.0  ;;  %v7989_v55 = vmax.f32 %v7893_v3, 0.0  ;;  %v7990_v15 = vmax.f32 %v7894_v29, 0.0  ;;  %v7374_v61 = vadd.f32 %v19003_v42, %v16841_v20  ;;  %v9439_v29 = vld [vmem:[%s18992_s1] sm:$0xff]  ;;  %v9465_v42 = vld [vmem:[%s18992_s1 + $0xd0] sm:$0xff] }
 0xc83   : > { %8771 = vmatprep.subr.bf16.mxu1 %v8117_v63  ;;  %v7758_v11 = vpop.permute.xlu1 %7757  ;;  %v6942_v35 = vpop.permute.xlu0 %6941  ;;  %8601 = vmatpush2.bf16.msra.mxu0 %v8094_v58  ;;  %v7376_v21 = vadd.f32 %v19004_v48, %v16841_v20  ;;  %v7888_v26 = vadd.f32 %v7753_v0, %v7464_v17  ;;  %v7889_v10 = vadd.f32 %v7753_v0, %v7466_v46  ;;  %v7988_v40 = vmax.f32 %v7892_v14, 0.0  ;;  %v19006_v20 = vld [vmem:[#allocation104_spill] sm:$0xff]  ;;  %v9466_v48 = vld [vmem:[%s18992_s1 + $0xd8] sm:$0xff] }
 0xc84   : > { %v7891_v2 = vadd.f32 %v7758_v11, %v7470_v51  ;;  %9518 = vperm.xlu1 %12388, %v9448_v62   ;;  %9503 = vperm.xlu0 %12387, %v9445_v31   ;;  %v7890_v16 = vadd.f32 %v7758_v11, %v7468_v4  ;;  %v8114_v8 = vpack.c.bf16 %v7994_v12, %v7992_v19  ;;  %v9440_v51 = vld [vmem:[%s18992_s1 + $0x8] sm:$0xff]  ;;  %v9469_v11 = vld [vmem:[%s18992_s1 + $0xf0] sm:$0xff]  ;;  %v9467_v19 = vld [vmem:[%s18992_s1 + $0xe0] sm:$0xff] }
 0xc85   : > { %v8113_v56 = vpack.c.bf16 %v7991_v7, %v7989_v55  ;;  %v8112_v36 = vpack.c.bf16 %v7990_v15, %v7988_v40  ;;  %v7378_v27 = vadd.f32 %v19005_v6, %v6867_v59  ;;  %v7380_v60 = vadd.f32 %v19006_v20, %v6867_v59  ;;  %v12778_v7 = vld [vmem:[%s18949_s2 + $0x1c] ss:$12 sps:$4 sm:$0xff]  }
 0xc86   : > { %8772 = vmatpush1.bf16.msra.mxu1 %v8116_v22  ;;  %v7987_v28 = vmax.f32 %v7891_v2, 0.0  ;;  %v7984_v24 = vmax.f32 %v7888_v26, 0.0  ;;  %v7985_v50 = vmax.f32 %v7889_v10, 0.0  ;;  %v7986_v57 = vmax.f32 %v7890_v16, 0.0  ;;  %v9470_v2 = vld [vmem:[%s18992_s1 + $0xf8] sm:$0xff]  ;;  %v9468_v15 = vld [vmem:[%s18992_s1 + $0xe8] sm:$0xff] }
 0xc87   : > { %8773 = vmatprep.subr.bf16.mxu1 %v8115_v25  ;;  %v6947_v23 = vpop.permute.xlu1 %6946  ;;  %v7663_v30 = vpop.permute.xlu0 %7662  ;;  %v7454_v43 = vadd.f32 %v16485_v44, %v6942_v35  ;;  %v7456_v37 = vadd.f32 %v16497_v49, %v6942_v35  ;;  %v9442_v49 = vld [vmem:[%s18992_s1 + $0x18] sm:$0xff]  ;;  %v12772_v25 = vld [vmem:[%s18949_s2] ss:$12 sps:$4 sm:$0xff]   ;;  %v12775_v55 = vld [vmem:[%s18949_s2 + $0x8] ss:$12 sps:$4 sm:$0xff]  }
 0xc88   : > { %v7852_v47 = vadd.f32 %v7663_v30, %v7374_v61  ;;  %v7853_v39 = vadd.f32 %v7663_v30, %v7376_v21  ;;  %9508 = vperm.xlu1 %12388, %v9446_v5   ;;  %9493 = vperm.xlu0 %12387, %v9443_v53   ;;  %v7458_v58 = vadd.f32 %v16513_v33, %v6947_v23  ;;  %v12776_v61 = vld [vmem:[%s18949_s2 + $0x18] ss:$12 sps:$4 sm:$0xff]   ;;  %v19007_v5 = vmov 0   ;;  %v12782_v53 = vld [vmem:[%s18949_s2 + $0x34] ss:$12 sps:$4 sm:$0xff]   ;;  %v9464_v10 = vld [vmem:[%s18992_s1 + $0xc8] sm:$0xff] }
 0xc89   : > { %v7460_v59 = vadd.f32 %v16529_v52, %v6947_v23  ;;  %v8111_v34 = vpack.c.bf16 %v7987_v28, %v7985_v50  ;;  %v8110_v62 = vpack.c.bf16 %v7986_v57, %v7984_v24  ;;  %v9463_v21 = vld [vmem:[%s18992_s1 + $0xc0] sm:$0xff]  ;;  %v9461_v16 = vld [vmem:[%s18992_s1 + $0xb0] sm:$0xff]  ;;  %v12786_v30 = vld [vmem:[%s18949_s2 + $0x4c] ss:$12 sps:$4 sm:$0xff]  }
 0xc8a   : > { %8774 = vmatpush1.bf16.msra.mxu1 %v8114_v8  ;;  %v7948_v45 = vmax.f32 %v7852_v47, 0.0  ;;  %v7949_v9 = vmax.f32 %v7853_v39, 0.0  ;;  %v12779_v26 = vld [vmem:[%s18949_s2 + $0x20] ss:$12 sps:$4 sm:$0xff]   ;;  %v12780_v23 = vld [vmem:[%s18949_s2 + $0x30] ss:$12 sps:$4 sm:$0xff]  }
 0xc8b   : > { %8775 = vmatprep.subr.bf16.mxu1 %v8113_v56  ;;  %v7668_v0 = vpop.permute.xlu1 %7667  ;;  %v7743_v38 = vpop.permute.xlu0 %7742  ;;  %v9462_v40 = vld [vmem:[%s18992_s1 + $0xb8] sm:$0xff]  ;;  %v9459_v8 = vld [vmem:[%s18992_s1 + $0xa0] sm:$0xff]  ;;  %v9460_v47 = vld [vmem:[%s18992_s1 + $0xa8] sm:$0xff] }
 0xc8c   : > { %v7854_v41 = vadd.f32 %v7668_v0, %v7378_v27  ;;  %v7855_v32 = vadd.f32 %v7668_v0, %v7380_v60  ;;  %9498 = vperm.xlu1 %12388, %v9444_v18   ;;  %9483 = vperm.xlu0 %12387, %v9441_v13   ;;  %v7884_v54 = vadd.f32 %v7743_v38, %v7454_v43  ;;  %v12783_v28 = vld [vmem:[%s18949_s2 + $0x38] ss:$12 sps:$4 sm:$0xff]   ;;  %v9457_v39 = vld [vmem:[%s18992_s1 + $0x90] sm:$0xff]  ;;  %v9456_v60 = vld [vmem:[%s18992_s1 + $0x88] sm:$0xff] }
 0xc8d   : > { %v7885_v3 = vadd.f32 %v7743_v38, %v7456_v37  ;;  %v12784_v56 = vld [vmem:[%s18949_s2 + $0x48] ss:$12 sps:$4 sm:$0xff]   ;;  %v9458_v6 = vld [vmem:[%s18992_s1 + $0x98] sm:$0xff]  ;;  %v9455_v27 = vld [vmem:[%s18992_s1 + $0x80] sm:$0xff]  ;;  %s19104_s1 = smov %s19103_s26 }
 0xc8e   : > { %v7950_v63 = vmax.f32 %v7854_v41, 0.0  ;;  %v7951_v44 = vmax.f32 %v7855_v32, 0.0  ;;  %8776 = vmatpush1.bf16.msra.mxu1 %v8112_v36  ;;  %v7980_v35 = vmax.f32 %v7884_v54, 0.0  ;;  %v12790_v36 = vld [vmem:[%s18949_s2 + $0x64] ss:$12 sps:$4 sm:$0xff]   ;;  %v10047_v50 = vld [vmem:[%s19009_s3 + $0x78] sm:$0xff] }
 0xc8f   : > { %8777 = vmatprep.subr.bf16.mxu1 %v8111_v34  ;;  %v7748_v33 = vpop.permute.xlu1 %7747  ;;  %v7981_v14 = vmax.f32 %v7885_v3, 0.0  ;;  %v12787_v20 = vld [vmem:[%s18949_s2 + $0x50] ss:$12 sps:$4 sm:$0xff]   ;;  %v12788_v13 = vld [vmem:[%s18949_s2 + $0x60] ss:$12 sps:$4 sm:$0xff]  }
 0xc90   : > { %v8092_v31 = vpack.c.bf16 %v7950_v63, %v7948_v45  ;;  %v7886_v52 = vadd.f32 %v7748_v33, %v7458_v58  ;;  %v7887_v1 = vadd.f32 %v7748_v33, %v7460_v59  ;;  %v8093_v12 = vpack.c.bf16 %v7951_v44, %v7949_v9  ;;  %9488 = vperm.xlu1 %12388, %v9442_v49   ;;  %v10046_v18 = vld [vmem:[%s19008_s28 + $0x70] sm:$0xff]  ;;  %v12794_v24 = vld [vmem:[%s18949_s2 + $0x7c] ss:$12 sps:$4 sm:$0xff]   ;;  %v10044_v57 = vld [vmem:[%s19009_s3 + $0x60] sm:$0xff]  ;;  %s19118_s28 = sld [smem:[#allocation39_spill]] }
 0xc91   : > { %9473 = vperm.xlu0 %12387, %v9439_v29   ;;  %v12791_v43 = vld [vmem:[%s18949_s2 + $0x68] ss:$12 sps:$4 sm:$0xff]   ;;  %v12792_v37 = vld [vmem:[%s18949_s2 + $0x78] ss:$12 sps:$4 sm:$0xff]   ;;  %v12795_v59 = vld [vmem:[%s18949_s2 + $0x80] ss:$12 sps:$4 sm:$0xff]  }
 0xc92   : > { %v7982_v17 = vmax.f32 %v7886_v52, 0.0  ;;  %v7983_v22 = vmax.f32 %v7887_v1, 0.0  ;;  %8778 = vmatpush1.bf16.msra.mxu1 %v8110_v62  ;;  %8602 = vmatprep.subr.bf16.mxu0 %v8093_v12  ;;  %v10045_v0 = vld [vmem:[%s19009_s3 + $0x68] sm:$0xff]  ;;  %v10042_v38 = vld [vmem:[%s19009_s3 + $0x50] sm:$0xff]  ;;  %v10043_v41 = vld [vmem:[%s19009_s3 + $0x58] sm:$0xff] }
 0xc93   : > { %8603 = vmatpush2.bf16.msra.mxu0 %v8092_v31  ;;  %v12798_v58 = vld [vmem:[%s18949_s2 + $0x94] ss:$12 sps:$4 sm:$0xff]   ;;  %v10041_v45 = vld [vmem:[%s19009_s3 + $0x48] sm:$0xff]  ;;  %v12796_v34 = vld [vmem:[%s18949_s2 + $0x90] ss:$12 sps:$4 sm:$0xff]  }
 0xc94   : > { %v8108_v46 = vpack.c.bf16 %v7982_v17, %v7980_v35  ;;  %v8109_v4 = vpack.c.bf16 %v7983_v22, %v7981_v14  ;;  %9478 = vperm.xlu1 %12388, %v9440_v51   ;;  %v10040_v32 = vld [vmem:[%s19009_s3 + $0x40] sm:$0xff]  ;;  %v10038_v9 = vld [vmem:[%s19009_s3 + $0x30] sm:$0xff]  ;;  %v12802_v63 = vld [vmem:[%s18949_s2 + $0xac] ss:$12 sps:$4 sm:$0xff]  }
 0xc95   : > { %9623 = vperm.xlu0 %12387, %v9469_v11   ;;  %v10039_v44 = vld [vmem:[%s19009_s3 + $0x38] sm:$0xff]  ;;  %v10036_v54 = vld [vmem:[%s19009_s3 + $0x20] sm:$0xff]  ;;  %v10037_v49 = vld [vmem:[%s19009_s3 + $0x28] sm:$0xff] }
 0xc96   : > { %8605 = vmatmul.mubr.bf16.vlgmr.msra.gmra.mxu0 %v12772_v25  ;;  %8779 = vmatprep.subr.bf16.mxu1 %v8109_v4  ;;  %v12799_v3 = vld [vmem:[%s18949_s2 + $0x98] ss:$12 sps:$4 sm:$0xff]   ;;  %v10034_v29 = vld [vmem:[%s19009_s3 + $0x10] sm:$0xff]  ;;  %v10033_v12 = vld [vmem:[%s19009_s3 + $0x8] sm:$0xff] }
 0xc97   : > { %8780 = vmatpush1.bf16.msra.mxu1 %v8108_v46  ;;  %8614 = vmatprep.mubr.bf16.mxu0 %v12778_v7  ;;  %v12800_v62 = vld [vmem:[%s18949_s2 + $0xa8] ss:$12 sps:$4 sm:$0xff]   ;;  %v12806_v33 = vld [vmem:[%s18949_s2 + $0xc4] ss:$12 sps:$4 sm:$0xff]   ;;  %v10035_v31 = vld [vmem:[%s19009_s3 + $0x18] sm:$0xff] }
 0xc98   : > { %9628 = vperm.xlu1 %12388, %v9470_v2   ;;  %v10032_v52 = vld [vmem:[%s19009_s3] sm:$0xff]  ;;  %v12803_v1 = vld [vmem:[%s18949_s2 + $0xb0] ss:$12 sps:$4 sm:$0xff]   ;;  %v12807_v35 = vld [vmem:[%s18949_s2 + $0xc8] ss:$12 sps:$4 sm:$0xff]  }
 0xc99   : > { %9613 = vperm.xlu0 %12387, %v9467_v19   ;;  %v12804_v51 = vld [vmem:[%s18949_s2 + $0xc0] ss:$12 sps:$4 sm:$0xff]   ;;  %v12810_v11 = vld [vmem:[%s18949_s2 + $0xdc] ss:$12 sps:$4 sm:$0xff]   ;;  %v12808_v14 = vld [vmem:[%s18949_s2 + $0xd8] ss:$12 sps:$4 sm:$0xff]  }
 0xc9a   : > { %8798 = vmatmul.mubr.bf16.vlgmr.msra.gmra.mxu1 %v12775_v55  ;;  %v12814_v17 = vld [vmem:[%s18949_s2 + $0xf4] ss:$12 sps:$4 sm:$0xff]   ;;  %v12812_v25 = vld [vmem:[%s18949_s2 + $0xf0] ss:$12 sps:$4 sm:$0xff]   ;;  %v12818_v7 = vld [vmem:[%s18949_s2 + $0x10c] ss:$12 sps:$4 sm:$0xff]  }
 0xc9b   : > { %8807 = vmatprep.mubr.bf16.mxu1 %v19007_v5  ;;  %v12811_v22 = vld [vmem:[%s18949_s2 + $0xe0] ss:$12 sps:$4 sm:$0xff]   ;;  %v12815_v46 = vld [vmem:[%s18949_s2 + $0xf8] ss:$12 sps:$4 sm:$0xff]   ;;  %v12816_v4 = vld [vmem:[%s18949_s2 + $0x108] ss:$12 sps:$4 sm:$0xff]  }
 0xc9c   : > { %9618 = vperm.xlu1 %12388, %v9468_v15   ;;  %v12822_v2 = vld [vmem:[%s18949_s2 + $0x124] ss:$12 sps:$4 sm:$0xff]   ;;  %v12820_v55 = vld [vmem:[%s18949_s2 + $0x120] ss:$12 sps:$4 sm:$0xff]   ;;  %v12826_v15 = vld [vmem:[%s18949_s2 + $0x13c] ss:$12 sps:$4 sm:$0xff]  }
 0xc9d   : > { %9603 = vperm.xlu0 %12387, %v9465_v42   ;;  %v12819_v19 = vld [vmem:[%s18949_s2 + $0x110] ss:$12 sps:$4 sm:$0xff]   ;;  %v12823_v42 = vld [vmem:[%s18949_s2 + $0x128] ss:$12 sps:$4 sm:$0xff]  }
 0xc9e   : > { %8615 = vmatmul.mubr.bf16.gmra.mxu0 %v12776_v61  ;;  %v12824_v61 = vld [vmem:[%s18949_s2 + $0x138] ss:$12 sps:$4 sm:$0xff]  }
 0xc9f   : > { %8624 = vmatprep.mubr.bf16.mxu0 %v12782_v53  ;;  %v12830_v53 = vld [vmem:[%s18949_s2 + $0x154] ss:$12 sps:$4 sm:$0xff]  }
 0xca0   : > { %9608 = vperm.xlu1 %12388, %v9466_v48   ;;  %v12827_v48 = vld [vmem:[%s18949_s2 + $0x140] ss:$12 sps:$4 sm:$0xff]  }
 0xca1   : > { %9593 = vperm.xlu0 %12387, %v9463_v21   ;;  %v12828_v21 = vld [vmem:[%s18949_s2 + $0x150] ss:$12 sps:$4 sm:$0xff]  }
 0xca2   : > { %8808 = vmatmul.mubr.bf16.gmra.mxu1 %v12779_v26  ;;  %v12834_v26 = vld [vmem:[%s18949_s2 + $0x16c] ss:$12 sps:$4 sm:$0xff]  }
 0xca3   : > { %8817 = vmatprep.mubr.bf16.mxu1 %v19007_v5 }
 0xca4   : > { %9598 = vperm.xlu1 %12388, %v9464_v10   ;;  %v12831_v10 = vld [vmem:[%s18949_s2 + $0x158] ss:$12 sps:$4 sm:$0xff]  }
 0xca5   : > { %9583 = vperm.xlu0 %12387, %v9461_v16   ;;  %v12832_v16 = vld [vmem:[%s18949_s2 + $0x168] ss:$12 sps:$4 sm:$0xff]  }
 0xca6   : > { %8625 = vmatmul.mubr.bf16.gmra.mxu0 %v12780_v23  ;;  %v12835_v23 = vld [vmem:[%s18949_s2 + $0x170] ss:$12 sps:$4 sm:$0xff]   ;;  %s19119_s2 = smov %s19118_s28 }
 0xca7   : > { %8634 = vmatprep.mubr.bf16.mxu0 %v12786_v30  ;;  %v16983_v30 = vpop.permute.xlu0 %8228 }
 0xca8   : > { %9588 = vperm.xlu1 %12388, %v9462_v40   ;;  %v16985_v40 = vpop.permute.xlu1 %8233 }
 0xca9   : > { %9573 = vperm.xlu0 %12387, %v9459_v8  }
 0xcaa   : > { %8818 = vmatmul.mubr.bf16.gmra.mxu1 %v12783_v28 }
 0xcab   : > { %8827 = vmatprep.mubr.bf16.mxu1 %v19007_v5  ;;  %v16987_v8 = vpop.permute.xlu0 %8218 }
 0xcac   : > { %9578 = vperm.xlu1 %12388, %v9460_v47   ;;  %v16989_v28 = vpop.permute.xlu1 %8223 }
 0xcad   : > { %9563 = vperm.xlu0 %12387, %v9457_v39  }
 0xcae   : > { %8635 = vmatmul.mubr.bf16.gmra.mxu0 %v12784_v56 }
 0xcaf   : > { %8644 = vmatprep.mubr.bf16.mxu0 %v12790_v36  ;;  %v16991_v47 = vpop.permute.xlu0 %8208 }
 0xcb0   : > { %9568 = vperm.xlu1 %12388, %v9458_v6   ;;  %v16993_v39 = vpop.permute.xlu1 %8213 }
 0xcb1   : > { %9553 = vperm.xlu0 %12387, %v9455_v27  }
 0xcb2   : > { %8828 = vmatmul.mubr.bf16.gmra.mxu1 %v12787_v20 }
 0xcb3   : > { %8837 = vmatprep.mubr.bf16.mxu1 %v19007_v5  ;;  %v16995_v56 = vpop.permute.xlu0 %8198 }
 0xcb4   : > { %9558 = vperm.xlu1 %12388, %v9456_v60   ;;  %v16997_v36 = vpop.permute.xlu1 %8203 }
 0xcb5   : > { %10120 = vperm.xlu0 %12387, %v10046_v18  }
 0xcb6   : > { %8645 = vmatmul.mubr.bf16.gmra.mxu0 %v12788_v13 }
 0xcb7   : > { %8654 = vmatprep.mubr.bf16.mxu0 %v12794_v24  ;;  %v16999_v6 = vpop.permute.xlu0 %8188 }
 0xcb8   : > { %10125 = vperm.xlu1 %12388, %v10047_v50   ;;  %v17001_v27 = vpop.permute.xlu1 %8193 }
 0xcb9   : > { %10110 = vperm.xlu0 %12387, %v10044_v57  }
 0xcba   : > { %8838 = vmatmul.mubr.bf16.gmra.mxu1 %v12791_v43 }
 0xcbb   : > { %8847 = vmatprep.mubr.bf16.mxu1 %v19007_v5  ;;  %v17003_v20 = vpop.permute.xlu0 %8178 }
 0xcbc   : > { %10115 = vperm.xlu1 %12388, %v10045_v0   ;;  %v17005_v60 = vpop.permute.xlu1 %8183 }
 0xcbd   : > { %10100 = vperm.xlu0 %12387, %v10042_v38  }
 0xcbe   : > { %8655 = vmatmul.mubr.bf16.gmra.mxu0 %v12792_v37 }
 0xcbf   : > { %8664 = vmatprep.mubr.bf16.mxu0 %v12798_v58  ;;  %v8169_v18 = vpop.permute.xlu0 %8168 }
 0xcc0   : > { %10105 = vperm.xlu1 %12388, %v10043_v41   ;;  %v17007_v13 = vpop.permute.xlu1 %8173 }
 0xcc1   : > { %10090 = vperm.xlu0 %12387, %v10040_v32  }
 0xcc2   : > { %8848 = vmatmul.mubr.bf16.gmra.mxu1 %v12795_v59 }
 0xcc3   : > { %8857 = vmatprep.mubr.bf16.mxu1 %v19007_v5  ;;  %v8159_v50 = vpop.permute.xlu0 %8158 }
 0xcc4   : > { %10095 = vperm.xlu1 %12388, %v10041_v45   ;;  %v17009_v37 = vpop.permute.xlu1 %8163 }
 0xcc5   : > { %10080 = vperm.xlu0 %12387, %v10038_v9   ;;  %19010 = vst [vmem:[#allocation66_spill] sm:$0xff] %v17009_v37 }
 0xcc6   : > { %8665 = vmatmul.mubr.bf16.gmra.mxu0 %v12796_v34 }
 0xcc7   : > { %8674 = vmatprep.mubr.bf16.mxu0 %v12802_v63 }
 0xcc8   : > { %10085 = vperm.xlu1 %12388, %v10039_v44  }
 0xcc9   : > { %10070 = vperm.xlu0 %12387, %v10036_v54  }
 0xcca   : > { %8858 = vmatmul.mubr.bf16.gmra.mxu1 %v12799_v3 }
 0xccb   : > { %8867 = vmatprep.mubr.bf16.mxu1 %v19007_v5 }
 0xccc   : > { %10075 = vperm.xlu1 %12388, %v10037_v49  }
 0xccd   : > { %10060 = vperm.xlu0 %12387, %v10034_v29  }
 0xcce   : > { %8675 = vmatmul.mubr.bf16.gmra.mxu0 %v12800_v62 }
 0xccf   : > { %8684 = vmatprep.mubr.bf16.mxu0 %v12806_v33 }
 0xcd0   : > { %10065 = vperm.xlu1 %12388, %v10035_v31  }
 0xcd1   : > { %10050 = vperm.xlu0 %12387, %v10032_v52  }
 0xcd2   : > { %8868 = vmatmul.mubr.bf16.gmra.mxu1 %v12803_v1 }
 0xcd3   : > { %8877 = vmatprep.mubr.bf16.mxu1 %v19007_v5 }
 0xcd4   : > { %10055 = vperm.xlu1 %12388, %v10033_v12  }
 0xcd6   : > { %8685 = vmatmul.mubr.bf16.gmra.mxu0 %v12804_v51 }
 0xcd7   : > { %8694 = vmatprep.mubr.bf16.mxu0 %v12810_v11 }
 0xcda   : > { %8878 = vmatmul.mubr.bf16.gmra.mxu1 %v12807_v35 }
 0xcdb   : > { %8887 = vmatprep.mubr.bf16.mxu1 %v19007_v5 }
 0xcde   : > { %8695 = vmatmul.mubr.bf16.gmra.mxu0 %v12808_v14 }
 0xcdf   : > { %8704 = vmatprep.mubr.bf16.mxu0 %v12814_v17 }
 0xce2   : > { %8888 = vmatmul.mubr.bf16.gmra.mxu1 %v12811_v22 }
 0xce3   : > { %8897 = vmatprep.mubr.bf16.mxu1 %v19007_v5 }
 0xce6   : > { %8705 = vmatmul.mubr.bf16.gmra.mxu0 %v12812_v25 }
 0xce7   : > { %8714 = vmatprep.mubr.bf16.mxu0 %v12818_v7 }
 0xcea   : > { %8898 = vmatmul.mubr.bf16.gmra.mxu1 %v12815_v46 }
 0xceb   : > { %8907 = vmatprep.mubr.bf16.mxu1 %v19007_v5 }
 0xcee   : > { %8715 = vmatmul.mubr.bf16.gmra.mxu0 %v12816_v4 }
 0xcef   : > { %8724 = vmatprep.mubr.bf16.mxu0 %v12822_v2 }
 0xcf2   : > { %8908 = vmatmul.mubr.bf16.gmra.mxu1 %v12819_v19 }
 0xcf3   : > { %8917 = vmatprep.mubr.bf16.mxu1 %v19007_v5 }
 0xcf6   : > { %8725 = vmatmul.mubr.bf16.gmra.mxu0 %v12820_v55 }
 0xcf7   : > { %8734 = vmatprep.mubr.bf16.mxu0 %v12826_v15 }
 0xcfa   : > { %8918 = vmatmul.mubr.bf16.gmra.mxu1 %v12823_v42 }
 0xcfb   : > { %8927 = vmatprep.mubr.bf16.mxu1 %v19007_v5 }
 0xcfe   : > { %8735 = vmatmul.mubr.bf16.gmra.mxu0 %v12824_v61 }
 0xcff   : > { %8744 = vmatprep.mubr.bf16.mxu0 %v12830_v53 }
 0xd02   : > { %8928 = vmatmul.mubr.bf16.gmra.mxu1 %v12827_v48 }
 0xd03   : > { %8937 = vmatprep.mubr.bf16.mxu1 %v19007_v5 }
 0xd06   : > { %8745 = vmatmul.mubr.bf16.gmra.mxu0 %v12828_v21  ;;  %v17036_v21 = vpop.permute.xlu0 %8308 }
 0xd07   : > { %8754 = vmatprep.mubr.bf16.mxu0 %v12834_v26  ;;  %19018 = vst [vmem:[#allocation60_spill] sm:$0xff] %v17036_v21 }
 0xd0a   : > { %8938 = vmatmul.mubr.bf16.gmra.mxu1 %v12831_v10 }
 0xd0b   : > { %8947 = vmatprep.mubr.bf16.mxu1 %v19007_v5 }
 0xd0e   : > { %8755 = vmatmul.mubr.bf16.gmra.mxu0 %v12832_v16 }
 0xd12   : > { %8948 = vmatmul.mubr.bf16.gmra.mxu1 %v12835_v23 }
 0xd56   : > { %v8606_v24 = vpop.f32.mrf.mxu0 }
 0xd57   : > { %v8607_v43 = vadd.f32 %v8606_v24, %v8159_v50 }
 0xd58   : > { %v8608_v57 = vpop.f32.mrf.mxu0 }
 0xd59   : > { %v8609_v58 = vadd.f32 %v8608_v57, %v8159_v50  ;;  %v17046_v57 = vpop.permute.xlu0 %8298 }
 0xd5a   : > { %v8610_v0 = vpop.f32.mrf.mxu0  ;;  %v8799_v38 = vpop.f32.mrf.mxu1  ;;  %19021 = vst [vmem:[#allocation122_spill] sm:$0xff] %v17046_v57 }
 0xd5b   : > { %v8800_v41 = vadd.f32 %v8799_v38, %v8607_v43  ;;  %v8611_v45 = vadd.f32 %v8610_v0, %v17009_v37 }
 0xd5c   : > { %v17011_v32 = vpop.f32.mrf.mxu0  ;;  %v8801_v59 = vpop.f32.mrf.mxu1 }
 0xd5d   : > { %19011 = vst [vmem:[#allocation158_spill] sm:$0xff] %v17011_v32  ;;  %v17014_v9 = vadd.f32 %v8801_v59, %v8609_v58  ;;  %v8958_v49 = vmax.f32 %v8800_v41, 0.0 }
 0xd5e   : > { %v8616_v34 = vpop.f32.mrf.mxu0  ;;  %v8803_v63 = vpop.f32.mrf.mxu1 }
 0xd5f   : > { %19012 = vst [vmem:[#allocation80_spill] sm:$0xff] %v17014_v9  ;;  %v8804_v44 = vadd.f32 %v8803_v63, %v8611_v45  ;;  %v8617_v29 = vadd.f32 %v8616_v34, %v8169_v18  ;;  %v17054_v34 = vpop.permute.xlu0 %8288 }
 0xd60   : > { %v8618_v54 = vpop.f32.mrf.mxu0  ;;  %v17016_v3 = vpop.f32.mrf.mxu1  ;;  %19023 = vst [vmem:[#allocation160_spill] sm:$0xff] %v17054_v34 }
 0xd61   : > { %19013 = vst [vmem:[#allocation153_spill] sm:$0xff] %v17016_v3  ;;  %v8960_v62 = vmax.f32 %v8804_v44, 0.0  ;;  %v8619_v1 = vadd.f32 %v8618_v54, %v8169_v18  ;;  %v17040_v18 = vpop.permute.xlu1 %8313 }
 0xd62   : > { %v8620_v33 = vpop.f32.mrf.mxu0  ;;  %v8809_v31 = vpop.f32.mrf.mxu1  ;;  %19019 = vst [vmem:[#allocation177_spill] sm:$0xff] %v17040_v18 }
 0xd63   : > { %v17018_v52 = vpack.c.bf16 %v8960_v62, %v8958_v49  ;;  %v8810_v12 = vadd.f32 %v8809_v31, %v8617_v29  ;;  %v8621_v35 = vadd.f32 %v8620_v33, %v17007_v13  ;;  %v12838_v29 = vld [vmem:[#allocation7 + $0x4] ss:$8 sps:$4 sm:$0xff]  }
 0xd64   : > { %v17020_v51 = vpop.f32.mrf.mxu0  ;;  %v8811_v11 = vpop.f32.mrf.mxu1  ;;  %9278 = vmatprep.mubr.bf16.mxu0 %v12838_v29 }
 0xd65   : > { %19014 = vst [vmem:[#allocation166_spill] sm:$0xff] %v17018_v52  ;;  %v17023_v14 = vadd.f32 %v8811_v11, %v8619_v1  ;;  %v8962_v4 = vmax.f32 %v8810_v12, 0.0  ;;  %v17052_v41 = vpop.permute.xlu1 %8303  ;;  %v17062_v1 = vpop.permute.xlu0 %8278 }
 0xd66   : > { %v8626_v17 = vpop.f32.mrf.mxu0  ;;  %v8813_v22 = vpop.f32.mrf.mxu1  ;;  %19022 = vst [vmem:[#allocation70_spill] sm:$0xff] %v17052_v41  ;;  %19025 = vst [vmem:[#allocation149_spill] sm:$0xff] %v17062_v1 }
 0xd67   : > { %19015 = vst [vmem:[#allocation62_spill] sm:$0xff] %v17023_v14  ;;  %v8814_v25 = vadd.f32 %v8813_v22, %v8621_v35  ;;  %v8627_v2 = vadd.f32 %v8626_v17, %v17003_v20 }
 0xd68   : > { %v17025_v7 = vpop.f32.mrf.mxu0  ;;  %v17027_v46 = vpop.f32.mrf.mxu1 }
 0xd69   : > { %v8964_v19 = vmax.f32 %v8814_v25, 0.0  ;;  %v17058_v62 = vpop.permute.xlu1 %8293 }
 0xd6a   : > { %v8630_v55 = vpop.f32.mrf.mxu0  ;;  %v8819_v15 = vpop.f32.mrf.mxu1  ;;  %19024 = vst [vmem:[#allocation119_spill] sm:$0xff] %v17058_v62 }
 0xd6b   : > { %v17030_v42 = vpack.c.bf16 %v8964_v19, %v8962_v4  ;;  %v17032_v61 = vadd.f32 %v8819_v15, %v8627_v2  ;;  %v17072_v2 = vpop.permute.xlu0 %8268  ;;  %v17097_v32 = vadd.f32 %v8630_v55, %v17005_v60 }
 0xd6c   : > { %v8632_v53 = vpop.f32.mrf.mxu0  ;;  %v17034_v48 = vpop.f32.mrf.mxu1  ;;  %19027 = vst [vmem:[#allocation157_spill] sm:$0xff] %v17072_v2  ;;  %v8623_v2 = vadd.f32 %v17020_v51, %v17007_v13 }
 0xd6d   : > { %19016 = vst [vmem:[#allocation167_spill] sm:$0xff] %v17030_v42  ;;  %19017 = vst [vmem:[#allocation169_spill] sm:$0xff] %v17032_v61  ;;  %v17068_v22 = vpop.permute.xlu1 %8283  ;;  %v17091_v61 = vadd.f32 %v17025_v7, %v17003_v20 }
 0xd6e   : > { %v8636_v26 = vpop.f32.mrf.mxu0  ;;  %v17038_v10 = vpop.f32.mrf.mxu1  ;;  %19026 = vst [vmem:[#allocation140_spill] sm:$0xff] %v17068_v22  ;;  %v17094_v3 = vadd.f32 %v17027_v46, %v8623_v2 }
 0xd6f   : > { %v17080_v57 = vpop.permute.xlu0 %8258  ;;  %v17101_v51 = vadd.f32 %v8636_v26, %v16999_v6 }
 0xd70   : > { %v8638_v16 = vpop.f32.mrf.mxu0  ;;  %v8825_v23 = vpop.f32.mrf.mxu1  ;;  %19029 = vst [vmem:[#allocation168_spill] sm:$0xff] %v17080_v57  ;;  %19031 = vst [vmem:[#allocation183_spill] sm:$0xff] %v17094_v3 }
 0xd71   : > { %v17076_v34 = vpop.permute.xlu1 %8273  ;;  %v17104_v57 = vadd.f32 %v8638_v16, %v16999_v6 }
 0xd72   : > { %v17042_v24 = vpop.f32.mrf.mxu0  ;;  %v17044_v50 = vpop.f32.mrf.mxu1  ;;  %19028 = vst [vmem:[#allocation155_spill] sm:$0xff] %v17076_v34  ;;  %v8633_v34 = vadd.f32 %v8632_v53, %v17005_v60 }
 0xd73   : > { %19020 = vst [vmem:[#allocation165_spill] sm:$0xff] %v17044_v50  ;;  %v17086_v14 = vpop.permute.xlu0 %8248 }
 0xd74   : > { %v8642_v43 = vpop.f32.mrf.mxu0  ;;  %v17048_v0 = vpop.f32.mrf.mxu1  ;;  %v17106_v53 = vadd.f32 %v8825_v23, %v8633_v34 }
 0xd75   : > { %v17082_v52 = vpop.permute.xlu1 %8263 }
 0xd76   : > { %v8646_v38 = vpop.f32.mrf.mxu0  ;;  %v17050_v58 = vpop.f32.mrf.mxu1  ;;  %19030 = vst [vmem:[#allocation77_spill] sm:$0xff] %v17082_v52  ;;  %v8643_v52 = vadd.f32 %v8642_v43, %v17001_v27  ;;  %19032 = vst [vmem:[#allocation87_spill] sm:$0xff] %v17106_v53 }
 0xd77   : > { %v17110_v7 = vadd.f32 %v8646_v38, %v16995_v56 }
 0xd78   : > { %v8648_v59 = vpop.f32.mrf.mxu0  ;;  %v8835_v45 = vpop.f32.mrf.mxu1 }
 0xd79   : > { %v8649_v20 = vadd.f32 %v8648_v59, %v16995_v56  ;;  %v17112_v46 = vadd.f32 %v8835_v45, %v8643_v52  ;;  %v17116_v26 = vpop.permute.xlu1 %8253 }
 0xd7a   : > { %v8650_v63 = vpop.f32.mrf.mxu0  ;;  %v17056_v44 = vpop.f32.mrf.mxu1 }
 0xd7b   : > { %v8651_v60 = vadd.f32 %v8650_v63, %v16997_v36  ;;  %v8239_v63 = vpop.permute.xlu0 %8238 }
 0xd7c   : > { %v8652_v54 = vpop.f32.mrf.mxu0  ;;  %v8841_v49 = vpop.f32.mrf.mxu1 }
 0xd7d   : > { %v8653_v6 = vadd.f32 %v8652_v54, %v16997_v36  ;;  %v17119_v16 = vadd.f32 %v8841_v49, %v8649_v20 }
 0xd7e   : > { %v8656_v33 = vpop.f32.mrf.mxu0  ;;  %v17060_v31 = vpop.f32.mrf.mxu1 }
 0xd7f   : > { %v8657_v56 = vadd.f32 %v8656_v33, %v16991_v47 }
 0xd80   : > { %v8658_v12 = vpop.f32.mrf.mxu0  ;;  %v8845_v11 = vpop.f32.mrf.mxu1 }
 0xd81   : > { %v8659_v52 = vadd.f32 %v8658_v12, %v16991_v47  ;;  %v17128_v20 = vadd.f32 %v8845_v11, %v8653_v6  ;;  %v8244_v11 = vpop.permute.xlu1 %8243 }
 0xd82   : > { %v17064_v35 = vpop.f32.mrf.mxu0  ;;  %v17066_v17 = vpop.f32.mrf.mxu1 }
 0xd84   : > { %v8662_v25 = vpop.f32.mrf.mxu0  ;;  %v17070_v4 = vpop.f32.mrf.mxu1 }
 0xd86   : > { %v8666_v19 = vpop.f32.mrf.mxu0  ;;  %v17074_v15 = vpop.f32.mrf.mxu1 }
 0xd88   : > { %v8668_v5 = vpop.f32.mrf.mxu0  ;;  %v8855_v29 = vpop.f32.mrf.mxu1 }
 0xd89   : > { %v8669_v3 = vadd.f32 %v8668_v5, %v16987_v8 }
 0xd8a   : > { %v8670_v1 = vpop.f32.mrf.mxu0  ;;  %v17078_v62 = vpop.f32.mrf.mxu1 }
 0xd8c   : > { %v8672_v18 = vpop.f32.mrf.mxu0  ;;  %v8861_v21 = vpop.f32.mrf.mxu1 }
 0xd8d   : > { %v8673_v55 = vadd.f32 %v8672_v18, %v16989_v28 }
 0xd8e   : > { %v8676_v22 = vpop.f32.mrf.mxu0  ;;  %v8863_v41 = vpop.f32.mrf.mxu1 }
 0xd8f   : > { %v8677_v38 = vadd.f32 %v8676_v22, %v16983_v30 }
 0xd90   : > { %v8678_v42 = vpop.f32.mrf.mxu0  ;;  %v8865_v9 = vpop.f32.mrf.mxu1 }
 0xd91   : > { %v8679_v23 = vadd.f32 %v8678_v42, %v16983_v30  ;;  %v8866_v45 = vadd.f32 %v8865_v9, %v8673_v55  ;;  %v8671_v42 = vadd.f32 %v8670_v1, %v16989_v28  ;;  %v8667_v30 = vadd.f32 %v8666_v19, %v16987_v8 }
 0xd92   : > { %v8680_v37 = vpop.f32.mrf.mxu0  ;;  %v8869_v13 = vpop.f32.mrf.mxu1  ;;  %v8862_v9 = vadd.f32 %v8861_v21, %v8669_v3  ;;  %v8661_v28 = vadd.f32 %v17064_v35, %v16993_v39  ;;  %v8852_v1 = vadd.f32 %v17070_v4, %v8659_v52  ;;  %v8977_v52 = vmax.f32 %v17128_v20, 0.0 }
 0xd93   : > { %v8681_v59 = vadd.f32 %v8680_v37, %v16985_v40  ;;  %v8663_v37 = vadd.f32 %v8662_v25, %v16993_v39  ;;  %v8870_v33 = vadd.f32 %v8869_v13, %v8677_v38  ;;  %v8864_v5 = vadd.f32 %v8863_v41, %v8671_v42 }
 0xd94   : > { %v8682_v43 = vpop.f32.mrf.mxu0  ;;  %v8871_v2 = vpop.f32.mrf.mxu1  ;;  %v8985_v50 = vmax.f32 %v8866_v45, 0.0  ;;  %v8860_v8 = vadd.f32 %v17078_v62, %v8667_v30  ;;  %v8983_v41 = vmax.f32 %v8862_v9, 0.0  ;;  %v8854_v45 = vadd.f32 %v17074_v15, %v8661_v28 }
 0xd95   : > { %v8683_v36 = vadd.f32 %v8682_v43, %v16985_v40  ;;  %v8872_v54 = vadd.f32 %v8871_v2, %v8679_v23  ;;  %v8856_v53 = vadd.f32 %v8855_v29, %v8663_v37  ;;  %v8986_v3 = vmax.f32 %v8870_v33, 0.0 }
 0xd96   : > { %v8686_v18 = vpop.f32.mrf.mxu0  ;;  %v8873_v34 = vpop.f32.mrf.mxu1  ;;  %v17139_v39 = vadd.f32 %v17060_v31, %v8651_v60  ;;  %v9051_v35 = vpack.c.bf16 %v8985_v50, %v8983_v41  ;;  %v8979_v37 = vmax.f32 %v8852_v1, 0.0  ;;  %v8982_v42 = vmax.f32 %v8860_v8, 0.0 }
 0xd97   : > { %v8874_v49 = vadd.f32 %v8873_v34, %v8681_v59  ;;  %v8687_v22 = vadd.f32 %v8686_v18, %v8239_v63  ;;  %v8987_v6 = vmax.f32 %v8872_v54, 0.0  ;;  %v8981_v18 = vmax.f32 %v8856_v53, 0.0 }
 0xd98   : > { %v8688_v47 = vpop.f32.mrf.mxu0  ;;  %v8875_v12 = vpop.f32.mrf.mxu1  ;;  %v8984_v34 = vmax.f32 %v8864_v5, 0.0  ;;  %v8980_v31 = vmax.f32 %v8854_v45, 0.0  ;;  %v8822_v1 = vadd.f32 %v17034_v48, %v17091_v61  ;;  %v19036_v45 = vld [vmem:[#allocation168_spill] sm:$0xff] }
 0xd99   : > { %v8876_v55 = vadd.f32 %v8875_v12, %v8683_v36  ;;  %v8988_v40 = vmax.f32 %v8874_v49, 0.0  ;;  %v8689_v23 = vadd.f32 %v8688_v47, %v8239_v63  ;;  %v8850_v49 = vadd.f32 %v17066_v17, %v8657_v56 }
 0xd9a   : > { %v8690_v43 = vpop.f32.mrf.mxu0  ;;  %v8879_v2 = vpop.f32.mrf.mxu1  ;;  %v9049_v50 = vpack.c.bf16 %v8981_v18, %v8979_v37  ;;  %v9050_v60 = vpack.c.bf16 %v8984_v34, %v8982_v42  ;;  %v19041_v37 = vld [vmem:[#allocation66_spill] sm:$0xff] }
 0xd9b   : > { %v8989_v25 = vmax.f32 %v8876_v55, 0.0  ;;  %v8880_v59 = vadd.f32 %v8879_v2, %v8687_v22  ;;  %v8691_v13 = vadd.f32 %v8690_v43, %v8244_v11  ;;  %v9052_v63 = vpack.c.bf16 %v8988_v40, %v8986_v3  ;;  %v19042_v42 = vld [vmem:[#allocation158_spill] sm:$0xff] }
 0xd9c   : > { %v8692_v21 = vpop.f32.mrf.mxu0  ;;  %v8881_v19 = vpop.f32.mrf.mxu1  ;;  %v8641_v40 = vadd.f32 %v17042_v24, %v17001_v27  ;;  %v8832_v43 = vadd.f32 %v17048_v0, %v17104_v57  ;;  %v8840_v2 = vadd.f32 %v17056_v44, %v17110_v7  ;;  %v8973_v24 = vmax.f32 %v17112_v46, 0.0 }
 0xd9d   : > { %v9053_v29 = vpack.c.bf16 %v8989_v25, %v8987_v6  ;;  %v8882_v38 = vadd.f32 %v8881_v19, %v8689_v23  ;;  %v8693_v4 = vadd.f32 %v8692_v21, %v8244_v11  ;;  %v8990_v53 = vmax.f32 %v8880_v59, 0.0  ;;  %v19035_v19 = vld [vmem:[#allocation165_spill] sm:$0xff] }
 0xd9e   : > { %v8696_v36 = vpop.f32.mrf.mxu0  ;;  %v8883_v54 = vpop.f32.mrf.mxu1  ;;  %v8978_v11 = vmax.f32 %v8850_v49, 0.0  ;;  %v8975_v25 = vmax.f32 %v17119_v16, 0.0  ;;  %v8834_v27 = vadd.f32 %v17050_v58, %v8641_v40  ;;  %v8976_v57 = vmax.f32 %v17139_v39, 0.0 }
 0xd9f   : > { %v8884_v62 = vadd.f32 %v8883_v54, %v8691_v13  ;;  %9246 = vmatprep.subr.bf16.mxu0 %v9053_v29  ;;  %v8697_v47 = vadd.f32 %v8696_v36, %v17086_v14  ;;  %v8991_v9 = vmax.f32 %v8882_v38, 0.0  ;;  %v8824_v21 = vadd.f32 %v17038_v10, %v17097_v32 }
 0xda0   : > { %v8698_v33 = vpop.f32.mrf.mxu0  ;;  %v8885_v15 = vpop.f32.mrf.mxu1  ;;  %9247 = vmatpush1.bf16.msra.mxu0 %v9052_v63  ;;  %v9048_v0 = vpack.c.bf16 %v8980_v31, %v8978_v11  ;;  %v9047_v8 = vpack.c.bf16 %v8977_v52, %v8975_v25  ;;  %v8830_v58 = vadd.f32 %v19035_v19, %v17101_v51  ;;  %v8971_v41 = vmax.f32 %v8832_v43, 0.0  ;;  %v19048_v43 = vld [vmem:[#allocation62_spill] sm:$0xff] }
 0xda1   : > { %v8992_v12 = vmax.f32 %v8884_v62, 0.0  ;;  %v8886_v30 = vadd.f32 %v8885_v15, %v8693_v4  ;;  %9248 = vmatprep.subr.bf16.mxu0 %v9051_v35  ;;  %v8699_v17 = vadd.f32 %v8698_v33, %v17086_v14  ;;  %v8974_v46 = vmax.f32 %v8840_v2, 0.0 }
 0xda2   : > { %v8700_v22 = vpop.f32.mrf.mxu0  ;;  %v8889_v55 = vpop.f32.mrf.mxu1  ;;  %v8972_v63 = vmax.f32 %v8834_v27, 0.0  ;;  %v9045_v36 = vpack.c.bf16 %v8973_v24, %v8971_v41  ;;  %v8970_v62 = vmax.f32 %v8830_v58, 0.0  ;;  %v8613_v33 = vadd.f32 %v19042_v42, %v19041_v37  ;;  %v19049_v24 = vld [vmem:[#allocation80_spill] sm:$0xff]  ;;  %v19051_v41 = vld [vmem:[#allocation166_spill] sm:$0xff] }
 0xda3   : > { %v17144_v20 = vpack.c.bf16 %v8992_v12, %v8990_v53  ;;  %v8993_v56 = vmax.f32 %v8886_v30, 0.0  ;;  %v8890_v5 = vadd.f32 %v8889_v55, %v8697_v47  ;;  %v8701_v14 = vadd.f32 %v8700_v22, %v17116_v26 }
 0xda4   : > { %v8702_v6 = vpop.f32.mrf.mxu0  ;;  %v8891_v23 = vpop.f32.mrf.mxu1  ;;  %9249 = vmatpush1.bf16.msra.mxu0 %v9050_v60  ;;  %v9046_v32 = vpack.c.bf16 %v8976_v57, %v8974_v46  ;;  %v8967_v15 = vmax.f32 %v8822_v1, 0.0  ;;  %v8968_v47 = vmax.f32 %v8824_v21, 0.0  ;;  %v9044_v12 = vpack.c.bf16 %v8972_v63, %v8970_v62 }
 0xda5   : > { %19033 = vst [vmem:[#allocation176_spill] sm:$0xff] %v17144_v20  ;;  %v17154_v59 = vpack.c.bf16 %v8993_v56, %v8991_v9  ;;  %v8892_v28 = vadd.f32 %v8891_v23, %v8699_v17  ;;  %9250 = vmatprep.subr.bf16.mxu0 %v9049_v50  ;;  %v8703_v16 = vadd.f32 %v8702_v6, %v17116_v26  ;;  %v8994_v38 = vmax.f32 %v8890_v5, 0.0  ;;  %v19037_v26 = vld [vmem:[#allocation87_spill] sm:$0xff]  ;;  %v19045_v50 = vld [vmem:[#allocation153_spill] sm:$0xff] }
 0xda6   : > { %v8706_v44 = vpop.f32.mrf.mxu0  ;;  %v8893_v7 = vpop.f32.mrf.mxu1  ;;  %v8969_v34 = vmax.f32 %v19037_v26, 0.0  ;;  %v8806_v60 = vadd.f32 %v19045_v50, %v8613_v33  ;;  %v19046_v9 = vld [vmem:[#allocation183_spill] sm:$0xff]  ;;  %v19047_v17 = vld [vmem:[#allocation169_spill] sm:$0xff]  ;;  %v8963_v2 = vmax.f32 %v19048_v43, 0.0  ;;  %v8959_v57 = vmax.f32 %v19049_v24, 0.0 }
 0xda7   : > { %19034 = vst [vmem:[#allocation190_spill] sm:$0xff] %v17154_v59  ;;  %v8894_v3 = vadd.f32 %v8893_v7, %v8701_v14  ;;  %v8707_v18 = vadd.f32 %v8706_v44, %v19036_v45  ;;  %v8995_v54 = vmax.f32 %v8892_v28, 0.0  ;;  %v8965_v22 = vmax.f32 %v19046_v9, 0.0  ;;  %v19054_v43 = vld [vmem:[#allocation177_spill] sm:$0xff] }
 0xda8   : > { %v17167_v29 = vpop.f32.mrf.mxu0  ;;  %v8895_v13 = vpop.f32.mrf.mxu1  ;;  %9251 = vmatpush1.bf16.msra.mxu0 %v9048_v0  ;;  %v9043_v55 = vpack.c.bf16 %v8969_v34, %v8967_v15  ;;  %v8966_v56 = vmax.f32 %v19047_v17, 0.0  ;;  %v8961_v25 = vmax.f32 %v8806_v60, 0.0  ;;  %v19053_v17 = vld [vmem:[#allocation60_spill] sm:$0xff] }
 0xda9   : > { %v8996_v61 = vmax.f32 %v8894_v3, 0.0  ;;  %v8896_v48 = vadd.f32 %v8895_v13, %v8703_v16  ;;  %9252 = vmatprep.subr.bf16.mxu0 %v9047_v8  ;;  %v9041_v14 = vpack.c.bf16 %v8965_v22, %v8963_v2  ;;  %v19050_v16 = vld [vmem:[#allocation167_spill] sm:$0xff]  ;;  %v19052_v22 = vld [vmem:[#allocation70_spill] sm:$0xff] }
 0xdaa   : > { %v17171_v10 = vpop.f32.mrf.mxu0  ;;  %v8899_v51 = vpop.f32.mrf.mxu1  ;;  %v9042_v11 = vpack.c.bf16 %v8968_v47, %v8966_v56  ;;  %v9039_v7 = vpack.c.bf16 %v8961_v25, %v8959_v57 }
 0xdab   : > { %v17173_v39 = vpack.c.bf16 %v8996_v61, %v8994_v38  ;;  %v8997_v35 = vmax.f32 %v8896_v48, 0.0  ;;  %v17175_v4 = vadd.f32 %v8899_v51, %v8707_v18 }
 0xdac   : > { %v17177_v52 = vpop.f32.mrf.mxu0  ;;  %v17179_v49 = vpop.f32.mrf.mxu1  ;;  %9253 = vmatpush1.bf16.msra.mxu0 %v9046_v32 }
 0xdad   : > { %19038 = vst [vmem:[#allocation86_spill] sm:$0xff] %v17173_v39  ;;  %19039 = vst [vmem:[#allocation185_spill] sm:$0xff] %v17175_v4  ;;  %v17183_v53 = vpack.c.bf16 %v8997_v35, %v8995_v54  ;;  %9254 = vmatprep.subr.bf16.mxu0 %v9045_v36 }
 0xdae   : > { %19040 = vst [vmem:[#allocation76_spill] sm:$0xff] %v17179_v49  ;;  %v17185_v30 = vpop.f32.mrf.mxu0  ;;  %v17187_v31 = vpop.f32.mrf.mxu1 }
 0xdaf   : > { %19043 = vst [vmem:[#allocation75_spill] sm:$0xff] %v17183_v53  ;;  %19044 = vst [vmem:[#allocation51_spill] sm:$0xff] %v17187_v31  ;;  %v19056_v53 = vld [vmem:[#allocation119_spill] sm:$0xff]  ;;  %v19057_v31 = vld [vmem:[#allocation160_spill] sm:$0xff] }
 0xdb0   : > { %v17192_v5 = vpop.f32.mrf.mxu0  ;;  %v17194_v40 = vpop.f32.mrf.mxu1  ;;  %9255 = vmatpush1.bf16.msra.mxu0 %v9044_v12 }
 0xdb1   : > { %9256 = vmatprep.subr.bf16.mxu0 %v9043_v55 }
 0xdb2   : > { %v17197_v6 = vpop.f32.mrf.mxu0  ;;  %v17199_v23 = vpop.f32.mrf.mxu1 }
 0xdb4   : > { %v17201_v28 = vpop.f32.mrf.mxu0  ;;  %v17203_v27 = vpop.f32.mrf.mxu1  ;;  %9257 = vmatpush1.bf16.msra.mxu0 %v9042_v11  ;;  %v19055_v11 = vld [vmem:[#allocation122_spill] sm:$0xff] }
 0xdb5   : > { %9258 = vmatprep.subr.bf16.mxu0 %v9041_v14 }
 0xdb6   : > { %v17206_v0 = vpop.f32.mrf.mxu0  ;;  %v17208_v44 = vpop.f32.mrf.mxu1 }
 0xdb8   : > { %v17210_v1 = vpop.f32.mrf.mxu0  ;;  %v17212_v8 = vpop.f32.mrf.mxu1  ;;  %9259 = vmatpush1.bf16.msra.mxu0 %v19050_v16 }
 0xdb9   : > { %9260 = vmatprep.subr.bf16.mxu0 %v9039_v7 }
 0xdba   : > { %v17215_v3 = vpop.f32.mrf.mxu0  ;;  %v17217_v21 = vpop.f32.mrf.mxu1 }
 0xdbc   : > { %v8732_v19 = vpop.f32.mrf.mxu0  ;;  %v17219_v58 = vpop.f32.mrf.mxu1  ;;  %9261 = vmatpush1.bf16.msra.mxu0 %v19051_v41 }
 0xdbe   : > { %v8736_v46 = vpop.f32.mrf.mxu0  ;;  %v17222_v13 = vpop.f32.mrf.mxu1 }
 0xdc0   : > { %v8738_v38 = vpop.f32.mrf.mxu0  ;;  %v8925_v18 = vpop.f32.mrf.mxu1 }
 0xdc2   : > { %v8740_v61 = vpop.f32.mrf.mxu0  ;;  %v8929_v48 = vpop.f32.mrf.mxu1 }
 0xdc4   : > { %v8742_v26 = vpop.f32.mrf.mxu0  ;;  %v8931_v34 = vpop.f32.mrf.mxu1 }
 0xdc6   : > { %v8746_v63 = vpop.f32.mrf.mxu0  ;;  %v8933_v36 = vpop.f32.mrf.mxu1 }
 0xdc8   : > { %v8748_v32 = vpop.f32.mrf.mxu0  ;;  %v8935_v51 = vpop.f32.mrf.mxu1 }
 0xdc9   : > { %v8749_v25 = vadd.f32 %v8748_v32, %v19055_v11  ;;  %v8747_v32 = vadd.f32 %v8746_v63, %v19055_v11 }
 0xdca   : > { %v8750_v54 = vpop.f32.mrf.mxu0  ;;  %v8939_v35 = vpop.f32.mrf.mxu1 }
 0xdcb   : > { %v8751_v20 = vadd.f32 %v8750_v54, %v19052_v22 }
 0xdcc   : > { %v8752_v62 = vpop.f32.mrf.mxu0  ;;  %v8941_v37 = vpop.f32.mrf.mxu1 }
 0xdcd   : > { %v8753_v55 = vadd.f32 %v8752_v62, %v19052_v22  ;;  %v8743_v62 = vadd.f32 %v8742_v26, %v19056_v53  ;;  %v8942_v4 = vadd.f32 %v8941_v37, %v8749_v25 }
 0xdce   : > { %v8756_v42 = vpop.f32.mrf.mxu0  ;;  %v8943_v33 = vpop.f32.mrf.mxu1 }
 0xdcf   : > { %v8757_v14 = vadd.f32 %v8756_v42, %v19053_v17  ;;  %v8944_v49 = vadd.f32 %v8943_v33, %v8751_v20  ;;  %v9015_v26 = vmax.f32 %v8942_v4, 0.0  ;;  %v19059_v20 = vld [vmem:[#allocation149_spill] sm:$0xff]  ;;  %v19060_v4 = vld [vmem:[#allocation155_spill] sm:$0xff] }
 0xdd0   : > { %v8758_v15 = vpop.f32.mrf.mxu0  ;;  %v8945_v47 = vpop.f32.mrf.mxu1 }
 0xdd1   : > { %v8759_v56 = vadd.f32 %v8758_v15, %v19053_v17  ;;  %v8946_v57 = vadd.f32 %v8945_v47, %v8753_v55  ;;  %v8936_v17 = vadd.f32 %v8935_v51, %v8743_v62  ;;  %v8729_v51 = vadd.f32 %v17210_v1, %v19059_v20 }
 0xdd2   : > { %v8760_v12 = vpop.f32.mrf.mxu0  ;;  %v8949_v50 = vpop.f32.mrf.mxu1  ;;  %v8727_v1 = vadd.f32 %v17206_v0, %v19059_v20  ;;  %v12842_v20 = vld [vmem:[#allocation7 + $0x20] ss:$8 sps:$4 sm:$0xff]  }
 0xdd3   : > { %v8761_v2 = vadd.f32 %v8760_v12, %v19054_v43  ;;  %v8950_v59 = vadd.f32 %v8949_v50, %v8757_v14  ;;  %v8739_v12 = vadd.f32 %v8738_v38, %v19057_v31  ;;  %v9017_v47 = vmax.f32 %v8946_v57, 0.0  ;;  %v19058_v50 = vld [vmem:[#allocation140_spill] sm:$0xff]  ;;  %v19062_v57 = vld [vmem:[#allocation77_spill] sm:$0xff] }
 0xdd4   : > { %v8762_v60 = vpop.f32.mrf.mxu0  ;;  %v8951_v9 = vpop.f32.mrf.mxu1  ;;  %v8733_v22 = vadd.f32 %v8732_v19, %v19058_v50  ;;  %v9013_v11 = vmax.f32 %v8936_v17, 0.0  ;;  %v8713_v0 = vadd.f32 %v17177_v52, %v19062_v57  ;;  %v8711_v52 = vadd.f32 %v17171_v10, %v19062_v57 }
 0xdd5   : > { %v8763_v7 = vadd.f32 %v8762_v60, %v19054_v43  ;;  %v8952_v16 = vadd.f32 %v8951_v9, %v8759_v56  ;;  %v8741_v9 = vadd.f32 %v8740_v61, %v19056_v53  ;;  %v8940_v56 = vadd.f32 %v8939_v35, %v8747_v32  ;;  %v19063_v32 = vld [vmem:[#allocation76_spill] sm:$0xff] }
 0xdd6   : > { %v8953_v24 = vpop.f32.mrf.mxu1  ;;  %v9018_v54 = vmax.f32 %v8950_v59, 0.0  ;;  %v8932_v43 = vadd.f32 %v8931_v34, %v8739_v12  ;;  %v8926_v33 = vadd.f32 %v8925_v18, %v8733_v22  ;;  %v9067_v25 = vpack.c.bf16 %v9017_v47, %v9015_v26  ;;  %v19066_v22 = vld [vmem:[#allocation75_spill] sm:$0xff]  ;;  %v19068_v26 = vld [vmem:[#allocation190_spill] sm:$0xff] }
 0xdd7   : > { %v8954_v41 = vadd.f32 %v8953_v24, %v8761_v2  ;;  %v9019_v55 = vmax.f32 %v8952_v16, 0.0  ;;  %v8934_v38 = vadd.f32 %v8933_v36, %v8741_v9  ;;  %v9016_v2 = vmax.f32 %v8944_v49, 0.0  ;;  %v19061_v36 = vld [vmem:[#allocation157_spill] sm:$0xff] }
 0xdd8   : > { %v8955_v39 = vpop.f32.mrf.mxu1  ;;  %v8731_v59 = vadd.f32 %v17215_v3, %v19058_v50  ;;  %v9014_v19 = vmax.f32 %v8940_v56, 0.0  ;;  %v8723_v61 = vadd.f32 %v17201_v28, %v19060_v4  ;;  %v9011_v49 = vmax.f32 %v8932_v43, 0.0  ;;  %v19067_v43 = vld [vmem:[#allocation86_spill] sm:$0xff] }
 0xdd9   : > { %v8956_v15 = vadd.f32 %v8955_v39, %v8763_v7  ;;  %v9020_v42 = vmax.f32 %v8954_v41, 0.0  ;;  %v8737_v39 = vadd.f32 %v8736_v46, %v19057_v31  ;;  %v8922_v31 = vadd.f32 %v17219_v58, %v8729_v51  ;;  %v12847_v51 = vld [vmem:[#allocation7 + $0x34] ss:$8 sps:$4 sm:$0xff]  }
 0xdda   : > { %v8924_v46 = vadd.f32 %v17222_v13, %v8731_v59  ;;  %v9012_v18 = vmax.f32 %v8934_v38, 0.0  ;;  %v9066_v34 = vpack.c.bf16 %v9016_v2, %v9014_v19  ;;  %v8719_v3 = vadd.f32 %v17192_v5, %v19061_v36  ;;  %v12841_v38 = vld [vmem:[#allocation7 + $0x14] ss:$8 sps:$4 sm:$0xff]   ;;  %v12839_v2 = vld [vmem:[#allocation7 + $0x10] ss:$8 sps:$4 sm:$0xff]  }
 0xddb   : > { %v9021_v60 = vmax.f32 %v8956_v15, 0.0  ;;  %v9068_v63 = vpack.c.bf16 %v9020_v42, %v9018_v54  ;;  %v8930_v53 = vadd.f32 %v8929_v48, %v8737_v39  ;;  %v8916_v48 = vadd.f32 %v17212_v8, %v8723_v61  ;;  %v19069_v39 = vld [vmem:[#allocation176_spill] sm:$0xff]  ;;  %v12856_v19 = vld [vmem:[#allocation7 + $0x64] ss:$8 sps:$4 sm:$0xff]  }
 0xddc   : > { %v9009_v35 = vmax.f32 %v8926_v33, 0.0  ;;  %v9065_v14 = vpack.c.bf16 %v9013_v11, %v9011_v49  ;;  %v8721_v28 = vadd.f32 %v17197_v6, %v19060_v4  ;;  %v8920_v58 = vadd.f32 %v17217_v21, %v8727_v1  ;;  %v12845_v33 = vld [vmem:[#allocation7 + $0x30] ss:$8 sps:$4 sm:$0xff]   ;;  %v12850_v11 = vld [vmem:[#allocation7 + $0x44] ss:$8 sps:$4 sm:$0xff]  }
 0xddd   : > { %v9069_v37 = vpack.c.bf16 %v9021_v60, %v9019_v55  ;;  %v9010_v24 = vmax.f32 %v8930_v53, 0.0  ;;  %v8912_v13 = vadd.f32 %v17203_v27, %v8719_v3  ;;  %v9007_v7 = vmax.f32 %v8922_v31, 0.0  ;;  %v12853_v59 = vld [vmem:[#allocation7 + $0x54] ss:$8 sps:$4 sm:$0xff]   ;;  %v12851_v53 = vld [vmem:[#allocation7 + $0x50] ss:$8 sps:$4 sm:$0xff]  }
 0xdde   : > { %v8717_v5 = vadd.f32 %v17185_v30, %v19061_v36  ;;  %v8914_v8 = vadd.f32 %v17208_v44, %v8721_v28  ;;  %v9008_v16 = vmax.f32 %v8924_v46, 0.0  ;;  %v8709_v6 = vadd.f32 %v17167_v29, %v19036_v45  ;;  %v19064_v44 = vld [vmem:[#allocation51_spill] sm:$0xff]  ;;  %v12859_v61 = vld [vmem:[#allocation7 + $0x74] ss:$8 sps:$4 sm:$0xff]   ;;  %v12857_v31 = vld [vmem:[#allocation7 + $0x70] ss:$8 sps:$4 sm:$0xff]  }
 0xddf   : > { %9262 = vmatprep.subr.bf16.mxu0 %v9069_v37  ;;  %v9064_v41 = vpack.c.bf16 %v9012_v18, %v9010_v24  ;;  %v8906_v21 = vadd.f32 %v17194_v40, %v8713_v0  ;;  %v9005_v62 = vmax.f32 %v8916_v48, 0.0  ;;  %v9063_v15 = vpack.c.bf16 %v9009_v35, %v9007_v7  ;;  %v12836_v37 = vld [vmem:[#allocation7] ss:$8 sps:$4 sm:$0xff]  }
 0xde0   : > { %9263 = vmatpush2.bf16.msra.mxu0 %v9068_v63  ;;  %v8910_v27 = vadd.f32 %v17199_v23, %v8717_v5  ;;  %v9006_v12 = vmax.f32 %v8920_v58, 0.0  ;;  %v8902_v30 = vadd.f32 %v19063_v32, %v8709_v6  ;;  %v9003_v42 = vmax.f32 %v8912_v13, 0.0  ;;  %v19065_v23 = vld [vmem:[#allocation185_spill] sm:$0xff]  ;;  %v12844_v63 = vld [vmem:[#allocation7 + $0x24] ss:$8 sps:$4 sm:$0xff]   ;;  %v9159_v6 = vpop.permute.xlu0 %9158 }
 0xde1   : > { %9264 = vmatprep.subr.bf16.mxu0 %v9067_v25  ;;  %v8904_v17 = vadd.f32 %v19064_v44, %v8711_v52  ;;  %v9004_v47 = vmax.f32 %v8914_v8, 0.0  ;;  %v9001_v29 = vmax.f32 %v8906_v21, 0.0  ;;  %v8998_v54 = vmax.f32 %v19065_v23, 0.0  ;;  %v12848_v25 = vld [vmem:[#allocation7 + $0x40] ss:$8 sps:$4 sm:$0xff]  }
 0xde2   : > { %v9062_v55 = vpack.c.bf16 %v9008_v16, %v9006_v12  ;;  %v9061_v45 = vpack.c.bf16 %v9005_v62, %v9003_v42  ;;  %v9002_v40 = vmax.f32 %v8910_v27, 0.0  ;;  %v8999_v60 = vmax.f32 %v8902_v30, 0.0  ;;  %v12854_v4 = vld [vmem:[#allocation7 + $0x60] ss:$8 sps:$4 sm:$0xff]   ;;  %v9164_v62 = vpop.permute.xlu1 %9163 }
 0xde3   : > { %v9000_v9 = vmax.f32 %v8904_v17, 0.0  ;;  %v19070_v49 = vmov 0  }
 0xde4   : > { %9265 = vmatpush2.bf16.msra.mxu0 %v9066_v34  ;;  %v9060_v10 = vpack.c.bf16 %v9004_v47, %v9002_v40  ;;  %v9059_v56 = vpack.c.bf16 %v9001_v29, %v8999_v60  ;;  %v9149_v27 = vpop.permute.xlu0 %9148 }
 0xde5   : > { %9266 = vmatprep.subr.bf16.mxu0 %v9065_v14  ;;  %v9058_v50 = vpack.c.bf16 %v9000_v9, %v8998_v54 }
 0xde6   : > { %v9154_v32 = vpop.permute.xlu1 %9153 }
 0xde8   : > { %9267 = vmatpush2.bf16.msra.mxu0 %v9064_v41  ;;  %v9139_v47 = vpop.permute.xlu0 %9138 }
 0xde9   : > { %9268 = vmatprep.subr.bf16.mxu0 %v9063_v15 }
 0xdea   : > { %v9144_v29 = vpop.permute.xlu1 %9143 }
 0xdec   : > { %9269 = vmatpush2.bf16.msra.mxu0 %v9062_v55  ;;  %v9129_v23 = vpop.permute.xlu0 %9128 }
 0xded   : > { %9270 = vmatprep.subr.bf16.mxu0 %v9061_v45 }
 0xdf0   : > { %9271 = vmatpush2.bf16.msra.mxu0 %v9060_v10 }
 0xdf1   : > { %9272 = vmatprep.subr.bf16.mxu0 %v9059_v56 }
 0xdf4   : > { %9273 = vmatpush2.bf16.msra.mxu0 %v9058_v50  ;;  %v9134_v50 = vpop.permute.xlu1 %9133 }
 0xdf5   : > { %9274 = vmatprep.subr.bf16.mxu0 %v19066_v22 }
 0xdf8   : > { %9275 = vmatpush2.bf16.msra.mxu0 %v19067_v43 }
 0xdf9   : > { %9276 = vmatprep.subr.bf16.mxu0 %v19068_v26 }
 0xdfc   : > { %9277 = vmatpush2.bf16.msra.mxu0 %v19069_v39 }
 0xdff   : > { %9279 = vmatmul.mubr.bf16.vlgmr.msra.gmra.mxu0 %v12836_v37 }
 0xe00   : > { %9288 = vmatprep.mubr.bf16.mxu0 %v12841_v38 }
 0xe07   : > { %9289 = vmatmul.mubr.bf16.gmra.mxu0 %v12839_v2 }
 0xe08   : > { %9298 = vmatprep.mubr.bf16.mxu0 %v12844_v63 }
 0xe0f   : > { %9299 = vmatmul.mubr.bf16.gmra.mxu0 %v12842_v20 }
 0xe10   : > { %9308 = vmatprep.mubr.bf16.mxu0 %v12847_v51 }
 0xe17   : > { %9309 = vmatmul.mubr.bf16.gmra.mxu0 %v12845_v33 }
 0xe18   : > { %9318 = vmatprep.mubr.bf16.mxu0 %v12850_v11  ;;  %v9119_v11 = vpop.permute.xlu0 %9118 }
 0xe1f   : > { %9319 = vmatmul.mubr.bf16.gmra.mxu0 %v12848_v25 }
 0xe20   : > { %9328 = vmatprep.mubr.bf16.mxu0 %v12853_v59 }
 0xe27   : > { %9329 = vmatmul.mubr.bf16.gmra.mxu0 %v12851_v53 }
 0xe28   : > { %9338 = vmatprep.mubr.bf16.mxu0 %v12856_v19 }
 0xe2f   : > { %9339 = vmatmul.mubr.bf16.gmra.mxu0 %v12854_v4  ;;  %v9124_v4 = vpop.permute.xlu1 %9123 }
 0xe30   : > { %9348 = vmatprep.mubr.bf16.mxu0 %v12859_v61 }
 0xe37   : > { %9349 = vmatmul.mubr.bf16.gmra.mxu0 %v12857_v31 }
 0xe38   : > { %9759 = vmatprep.mubr.bf16.mxu0 %v19070_v49 }
 0xebf   : > { %v17273_v1 = vpop.f32.mrf.mxu0 }
 0xec1   : > { %v17275_v46 = vpop.f32.mrf.mxu0 }
 0xec3   : > { %v17277_v18 = vpop.f32.mrf.mxu0 }
 0xec5   : > { %v17279_v34 = vpop.f32.mrf.mxu0 }
 0xec7   : > { %v17281_v36 = vpop.f32.mrf.mxu0 }
 0xec9   : > { %v17283_v3 = vpop.f32.mrf.mxu0 }
 0xecb   : > { %v17285_v48 = vpop.f32.mrf.mxu0 }
 0xecd   : > { %v17287_v35 = vpop.f32.mrf.mxu0 }
 0xecf   : > { %v17289_v14 = vpop.f32.mrf.mxu0 }
 0xed1   : > { %v17291_v28 = vpop.f32.mrf.mxu0 }
 0xed3   : > { %v17293_v58 = vpop.f32.mrf.mxu0 }
 0xed5   : > { %v17295_v24 = vpop.f32.mrf.mxu0 }
 0xed7   : > { %v17297_v57 = vpop.f32.mrf.mxu0 }
 0xed9   : > { %v17299_v0 = vpop.f32.mrf.mxu0 }
 0xedb   : > { %v17301_v13 = vpop.f32.mrf.mxu0 }
 0xedd   : > { %v17303_v7 = vpop.f32.mrf.mxu0 }
 0xedf   : > { %v9320_v5 = vpop.f32.mrf.mxu0 }
 0xee1   : > { %v9322_v8 = vpop.f32.mrf.mxu0 }
 0xee3   : > { %v9324_v16 = vpop.f32.mrf.mxu0 }
 0xee5   : > { %v9326_v41 = vpop.f32.mrf.mxu0 }
 0xee7   : > { %v9330_v21 = vpop.f32.mrf.mxu0 }
 0xee8   : > { %v9331_v63 = vadd.f32 %v9330_v21, %v9139_v47 }
 0xee9   : > { %v9332_v15 = vpop.f32.mrf.mxu0 }
 0xeea   : > { %v9333_v43 = vadd.f32 %v9332_v15, %v9139_v47  ;;  %v9327_v15 = vadd.f32 %v9326_v41, %v9134_v50  ;;  %v9109_v41 = vpop.permute.xlu0 %9108 }
 0xeeb   : > { %v9334_v52 = vpop.f32.mrf.mxu0 }
 0xeec   : > { %v17317_v25 = vmax.f32 %v9333_v43, 0.0  ;;  %v9335_v21 = vadd.f32 %v9334_v52, %v9144_v29  ;;  %v9325_v52 = vadd.f32 %v9324_v16, %v9134_v50  ;;  %v9315_v50 = vadd.f32 %v17301_v13, %v9124_v4 }
 0xeed   : > { %v9336_v12 = vpop.f32.mrf.mxu0 }
 0xeee   : > { %19075 = vst [vmem:[#allocation188_spill] sm:$0xff] %v17317_v25  ;;  %v9337_v59 = vadd.f32 %v9336_v12, %v9144_v29  ;;  %v17341_v47 = vmax.f32 %v9335_v21, 0.0  ;;  %v9313_v29 = vadd.f32 %v17299_v0, %v9119_v11 }
 0xeef   : > { %v9340_v30 = vpop.f32.mrf.mxu0 }
 0xef0   : > { %v9341_v42 = vadd.f32 %v9340_v30, %v9149_v27  ;;  %19082 = vst [vmem:[#allocation159_spill] sm:$0xff] %v17341_v47  ;;  %v17364_v43 = vmax.f32 %v9313_v29, 0.0 }
 0xef1   : > { %v9342_v44 = vpop.f32.mrf.mxu0 }
 0xef2   : > { %v9343_v17 = vadd.f32 %v9342_v44, %v9149_v27  ;;  %v17305_v45 = vmax.f32 %v9341_v42, 0.0  ;;  %19087 = vst [vmem:[#allocation93_spill] sm:$0xff] %v17364_v43 }
 0xef3   : > { %v9344_v55 = vpop.f32.mrf.mxu0 }
 0xef4   : > { %19071 = vst [vmem:[#allocation74_spill] sm:$0xff] %v17305_v45  ;;  %v17307_v40 = vmax.f32 %v9343_v17, 0.0  ;;  %v9345_v53 = vadd.f32 %v9344_v55, %v9154_v32  ;;  %v9321_v17 = vadd.f32 %v9320_v5, %v9129_v23  ;;  %v9114_v55 = vpop.permute.xlu1 %9113 }
 0xef5   : > { %v9346_v60 = vpop.f32.mrf.mxu0 }
 0xef6   : > { %19072 = vst [vmem:[#allocation78_spill] sm:$0xff] %v17307_v40  ;;  %v10487_v9 = vadd.f32 %v17307_v40, %v17305_v45  ;;  %v9347_v37 = vadd.f32 %v9346_v60, %v9154_v32  ;;  %v17331_v32 = vmax.f32 %v9337_v59, 0.0  ;;  %v17333_v30 = vmax.f32 %v9345_v53, 0.0 }
 0xef7   : > { %v9350_v10 = vpop.f32.mrf.mxu0 }
 0xef8   : > { %v9351_v56 = vadd.f32 %v9350_v10, %v9159_v6  ;;  %10488 = vadd.xlane.f32.xlu0 %v10487_v9  ;;  %v17321_v61 = vmax.f32 %v9347_v37, 0.0  ;;  %19080 = vst [vmem:[#allocation147_spill] sm:$0xff] %v17331_v32  ;;  %19081 = vst [vmem:[#allocation95_spill] sm:$0xff] %v17333_v30  ;;  %v9317_v9 = vadd.f32 %v17303_v7, %v9124_v4  ;;  %v17349_v10 = vmax.f32 %v9327_v15, 0.0 }
 0xef9   : > { %v9352_v54 = vpop.f32.mrf.mxu0  ;;  %v9435_v16 = vpack.c.bf16 %v17333_v30, %v17305_v45  ;;  %v9434_v0 = vpack.c.bf16 %v17331_v32, %v17317_v25  ;;  %v9303_v7 = vadd.f32 %v17291_v28, %v9109_v41  ;;  %v9307_v37 = vadd.f32 %v17295_v24, %v9114_v55 }
 0xefa   : > { %v9353_v22 = vadd.f32 %v9352_v54, %v9159_v6  ;;  %v17311_v39 = vmax.f32 %v9351_v56, 0.0  ;;  %19077 = vst [vmem:[#allocation81_spill] sm:$0xff] %v17321_v61  ;;  %v17325_v6 = vmax.f32 %v9331_v63, 0.0  ;;  %v10490_v5 = vadd.f32 %v17321_v61, %v17333_v30  ;;  %19084 = vst [vmem:[#allocation138_spill] sm:$0xff] %v17349_v10 }
 0xefb   : > { %v9354_v26 = vpop.f32.mrf.mxu0  ;;  %v10484_v56 = vadd.f32 %v17331_v32, %v17341_v47  ;;  %v17356_v54 = vmax.f32 %v9321_v17, 0.0  ;;  %v9301_v28 = vadd.f32 %v17289_v14, %v9109_v41  ;;  %v17381_v24 = vmax.f32 %v9315_v50, 0.0 }
 0xefc   : > { %19073 = vst [vmem:[#allocation79_spill] sm:$0xff] %v17311_v39  ;;  %v17313_v38 = vmax.f32 %v9353_v22, 0.0  ;;  %v9355_v2 = vadd.f32 %v9354_v26, %v9164_v62  ;;  %19079 = vst [vmem:[#allocation85_spill] sm:$0xff] %v17325_v6  ;;  %v10481_v44 = vadd.f32 %v17317_v25, %v17325_v6  ;;  %v17361_v22 = vmax.f32 %v9325_v52, 0.0  ;;  %v9099_v26 = vpop.permute.xlu0 %9098 }
 0xefd   : > { %v9356_v20 = vpop.f32.mrf.mxu0  ;;  %19085 = vst [vmem:[#allocation136_spill] sm:$0xff] %v17356_v54  ;;  %v9433_v13 = vpack.c.bf16 %v17341_v47, %v17325_v6  ;;  %19090 = vst [vmem:[#allocation187_spill] sm:$0xff] %v17381_v24  ;;  %v9293_v59 = vadd.f32 %v17283_v3, %v9099_v26  ;;  %v17384_v53 = vmax.f32 %v9303_v7, 0.0  ;;  %v17389_v21 = vmax.f32 %v9307_v37, 0.0 }
 0xefe   : > { %19074 = vst [vmem:[#allocation112_spill] sm:$0xff] %v17313_v38  ;;  %v9357_v51 = vadd.f32 %v9356_v20, %v9164_v62  ;;  %v10493_v33 = vadd.f32 %v17313_v38, %v17311_v39  ;;  %v17319_v19 = vmax.f32 %v9355_v2, 0.0  ;;  %v9323_v62 = vadd.f32 %v9322_v8, %v9129_v23  ;;  %19086 = vst [vmem:[#allocation154_spill] sm:$0xff] %v17361_v22  ;;  %v9104_v20 = vpop.permute.xlu1 %9103 }
 0xeff   : > { %v9436_v8 = vpack.c.bf16 %v17321_v61, %v17307_v40  ;;  %v9311_v23 = vadd.f32 %v17297_v57, %v9119_v11  ;;  %v17369_v2 = vmax.f32 %v9317_v9, 0.0  ;;  %v10478_v63 = vadd.f32 %v17349_v10, %v17361_v22  ;;  %19091 = vst [vmem:[#allocation91_spill] sm:$0xff] %v17384_v53  ;;  %19092 = vst [vmem:[#allocation175_spill] sm:$0xff] %v17389_v21 }
 0xf00   : > { %19076 = vst [vmem:[#allocation73_spill] sm:$0xff] %v17319_v19  ;;  %v17323_v31 = vmax.f32 %v9357_v51, 0.0  ;;  %10494 = vadd.xlane.f32.xlu0 %v10493_v33  ;;  %v9437_v42 = vpack.c.bf16 %v17319_v19, %v17311_v39  ;;  %v17344_v60 = vmax.f32 %v9323_v62, 0.0  ;;  %v9305_v11 = vadd.f32 %v17293_v58, %v9114_v55 }
 0xf01   : > { %19088 = vst [vmem:[#allocation184_spill] sm:$0xff] %v17369_v2  ;;  %v17376_v51 = vmax.f32 %v9311_v23, 0.0  ;;  %v9297_v4 = vadd.f32 %v17287_v35, %v9104_v20  ;;  %v9431_v62 = vpack.c.bf16 %v17361_v22, %v17356_v54  ;;  %v10472_v58 = vadd.f32 %v17369_v2, %v17381_v24 }
 0xf02   : > { %19078 = vst [vmem:[#allocation98_spill] sm:$0xff] %v17323_v31  ;;  %v10496_v27 = vadd.f32 %v17323_v31, %v17319_v19  ;;  %v9438_v12 = vpack.c.bf16 %v17323_v31, %v17313_v38  ;;  %19083 = vst [vmem:[#allocation186_spill] sm:$0xff] %v17344_v60  ;;  %v10475_v57 = vadd.f32 %v17344_v60, %v17356_v54  ;;  %v17401_v35 = vmax.f32 %v9305_v11, 0.0  ;;  %v12862_v11 = vld [vmem:[#allocation8 + $0x10] sm:$0xff]  }
 0xf03   : > { %19089 = vst [vmem:[#allocation182_spill] sm:$0xff] %v17376_v51  ;;  %v9432_v33 = vpack.c.bf16 %v17349_v10, %v17344_v60  ;;  %v10469_v14 = vadd.f32 %v17364_v43, %v17376_v51  ;;  %v9291_v15 = vadd.f32 %v17281_v36, %v9099_v26  ;;  %v9430_v3 = vpack.c.bf16 %v17369_v2, %v17364_v43 }
 0xf04   : > { %10497 = vadd.xlane.f32.xlu1 %v10496_v27  ;;  %9727 = vmatprep.subr.bf16.mxu0 %v9438_v12  ;;  %v17396_v27 = vmax.f32 %v9301_v28, 0.0  ;;  %v9089_v12 = vpop.permute.xlu0 %9088  ;;  %19094 = vst [vmem:[#allocation89_spill] sm:$0xff] %v17401_v35  ;;  %v17409_v52 = vmax.f32 %v9297_v4, 0.0  ;;  %v10466_v55 = vadd.f32 %v17389_v21, %v17401_v35  ;;  %v12861_v28 = vld [vmem:[#allocation8 + $0x8] sm:$0xff]  }
 0xf05   : > { %10482 = vadd.xlane.f32.xlu0 %v10481_v44  ;;  %9728 = vmatpush1.bf16.msra.mxu0 %v9437_v42  ;;  %v9295_v42 = vadd.f32 %v17285_v48, %v9104_v20  ;;  %v9094_v44 = vpop.permute.xlu1 %9093  ;;  %v9283_v17 = vadd.f32 %v17275_v46, %v9089_v12  ;;  %v9429_v48 = vpack.c.bf16 %v17381_v24, %v17376_v51  ;;  %v12860_v20 = vld [vmem:[#allocation8] sm:$0xff]   ;;  %v12865_v4 = vld [vmem:[#allocation8 + $0x28] sm:$0xff]  }
 0xf06   : > { %9729 = vmatprep.subr.bf16.mxu0 %v9436_v8  ;;  %19093 = vst [vmem:[#allocation179_spill] sm:$0xff] %v17396_v27  ;;  %v17404_v8 = vmax.f32 %v9293_v59, 0.0  ;;  %v10463_v36 = vadd.f32 %v17384_v53, %v17396_v27  ;;  %v9287_v41 = vadd.f32 %v17279_v34, %v9094_v44  ;;  %19096 = vst [vmem:[#allocation134_spill] sm:$0xff] %v17409_v52  ;;  %v12863_v59 = vld [vmem:[#allocation8 + $0x18] sm:$0xff]  }
 0xf07   : > { %v9281_v29 = vadd.f32 %v17273_v1, %v9089_v12  ;;  %v9428_v46 = vpack.c.bf16 %v17389_v21, %v17384_v53  ;;  %v9285_v9 = vadd.f32 %v17277_v18, %v9094_v44  ;;  %v17423_v34 = vmax.f32 %v9283_v17, 0.0  ;;  %v12870_v12 = vld [vmem:[#allocation8 + $0x50] sm:$0xff]   ;;  %v12872_v44 = vld [vmem:[#allocation8 + $0x60] sm:$0xff]   ;;  %v12873_v17 = vld [vmem:[#allocation8 + $0x68] sm:$0xff]  }
 0xf08   : > { %10491 = vadd.xlane.f32.xlu1 %v10490_v5  ;;  %19095 = vst [vmem:[#allocation171_spill] sm:$0xff] %v17404_v8  ;;  %v17416_v5 = vmax.f32 %v9291_v15, 0.0  ;;  %v17427_v23 = vmax.f32 %v9287_v41, 0.0  ;;  %v9427_v1 = vpack.c.bf16 %v17401_v35, %v17396_v27  ;;  %v9426_v18 = vpack.c.bf16 %v17409_v52, %v17404_v8  ;;  %v12868_v15 = vld [vmem:[#allocation8 + $0x40] sm:$0xff]   ;;  %v12875_v41 = vld [vmem:[#allocation8 + $0x78] sm:$0xff]  }
 0xf09   : > { %10485 = vadd.xlane.f32.xlu0 %v10484_v56  ;;  %9730 = vmatpush1.bf16.msra.mxu0 %v9435_v16  ;;  %v17421_v16 = vmax.f32 %v9295_v42, 0.0  ;;  %19099 = vst [vmem:[#allocation56_spill] sm:$0xff] %v17423_v34  ;;  %v17433_v50 = vmax.f32 %v9281_v29, 0.0  ;;  %v17437_v7 = vmax.f32 %v9285_v9, 0.0  ;;  %v12871_v42 = vld [vmem:[#allocation8 + $0x58] sm:$0xff]  }
 0xf0a   : > { %9731 = vmatprep.subr.bf16.mxu0 %v9434_v0  ;;  %19097 = vst [vmem:[#allocation97_spill] sm:$0xff] %v17416_v5  ;;  %v10457_v56 = vadd.f32 %v17404_v8, %v17416_v5  ;;  %19100 = vst [vmem:[#allocation115_spill] sm:$0xff] %v17427_v23 }
 0xf0b   : > { %19098 = vst [vmem:[#allocation189_spill] sm:$0xff] %v17421_v16  ;;  %v10460_v0 = vadd.f32 %v17409_v52, %v17421_v16  ;;  %19101 = vst [vmem:[#allocation114_spill] sm:$0xff] %v17433_v50  ;;  %v9425_v26 = vpack.c.bf16 %v17421_v16, %v17416_v5  ;;  %v10454_v37 = vadd.f32 %v17427_v23, %v17437_v7 }
 0xf0c   : > { %10476 = vadd.xlane.f32.xlu1 %v10475_v57  ;;  %19102 = vst [vmem:[#allocation125_spill] sm:$0xff] %v17437_v7  ;;  %v10451_v57 = vadd.f32 %v17423_v34, %v17433_v50 }
 0xf0d   : > { %10479 = vadd.xlane.f32.xlu0 %v10478_v63  ;;  %9732 = vmatpush1.bf16.msra.mxu0 %v9433_v13  ;;  %v9424_v13 = vpack.c.bf16 %v17427_v23, %v17423_v34  ;;  %v9423_v63 = vpack.c.bf16 %v17437_v7, %v17433_v50 }
 0xf0e   : > { %9733 = vmatprep.subr.bf16.mxu0 %v9432_v33  ;;  %v10372_v33 = vld [vmem:[%s19103_s26] sm:$0xff]  ;;  %s12233_s26 = smul.u32 48, %s13745_s22  ;;  %s18192_s22 = sand.u32 1, %s13360_s23  }
 0xf10   : > { %10470 = vadd.xlane.f32.xlu1 %v10469_v14  ;;  %v12864_v14 = vld [vmem:[#allocation8 + $0x20] sm:$0xff]  }
 0xf11   : > { %10473 = vadd.xlane.f32.xlu0 %v10472_v58  ;;  %9734 = vmatpush1.bf16.msra.mxu0 %v9431_v62  ;;  %v12866_v62 = vld [vmem:[#allocation8 + $0x30] sm:$0xff]   ;;  %v12867_v58 = vld [vmem:[#allocation8 + $0x38] sm:$0xff]  }
 0xf12   : > { %9735 = vmatprep.subr.bf16.mxu0 %v9430_v3  ;;  %v12869_v3 = vld [vmem:[#allocation8 + $0x48] sm:$0xff]  }
 0xf14   : > { %10464 = vadd.xlane.f32.xlu1 %v10463_v36  ;;  %v12874_v36 = vld [vmem:[#allocation8 + $0x70] sm:$0xff]  }
 0xf15   : > { %10467 = vadd.xlane.f32.xlu0 %v10466_v55  ;;  %9736 = vmatpush1.bf16.msra.mxu0 %v9429_v48  ;;  %v17465_v48 = vpop.permute.xlu0 %9543  ;;  %v17467_v55 = vpop.permute.xlu1 %9548 }
 0xf16   : > { %9737 = vmatprep.subr.bf16.mxu0 %v9428_v46 }
 0xf18   : > { %10458 = vadd.xlane.f32.xlu1 %v10457_v56 }
 0xf19   : > { %10461 = vadd.xlane.f32.xlu0 %v10460_v0  ;;  %9738 = vmatpush1.bf16.msra.mxu0 %v9427_v1  ;;  %v17469_v29 = vpop.permute.xlu0 %9533  ;;  %v17471_v46 = vpop.permute.xlu1 %9538 }
 0xf1a   : > { %9739 = vmatprep.subr.bf16.mxu0 %v9426_v18 }
 0xf1c   : > { %10452 = vadd.xlane.f32.xlu1 %v10451_v57 }
 0xf1d   : > { %10455 = vadd.xlane.f32.xlu0 %v10454_v37  ;;  %9740 = vmatpush1.bf16.msra.mxu0 %v9425_v26  ;;  %v17473_v9 = vpop.permute.xlu0 %9523  ;;  %v17475_v56 = vpop.permute.xlu1 %9528 }
 0xf1e   : > { %9741 = vmatprep.subr.bf16.mxu0 %v9424_v13 }
 0xf21   : > { %9742 = vmatpush1.bf16.msra.mxu0 %v9423_v63  ;;  %v17477_v1 = vpop.permute.xlu0 %9513  ;;  %v17479_v0 = vpop.permute.xlu1 %9518 }
 0xf24   : > { %9760 = vmatmul.mubr.bf16.vlgmr.msra.gmra.mxu0 %v12860_v20 }
 0xf25   : > { %9769 = vmatprep.mubr.bf16.mxu0 %v19070_v49  ;;  %v17481_v18 = vpop.permute.xlu0 %9503  ;;  %v17483_v57 = vpop.permute.xlu1 %9508 }
 0xf29   : > { %v17485_v26 = vpop.permute.xlu0 %9493  ;;  %v17487_v37 = vpop.permute.xlu1 %9498 }
 0xf2c   : > { %9770 = vmatmul.mubr.bf16.gmra.mxu0 %v12861_v28 }
 0xf2d   : > { %9779 = vmatprep.mubr.bf16.mxu0 %v19070_v49  ;;  %v9484_v13 = vpop.permute.xlu0 %9483  ;;  %v9489_v63 = vpop.permute.xlu1 %9488 }
 0xf31   : > { %v9474_v28 = vpop.permute.xlu0 %9473 }
 0xf33   : > { %10377 = vperm.xlu0 %12387, %v10372_v33  }
 0xf34   : > { %9780 = vmatmul.mubr.bf16.gmra.mxu0 %v12862_v11 }
 0xf35   : > { %9789 = vmatprep.mubr.bf16.mxu0 %v19070_v49 }
 0xf3c   : > { %9790 = vmatmul.mubr.bf16.gmra.mxu0 %v12863_v59  ;;  %v9479_v59 = vpop.permute.xlu1 %9478 }
 0xf3d   : > { %9799 = vmatprep.mubr.bf16.mxu0 %v19070_v49 }
 0xf44   : > { %9800 = vmatmul.mubr.bf16.gmra.mxu0 %v12864_v14 }
 0xf45   : > { %9809 = vmatprep.mubr.bf16.mxu0 %v19070_v49 }
 0xf4c   : > { %9810 = vmatmul.mubr.bf16.gmra.mxu0 %v12865_v4 }
 0xf4d   : > { %9819 = vmatprep.mubr.bf16.mxu0 %v19070_v49 }
 0xf54   : > { %9820 = vmatmul.mubr.bf16.gmra.mxu0 %v12866_v62 }
 0xf55   : > { %9829 = vmatprep.mubr.bf16.mxu0 %v19070_v49 }
 0xf5c   : > { %9830 = vmatmul.mubr.bf16.gmra.mxu0 %v12867_v58 }
 0xf5d   : > { %9839 = vmatprep.mubr.bf16.mxu0 %v19070_v49 }
 0xf64   : > { %9840 = vmatmul.mubr.bf16.gmra.mxu0 %v12868_v15 }
 0xf65   : > { %9849 = vmatprep.mubr.bf16.mxu0 %v19070_v49 }
 0xf6c   : > { %9850 = vmatmul.mubr.bf16.gmra.mxu0 %v12869_v3 }
 0xf6d   : > { %9859 = vmatprep.mubr.bf16.mxu0 %v19070_v49 }
 0xf74   : > { %9860 = vmatmul.mubr.bf16.gmra.mxu0 %v12870_v12 }
 0xf75   : > { %9869 = vmatprep.mubr.bf16.mxu0 %v19070_v49 }
 0xf7c   : > { %9870 = vmatmul.mubr.bf16.gmra.mxu0 %v12871_v42 }
 0xf7d   : > { %9879 = vmatprep.mubr.bf16.mxu0 %v19070_v49 }
 0xf84   : > { %9880 = vmatmul.mubr.bf16.gmra.mxu0 %v12872_v44 }
 0xf85   : > { %9889 = vmatprep.mubr.bf16.mxu0 %v19070_v49 }
 0xf8c   : > { %9890 = vmatmul.mubr.bf16.gmra.mxu0 %v12873_v17 }
 0xf8d   : > { %9899 = vmatprep.mubr.bf16.mxu0 %v19070_v49 }
 0xf94   : > { %9900 = vmatmul.mubr.bf16.gmra.mxu0 %v12874_v36 }
 0xf95   : > { %9909 = vmatprep.mubr.bf16.mxu0 %v19070_v49 }
 0xf9c   : > { %9910 = vmatmul.mubr.bf16.gmra.mxu0 %v12875_v41 }
 0xfe4   : > { %v9761_v20 = vpop.f32.mrf.mxu0 }
 0xfe5   : > { %v9762_v11 = vadd.f32 %v9761_v20, %v9474_v28 }
 0xfe6   : > { %v9763_v33 = vpop.f32.mrf.mxu0 }
 0xfe7   : > { %v9764_v4 = vadd.f32 %v9763_v33, %v9474_v28  ;;  %v9920_v15 = vmax.f32 %v9762_v11, 0.0 }
 0xfe8   : > { %v9765_v14 = vpop.f32.mrf.mxu0 }
 0xfe9   : > { %v9766_v62 = vadd.f32 %v9765_v14, %v9479_v59  ;;  %v9921_v44 = vmax.f32 %v9764_v4, 0.0 }
 0xfea   : > { %v9767_v58 = vpop.f32.mrf.mxu0 }
 0xfeb   : > { %v9922_v3 = vmax.f32 %v9766_v62, 0.0  ;;  %v9768_v12 = vadd.f32 %v9767_v58, %v9479_v59 }
 0xfec   : > { %v9771_v42 = vpop.f32.mrf.mxu0 }
 0xfed   : > { %v17489_v17 = vpack.c.bf16 %v9922_v3, %v9920_v15  ;;  %v9923_v36 = vmax.f32 %v9768_v12, 0.0  ;;  %v9772_v22 = vadd.f32 %v9771_v42, %v9484_v13 }
 0xfee   : > { %v9773_v41 = vpop.f32.mrf.mxu0 }
 0xfef   : > { %v17491_v10 = vpack.c.bf16 %v9923_v36, %v9921_v44  ;;  %v9774_v47 = vadd.f32 %v9773_v41, %v9484_v13  ;;  %v9924_v54 = vmax.f32 %v9772_v22, 0.0  ;;  %v17505_v13 = vpop.permute.xlu0 %9623  ;;  %v17509_v22 = vpop.permute.xlu1 %9628  ;;  %v12878_v36 = vld [vmem:[#allocation10 + $0x4] ss:$8 sps:$4 sm:$0xff]  }
 0xff0   : > { %v9775_v32 = vpop.f32.mrf.mxu0  ;;  %10240 = vmatprep.mubr.bf16.mxu1 %v12878_v36 }
 0xff1   : > { %v9776_v20 = vadd.f32 %v9775_v32, %v9489_v63  ;;  %v9925_v11 = vmax.f32 %v9774_v47, 0.0 }
 0xff2   : > { %v9777_v60 = vpop.f32.mrf.mxu0 }
 0xff3   : > { %v9926_v28 = vmax.f32 %v9776_v20, 0.0  ;;  %v9778_v33 = vadd.f32 %v9777_v60, %v9489_v63  ;;  %v17517_v12 = vpop.permute.xlu1 %9618 }
 0xff4   : > { %v17493_v14 = vpop.f32.mrf.mxu0 }
 0xff5   : > { %v17495_v59 = vpack.c.bf16 %v9926_v28, %v9924_v54  ;;  %v9927_v4 = vmax.f32 %v9778_v33, 0.0  ;;  %v17515_v54 = vpop.permute.xlu0 %9613 }
 0xff6   : > { %v17497_v62 = vpop.f32.mrf.mxu0 }
 0xff7   : > { %v17499_v58 = vpack.c.bf16 %v9927_v4, %v9925_v11  ;;  %v17525_v28 = vpop.permute.xlu1 %9608 }
 0xff8   : > { %v17501_v15 = vpop.f32.mrf.mxu0 }
 0xff9   : > { %v17521_v41 = vpop.permute.xlu0 %9603 }
 0xffa   : > { %v17503_v3 = vpop.f32.mrf.mxu0 }
 0xffb   : > { %v17529_v6 = vpop.permute.xlu1 %9598 }
 0xffc   : > { %v17507_v32 = vpop.f32.mrf.mxu0  ;;  %19106 = vst [vmem:[#allocation181_spill] sm:$0xff] %v17529_v6 }
 0xffd   : > { %v17527_v4 = vpop.permute.xlu0 %9593 }
 0xffe   : > { %v17511_v60 = vpop.f32.mrf.mxu0  ;;  %19105 = vst [vmem:[#allocation53_spill] sm:$0xff] %v17527_v4 }
 0xfff   : > { %v17533_v53 = vpop.permute.xlu1 %9588 }
0x1000   : > { %v17513_v47 = vpop.f32.mrf.mxu0  ;;  %19108 = vst [vmem:[#allocation116_spill] sm:$0xff] %v17533_v53 }
0x1001   : > { %v17531_v2 = vpop.permute.xlu0 %9583 }
0x1002   : > { %v9797_v63 = vpop.f32.mrf.mxu0  ;;  %19107 = vst [vmem:[#allocation170_spill] sm:$0xff] %v17531_v2 }
0x1003   : > { %v17537_v43 = vpop.permute.xlu1 %9578 }
0x1004   : > { %v17519_v42 = vpop.f32.mrf.mxu0  ;;  %19110 = vst [vmem:[#allocation178_spill] sm:$0xff] %v17537_v43 }
0x1005   : > { %v17535_v30 = vpop.permute.xlu0 %9573 }
0x1006   : > { %v9803_v44 = vpop.f32.mrf.mxu0  ;;  %19109 = vst [vmem:[#allocation173_spill] sm:$0xff] %v17535_v30 }
0x1007   : > { %v17544_v40 = vpop.permute.xlu1 %9568 }
0x1008   : > { %v17523_v20 = vpop.f32.mrf.mxu0 }
0x1009   : > { %v17539_v19 = vpop.permute.xlu0 %9563 }
0x100a   : > { %v9807_v33 = vpop.f32.mrf.mxu0 }
0x100c   : > { %v9811_v11 = vpop.f32.mrf.mxu0 }
0x100d   : > { %v9554_v43 = vpop.permute.xlu0 %9553 }
0x100e   : > { %v9813_v25 = vpop.f32.mrf.mxu0 }
0x1010   : > { %v9815_v21 = vpop.f32.mrf.mxu0 }
0x1012   : > { %v9817_v35 = vpop.f32.mrf.mxu0 }
0x1013   : > { %v9818_v49 = vadd.f32 %v9817_v35, %v17475_v56 }
0x1014   : > { %v9821_v24 = vpop.f32.mrf.mxu0 }
0x1016   : > { %v9823_v27 = vpop.f32.mrf.mxu0 }
0x1017   : > { %v9824_v50 = vadd.f32 %v9823_v27, %v17469_v29 }
0x1018   : > { %v9825_v61 = vpop.f32.mrf.mxu0 }
0x1019   : > { %v9826_v39 = vadd.f32 %v9825_v61, %v17471_v46  ;;  %v9808_v61 = vadd.f32 %v9807_v33, %v17479_v0  ;;  %v9802_v33 = vadd.f32 %v17519_v42, %v17477_v1 }
0x101a   : > { %v9827_v36 = vpop.f32.mrf.mxu0 }
0x101b   : > { %v9828_v7 = vadd.f32 %v9827_v36, %v17471_v46 }
0x101c   : > { %v9831_v51 = vpop.f32.mrf.mxu0 }
0x101d   : > { %v9832_v45 = vadd.f32 %v9831_v51, %v17465_v48  ;;  %v9947_v36 = vmax.f32 %v9828_v7, 0.0  ;;  %v9814_v51 = vadd.f32 %v9813_v25, %v17473_v9  ;;  %v9804_v25 = vadd.f32 %v9803_v44, %v17477_v1 }
0x101e   : > { %v9833_v31 = vpop.f32.mrf.mxu0 }
0x101f   : > { %v9834_v52 = vadd.f32 %v9833_v31, %v17465_v48  ;;  %v9948_v2 = vmax.f32 %v9832_v45, 0.0  ;;  %v9945_v48 = vmax.f32 %v9824_v50, 0.0  ;;  %v9798_v45 = vadd.f32 %v9797_v63, %v17483_v57 }
0x1020   : > { %v9835_v23 = vpop.f32.mrf.mxu0  ;;  %v9941_v50 = vmax.f32 %v9814_v51, 0.0 }
0x1021   : > { %v9836_v16 = vadd.f32 %v9835_v23, %v17467_v55  ;;  %v9949_v30 = vmax.f32 %v9834_v52, 0.0  ;;  %v9822_v23 = vadd.f32 %v9821_v24, %v17469_v29  ;;  %v9943_v52 = vmax.f32 %v9818_v49, 0.0 }
0x1022   : > { %v9837_v34 = vpop.f32.mrf.mxu0  ;;  %v9806_v49 = vadd.f32 %v17523_v20, %v17479_v0 }
0x1023   : > { %v9838_v38 = vadd.f32 %v9837_v34, %v17467_v55  ;;  %v9950_v8 = vmax.f32 %v9836_v16, 0.0  ;;  %v9559_v34 = vpop.permute.xlu1 %9558  ;;  %v9816_v16 = vadd.f32 %v9815_v21, %v17475_v56  ;;  %v9946_v55 = vmax.f32 %v9826_v39, 0.0 }
0x1024   : > { %v9841_v5 = vpop.f32.mrf.mxu0  ;;  %v9944_v24 = vmax.f32 %v9822_v23, 0.0  ;;  %v10011_v56 = vpack.c.bf16 %v9943_v52, %v9941_v50  ;;  %v9796_v23 = vadd.f32 %v17513_v47, %v17483_v57  ;;  %v9938_v51 = vmax.f32 %v9806_v49, 0.0 }
0x1025   : > { %v9951_v31 = vmax.f32 %v9838_v38, 0.0  ;;  %v9842_v4 = vadd.f32 %v9841_v5, %v9554_v43  ;;  %v10014_v35 = vpack.c.bf16 %v9950_v8, %v9948_v2  ;;  %v10013_v38 = vpack.c.bf16 %v9947_v36, %v9945_v48 }
0x1026   : > { %v9843_v53 = vpop.f32.mrf.mxu0  ;;  %v9942_v2 = vmax.f32 %v9816_v16, 0.0  ;;  %v9937_v36 = vmax.f32 %v9804_v25, 0.0  ;;  %v9935_v48 = vmax.f32 %v9798_v45, 0.0  ;;  %v9792_v16 = vadd.f32 %v17507_v32, %v17481_v18 }
0x1027   : > { %v10015_v27 = vpack.c.bf16 %v9951_v31, %v9949_v30  ;;  %v9844_v46 = vadd.f32 %v9843_v53, %v9554_v43  ;;  %v9812_v30 = vadd.f32 %v9811_v11, %v17473_v9  ;;  %v9952_v29 = vmax.f32 %v9842_v4, 0.0 }
0x1028   : > { %v9845_v7 = vpop.f32.mrf.mxu0  ;;  %v9939_v43 = vmax.f32 %v9808_v61, 0.0  ;;  %v10012_v53 = vpack.c.bf16 %v9946_v55, %v9944_v24  ;;  %v9788_v31 = vadd.f32 %v17503_v3, %v17487_v37  ;;  %v9784_v61 = vadd.f32 %v17497_v62, %v17485_v26 }
0x1029   : > { %v9846_v6 = vadd.f32 %v9845_v7, %v9559_v34  ;;  %10208 = vmatprep.subr.bf16.mxu1 %v10015_v27  ;;  %v9953_v63 = vmax.f32 %v9844_v46, 0.0  ;;  %v9940_v11 = vmax.f32 %v9812_v30, 0.0  ;;  %v9936_v55 = vmax.f32 %v9802_v33, 0.0 }
0x102a   : > { %v9847_v5 = vpop.f32.mrf.mxu0  ;;  %10209 = vmatpush1.bf16.msra.mxu1 %v10014_v35  ;;  %v10009_v27 = vpack.c.bf16 %v9939_v43, %v9937_v36  ;;  %v9931_v52 = vmax.f32 %v9788_v31, 0.0  ;;  %v9782_v30 = vadd.f32 %v17493_v14, %v17485_v26  ;;  %v9932_v24 = vmax.f32 %v9792_v16, 0.0 }
0x102b   : > { %v9954_v21 = vmax.f32 %v9846_v6, 0.0  ;;  %v9848_v39 = vadd.f32 %v9847_v5, %v9559_v34  ;;  %10210 = vmatprep.subr.bf16.mxu1 %v10013_v38  ;;  %v9794_v6 = vadd.f32 %v17511_v60, %v17481_v18  ;;  %v10010_v1 = vpack.c.bf16 %v9942_v2, %v9940_v11 }
0x102c   : > { %v9851_v8 = vpop.f32.mrf.mxu0  ;;  %v9934_v38 = vmax.f32 %v9796_v23, 0.0  ;;  %v10008_v46 = vpack.c.bf16 %v9938_v51, %v9936_v55 }
0x102d   : > { %v17560_v44 = vpack.c.bf16 %v9954_v21, %v9952_v29  ;;  %v9955_v9 = vmax.f32 %v9848_v39, 0.0  ;;  %v9852_v20 = vadd.f32 %v9851_v8, %v17539_v19  ;;  %v9933_v35 = vmax.f32 %v9794_v6, 0.0 }
0x102e   : > { %v9853_v4 = vpop.f32.mrf.mxu0  ;;  %10211 = vmatpush1.bf16.msra.mxu1 %v10012_v53  ;;  %v9928_v39 = vmax.f32 %v9782_v30, 0.0 }
0x102f   : > { %v17566_v0 = vpack.c.bf16 %v9955_v9, %v9953_v63  ;;  %10212 = vmatprep.subr.bf16.mxu1 %v10011_v56  ;;  %v9854_v34 = vadd.f32 %v9853_v4, %v17539_v19  ;;  %v9956_v57 = vmax.f32 %v9852_v20, 0.0  ;;  %v9786_v19 = vadd.f32 %v17501_v15, %v17487_v37 }
0x1030   : > { %v9855_v42 = vpop.f32.mrf.mxu0  ;;  %v10007_v62 = vpack.c.bf16 %v9935_v48, %v9933_v35  ;;  %v10006_v15 = vpack.c.bf16 %v9934_v38, %v9932_v24  ;;  %v19112_v24 = vld [vmem:[#allocation53_spill] sm:$0xff] }
0x1031   : > { %v9856_v60 = vadd.f32 %v9855_v42, %v17544_v40  ;;  %v9957_v25 = vmax.f32 %v9854_v34, 0.0  ;;  %v9930_v37 = vmax.f32 %v9786_v19, 0.0 }
0x1032   : > { %v9857_v3 = vpop.f32.mrf.mxu0  ;;  %10213 = vmatpush1.bf16.msra.mxu1 %v10010_v1 }
0x1033   : > { %v9958_v47 = vmax.f32 %v9856_v60, 0.0  ;;  %v9858_v7 = vadd.f32 %v9857_v3, %v17544_v40  ;;  %10214 = vmatprep.subr.bf16.mxu1 %v10009_v27  ;;  %v9929_v40 = vmax.f32 %v9784_v61, 0.0  ;;  %v10004_v43 = vpack.c.bf16 %v9930_v37, %v9928_v39 }
0x1034   : > { %v17582_v45 = vpop.f32.mrf.mxu0 }
0x1035   : > { %v17584_v18 = vpack.c.bf16 %v9958_v47, %v9956_v57  ;;  %v9959_v32 = vmax.f32 %v9858_v7, 0.0  ;;  %v10005_v21 = vpack.c.bf16 %v9931_v52, %v9929_v40 }
0x1036   : > { %v17588_v5 = vpop.f32.mrf.mxu0  ;;  %10215 = vmatpush1.bf16.msra.mxu1 %v10008_v46 }
0x1037   : > { %v17590_v50 = vpack.c.bf16 %v9959_v32, %v9957_v25  ;;  %10216 = vmatprep.subr.bf16.mxu1 %v10007_v62 }
0x1038   : > { %v17592_v29 = vpop.f32.mrf.mxu0 }
0x103a   : > { %v17594_v49 = vpop.f32.mrf.mxu0  ;;  %10217 = vmatpush1.bf16.msra.mxu1 %v10006_v15 }
0x103b   : > { %10218 = vmatprep.subr.bf16.mxu1 %v10005_v21 }
0x103c   : > { %v17596_v26 = vpop.f32.mrf.mxu0 }
0x103e   : > { %v17598_v14 = vpop.f32.mrf.mxu0  ;;  %10219 = vmatpush1.bf16.msra.mxu1 %v10004_v43 }
0x103f   : > { %10220 = vmatprep.subr.bf16.mxu1 %v17499_v58 }
0x1040   : > { %v17601_v2 = vpop.f32.mrf.mxu0 }
0x1042   : > { %v9877_v53 = vpop.f32.mrf.mxu0  ;;  %10221 = vmatpush1.bf16.msra.mxu1 %v17495_v59 }
0x1043   : > { %10222 = vmatprep.subr.bf16.mxu1 %v17491_v10 }
0x1044   : > { %v9881_v8 = vpop.f32.mrf.mxu0 }
0x1046   : > { %v9883_v56 = vpop.f32.mrf.mxu0  ;;  %10223 = vmatpush1.bf16.msra.mxu1 %v17489_v17 }
0x1048   : > { %v9885_v63 = vpop.f32.mrf.mxu0 }
0x104a   : > { %v9887_v9 = vpop.f32.mrf.mxu0 }
0x104c   : > { %v9891_v33 = vpop.f32.mrf.mxu0 }
0x104d   : > { %v9892_v32 = vadd.f32 %v9891_v33, %v17521_v41 }
0x104e   : > { %v9893_v11 = vpop.f32.mrf.mxu0 }
0x104f   : > { %v9894_v7 = vadd.f32 %v9893_v11, %v17521_v41 }
0x1050   : > { %v9895_v4 = vpop.f32.mrf.mxu0 }
0x1051   : > { %v9896_v52 = vadd.f32 %v9895_v4, %v17525_v28  ;;  %v9973_v40 = vmax.f32 %v9894_v7, 0.0  ;;  %v9972_v4 = vmax.f32 %v9892_v32, 0.0  ;;  %v12894_v7 = vld [vmem:[#allocation10 + $0x60] ss:$8 sps:$4 sm:$0xff]  }
0x1052   : > { %v9897_v6 = vpop.f32.mrf.mxu0 }
0x1053   : > { %v9898_v16 = vadd.f32 %v9897_v6, %v17525_v28  ;;  %v9974_v15 = vmax.f32 %v9896_v52, 0.0  ;;  %v19113_v28 = vld [vmem:[#allocation116_spill] sm:$0xff]  ;;  %v19114_v6 = vld [vmem:[#allocation170_spill] sm:$0xff]  ;;  %v19117_v52 = vmov 0  }
0x1054   : > { %v9901_v36 = vpop.f32.mrf.mxu0  ;;  %v9878_v39 = vadd.f32 %v9877_v53, %v19113_v28  ;;  %v9874_v41 = vadd.f32 %v17598_v14, %v19114_v6 }
0x1055   : > { %v9902_v57 = vadd.f32 %v9901_v36, %v17515_v54 }
0x1056   : > { %v9903_v20 = vpop.f32.mrf.mxu0  ;;  %v9967_v53 = vmax.f32 %v9878_v39, 0.0 }
0x1057   : > { %v9904_v27 = vadd.f32 %v9903_v20, %v17515_v54  ;;  %v9976_v30 = vmax.f32 %v9902_v57, 0.0  ;;  %v9884_v54 = vadd.f32 %v9883_v56, %v19112_v24  ;;  %v9876_v56 = vadd.f32 %v17601_v2, %v19113_v28  ;;  %v19115_v20 = vld [vmem:[#allocation178_spill] sm:$0xff]  ;;  %v12885_v57 = vld [vmem:[#allocation10 + $0x30] ss:$8 sps:$4 sm:$0xff]  }
0x1058   : > { %v9905_v58 = vpop.f32.mrf.mxu0  ;;  %v9866_v2 = vadd.f32 %v17592_v29, %v19115_v20  ;;  %v12876_v29 = vld [vmem:[#allocation10] ss:$8 sps:$4 sm:$0xff]  }
0x1059   : > { %v9906_v60 = vadd.f32 %v9905_v58, %v17517_v12  ;;  %v9977_v19 = vmax.f32 %v9904_v27, 0.0  ;;  %v9969_v33 = vmax.f32 %v9884_v54, 0.0  ;;  %v9868_v58 = vadd.f32 %v17594_v49, %v19115_v20 }
0x105a   : > { %v9907_v31 = vpop.f32.mrf.mxu0  ;;  %v9962_v27 = vmax.f32 %v9866_v2, 0.0 }
0x105b   : > { %v9908_v59 = vadd.f32 %v9907_v31, %v17517_v12  ;;  %v9978_v38 = vmax.f32 %v9906_v60, 0.0  ;;  %v9975_v12 = vmax.f32 %v9898_v16, 0.0  ;;  %v12879_v16 = vld [vmem:[#allocation10 + $0x10] ss:$8 sps:$4 sm:$0xff]  }
0x105c   : > { %v9911_v23 = vpop.f32.mrf.mxu0 }
0x105d   : > { %v9912_v17 = vadd.f32 %v9911_v23, %v17505_v13  ;;  %v9979_v55 = vmax.f32 %v9908_v59, 0.0  ;;  %v10028_v21 = vpack.c.bf16 %v9978_v38, %v9976_v30  ;;  %v10027_v11 = vpack.c.bf16 %v9975_v12, %v9973_v40  ;;  %v17642_v38 = vpop.permute.xlu0 %10120 }
0x105e   : > { %v9913_v51 = vpop.f32.mrf.mxu0  ;;  %v9966_v59 = vmax.f32 %v9876_v56, 0.0 }
0x105f   : > { %v9914_v10 = vadd.f32 %v9913_v51, %v17505_v13  ;;  %v9980_v47 = vmax.f32 %v9912_v17, 0.0  ;;  %v10029_v25 = vpack.c.bf16 %v9979_v55, %v9977_v19  ;;  %v19116_v51 = vld [vmem:[#allocation173_spill] sm:$0xff]  ;;  %v12884_v55 = vld [vmem:[#allocation10 + $0x24] ss:$8 sps:$4 sm:$0xff]  }
0x1060   : > { %v9915_v1 = vpop.f32.mrf.mxu0  ;;  %v9864_v14 = vadd.f32 %v17588_v5, %v19116_v51  ;;  %v9862_v49 = vadd.f32 %v17582_v45, %v19116_v51  ;;  %v12881_v45 = vld [vmem:[#allocation10 + $0x14] ss:$8 sps:$4 sm:$0xff]  }
0x1061   : > { %v9916_v42 = vadd.f32 %v9915_v1, %v17509_v22  ;;  %v9981_v3 = vmax.f32 %v9914_v10, 0.0  ;;  %v9965_v1 = vmax.f32 %v9874_v41, 0.0  ;;  %v12899_v19 = vld [vmem:[#allocation10 + $0x74] ss:$8 sps:$4 sm:$0xff]  }
0x1062   : > { %v9917_v48 = vpop.f32.mrf.mxu0  ;;  %v9960_v5 = vmax.f32 %v9862_v49, 0.0 }
0x1063   : > { %v9918_v34 = vadd.f32 %v9917_v48, %v17509_v22  ;;  %v9982_v61 = vmax.f32 %v9916_v42, 0.0  ;;  %v19111_v22 = vld [vmem:[#allocation181_spill] sm:$0xff]  ;;  %v9963_v42 = vmax.f32 %v9868_v58, 0.0  ;;  %v10023_v17 = vpack.c.bf16 %v9967_v53, %v9965_v1 }
0x1064   : > { %v9888_v62 = vadd.f32 %v9887_v9, %v19111_v22  ;;  %v9886_v37 = vadd.f32 %v9885_v63, %v19111_v22  ;;  %v9882_v9 = vadd.f32 %v9881_v8, %v19112_v24  ;;  %v10026_v63 = vpack.c.bf16 %v9974_v15, %v9972_v4  ;;  %v17646_v22 = vpop.permute.xlu0 %10110 }
0x1065   : > { %v9983_v35 = vmax.f32 %v9918_v34, 0.0  ;;  %v10030_v46 = vpack.c.bf16 %v9982_v61, %v9980_v47  ;;  %v9872_v8 = vadd.f32 %v17596_v26, %v19114_v6  ;;  %v9961_v26 = vmax.f32 %v9864_v14, 0.0  ;;  %v12896_v47 = vld [vmem:[#allocation10 + $0x64] ss:$8 sps:$4 sm:$0xff]  }
0x1066   : > { %v9971_v43 = vmax.f32 %v9888_v62, 0.0  ;;  %v9970_v36 = vmax.f32 %v9886_v37, 0.0  ;;  %v9968_v23 = vmax.f32 %v9882_v9, 0.0  ;;  %v10020_v61 = vpack.c.bf16 %v9962_v27, %v9960_v5 }
0x1067   : > { %v10031_v13 = vpack.c.bf16 %v9983_v35, %v9981_v3  ;;  %v9964_v48 = vmax.f32 %v9872_v8, 0.0  ;;  %v10021_v60 = vpack.c.bf16 %v9963_v42, %v9961_v26  ;;  %v12882_v3 = vld [vmem:[#allocation10 + $0x20] ss:$8 sps:$4 sm:$0xff]   ;;  %v12887_v35 = vld [vmem:[#allocation10 + $0x34] ss:$8 sps:$4 sm:$0xff]  }
0x1068   : > { %v10025_v31 = vpack.c.bf16 %v9971_v43, %v9969_v33  ;;  %v10024_v10 = vpack.c.bf16 %v9970_v36, %v9968_v23  ;;  %v17650_v12 = vpop.permute.xlu0 %10100 }
0x1069   : > { %10224 = vmatprep.subr.bf16.mxu1 %v10031_v13  ;;  %v10022_v34 = vpack.c.bf16 %v9966_v59, %v9964_v48  ;;  %v12897_v13 = vld [vmem:[#allocation10 + $0x70] ss:$8 sps:$4 sm:$0xff]  }
0x106a   : > { %10225 = vmatpush2.bf16.msra.mxu1 %v10030_v46  ;;  %v17644_v46 = vpop.permute.xlu1 %10125 }
0x106b   : > { %10226 = vmatprep.subr.bf16.mxu1 %v10029_v25 }
0x106c   : > { %v17654_v32 = vpop.permute.xlu0 %10090 }
0x106e   : > { %10227 = vmatpush2.bf16.msra.mxu1 %v10028_v21  ;;  %v17648_v62 = vpop.permute.xlu1 %10115 }
0x106f   : > { %10228 = vmatprep.subr.bf16.mxu1 %v10027_v11 }
0x1070   : > { %v17658_v24 = vpop.permute.xlu0 %10080 }
0x1072   : > { %10229 = vmatpush2.bf16.msra.mxu1 %v10026_v63  ;;  %v17652_v25 = vpop.permute.xlu1 %10105 }
0x1073   : > { %10230 = vmatprep.subr.bf16.mxu1 %v10025_v31 }
0x1074   : > { %v17662_v40 = vpop.permute.xlu0 %10070 }
0x1076   : > { %10231 = vmatpush2.bf16.msra.mxu1 %v10024_v10  ;;  %v17656_v30 = vpop.permute.xlu1 %10095 }
0x1077   : > { %10232 = vmatprep.subr.bf16.mxu1 %v10023_v17 }
0x1078   : > { %v10061_v15 = vpop.permute.xlu0 %10060 }
0x107a   : > { %10233 = vmatpush2.bf16.msra.mxu1 %v10022_v34  ;;  %v17660_v54 = vpop.permute.xlu1 %10085 }
0x107b   : > { %10234 = vmatprep.subr.bf16.mxu1 %v10021_v60 }
0x107c   : > { %v10051_v39 = vpop.permute.xlu0 %10050 }
0x107e   : > { %10235 = vmatpush2.bf16.msra.mxu1 %v10020_v61  ;;  %v17664_v37 = vpop.permute.xlu1 %10075 }
0x107f   : > { %10236 = vmatprep.subr.bf16.mxu1 %v17590_v50  ;;  %v12890_v50 = vld [vmem:[#allocation10 + $0x44] ss:$8 sps:$4 sm:$0xff]  }
0x1082   : > { %10237 = vmatpush2.bf16.msra.mxu1 %v17584_v18  ;;  %v12888_v18 = vld [vmem:[#allocation10 + $0x40] ss:$8 sps:$4 sm:$0xff]   ;;  %v10066_v21 = vpop.permute.xlu1 %10065 }
0x1083   : > { %10238 = vmatprep.subr.bf16.mxu1 %v17566_v0  ;;  %v12893_v0 = vld [vmem:[#allocation10 + $0x54] ss:$8 sps:$4 sm:$0xff]  }
0x1086   : > { %10239 = vmatpush2.bf16.msra.mxu1 %v17560_v44  ;;  %v12891_v44 = vld [vmem:[#allocation10 + $0x50] ss:$8 sps:$4 sm:$0xff]   ;;  %v10056_v9 = vpop.permute.xlu1 %10055 }
0x1089   : > { %10241 = vmatmul.mubr.bf16.vlgmr.msra.gmra.mxu1 %v12876_v29 }
0x108a   : > { %10250 = vmatprep.mubr.bf16.mxu1 %v12881_v45 }
0x1091   : > { %10251 = vmatmul.mubr.bf16.gmra.mxu1 %v12879_v16 }
0x1092   : > { %10260 = vmatprep.mubr.bf16.mxu1 %v12884_v55 }
0x1099   : > { %10261 = vmatmul.mubr.bf16.gmra.mxu1 %v12882_v3 }
0x109a   : > { %10270 = vmatprep.mubr.bf16.mxu1 %v12887_v35 }
0x10a1   : > { %10271 = vmatmul.mubr.bf16.gmra.mxu1 %v12885_v57 }
0x10a2   : > { %10280 = vmatprep.mubr.bf16.mxu1 %v12890_v50 }
0x10a9   : > { %10281 = vmatmul.mubr.bf16.gmra.mxu1 %v12888_v18 }
0x10aa   : > { %10290 = vmatprep.mubr.bf16.mxu1 %v12893_v0 }
0x10b1   : > { %10291 = vmatmul.mubr.bf16.gmra.mxu1 %v12891_v44 }
0x10b2   : > { %10300 = vmatprep.mubr.bf16.mxu1 %v12896_v47 }
0x10b9   : > { %10301 = vmatmul.mubr.bf16.gmra.mxu1 %v12894_v7 }
0x10ba   : > { %10310 = vmatprep.mubr.bf16.mxu1 %v12899_v19 }
0x10c1   : > { %10311 = vmatmul.mubr.bf16.gmra.mxu1 %v12897_v13 }
0x10c2   : > { %10432 = vmatprep.mubr.bf16.mxu1 %v19117_v52 }
0x1149   : > { %v10242_v28 = vpop.f32.mrf.mxu1 }
0x114a   : > { %v10243_v11 = vadd.f32 %v10242_v28, %v10051_v39 }
0x114b   : > { %v10244_v43 = vpop.f32.mrf.mxu1 }
0x114c   : > { %v10245_v6 = vadd.f32 %v10244_v43, %v10051_v39  ;;  %v10321_v56 = vmax.f32 %v10243_v11, 0.0 }
0x114d   : > { %v10246_v4 = vpop.f32.mrf.mxu1 }
0x114e   : > { %v10247_v41 = vadd.f32 %v10246_v4, %v10056_v9  ;;  %v10322_v58 = vmax.f32 %v10245_v6, 0.0 }
0x114f   : > { %v10248_v33 = vpop.f32.mrf.mxu1 }
0x1150   : > { %v10323_v36 = vmax.f32 %v10247_v41, 0.0  ;;  %v10249_v63 = vadd.f32 %v10248_v33, %v10056_v9 }
0x1151   : > { %v10252_v20 = vpop.f32.mrf.mxu1 }
0x1152   : > { %v17666_v53 = vpack.c.bf16 %v10323_v36, %v10321_v56  ;;  %v10324_v31 = vmax.f32 %v10249_v63, 0.0  ;;  %v10253_v51 = vadd.f32 %v10252_v20, %v10061_v15 }
0x1153   : > { %v10254_v8 = vpop.f32.mrf.mxu1 }
0x1154   : > { %v17668_v23 = vpack.c.bf16 %v10324_v31, %v10322_v58  ;;  %v10255_v1 = vadd.f32 %v10254_v8, %v10061_v15  ;;  %v10325_v10 = vmax.f32 %v10253_v51, 0.0 }
0x1155   : > { %v10256_v14 = vpop.f32.mrf.mxu1 }
0x1156   : > { %v10257_v2 = vadd.f32 %v10256_v14, %v10066_v21  ;;  %v10326_v48 = vmax.f32 %v10255_v1, 0.0 }
0x1157   : > { %v10258_v59 = vpop.f32.mrf.mxu1 }
0x1158   : > { %v10327_v42 = vmax.f32 %v10257_v2, 0.0  ;;  %v10259_v17 = vadd.f32 %v10258_v59, %v10066_v21 }
0x1159   : > { %v17670_v49 = vpop.f32.mrf.mxu1 }
0x115a   : > { %v17672_v26 = vpack.c.bf16 %v10327_v42, %v10325_v10  ;;  %v10328_v27 = vmax.f32 %v10259_v17, 0.0 }
0x115b   : > { %v17674_v34 = vpop.f32.mrf.mxu1 }
0x115c   : > { %v17676_v60 = vpack.c.bf16 %v10328_v27, %v10326_v48 }
0x115d   : > { %v17678_v5 = vpop.f32.mrf.mxu1 }
0x115f   : > { %v17680_v61 = vpop.f32.mrf.mxu1 }
0x1161   : > { %v17682_v29 = vpop.f32.mrf.mxu1 }
0x1163   : > { %v10274_v45 = vpop.f32.mrf.mxu1 }
0x1165   : > { %v10276_v16 = vpop.f32.mrf.mxu1 }
0x1167   : > { %v10278_v55 = vpop.f32.mrf.mxu1 }
0x1169   : > { %v10282_v3 = vpop.f32.mrf.mxu1 }
0x116b   : > { %v10284_v35 = vpop.f32.mrf.mxu1 }
0x116d   : > { %v10286_v57 = vpop.f32.mrf.mxu1 }
0x116f   : > { %v10288_v50 = vpop.f32.mrf.mxu1 }
0x1171   : > { %v10292_v18 = vpop.f32.mrf.mxu1 }
0x1172   : > { %v10293_v17 = vadd.f32 %v10292_v18, %v17650_v12 }
0x1173   : > { %v10294_v0 = vpop.f32.mrf.mxu1 }
0x1174   : > { %v10295_v14 = vadd.f32 %v10294_v0, %v17650_v12  ;;  %v10489_v0 = vpop.xlane.xlu0 %10488  ;;  %v10275_v12 = vadd.f32 %v10274_v45, %v17658_v24  ;;  %v10265_v45 = vadd.f32 %v17674_v34, %v17662_v40 }
0x1175   : > { %v10296_v44 = vpop.f32.mrf.mxu1 }
0x1176   : > { %v10297_v2 = vadd.f32 %v10296_v44, %v17652_v25  ;;  %v10342_v27 = vmax.f32 %v10295_v14, 0.0  ;;  %v10279_v44 = vadd.f32 %v10278_v55, %v17660_v54  ;;  %v10511_v14 = vmul.f32 0.00390625, %v10489_v0 }
0x1177   : > { %v10298_v47 = vpop.f32.mrf.mxu1 }
0x1178   : > { %v10299_v63 = vadd.f32 %v10298_v47, %v17652_v25  ;;  %v10287_v47 = vadd.f32 %v10286_v57, %v17656_v30  ;;  %v10336_v57 = vmax.f32 %v10279_v44, 0.0 }
0x1179   : > { %v10302_v7 = vpop.f32.mrf.mxu1 }
0x117a   : > { %v10303_v8 = vadd.f32 %v10302_v7, %v17646_v22  ;;  %v10343_v7 = vmax.f32 %v10297_v2, 0.0 }
0x117b   : > { %v10304_v19 = vpop.f32.mrf.mxu1 }
0x117c   : > { %v10305_v41 = vadd.f32 %v10304_v19, %v17646_v22  ;;  %v10345_v48 = vmax.f32 %v10303_v8, 0.0  ;;  %v10285_v22 = vadd.f32 %v10284_v35, %v17654_v32  ;;  %v10495_v35 = vpop.xlane.xlu0 %10494 }
0x117d   : > { %v10306_v13 = vpop.f32.mrf.mxu1 }
0x117e   : > { %v10307_v56 = vadd.f32 %v10306_v13, %v17648_v62  ;;  %v10346_v1 = vmax.f32 %v10305_v41, 0.0  ;;  %v10283_v13 = vadd.f32 %v10282_v3, %v17654_v32  ;;  %v10338_v18 = vmax.f32 %v10285_v22, 0.0 }
0x117f   : > { %v10308_v15 = vpop.f32.mrf.mxu1  ;;  %v10334_v3 = vmax.f32 %v10275_v12, 0.0  ;;  %v10263_v41 = vadd.f32 %v17670_v49, %v17662_v40  ;;  %v10513_v49 = vmul.f32 0.00390625, %v10495_v35 }
0x1180   : > { %v10309_v43 = vadd.f32 %v10308_v15, %v17648_v62  ;;  %v10347_v59 = vmax.f32 %v10307_v56, 0.0  ;;  %v10344_v62 = vmax.f32 %v10299_v63, 0.0  ;;  %v10341_v15 = vmax.f32 %v10293_v17, 0.0 }
0x1181   : > { %v10312_v21 = vpop.f32.mrf.mxu1  ;;  %v10337_v32 = vmax.f32 %v10283_v13, 0.0 }
0x1182   : > { %v10313_v4 = vadd.f32 %v10312_v21, %v17642_v38  ;;  %v10348_v20 = vmax.f32 %v10309_v43, 0.0  ;;  %v10368_v25 = vpack.c.bf16 %v10347_v59, %v10345_v48  ;;  %v10277_v21 = vadd.f32 %v10276_v16, %v17660_v54 }
0x1183   : > { %v10314_v28 = vpop.f32.mrf.mxu1  ;;  %v10273_v43 = vadd.f32 %v17682_v29, %v17658_v24  ;;  %v10267_v54 = vadd.f32 %v17678_v5, %v17664_v37  ;;  %v10330_v29 = vmax.f32 %v10265_v45, 0.0  ;;  %v12911_v45 = vld [vmem:[#allocation13 + $0x30] sm:$0xff]  }
0x1184   : > { %v10315_v11 = vadd.f32 %v10314_v28, %v17642_v38  ;;  %v10349_v51 = vmax.f32 %v10313_v4, 0.0  ;;  %v10369_v42 = vpack.c.bf16 %v10348_v20, %v10346_v1  ;;  %v10339_v28 = vmax.f32 %v10287_v47, 0.0 }
0x1185   : > { %v10316_v39 = vpop.f32.mrf.mxu1  ;;  %v10335_v16 = vmax.f32 %v10277_v21, 0.0  ;;  %v10363_v4 = vpack.c.bf16 %v10336_v57, %v10334_v3  ;;  %v10333_v24 = vmax.f32 %v10273_v43, 0.0  ;;  %v12903_v21 = vld [vmem:[#allocation11 + $0x8] sm:$0xff]   ;;  %v12909_v43 = vld [vmem:[#allocation11 + $0x38] sm:$0xff]  }
0x1186   : > { %v10317_v9 = vadd.f32 %v10316_v39, %v17644_v46  ;;  %v10350_v58 = vmax.f32 %v10315_v11, 0.0  ;;  %v10366_v39 = vpack.c.bf16 %v10343_v7, %v10341_v15  ;;  %v10364_v11 = vpack.c.bf16 %v10339_v28, %v10337_v32  ;;  %v12904_v28 = vld [vmem:[#allocation11 + $0x10] sm:$0xff]   ;;  %v12907_v57 = vld [vmem:[#allocation11 + $0x28] sm:$0xff]   ;;  %v12910_v32 = vld [vmem:[#allocation13] sm:$0xff]  }
0x1187   : > { %v10318_v6 = vpop.f32.mrf.mxu1  ;;  %v10362_v34 = vpack.c.bf16 %v10335_v16, %v10333_v24  ;;  %12201 = vmatprep.mubr.bf16.mxu0 %v12910_v32 }
0x1188   : > { %v10319_v33 = vadd.f32 %v10318_v6, %v17644_v46  ;;  %v10351_v36 = vmax.f32 %v10317_v9, 0.0  ;;  %v10289_v46 = vadd.f32 %v10288_v50, %v17656_v30  ;;  %v10367_v50 = vpack.c.bf16 %v10344_v62, %v10342_v27  ;;  %v10483_v6 = vpop.xlane.xlu0 %10482 }
0x1189   : > { %v10269_v30 = vadd.f32 %v17680_v61, %v17664_v37  ;;  %v10498_v61 = vpop.xlane.xlu1 %10497 }
0x118a   : > { %v10352_v31 = vmax.f32 %v10319_v33, 0.0  ;;  %v10370_v10 = vpack.c.bf16 %v10351_v36, %v10349_v51  ;;  %v10340_v19 = vmax.f32 %v10289_v46, 0.0  ;;  %v10331_v33 = vmax.f32 %v10267_v54, 0.0  ;;  %v12900_v51 = vld [vmem:[%s19118_s28] sm:$0xff]   ;;  %s17722_s28 = scalar_lea.vmem %s13604_s20, %s12233_s26  ;;  %s11402_s26 = sshll.u32 %s18192_s22, 8 }
0x118b   : > { %v10332_v9 = vmax.f32 %v10269_v30, 0.0  ;;  %v10329_v36 = vmax.f32 %v10263_v41, 0.0  ;;  %v10514_v20 = vmul.f32 0.00390625, %v10498_v61  ;;  %v12901_v46 = vld [vmem:[%s19119_s2 + $0x8] ss:$0 sps:$4 sm:$0x11]  }
0x118c   : > { %v10371_v38 = vpack.c.bf16 %v10352_v31, %v10350_v58  ;;  %v10365_v55 = vpack.c.bf16 %v10340_v19, %v10338_v18  ;;  %v10486_v5 = vpop.xlane.xlu0 %10485  ;;  %v12906_v30 = vld [vmem:[#allocation11 + $0x20] sm:$0xff]   ;;  %s19120_s2 = sld [smem:[#allocation42_spill]] }
0x118d   : > { %v10361_v56 = vpack.c.bf16 %v10332_v9, %v10330_v29  ;;  %v10492_v37 = vpop.xlane.xlu1 %10491  ;;  %v10360_v63 = vpack.c.bf16 %v10331_v33, %v10329_v36  ;;  %v10538_v31 = vpack.c.bf16 %v10514_v20, %v10513_v49 }
0x118e   : > { %10400 = vmatprep.subr.bf16.mxu1 %v10371_v38  ;;  %v10512_v8 = vmul.f32 0.00390625, %v10492_v37 }
0x118f   : > { %10401 = vmatpush1.bf16.msra.mxu1 %v10370_v10 }
0x1190   : > { %10402 = vmatprep.subr.bf16.mxu1 %v10369_v42  ;;  %v10480_v40 = vpop.xlane.xlu0 %10479  ;;  %v10537_v2 = vpack.c.bf16 %v10512_v8, %v10511_v14 }
0x1191   : > { %v10477_v58 = vpop.xlane.xlu1 %10476  ;;  %v10508_v10 = vmul.f32 0.00390625, %v10480_v40 }
0x1192   : > { %v10553_v8 = vld [vmem:[%s19120_s2 + $0x70] sm:$0xff] }
0x1193   : > { %10403 = vmatpush1.bf16.msra.mxu1 %v10368_v25 }
0x1194   : > { %10404 = vmatprep.subr.bf16.mxu1 %v10367_v50  ;;  %v10474_v38 = vpop.xlane.xlu0 %10473 }
0x1195   : > { %v10471_v1 = vpop.xlane.xlu1 %10470  ;;  %v10506_v22 = vmul.f32 0.00390625, %v10474_v38  ;;  %v10554_v38 = vld [vmem:[%s19120_s2 + $0x78] sm:$0xff] }
0x1196   : > { %v10505_v48 = vmul.f32 0.00390625, %v10471_v1  ;;  %v10551_v1 = vld [vmem:[%s19120_s2 + $0x60] sm:$0xff] }
0x1197   : > { %10405 = vmatpush1.bf16.msra.mxu1 %v10366_v39  ;;  %v12905_v39 = vld [vmem:[#allocation11 + $0x18] sm:$0xff]  }
0x1198   : > { %10406 = vmatprep.subr.bf16.mxu1 %v10365_v55  ;;  %v10468_v42 = vpop.xlane.xlu0 %10467  ;;  %v10534_v0 = vpack.c.bf16 %v10506_v22, %v10505_v48  ;;  %v12908_v55 = vld [vmem:[#allocation11 + $0x30] sm:$0xff]   ;;  %v10548_v22 = vld [vmem:[%s19120_s2 + $0x48] sm:$0xff] }
0x1199   : > { %v10465_v62 = vpop.xlane.xlu1 %10464  ;;  %v10504_v7 = vmul.f32 0.00390625, %v10468_v42 }
0x119a   : > { %v10503_v47 = vmul.f32 0.00390625, %v10465_v62 }
0x119b   : > { %10407 = vmatpush1.bf16.msra.mxu1 %v10364_v11 }
0x119c   : > { %10408 = vmatprep.subr.bf16.mxu1 %v10363_v4  ;;  %v10533_v25 = vpack.c.bf16 %v10504_v7, %v10503_v47  ;;  %v10547_v7 = vld [vmem:[%s19120_s2 + $0x40] sm:$0xff] }
0x119d   : > { %v10459_v27 = vpop.xlane.xlu1 %10458 }
0x119e   : > { %v10501_v44 = vmul.f32 0.00390625, %v10459_v27 }
0x119f   : > { %10409 = vmatpush1.bf16.msra.mxu1 %v10362_v34 }
0x11a0   : > { %10410 = vmatprep.subr.bf16.mxu1 %v10361_v56 }
0x11a1   : > { %v10453_v50 = vpop.xlane.xlu1 %10452 }
0x11a2   : > { %v10499_v12 = vmul.f32 0.00390625, %v10453_v50  ;;  %v10546_v50 = vld [vmem:[%s19120_s2 + $0x38] sm:$0xff] }
0x11a3   : > { %10411 = vmatpush1.bf16.msra.mxu1 %v10360_v63 }
0x11a4   : > { %10412 = vmatprep.subr.bf16.mxu1 %v17676_v60  ;;  %v10510_v60 = vmul.f32 0.00390625, %v10486_v5 }
0x11a7   : > { %10413 = vmatpush1.bf16.msra.mxu1 %v17672_v26  ;;  %v10509_v26 = vmul.f32 0.00390625, %v10483_v6 }
0x11a8   : > { %10414 = vmatprep.subr.bf16.mxu1 %v17668_v23  ;;  %v10507_v23 = vmul.f32 0.00390625, %v10477_v58 }
0x11a9   : > { %v10536_v59 = vpack.c.bf16 %v10510_v60, %v10509_v26  ;;  %v10550_v60 = vld [vmem:[%s19120_s2 + $0x58] sm:$0xff] }
0x11aa   : > { %v10535_v17 = vpack.c.bf16 %v10508_v10, %v10507_v23 }
0x11ab   : > { %10415 = vmatpush1.bf16.msra.mxu1 %v17666_v53  ;;  %v12902_v53 = vld [vmem:[#allocation11] sm:$0xff]  }
0x11ac   : > { %12153 = vmatprep.subr.bf16.mxu1 %v10538_v31 }
0x11ae   : > { %10433 = vmatmul.mubr.bf16.vlgmr.msra.gmra.mxu1 %v12900_v51 }
0x11af   : > { %12154 = vmatpush3.bf16.msra.mxu1 %v10538_v31  ;;  %10442 = vmatprep.mubr.bf16.mxu1 %v19117_v52  ;;  %v10462_v52 = vpop.xlane.xlu0 %10461 }
0x11b0   : > { %12155 = vmatprep.subr.bf16.mxu1 %v10537_v2  ;;  %v10502_v19 = vmul.f32 0.00390625, %v10462_v52 }
0x11b2   : > { %v10532_v15 = vpack.c.bf16 %v10502_v19, %v10501_v44 }
0x11b3   : > { %12156 = vmatpush3.bf16.msra.mxu1 %v10537_v2  ;;  %v10456_v13 = vpop.xlane.xlu0 %10455 }
0x11b4   : > { %12157 = vmatprep.subr.bf16.mxu1 %v10536_v59  ;;  %v10500_v18 = vmul.f32 0.00390625, %v10456_v13 }
0x11b6   : > { %10443 = vmatmul.mubr.bf16.gmra.mxu1 %v12901_v46  ;;  %v10531_v35 = vpack.c.bf16 %v10500_v18, %v10499_v12  ;;  %v10549_v46 = vld [vmem:[%s19120_s2 + $0x50] sm:$0xff] }
0x11b7   : > { %12158 = vmatpush3.bf16.msra.mxu1 %v10536_v59  ;;  %12169 = vmatprep.mubr.bf16.mxu1 %v12902_v53  ;;  %v10378_v3 = vpop.permute.xlu0 %10377  ;;  %v10552_v59 = vld [vmem:[%s19120_s2 + $0x68] sm:$0xff]  ;;  %v10545_v12 = vld [vmem:[%s19120_s2 + $0x30] sm:$0xff] }
0x11b8   : > { %12159 = vmatprep.subr.bf16.mxu1 %v10535_v17 }
0x11bb   : > { %12160 = vmatpush3.bf16.msra.mxu1 %v10535_v17 }
0x11bc   : > { %12161 = vmatprep.subr.bf16.mxu1 %v10534_v0 }
0x11bf   : > { %12162 = vmatpush3.bf16.msra.mxu1 %v10534_v0 }
0x11c0   : > { %12163 = vmatprep.subr.bf16.mxu1 %v10533_v25 }
0x11c3   : > { %12164 = vmatpush3.bf16.msra.mxu1 %v10533_v25 }
0x11c4   : > { %12165 = vmatprep.subr.bf16.mxu1 %v10532_v15 }
0x11c7   : > { %12166 = vmatpush3.bf16.msra.mxu1 %v10532_v15 }
0x11c8   : > { %12167 = vmatprep.subr.bf16.mxu1 %v10531_v35 }
0x11cb   : > { %12168 = vmatpush3.bf16.msra.mxu1 %v10531_v35 }
0x11ce   : > { %12170 = vmatmul.mubr.bf16.vlgmr.msra.gmra.mxu1 %v12903_v21 }
0x11cf   : > { %12173 = vmatprep.mubr.bf16.mxu1 %v12904_v28  ;;  %v10544_v28 = vld [vmem:[%s19120_s2 + $0x28] sm:$0xff] }
0x11d6   : > { %12174 = vmatmul.mubr.bf16.gmra.mxu1 %v12905_v39 }
0x11d7   : > { %12177 = vmatprep.mubr.bf16.mxu1 %v12906_v30 }
0x11de   : > { %12178 = vmatmul.mubr.bf16.gmra.mxu1 %v12907_v57  ;;  %v10543_v57 = vld [vmem:[%s19120_s2 + $0x20] sm:$0xff] }
0x11df   : > { %12181 = vmatprep.mubr.bf16.mxu1 %v12908_v55 }
0x11e6   : > { %12182 = vmatmul.mubr.bf16.gmra.mxu1 %v12909_v43 }
0x11e7   : > { %12213 = vmatprep.mubr.bf16.mxu1 %v12911_v45  ;;  %v10542_v45 = vld [vmem:[%s19120_s2 + $0x18] sm:$0xff] }
0x126e   : > { %v10434_v54 = vpop.f32.mrf.mxu1 }
0x126f   : > { %v10435_v16 = vadd.f32 %v10434_v54, %v10378_v3 }
0x1270   : > { %v10436_v11 = vpop.f32.mrf.mxu1 }
0x1271   : > { %11141 = vst [vmem:[%s17722_s28] sm:$0xff] %v10435_v16  ;;  %v10437_v9 = vadd.f32 %v10436_v11, %v10378_v3  ;;  %v10541_v16 = vld [vmem:[%s19120_s2 + $0x10] sm:$0xff] }
0x1272   : > { %v17725_v4 = vpop.f32.mrf.mxu1 }
0x1273   : > { %11142 = vst [vmem:[%s17722_s28 + $0x8] sm:$0xff] %v10437_v9 }
0x1274   : > { %v17728_v61 = vpop.f32.mrf.mxu1 }
0x1276   : > { %v17730_v6 = vpop.f32.mrf.mxu1 }
0x1278   : > { %v17732_v41 = vpop.f32.mrf.mxu1 }
0x127a   : > { %v10448_v24 = vpop.f32.mrf.mxu1 }
0x127c   : > { %v10449_v29 = vpop.f32.mrf.mxu1 }
0x127d   : > { %v10540_v29 = vld [vmem:[%s19120_s2 + $0x8] sm:$0xff] }
0x128e   : > { %v17734_v33 = vpop.f32.mrf.mxu1 }
0x1290   : > { %v17736_v34 = vpop.f32.mrf.mxu1 }
0x1292   : > { %v17738_v56 = vpop.f32.mrf.mxu1 }
0x1293   : > { %v10649_v11 = vadd.f32 %v17738_v56, %v10542_v45 }
0x1294   : > { %v17740_v36 = vpop.f32.mrf.mxu1 }
0x1296   : > { %v12175_v37 = vpop.f32.mrf.mxu1 }
0x1297   : > { %v10662_v39 = vadd.f32 %v12175_v37, %v10545_v12  ;;  %v10646_v37 = vadd.f32 %v17734_v33, %v10541_v16  ;;  %v10746_v12 = vld [vmem:[%s18221_s4 + $0x30] sm:$0xff] }
0x1298   : > { %v10653_v5 = vpop.f32.mrf.mxu1 }
0x1299   : > { %v10706_v3 = vmax.f32 %v10662_v39, 0.0  ;;  %v10654_v54 = vadd.f32 %v10653_v5, %v10543_v57 }
0x129a   : > { %v12176_v63 = vpop.f32.mrf.mxu1 }
0x129b   : > { %v10665_v18 = vadd.f32 %v12176_v63, %v10546_v50  ;;  %v10704_v63 = vmax.f32 %v10654_v54, 0.0  ;;  %v10747_v54 = vld [vmem:[%s18221_s4 + $0x38] sm:$0xff] }
0x129c   : > { %v10656_v20 = vpop.f32.mrf.mxu1 }
0x129d   : > { %v10707_v55 = vmax.f32 %v10665_v18, 0.0  ;;  %v10657_v43 = vadd.f32 %v10656_v20, %v10544_v28  ;;  %v10539_v20 = vld [vmem:[%s19120_s2] sm:$0xff]  ;;  %s17787_s2 = scalar_lea.vmem [#allocation14], %s11402_s26  ;;  %s11896_s26 = sshll.u32 %s13627_s0, 12 }
0x129e   : > { %v12179_v58 = vpop.f32.mrf.mxu1  ;;  %v10638_v56 = vadd.f32 %v17736_v34, %v10539_v20  ;;  %v12914_v34 = vld [vmem:[#allocation13 + $0x10] sm:$0xff]   ;;  %s11166_s22 = sshll.u32 %s17787_s2, 4  ;;  %s19153_s0 = sand.u32 1, %s13360_s23   ;;  %s17850_s22 = int_to_ptr.vmem [resolvable:$true] %s11166_s22 }
0x129f   : > { %v10678_v27 = vadd.f32 %v12179_v58, %v10549_v46  ;;  %v10735_v9 = vpack.c.bf16 %v10707_v55, %v10706_v3  ;;  %v10705_v24 = vmax.f32 %v10657_v43, 0.0  ;;  %v10703_v58 = vmax.f32 %v10649_v11, 0.0  ;;  %v10752_v46 = vld [vmem:[%s18221_s4 + $0x60] sm:$0xff]  ;;  %s13292_s3 = scalar_lea.vmem %s17850_s22, 4096 }
0x12a0   : > { %v10669_v40 = vpop.f32.mrf.mxu1  ;;  %v10700_v33 = vmax.f32 %v10638_v56, 0.0  ;;  %v10744_v55 = vld [vmem:[%s18221_s4 + $0x20] sm:$0xff]  ;;  %p13293_p1 = scmp.ne.s32.totalorder %s17850_s22, %s13292_s3 }
0x12a1   : > { %v10710_v13 = vmax.f32 %v10678_v27, 0.0  ;;  %v10670_v15 = vadd.f32 %v10669_v40, %v10547_v7  ;;  %v10641_v40 = vadd.f32 %v17740_v36, %v10540_v29  ;;  %v10734_v5 = vpack.c.bf16 %v10705_v24, %v10704_v63  ;;  %v12912_v36 = vld [vmem:[#allocation13 + $0x8] sm:$0xff]  }
0x12a2   : > { %v12180_v49 = vpop.f32.mrf.mxu1  ;;  %v10745_v24 = vld [vmem:[%s18221_s4 + $0x28] sm:$0xff]  ;;  %p13294_p3 = pnand %p13293_p1, %p19154_p5 }
0x12a3   : > { %v10681_v42 = vadd.f32 %v12180_v49, %v10550_v60  ;;  %v10708_v30 = vmax.f32 %v10670_v15, 0.0  ;;  %v10702_v49 = vmax.f32 %v10646_v37, 0.0  ;;  %v10742_v60 = vld [vmem:[%s18221_s4 + $0x10] sm:$0xff] }
0x12a4   : > { %v10672_v31 = vpop.f32.mrf.mxu1  ;;  %p13295_p2 = pneg %p13294_p3 }
0x12a5   : > { %v10711_v25 = vmax.f32 %v10681_v42, 0.0  ;;  %v10673_v44 = vadd.f32 %v10672_v31, %v10548_v22  ;;  %v10733_v31 = vpack.c.bf16 %v10703_v58, %v10702_v49 }
0x12a6   : > { %v12183_v51 = vpop.f32.mrf.mxu1 }
0x12a7   : > { %v10694_v2 = vadd.f32 %v12183_v51, %v10553_v8  ;;  %v10737_v35 = vpack.c.bf16 %v10711_v25, %v10710_v13  ;;  %v10709_v21 = vmax.f32 %v10673_v44, 0.0  ;;  %v10701_v8 = vmax.f32 %v10641_v40, 0.0  ;;  %v10741_v25 = vld [vmem:[%s18221_s4 + $0x8] sm:$0xff] }
0x12a8   : > { %v10685_v14 = vpop.f32.mrf.mxu1 }
0x12a9   : > { %v10686_v23 = vadd.f32 %v10685_v14, %v10551_v1  ;;  %v10714_v53 = vmax.f32 %v10694_v2, 0.0  ;;  %v10736_v32 = vpack.c.bf16 %v10709_v21, %v10708_v30  ;;  %v10732_v51 = vpack.c.bf16 %v10701_v8, %v10700_v33  ;;  %v12913_v14 = vld [vmem:[#allocation13 + $0x38] sm:$0xff]   ;;  %v12917_v2 = vld [vmem:[#allocation13 + $0x28] sm:$0xff]  }
0x12aa   : > { %v12184_v26 = vpop.f32.mrf.mxu1  ;;  %v12915_v1 = vld [vmem:[#allocation13 + $0x18] sm:$0xff]   ;;  %v10753_v21 = vld [vmem:[%s18221_s4 + $0x68] sm:$0xff] }
0x12ab   : > { %v10697_v10 = vadd.f32 %v12184_v26, %v10554_v38  ;;  %v10712_v52 = vmax.f32 %v10686_v23, 0.0  ;;  %v12916_v38 = vld [vmem:[#allocation13 + $0x20] sm:$0xff]   ;;  %v10754_v26 = vld [vmem:[%s18221_s4 + $0x70] sm:$0xff] }
0x12ac   : > { %v10688_v62 = vpop.f32.mrf.mxu1 }
0x12ad   : > { %v10715_v17 = vmax.f32 %v10697_v10, 0.0  ;;  %v10689_v48 = vadd.f32 %v10688_v62, %v10552_v59  ;;  %v10740_v10 = vld [vmem:[%s18221_s4] sm:$0xff] }
0x12af   : > { %v10739_v0 = vpack.c.bf16 %v10715_v17, %v10714_v53  ;;  %v10713_v47 = vmax.f32 %v10689_v48, 0.0  ;;  %v10743_v48 = vld [vmem:[%s18221_s4 + $0x18] sm:$0xff] }
0x12b1   : > { %v10738_v19 = vpack.c.bf16 %v10713_v47, %v10712_v52  ;;  %12185 = vmatprep.subr.bf16.mxu0 %v10739_v0  ;;  %12217 = vmatprep.subr.bf16.mxu1 %v10739_v0  ;;  %v10755_v47 = vld [vmem:[%s18221_s4 + $0x78] sm:$0xff] }
0x12b2   : > { %12186 = vmatpush3.bf16.msra.mxu0 %v10739_v0  ;;  %12225 = vmatpush3.bf16.msra.mxu1 %v10739_v0 }
0x12b3   : > { %12187 = vmatprep.subr.bf16.mxu0 %v10738_v19  ;;  %12218 = vmatprep.subr.bf16.mxu1 %v10738_v19 }
0x12b6   : > { %12188 = vmatpush3.bf16.msra.mxu0 %v10738_v19  ;;  %12226 = vmatpush3.bf16.msra.mxu1 %v10738_v19 }
0x12b7   : > { %12189 = vmatprep.subr.bf16.mxu0 %v10737_v35  ;;  %12219 = vmatprep.subr.bf16.mxu1 %v10737_v35 }
0x12ba   : > { %12190 = vmatpush3.bf16.msra.mxu0 %v10737_v35  ;;  %12227 = vmatpush3.bf16.msra.mxu1 %v10737_v35 }
0x12bb   : > { %12191 = vmatprep.subr.bf16.mxu0 %v10736_v32  ;;  %12220 = vmatprep.subr.bf16.mxu1 %v10736_v32 }
0x12be   : > { %12192 = vmatpush3.bf16.msra.mxu0 %v10736_v32  ;;  %12228 = vmatpush3.bf16.msra.mxu1 %v10736_v32 }
0x12bf   : > { %12193 = vmatprep.subr.bf16.mxu0 %v10735_v9  ;;  %12221 = vmatprep.subr.bf16.mxu1 %v10735_v9 }
0x12c2   : > { %12194 = vmatpush3.bf16.msra.mxu0 %v10735_v9  ;;  %12229 = vmatpush3.bf16.msra.mxu1 %v10735_v9 }
0x12c3   : > { %12195 = vmatprep.subr.bf16.mxu0 %v10734_v5  ;;  %12222 = vmatprep.subr.bf16.mxu1 %v10734_v5 }
0x12c6   : > { %12196 = vmatpush3.bf16.msra.mxu0 %v10734_v5  ;;  %12230 = vmatpush3.bf16.msra.mxu1 %v10734_v5 }
0x12c7   : > { %12197 = vmatprep.subr.bf16.mxu0 %v10733_v31  ;;  %12223 = vmatprep.subr.bf16.mxu1 %v10733_v31 }
0x12ca   : > { %12198 = vmatpush3.bf16.msra.mxu0 %v10733_v31  ;;  %12231 = vmatpush3.bf16.msra.mxu1 %v10733_v31 }
0x12cb   : > { %12199 = vmatprep.subr.bf16.mxu0 %v10732_v51  ;;  %12224 = vmatprep.subr.bf16.mxu1 %v10732_v51 }
0x12ce   : > { %12200 = vmatpush3.bf16.msra.mxu0 %v10732_v51  ;;  %12232 = vmatpush3.bf16.msra.mxu1 %v10732_v51  ;;  %v10750_v51 = vld [vmem:[%s18221_s4 + $0x50] sm:$0xff] }
0x12d1   : > { %12202 = vmatmul.mubr.bf16.vlgmr.msra.gmra.mxu0 %v12912_v36  ;;  %12214 = vmatmul.mubr.bf16.vlgmr.msra.gmra.mxu1 %v12913_v14 }
0x12d2   : > { %12205 = vmatprep.mubr.bf16.mxu0 %v12914_v34 }
0x12d9   : > { %12206 = vmatmul.mubr.bf16.gmra.mxu0 %v12915_v1 }
0x12da   : > { %12209 = vmatprep.mubr.bf16.mxu0 %v12916_v38  ;;  %v10748_v38 = vld [vmem:[%s18221_s4 + $0x40] sm:$0xff] }
0x12e1   : > { %12210 = vmatmul.mubr.bf16.gmra.mxu0 %v12917_v2 }
0x1391   : > { %v12203_v59 = vpop.f32.mrf.mxu0  ;;  %v12215_v23 = vpop.f32.mrf.mxu1 }
0x1392   : > { %v10847_v62 = vadd.f32 %v12203_v59, %v10742_v60  ;;  %v10895_v42 = vadd.f32 %v12215_v23, %v10754_v26  ;;  %v10751_v23 = vld [vmem:[%s18221_s4 + $0x58] sm:$0xff] }
0x1393   : > { %v10838_v53 = vpop.f32.mrf.mxu0  ;;  %v10886_v17 = vpop.f32.mrf.mxu1 }
0x1394   : > { %v11874_v22 = vmul.f32 -1.442695, %v10847_v62  ;;  %v11886_v27 = vmul.f32 -1.442695, %v10895_v42  ;;  %v10839_v52 = vadd.f32 %v10838_v53, %v10740_v10  ;;  %v10887_v0 = vadd.f32 %v10886_v17, %v10752_v46 }
0x1395   : > { %v12204_v7 = vpop.f32.mrf.mxu0  ;;  %v12216_v44 = vpop.f32.mrf.mxu1 }
0x1396   : > { %13046 = vpow2.f32 %v11874_v22  ;;  %v11872_v19 = vmul.f32 -1.442695, %v10839_v52  ;;  %v11884_v50 = vmul.f32 -1.442695, %v10887_v0  ;;  %v10850_v13 = vadd.f32 %v12204_v7, %v10743_v48  ;;  %v10749_v48 = vld [vmem:[%s18221_s4 + $0x48] sm:$0xff]  ;;  %s13418_s4 = smov [#allocation14]  }
0x1397   : > { %13048 = vpow2.f32 %v11886_v27  ;;  %v10841_v15 = vpop.f32.mrf.mxu0  ;;  %v10898_v18 = vadd.f32 %v12216_v44, %v10755_v47  ;;  %v10889_v35 = vpop.f32.mrf.mxu1  ;;  %s13296_s5 = sshll.u32 %s13418_s4, 4  ;;  %s13297_s5 = int_to_ptr.vmem [resolvable:$false] %s13296_s5 }
0x1398   : > { %13050 = vpow2.f32 %v11872_v19  ;;  %v11875_v28 = vmul.f32 -1.442695, %v10850_v13  ;;  %v10842_v39 = vadd.f32 %v10841_v15, %v10741_v25  ;;  %v10890_v45 = vadd.f32 %v10889_v35, %v10753_v21  ;;  %s13298_s6 = scalar_lea.vmem %s13297_s5, 8192  ;;  %p13299_p4 = scmp.lt.s32.totalorder %s17850_s22, %s13297_s5 }
0x1399   : > { %13052 = vpow2.f32 %v11884_v50  ;;  %v12207_v30 = vpop.f32.mrf.mxu0  ;;  %v11887_v57 = vmul.f32 -1.442695, %v10898_v18  ;;  %p13300_p7 = scmp.lt.s32.totalorder %s13298_s6, %s13292_s3 }
0x139a   : > { %13054 = vpow2.f32 %v11875_v28  ;;  %v11873_v43 = vmul.f32 -1.442695, %v10842_v39  ;;  %v10863_v32 = vadd.f32 %v12207_v30, %v10746_v12  ;;  %v11885_v63 = vmul.f32 -1.442695, %v10890_v45 }
0x139b   : > { %v10854_v3 = vpop.f32.mrf.mxu0  ;;  %p13301_p13 = por %p13300_p7, %p13299_p4 }
0x139c   : > { %13056 = vpow2.f32 %v11873_v43  ;;  %v11878_v16 = vmul.f32 -1.442695, %v10863_v32  ;;  %v10855_v11 = vadd.f32 %v10854_v3, %v10744_v55 }
0x139d   : > { %13058 = vpow2.f32 %v11887_v57  ;;  %v12208_v9 = vpop.f32.mrf.mxu0  ;;  %p13302_p10 = pnand %p13301_p13, %p13295_p2 }
0x139e   : > { %13060 = vpow2.f32 %v11878_v16  ;;  %v11876_v29 = vmul.f32 -1.442695, %v10855_v11  ;;  %v10866_v37 = vadd.f32 %v12208_v9, %v10747_v54 }
0x139f   : > { %v10857_v20 = vpop.f32.mrf.mxu0 }
0x13a0   : > { %13062 = vpow2.f32 %v11876_v29  ;;  %v10858_v58 = vadd.f32 %v10857_v20, %v10745_v24  ;;  %v11879_v40 = vmul.f32 -1.442695, %v10866_v37 }
0x13a1   : > { %v12211_v5 = vpop.f32.mrf.mxu0  ;;  %13064 = vpow2.f32 %v11885_v63 }
0x13a2   : > { %v11877_v33 = vmul.f32 -1.442695, %v10858_v58  ;;  %13066 = vpow2.f32 %v11879_v40  ;;  %v10879_v59 = vadd.f32 %v12211_v5, %v10750_v51  ;;  %v10373_v51 = vld [vmem:[%s19104_s1 + $0x8] sm:$0xff] }
0x13a3   : > { %v13047_v49 = vpop.eup %13046  ;;  %v10870_v56 = vpop.f32.mrf.mxu0 }
0x13a4   : > { %v13049_v31 = vpop.eup %13048  ;;  %v10951_v8 = vadd.f32 1.0, %v13047_v49  ;;  %v10871_v62 = vadd.f32 %v10870_v56, %v10748_v38  ;;  %v11882_v27 = vmul.f32 -1.442695, %v10879_v59  ;;  %v19124_v59 = vld [vmem:[#allocation112_spill] sm:$0xff] }
0x13a5   : > { %v13051_v36 = vpop.eup %13050  ;;  %v10963_v14 = vadd.f32 1.0, %v13049_v31  ;;  %v12212_v2 = vpop.f32.mrf.mxu0 }
0x13a6   : > { %v13053_v34 = vpop.eup %13052  ;;  %13068 = vrcp.f32 %v10951_v8  ;;  %v10949_v1 = vadd.f32 1.0, %v13051_v36  ;;  %v10882_v52 = vadd.f32 %v12212_v2, %v10751_v23  ;;  %v11880_v7 = vmul.f32 -1.442695, %v10871_v62  ;;  %v10374_v8 = vld [vmem:[%s19104_s1 + $0x10] sm:$0x3]  ;;  %s17848_s1 = scalar_lea.hbm %s13599_s13, %s11896_s26  ;;  %s17862_s26 = scalar_lea.sflag [#allocation4], %s19153_s0 }
0x13a7   : > { %v13055_v60 = vpop.eup %13054  ;;  %13070 = vrcp.f32 %v10963_v14  ;;  %v10961_v26 = vadd.f32 1.0, %v13053_v34  ;;  %v10873_v17 = vpop.f32.mrf.mxu0  ;;  %v19121_v14 = vld [vmem:[#allocation97_spill] sm:$0xff] }
0x13a8   : > { %13072 = vpow2.f32 %v11877_v33  ;;  %v10952_v46 = vadd.f32 1.0, %v13055_v60  ;;  %v10874_v25 = vadd.f32 %v10873_v17, %v10749_v48  ;;  %v11883_v50 = vmul.f32 -1.442695, %v10882_v52  ;;  %v19123_v60 = vld [vmem:[#allocation79_spill] sm:$0xff]  ;;  %v19127_v48 = vld [vmem:[#allocation74_spill] sm:$0xff] }
0x13a9   : > { %v13057_v10 = vpop.eup %13056  ;;  %13074 = vrcp.f32 %v10961_v26 }
0x13aa   : > { %v13059_v42 = vpop.eup %13058  ;;  %13076 = vrcp.f32 %v10949_v1  ;;  %v10950_v53 = vadd.f32 1.0, %v13057_v10  ;;  %v11881_v15 = vmul.f32 -1.442695, %v10874_v25  ;;  %v19122_v1 = vld [vmem:[#allocation171_spill] sm:$0xff]  ;;  %v19130_v25 = vld [vmem:[#allocation134_spill] sm:$0xff] }
0x13ab   : > { %v13061_v22 = vpop.eup %13060  ;;  %13078 = vrcp.f32 %v10952_v46  ;;  %v10964_v44 = vadd.f32 1.0, %v13059_v42  ;;  %v19125_v46 = vld [vmem:[#allocation114_spill] sm:$0xff]  ;;  %v19126_v42 = vld [vmem:[#allocation56_spill] sm:$0xff] }
0x13ac   : > { %v10955_v0 = vadd.f32 1.0, %v13061_v22  ;;  %13080 = vrcp.f32 %v10950_v53 }
0x13ad   : > { %v13063_v47 = vpop.eup %13062  ;;  %13082 = vpow2.f32 %v11882_v27  ;;  %v19128_v27 = vld [vmem:[#allocation78_spill] sm:$0xff] }
0x13ae   : > { %v13065_v19 = vpop.eup %13064  ;;  %13084 = vrcp.f32 %v10955_v0  ;;  %v10953_v13 = vadd.f32 1.0, %v13063_v47  ;;  %v19129_v47 = vld [vmem:[#allocation189_spill] sm:$0xff] }
0x13af   : > { %13086 = vpow2.f32 %v11880_v7  ;;  %v13067_v12 = vpop.eup %13066  ;;  %v10962_v18 = vadd.f32 1.0, %v13065_v19 }
0x13b0   : > { %13088 = vrcp.f32 %v10964_v44  ;;  %v10956_v30 = vadd.f32 1.0, %v13067_v12 }
0x13b1   : > { %13090 = vpow2.f32 %v11883_v50  ;;  %v19131_v50 = vld [vmem:[#allocation125_spill] sm:$0xff] }
0x13b2   : > { %13092 = vrcp.f32 %v10953_v13 }
0x13b3   : > { %v13069_v35 = vpop.eup %13068  ;;  %13094 = vpow2.f32 %v11881_v15  ;;  %v19132_v15 = vld [vmem:[#allocation115_spill] sm:$0xff] }
0x13b4   : > { %v13071_v21 = vpop.eup %13070  ;;  %11009 = vperm.xlu1 %12388, %v13069_v35   ;;  %13096 = vrcp.f32 %v10962_v18  ;;  %v19133_v35 = vld [vmem:[#allocation73_spill] sm:$0xff] }
0x13b5   : > { %v13073_v28 = vpop.eup %13072  ;;  %11069 = vperm.xlu0 %12387, %v13071_v21   ;;  %13098 = vrcp.f32 %v10956_v30 }
0x13b6   : > { %v13075_v39 = vpop.eup %13074  ;;  %v10954_v43 = vadd.f32 1.0, %v13073_v28  ;;  %v19134_v28 = vld [vmem:[#allocation98_spill] sm:$0xff] }
0x13b7   : > { %v13077_v57 = vpop.eup %13076 }
0x13b8   : > { %10999 = vperm.xlu1 %12388, %v13077_v57   ;;  %v13079_v55 = vpop.eup %13078  ;;  %13100 = vrcp.f32 %v10954_v43  ;;  %v19135_v57 = vld [vmem:[#allocation182_spill] sm:$0xff]  ;;  %v19136_v43 = vld [vmem:[#allocation93_spill] sm:$0xff] }
0x13b9   : > { %11059 = vperm.xlu0 %12387, %v13075_v39   ;;  %v13081_v32 = vpop.eup %13080 }
0x13ba   : > { %v13083_v45 = vpop.eup %13082 }
0x13bb   : > { %v13085_v3 = vpop.eup %13084  ;;  %v10959_v54 = vadd.f32 1.0, %v13083_v45 }
0x13bc   : > { %11014 = vperm.xlu1 %12388, %v13079_v55   ;;  %v13087_v16 = vpop.eup %13086 }
0x13bd   : > { %11004 = vperm.xlu0 %12387, %v13081_v32   ;;  %v13089_v11 = vpop.eup %13088  ;;  %13102 = vrcp.f32 %v10959_v54  ;;  %v10957_v9 = vadd.f32 1.0, %v13087_v16  ;;  %v19138_v16 = vld [vmem:[#allocation81_spill] sm:$0xff] }
0x13be   : > { %v13091_v24 = vpop.eup %13090 }
0x13bf   : > { %v13093_v29 = vpop.eup %13092  ;;  %13104 = vrcp.f32 %v10957_v9  ;;  %v10960_v37 = vadd.f32 1.0, %v13091_v24  ;;  %v19139_v24 = vld [vmem:[#allocation179_spill] sm:$0xff] }
0x13c0   : > { %11074 = vperm.xlu1 %12388, %v13089_v11   ;;  %v13095_v63 = vpop.eup %13094 }
0x13c1   : > { %11029 = vperm.xlu0 %12387, %v13085_v3   ;;  %v13097_v20 = vpop.eup %13096  ;;  %13106 = vrcp.f32 %v10960_v37  ;;  %v10958_v58 = vadd.f32 1.0, %v13095_v63  ;;  %v19137_v3 = vld [vmem:[#allocation95_spill] sm:$0xff] }
0x13c2   : > { %v13099_v40 = vpop.eup %13098  ;;  %v19140_v37 = vld [vmem:[#allocation91_spill] sm:$0xff] }
0x13c3   : > { %13108 = vrcp.f32 %v10958_v58  ;;  %v19141_v58 = vld [vmem:[#allocation187_spill] sm:$0xff] }
0x13c4   : > { %11064 = vperm.xlu1 %12388, %v13097_v20  }
0x13c5   : > { %11019 = vperm.xlu0 %12387, %v13093_v29   ;;  %v13101_v5 = vpop.eup %13100 }
0x13c8   : > { %11034 = vperm.xlu1 %12388, %v13099_v40  }
0x13ca   : > { %v13103_v49 = vpop.eup %13102 }
0x13cb   : > { %11049 = vperm.xlu0 %12387, %v13103_v49  }
0x13cc   : > { %11024 = vperm.xlu1 %12388, %v13101_v5   ;;  %v13105_v56 = vpop.eup %13104  ;;  %v19142_v5 = vld [vmem:[#allocation184_spill] sm:$0xff] }
0x13ce   : > { %v13107_v31 = vpop.eup %13106 }
0x13cf   : > { %11039 = vperm.xlu0 %12387, %v13105_v56  }
0x13d0   : > { %11054 = vperm.xlu1 %12388, %v13107_v31   ;;  %v13109_v33 = vpop.eup %13108 }
0x13d3   : > { %10387 = vperm.xlu0 %12387, %v10374_v8   ;;  %v19143_v8 = vld [vmem:[#allocation89_spill] sm:$0xff] }
0x13d4   : > { %11044 = vperm.xlu1 %12388, %v13109_v33  }
0x13d8   : > { %10382 = vperm.xlu1 %12388, %v10373_v51   ;;  %v19144_v51 = vld [vmem:[#allocation175_spill] sm:$0xff] }
0x142f   : > { %v11010_v36 = vpop.permute.xlu1 %11009 }
0x1430   : > { %v11081_v34 = vmul.f32 %v11010_v36, %v19121_v14  ;;  %v11082_v38 = vmul.f32 %v11010_v36, %v19122_v1  ;;  %v11070_v2 = vpop.permute.xlu0 %11069  ;;  %v19145_v14 = vld [vmem:[#allocation85_spill] sm:$0xff]  ;;  %v19146_v1 = vld [vmem:[#allocation188_spill] sm:$0xff] }
0x1431   : > { %v11105_v26 = vmul.f32 %v11070_v2, %v19123_v60  ;;  %v11106_v23 = vmul.f32 %v11070_v2, %v19124_v59 }
0x1432   : > { %11113 = vst [vmem:[%s17787_s2 + $0x20] sm:$0xff] %v11081_v34  ;;  %11114 = vst [vmem:[%s17787_s2 + $0x28] sm:$0xff] %v11082_v38 }
0x1433   : > { %11137 = vst [vmem:[%s17787_s2 + $0xe0] sm:$0xff] %v11105_v26  ;;  %11138 = vst [vmem:[%s17787_s2 + $0xe8] sm:$0xff] %v11106_v23  ;;  %v11000_v10 = vpop.permute.xlu1 %10999  ;;  %v19147_v26 = vld [vmem:[#allocation136_spill] sm:$0xff]  ;;  %v19148_v23 = vld [vmem:[#allocation186_spill] sm:$0xff] }
0x1434   : > { %v11077_v62 = vmul.f32 %v11000_v10, %v19125_v46  ;;  %v11078_v53 = vmul.f32 %v11000_v10, %v19126_v42  ;;  %v11060_v17 = vpop.permute.xlu0 %11059  ;;  %v19149_v46 = vld [vmem:[#allocation159_spill] sm:$0xff] }
0x1435   : > { %v11101_v22 = vmul.f32 %v11060_v17, %v19127_v48  ;;  %v11102_v52 = vmul.f32 %v11060_v17, %v19128_v27  ;;  %v19150_v42 = vld [vmem:[#allocation147_spill] sm:$0xff] }
0x1436   : > { %11109 = vst [vmem:[%s17787_s2] sm:$0xff] %v11077_v62  ;;  %11110 = vst [vmem:[%s17787_s2 + $0x8] sm:$0xff] %v11078_v53 }
0x1437   : > { %11133 = vst [vmem:[%s17787_s2 + $0xc0] sm:$0xff] %v11101_v22  ;;  %11134 = vst [vmem:[%s17787_s2 + $0xc8] sm:$0xff] %v11102_v52  ;;  %v11015_v0 = vpop.permute.xlu1 %11014  ;;  %v19151_v52 = vld [vmem:[#allocation154_spill] sm:$0xff] }
0x1438   : > { %v11083_v7 = vmul.f32 %v11015_v0, %v19129_v47  ;;  %v11084_v44 = vmul.f32 %v11015_v0, %v19130_v25  ;;  %v11005_v19 = vpop.permute.xlu0 %11004  ;;  %v19152_v47 = vld [vmem:[#allocation138_spill] sm:$0xff] }
0x1439   : > { %v11079_v13 = vmul.f32 %v11005_v19, %v19131_v50  ;;  %v11080_v12 = vmul.f32 %v11005_v19, %v19132_v15 }
0x143a   : > { %11115 = vst [vmem:[%s17787_s2 + $0x30] sm:$0xff] %v11083_v7  ;;  %11116 = vst [vmem:[%s17787_s2 + $0x38] sm:$0xff] %v11084_v44 }
0x143b   : > { %11111 = vst [vmem:[%s17787_s2 + $0x10] sm:$0xff] %v11079_v13  ;;  %11112 = vst [vmem:[%s17787_s2 + $0x18] sm:$0xff] %v11080_v12  ;;  %v11075_v18 = vpop.permute.xlu1 %11074 }
0x143c   : > { %v11107_v21 = vmul.f32 %v11075_v18, %v19133_v35  ;;  %v11108_v39 = vmul.f32 %v11075_v18, %v19134_v28  ;;  %v11030_v30 = vpop.permute.xlu0 %11029 }
0x143d   : > { %v11089_v55 = vmul.f32 %v11030_v30, %v19135_v57  ;;  %v11090_v32 = vmul.f32 %v11030_v30, %v19136_v43 }
0x143e   : > { %11139 = vst [vmem:[%s17787_s2 + $0xf0] sm:$0xff] %v11107_v21  ;;  %11140 = vst [vmem:[%s17787_s2 + $0xf8] sm:$0xff] %v11108_v39 }
0x143f   : > { %11121 = vst [vmem:[%s17787_s2 + $0x60] sm:$0xff] %v11089_v55  ;;  %11122 = vst [vmem:[%s17787_s2 + $0x68] sm:$0xff] %v11090_v32  ;;  %v11065_v45 = vpop.permute.xlu1 %11064 }
0x1440   : > { %v11103_v54 = vmul.f32 %v11065_v45, %v19137_v3  ;;  %v11104_v11 = vmul.f32 %v11065_v45, %v19138_v16  ;;  %v11020_v9 = vpop.permute.xlu0 %11019 }
0x1441   : > { %v11085_v29 = vmul.f32 %v11020_v9, %v19139_v24  ;;  %v11086_v63 = vmul.f32 %v11020_v9, %v19140_v37 }
0x1442   : > { %11135 = vst [vmem:[%s17787_s2 + $0xd0] sm:$0xff] %v11103_v54  ;;  %11136 = vst [vmem:[%s17787_s2 + $0xd8] sm:$0xff] %v11104_v11 }
0x1443   : > { %11117 = vst [vmem:[%s17787_s2 + $0x40] sm:$0xff] %v11085_v29  ;;  %11118 = vst [vmem:[%s17787_s2 + $0x48] sm:$0xff] %v11086_v63  ;;  %v11035_v20 = vpop.permute.xlu1 %11034 }
0x1444   : > { %v11091_v40 = vmul.f32 %v11035_v20, %v19141_v58  ;;  %v11092_v49 = vmul.f32 %v11035_v20, %v19142_v5 }
0x1446   : > { %11123 = vst [vmem:[%s17787_s2 + $0x70] sm:$0xff] %v11091_v40  ;;  %11124 = vst [vmem:[%s17787_s2 + $0x78] sm:$0xff] %v11092_v49  ;;  %v11050_v31 = vpop.permute.xlu0 %11049 }
0x1447   : > { %v11025_v56 = vpop.permute.xlu1 %11024  ;;  %v11097_v34 = vmul.f32 %v11050_v31, %v19145_v14  ;;  %v11098_v38 = vmul.f32 %v11050_v31, %v19146_v1 }
0x1448   : > { %v11087_v33 = vmul.f32 %v11025_v56, %v19143_v8  ;;  %v11088_v36 = vmul.f32 %v11025_v56, %v19144_v51 }
0x1449   : > { %11129 = vst [vmem:[%s17787_s2 + $0xa0] sm:$0xff] %v11097_v34  ;;  %11130 = vst [vmem:[%s17787_s2 + $0xa8] sm:$0xff] %v11098_v38 }
0x144a   : > { %11119 = vst [vmem:[%s17787_s2 + $0x50] sm:$0xff] %v11087_v33  ;;  %11120 = vst [vmem:[%s17787_s2 + $0x58] sm:$0xff] %v11088_v36  ;;  %v11040_v2 = vpop.permute.xlu0 %11039 }
0x144b   : > { %v11055_v60 = vpop.permute.xlu1 %11054  ;;  %v11093_v59 = vmul.f32 %v11040_v2, %v19147_v26  ;;  %v11094_v10 = vmul.f32 %v11040_v2, %v19148_v23 }
0x144c   : > { %v11099_v62 = vmul.f32 %v11055_v60, %v19149_v46  ;;  %v11100_v53 = vmul.f32 %v11055_v60, %v19150_v42 }
0x144d   : > { %11125 = vst [vmem:[%s17787_s2 + $0x80] sm:$0xff] %v11093_v59  ;;  %11126 = vst [vmem:[%s17787_s2 + $0x88] sm:$0xff] %v11094_v10 }
0x144e   : > { %11131 = vst [vmem:[%s17787_s2 + $0xb0] sm:$0xff] %v11099_v62  ;;  %11132 = vst [vmem:[%s17787_s2 + $0xb8] sm:$0xff] %v11100_v53  ;;  %v10388_v17 = vpop.permute.xlu0 %10387 }
0x144f   : > { %v11045_v48 = vpop.permute.xlu1 %11044  ;;  %v10445_v22 = vadd.f32 %v17730_v6, %v10388_v17  ;;  %v10447_v27 = vadd.f32 %v17732_v41, %v10388_v17 }
0x1450   : > { %v11095_v0 = vmul.f32 %v11045_v48, %v19151_v52  ;;  %v11096_v7 = vmul.f32 %v11045_v48, %v19152_v47 }
0x1451   : > { %11145 = vst [vmem:[%s17722_s28 + $0x20] sm:$0x3] %v10445_v22  ;;  %11146 = vst [vmem:[%s17722_s28 + $0x28] sm:$0x3] %v10447_v27 }
0x1452   : > { %11127 = vst [vmem:[%s17787_s2 + $0x90] sm:$0xff] %v11095_v0  ;;  %11128 = vst [vmem:[%s17787_s2 + $0x98] sm:$0xff] %v11096_v7 }
0x1453   : > { %v10383_v25 = vpop.permute.xlu1 %10382 }
0x1454   : > { %13305 = shalt.err (!%p13302_p10)
}
0x1455   : > { %s13306_s2 = scalar_lea.hbm %s17848_s1, 4096  ;;  %s13310_s0 = scalar_lea.hbm %s13599_s13, 8192 }
0x1456   : > { %p13307_p8 = scmp.ne.s32.totalorder %s17848_s1, %s13306_s2  ;;  %p13311_p0 = scmp.lt.s32.totalorder %s17848_s1, %s13599_s13 }
0x1457   : > { %p13312_p6 = scmp.lt.s32.totalorder %s13310_s0, %s13306_s2 }
0x1458   : > { %p13308_p11 = pnand %p13307_p8, %p19154_p5 }
0x1459   : > { %p13313_p9 = por %p13312_p6, %p13311_p0 }
0x145a   : > { %p13309_p12 = pneg %p13308_p11 }
0x145c   : > { %p13314_p1 = pnand %p13313_p9, %p13309_p12 }
0x145e   : > { %13317 = shalt.err (!%p13314_p1)
}
0x145f   : > { %s13419_s5 = smov 256   ;;  %s13420_s3 = smov 16   ;;  %v10439_v6 = vadd.f32 %v17725_v4, %v10383_v25  ;;  %v10441_v41 = vadd.f32 %v17728_v61, %v10383_v25 }
0x1460   : > { %12262 = dma.vmem_to_hbm [thread:$0]  (%p19154_p5), %s17850_s22, 4096, %s17848_s1, %s17862_s26, %s13419_s5, %s13419_s5, %s13420_s3  }
0x1461   : > { %11143 = vst [vmem:[%s17722_s28 + $0x10] sm:$0xff] %v10439_v6  ;;  %11144 = vst [vmem:[%s17722_s28 + $0x18] sm:$0xff] %v10441_v41 }
0x1462 PF: > { %s19155_s6 = sld [smem:[#allocation46_spill]] }
0x1463   : > { %s19156_s4 = sld [smem:[#allocation44_spill]] }
0x1464   : > { %s19157_s2 = sld [smem:[#allocation49_spill]] }
0x1468   : > { %p12304_p3 = scmp.ge.s32.totalorder %s19155_s6, 2 }
0x1469   : > { %s11184_s0 = sand.u32 1, %s19156_s4  }
0x146a   : > { %p19158_p2 = scmp.ne.s32.totalorder %s19157_s2, 0  ;;  %s11185_s7 = scalar_lea.sflag [#allocation4], %s11184_s0 }
0x146c   : > { %p12287_p4 = pnand %p12304_p3, %p19158_p2 }
0x146e   : > { %p12288_p7 = pneg %p12287_p4 }
0x1470   : > { %13351 = dma.done.wait (%p12288_p7), %s11185_s7, 4096  }
0x1471   : > { %13353 = vsyncadd (%p12288_p7), %s11185_s7, 4294963200  ;;  %s19159_s28 = sld [smem:[#allocation47_spill]]  ;;  %s19162_s22 = smov %s13360_s23 }
0x1472   : > { %s19160_s15 = sld [smem:[#allocation45_spill]] }
0x1473   : > { %s19161_s26 = sld [smem:[#allocation48_spill]] }
0x1477   : > { %p86_p5 = scmp.ge.s32.totalorder %s19159_s28, 4  }
0x1478   : > { %s19163_s23 = smov %s19160_s15 }
0x1479   :  { %88 = sbr.rel (!%p86_p5) target bundleno = 69 (0x45), region = 273 }
0x147e   :  { %11198 = vsyncpa [#allocation3], 1 }
0x147f   :  { %11200 = vsyncpa [#allocation3 + $0x1], 1 }
0x1480   :  { %11201 = vsyncpa [#allocation6], 1 }
0x1481   :  { %11202 = vsyncpa [#allocation9], 1 }
0x1482   :  { %11203 = vsyncpa [#allocation12], 1 }
0x1483   :  { %11204 = vsyncpa [#allocation4], 1 }
0x1484   :  { %11206 = vsyncpa [#allocation4 + $0x1], 1 }

</bundles_post_ra>
